<compile_context>
chip_gen: v5e
topology: v5e:2x2
jax: 0.10.0
libtpu: 0.0.40
codegen_flags: <defaults>
</compile_context>

<pallas_src>
import functools

import jax
import jax.numpy as jnp
from jax.experimental import pallas as pl
from jax.experimental.pallas import tpu as pltpu


def _round_up(x, m):
    return (x + m - 1) // m * m


def _cdiv(a, b):
    return -(-a // b)


def _auto_batch_splits(batch):
    """Shard the batch across TensorCores only on 2-TC (v7x-class) chips."""
    if batch % 2 != 0:
        return 1
    try:
        kind = jax.devices()[0].device_kind.lower()
    except Exception:
        return 1
    return 2 if "7" in kind else 1


def _bfs_layer_kernel(x_ref, w_ref, b_ref, mask_ref, out_ref, buf_ref, *,
                      n_layers, n_chunks, tm, guard, cb, taps):
    """One 3x3 stride-1 'same' conv layer of the BFS encoder.

    Grid: (batch_split, layer). The activation slab for the current batch block
    lives in the ping-pong scratch `buf_ref`; weights/bias for the current layer
    are streamed per grid step (double-buffered by BlockSpec).

    x_ref:    (1, R_guard, CB)  bf16  padded input slab (zero guards/padding)
    w_ref:    (1, 9, CB, CB)    bf16  per-tap weight matrices for this layer
    b_ref:    (1, 1, CB)        f32   bias for this layer
    mask_ref: (R_pad, CB)       bf16  1 at interior pixels, 0 at padding rows
    out_ref:  (1, R_pad, CB)    bf16  final-layer output slab
    buf_ref:  (2, R_guard, CB)  bf16  ping-pong activation scratch
    """
    layer = pl.program_id(1)

    # Layer 0 reads its activations from slot 1: stage the (already zero-padded)
    # input slab there once per batch block.
    @pl.when(layer == 0)
    def _():
        buf_ref[1, :, :] = x_ref[0, :, :]

    dst = layer % 2            # slot written by this layer
    src = 1 - dst              # slot written by the previous layer (x for layer 0)
    # ReLU on every layer except the last: max(acc, 0) vs max(acc, -inf).
    relu_floor = jnp.where(layer < n_layers - 1, 0.0, -jnp.inf).astype(jnp.float32)
    is_last = layer == n_layers - 1

    for c in range(n_chunks):
        row0 = c * tm
        base = guard + row0

        # 9 accumulating K=CB dots on row-shifted views -- no im2col patch.
        acc = jnp.zeros((tm, cb), jnp.float32)
        for t, d in enumerate(taps):
            lhs = buf_ref[src, pl.ds(base + d, tm), :]
            acc = acc + jax.lax.dot_general(
                lhs, w_ref[0, t],
                (((1,), (0,)), ((), ())),
                preferred_element_type=jnp.float32)

        acc = acc + b_ref[0]                   # (1, CB) f32 bias broadcast (VPU)
        acc = jnp.maximum(acc, relu_floor)     # ReLU (disabled on the last layer)
        # Keep spatial-padding rows exactly zero so the next layer sees zero pad.
        acc = jnp.where(mask_ref[pl.ds(row0, tm), :] > 0, acc, 0.0)
        acc_bf = acc.astype(jnp.bfloat16)

        @pl.when(layer < n_layers - 1)
        def _():
            buf_ref[dst, pl.ds(base, tm), :] = acc_bf

        @pl.when(is_last)
        def _():
            out_ref[0, pl.ds(row0, tm), :] = acc_bf


def procedure_cloning_bfs_forward(x, params, *, batch_splits=None):
    """x: (B, H, W, C_obs) NHWC float32. params: list of (w (3,3,Cin,Cout), b (Cout,)).

    Matches the PyTorch module: NHWC->NCHW, [Conv3x3 pad=1 + ReLU]*(L-1), Conv3x3,
    NCHW->NHWC. Returns {'logit': (B, H, W, action_shape + 1)}.
    """
    B, H, W, cin0 = x.shape
    n_layers = len(params)
    couts = [int(w.shape[-1]) for (w, _) in params]
    cout_final = couts[-1]

    CB = max(128, _round_up(max([cin0] + couts), 128))   # lane-dense channel slab
    pitch = W + 2
    rows_img = (H + 2) * pitch

    if batch_splits is None:
        batch_splits = _auto_batch_splits(B)
    S = int(batch_splits)
    if B % S != 0:
        raise ValueError(f"batch_splits={S} must divide batch={B}")
    Bg = B // S

    # Per batch-block row budget: flat padded rows, M-chunked for the epilogue.
    R_grp = Bg * rows_img
    n_chunks = max(1, _cdiv(R_grp, 192))
    TM = _round_up(_cdiv(R_grp, n_chunks), 8)
    R_pad = n_chunks * TM
    G = _round_up(pitch + 1, 8)          # guard rows keep every tap slice in bounds
    R_guard = R_pad + 2 * G

    # --- wrapper-side layout plumbing (tiny, one-time, plain JAX) ---
    # Input: pad spatially + channel-pad to CB, flatten rows per batch block,
    # add zero guard rows, cast to bf16.
    xp = jnp.pad(x, ((0, 0), (1, 1), (1, 1), (0, CB - cin0)))
    x_slab = xp.reshape(S, R_grp, CB)
    x_slab = jnp.pad(x_slab, ((0, 0), (G, R_guard - R_grp - G), (0, 0)))
    x_slab = x_slab.astype(jnp.bfloat16)

    # Weights: (3,3,Cin,Cout) -> zero-pad channels -> (9, CB, CB) per layer.
    w_list, b_list = [], []
    for (w, b) in params:
        ci, co = int(w.shape[2]), int(w.shape[3])
        wp = jnp.pad(w, ((0, 0), (0, 0), (0, CB - ci), (0, CB - co)))
        w_list.append(wp.reshape(9, CB, CB).astype(jnp.bfloat16))
        b_list.append(jnp.pad(b, (0, CB - co)).astype(jnp.float32))
    w_all = jnp.stack(w_list)                 # (L, 9, CB, CB) bf16
    b_all = jnp.stack(b_list)[:, None, :]     # (L, 1, CB)     f32

    # Lane-dense interior-pixel mask (same for every batch block), loaded once.
    m_img = jnp.zeros((H + 2, W + 2), jnp.float32).at[1:H + 1, 1:W + 1].set(1.0)
    m_rows = jnp.tile(m_img.reshape(-1), Bg)
    m_rows = jnp.pad(m_rows, (0, R_pad - R_grp))
    mask = jnp.broadcast_to(m_rows[:, None], (R_pad, CB)).astype(jnp.bfloat16)

    # Flat-row offsets of the 9 stencil taps (kh, kw row-major).
    taps = (-pitch - 1, -pitch, -pitch + 1, -1, 0, 1, pitch - 1, pitch, pitch + 1)

    # Explicit VMEM budget (per core), with headroom; keeps scaling in B visible.
    est_vmem = (2 * R_guard * CB * 2          # ping-pong activation scratch (bf16)
                + 2 * R_guard * CB * 2        # input block (double-buffered)
                + 2 * 9 * CB * CB * 2         # weights (double-buffered)
                + 2 * R_pad * CB * 2          # output block
                + R_pad * CB * 2              # interior mask
                + 6 * TM * CB * 4)            # per-chunk f32 temporaries
    vmem_limit = int(min(64 * 2**20, max(32 * 2**20, 2 * est_vmem)))

    kernel = functools.partial(
        _bfs_layer_kernel, n_layers=n_layers, n_chunks=n_chunks,
        tm=TM, guard=G, cb=CB, taps=taps)

    out = pl.pallas_call(
        kernel,
        out_shape=jax.ShapeDtypeStruct((S, R_pad, CB), jnp.bfloat16),
        grid=(S, n_layers),
        in_specs=[
            pl.BlockSpec((1, R_guard, CB), lambda s, l: (s, 0, 0)),     # x slab
            pl.BlockSpec((1, 9, CB, CB), lambda s, l: (l, 0, 0, 0)),    # weights
            pl.BlockSpec((1, 1, CB), lambda s, l: (l, 0, 0)),           # bias
            pl.BlockSpec((R_pad, CB), lambda s, l: (0, 0)),             # mask
        ],
        out_specs=pl.BlockSpec((1, R_pad, CB), lambda s, l: (s, 0, 0)),
        scratch_shapes=[
            pltpu.VMEM((2, R_guard, CB), jnp.bfloat16),   # ping-pong activations
        ],
        compiler_params=pltpu.CompilerParams(
            dimension_semantics=("parallel", "arbitrary"),
            vmem_limit_bytes=vmem_limit),
    )(x_slab, w_all, b_all, mask)

    # Unpack: drop padding/garbage rows and padded channels, back to NHWC, f32.
    y = out[:, :R_grp, :].reshape(B, H + 2, W + 2, CB)[:, 1:H + 1, 1:W + 1, :cout_final]
    return {'logit': y.astype(jnp.float32)}


def init_params(key, obs_shape, action_shape, encoder_hidden_size_list):
    """Deterministic (PRNGKey-seeded) init of the conv layers (PyTorch-like uniform)."""
    hidden = list(encoder_hidden_size_list) + [action_shape + 1]
    cins = [obs_shape[0]] + hidden[:-1]
    params = []
    for cin, cout in zip(cins, hidden):
        key, k_w, k_b = jax.random.split(key, 3)
        fan_in = cin * 3 * 3
        bound = 1.0 / jnp.sqrt(fan_in)
        w = jax.random.uniform(k_w, (3, 3, cin, cout), jnp.float32, -bound, bound)
        b = jax.random.uniform(k_b, (cout,), jnp.float32, -bound, bound)
        params.append((w, b))
    return params


def _reference_forward(x, params):
    """Pure-JAX f32 reference (lax conv) for correctness check."""
    n = len(params)
    h = x
    for i, (w, b) in enumerate(params):
        h = jax.lax.conv_general_dilated(
            h, w, window_strides=(1, 1), padding=((1, 1), (1, 1)),
            dimension_numbers=('NHWC', 'HWIO', 'NHWC')) + b[None, None, None, :]
        if i < n - 1:
            h = jnp.maximum(h, 0.0)
    return h


if __name__ == "__main__":
    key = jax.random.PRNGKey(0)

    # Small shapes consistent with the module: obs_shape=[3,16,16], action_shape=4.
    B, H, W, C = 2, 16, 16, 3
    action_shape = 4
    encoder_hidden_size_list = [32, 32, 64, 64]

    key, k_x = jax.random.split(key)
    x = jax.random.normal(k_x, (B, H, W, C), jnp.float32)
    params = init_params(key, [C, H, W], action_shape, encoder_hidden_size_list)

    fwd = jax.jit(procedure_cloning_bfs_forward)
    out = fwd(x, params)
    logit = jax.block_until_ready(out['logit'])
    assert logit.shape == (B, H, W, action_shape + 1), logit.shape

    ref = jax.block_until_ready(_reference_forward(x, params))
    # bf16 MXU operands + bf16 inter-layer activations + bf16 output store vs the
    # f32 reference -> loose-but-safe tolerance.
    max_err = float(jnp.max(jnp.abs(logit - ref)))
    assert max_err < 7.5e-2, max_err

    print("KERNEL_OK")
</pallas_src>

<mosaic_0001>
module attributes {stable_mosaic.version = 11 : i64} {
  func.func @_bfs_layer_kernel(%arg0: i32, %arg1: i32, %arg2: memref<1x720x128xbf16, #tpu.memory_space<vmem>>, %arg3: memref<1x9x128x128xbf16, #tpu.memory_space<vmem>>, %arg4: memref<1x1x128xf32, #tpu.memory_space<vmem>>, %arg5: memref<672x128xbf16, #tpu.memory_space<vmem>>, %arg6: memref<1x672x128xbf16, #tpu.memory_space<vmem>>, %arg7: memref<2x720x128xbf16, #tpu.memory_space<vmem>>) attributes {dimension_semantics = [#tpu.dimension_semantics<parallel>, #tpu.dimension_semantics<arbitrary>], iteration_bounds = array<i64: 1, 5>, scalar_prefetch = 0 : i64, scratch_operands = 1 : i64, tpu.core_type = #tpu.core_type<tc>, window_params = [{transform_indices = @transform_0, window_bounds = array<i64: 1, 720, 128>}, {transform_indices = @transform_1, window_bounds = array<i64: 1, 9, 128, 128>}, {transform_indices = @transform_2, window_bounds = array<i64: 1, 1, 128>}, {pipeline_mode = #tpu.pipeline_mode<synchronous>, transform_indices = @transform_3, window_bounds = array<i64: 672, 128>}, {transform_indices = @transform_4, window_bounds = array<i64: 1, 672, 128>}]} {
    %c0_i32 = arith.constant 0 : i32
    %0 = arith.cmpi eq, %arg1, %c0_i32 : i32
    %1 = arith.extui %0 : i1 to i32
    %c0_i32_0 = arith.constant 0 : i32
    %2 = arith.cmpi ne, %1, %c0_i32_0 : i32
    scf.if %2 {
      %c0_259 = arith.constant 0 : index
      %c0_260 = arith.constant 0 : index
      %c0_261 = arith.constant 0 : index
      %341 = vector.load %arg2[%c0_259, %c0_260, %c0_261] : memref<1x720x128xbf16, #tpu.memory_space<vmem>>, vector<1x720x128xbf16>
      %342 = vector.shape_cast %341 : vector<1x720x128xbf16> to vector<720x128xbf16>
      %c1_262 = arith.constant 1 : index
      %c0_263 = arith.constant 0 : index
      %c0_264 = arith.constant 0 : index
      %343 = vector.load %arg7[%c1_262, %c0_263, %c0_264] : memref<2x720x128xbf16, #tpu.memory_space<vmem>>, vector<1x720x128xbf16>
      %344 = vector.shape_cast %343 : vector<1x720x128xbf16> to vector<720x128xbf16>
      %345 = vector.shape_cast %342 : vector<720x128xbf16> to vector<1x720x128xbf16>
      tpu.vector_store %arg7[%c1_262, %c0_263, %c0_264], %345 {strides = array<i32>} : memref<2x720x128xbf16, #tpu.memory_space<vmem>>, vector<1x720x128xbf16>,
    } else {
    }
    %c2_i32 = arith.constant 2 : i32
    %c0_i32_1 = arith.constant 0 : i32
    %3 = arith.cmpi eq, %c2_i32, %c0_i32_1 : i32
    %c1_i32 = arith.constant 1 : i32
    %4 = arith.select %3, %c1_i32, %c2_i32 : i32
    %5 = arith.remsi %arg1, %4 : i32
    %c0_i32_2 = arith.constant 0 : i32
    %6 = arith.cmpi ne, %5, %c0_i32_2 : i32
    %c0_i32_3 = arith.constant 0 : i32
    %7 = arith.cmpi slt, %5, %c0_i32_3 : i32
    %c0_i32_4 = arith.constant 0 : i32
    %8 = arith.cmpi slt, %4, %c0_i32_4 : i32
    %9 = arith.xori %7, %8 : i1
    %10 = arith.andi %9, %6 : i1
    %11 = arith.addi %5, %4 : i32
    %12 = arith.select %10, %11, %5 : i32
    %c1_i32_5 = arith.constant 1 : i32
    %13 = arith.subi %c1_i32_5, %12 : i32
    %c4_i32 = arith.constant 4 : i32
    %14 = arith.cmpi slt, %arg1, %c4_i32 : i32
    %cst = arith.constant 0.000000e+00 : f32
    %cst_6 = arith.constant 0xFF800000 : f32
    %15 = arith.select %14, %cst, %cst_6 : f32
    %c4_i32_7 = arith.constant 4 : i32
    %16 = arith.cmpi eq, %arg1, %c4_i32_7 : i32
    %cst_8 = arith.constant 0.000000e+00 : f32
    %17 = vector.broadcast %cst_8 : f32 to vector<168x128xf32>
    %18 = arith.index_cast %13 : i32 to index
    %c5 = arith.constant 5 : index
    %c0 = arith.constant 0 : index
    %19 = vector.load %arg7[%18, %c5, %c0] : memref<2x720x128xbf16, #tpu.memory_space<vmem>>, vector<1x168x128xbf16>
    %20 = vector.shape_cast %19 : vector<1x168x128xbf16> to vector<168x128xbf16>
    %c0_9 = arith.constant 0 : index
    %c0_10 = arith.constant 0 : index
    %c0_11 = arith.constant 0 : index
    %c0_12 = arith.constant 0 : index
    %21 = vector.load %arg3[%c0_9, %c0_10, %c0_11, %c0_12] : memref<1x9x128x128xbf16, #tpu.memory_space<vmem>>, vector<1x1x128x128xbf16>
    %22 = vector.shape_cast %21 : vector<1x1x128x128xbf16> to vector<128x128xbf16>
    %cst_13 = arith.constant dense<0.000000e+00> : vector<168x128xf32>
    %23 = tpu.matmul %20, %22, %cst_13 {dimension_numbers = #tpu.dot_dimension_numbers<[1], [0], [0], [1], [0, 0, 1, 1], [], []>} : vector<168x128xbf16>, vector<128x128xbf16>, vector<168x128xf32> -> vector<168x128xf32>
    %24 = arith.addf %17, %23 : vector<168x128xf32>
    %25 = arith.index_cast %13 : i32 to index
    %c6 = arith.constant 6 : index
    %c0_14 = arith.constant 0 : index
    %26 = vector.load %arg7[%25, %c6, %c0_14] : memref<2x720x128xbf16, #tpu.memory_space<vmem>>, vector<1x168x128xbf16>
    %27 = vector.shape_cast %26 : vector<1x168x128xbf16> to vector<168x128xbf16>
    %c0_15 = arith.constant 0 : index
    %c1 = arith.constant 1 : index
    %c0_16 = arith.constant 0 : index
    %c0_17 = arith.constant 0 : index
    %28 = vector.load %arg3[%c0_15, %c1, %c0_16, %c0_17] : memref<1x9x128x128xbf16, #tpu.memory_space<vmem>>, vector<1x1x128x128xbf16>
    %29 = vector.shape_cast %28 : vector<1x1x128x128xbf16> to vector<128x128xbf16>
    %cst_18 = arith.constant dense<0.000000e+00> : vector<168x128xf32>
    %30 = tpu.matmul %27, %29, %cst_18 {dimension_numbers = #tpu.dot_dimension_numbers<[1], [0], [0], [1], [0, 0, 1, 1], [], []>} : vector<168x128xbf16>, vector<128x128xbf16>, vector<168x128xf32> -> vector<168x128xf32>
    %31 = arith.addf %24, %30 : vector<168x128xf32>
    %32 = arith.index_cast %13 : i32 to index
    %c7 = arith.constant 7 : index
    %c0_19 = arith.constant 0 : index
    %33 = vector.load %arg7[%32, %c7, %c0_19] : memref<2x720x128xbf16, #tpu.memory_space<vmem>>, vector<1x168x128xbf16>
    %34 = vector.shape_cast %33 : vector<1x168x128xbf16> to vector<168x128xbf16>
    %c0_20 = arith.constant 0 : index
    %c2 = arith.constant 2 : index
    %c0_21 = arith.constant 0 : index
    %c0_22 = arith.constant 0 : index
    %35 = vector.load %arg3[%c0_20, %c2, %c0_21, %c0_22] : memref<1x9x128x128xbf16, #tpu.memory_space<vmem>>, vector<1x1x128x128xbf16>
    %36 = vector.shape_cast %35 : vector<1x1x128x128xbf16> to vector<128x128xbf16>
    %cst_23 = arith.constant dense<0.000000e+00> : vector<168x128xf32>
    %37 = tpu.matmul %34, %36, %cst_23 {dimension_numbers = #tpu.dot_dimension_numbers<[1], [0], [0], [1], [0, 0, 1, 1], [], []>} : vector<168x128xbf16>, vector<128x128xbf16>, vector<168x128xf32> -> vector<168x128xf32>
    %38 = arith.addf %31, %37 : vector<168x128xf32>
    %39 = arith.index_cast %13 : i32 to index
    %c23 = arith.constant 23 : index
    %c0_24 = arith.constant 0 : index
    %40 = vector.load %arg7[%39, %c23, %c0_24] : memref<2x720x128xbf16, #tpu.memory_space<vmem>>, vector<1x168x128xbf16>
    %41 = vector.shape_cast %40 : vector<1x168x128xbf16> to vector<168x128xbf16>
    %c0_25 = arith.constant 0 : index
    %c3 = arith.constant 3 : index
    %c0_26 = arith.constant 0 : index
    %c0_27 = arith.constant 0 : index
    %42 = vector.load %arg3[%c0_25, %c3, %c0_26, %c0_27] : memref<1x9x128x128xbf16, #tpu.memory_space<vmem>>, vector<1x1x128x128xbf16>
    %43 = vector.shape_cast %42 : vector<1x1x128x128xbf16> to vector<128x128xbf16>
    %cst_28 = arith.constant dense<0.000000e+00> : vector<168x128xf32>
    %44 = tpu.matmul %41, %43, %cst_28 {dimension_numbers = #tpu.dot_dimension_numbers<[1], [0], [0], [1], [0, 0, 1, 1], [], []>} : vector<168x128xbf16>, vector<128x128xbf16>, vector<168x128xf32> -> vector<168x128xf32>
    %45 = arith.addf %38, %44 : vector<168x128xf32>
    %46 = arith.index_cast %13 : i32 to index
    %c24 = arith.constant 24 : index
    %c0_29 = arith.constant 0 : index
    %47 = vector.load %arg7[%46, %c24, %c0_29] : memref<2x720x128xbf16, #tpu.memory_space<vmem>>, vector<1x168x128xbf16>
    %48 = vector.shape_cast %47 : vector<1x168x128xbf16> to vector<168x128xbf16>
    %c0_30 = arith.constant 0 : index
    %c4 = arith.constant 4 : index
    %c0_31 = arith.constant 0 : index
    %c0_32 = arith.constant 0 : index
    %49 = vector.load %arg3[%c0_30, %c4, %c0_31, %c0_32] : memref<1x9x128x128xbf16, #tpu.memory_space<vmem>>, vector<1x1x128x128xbf16>
    %50 = vector.shape_cast %49 : vector<1x1x128x128xbf16> to vector<128x128xbf16>
    %cst_33 = arith.constant dense<0.000000e+00> : vector<168x128xf32>
    %51 = tpu.matmul %48, %50, %cst_33 {dimension_numbers = #tpu.dot_dimension_numbers<[1], [0], [0], [1], [0, 0, 1, 1], [], []>} : vector<168x128xbf16>, vector<128x128xbf16>, vector<168x128xf32> -> vector<168x128xf32>
    %52 = arith.addf %45, %51 : vector<168x128xf32>
    %53 = arith.index_cast %13 : i32 to index
    %c25 = arith.constant 25 : index
    %c0_34 = arith.constant 0 : index
    %54 = vector.load %arg7[%53, %c25, %c0_34] : memref<2x720x128xbf16, #tpu.memory_space<vmem>>, vector<1x168x128xbf16>
    %55 = vector.shape_cast %54 : vector<1x168x128xbf16> to vector<168x128xbf16>
    %c0_35 = arith.constant 0 : index
    %c5_36 = arith.constant 5 : index
    %c0_37 = arith.constant 0 : index
    %c0_38 = arith.constant 0 : index
    %56 = vector.load %arg3[%c0_35, %c5_36, %c0_37, %c0_38] : memref<1x9x128x128xbf16, #tpu.memory_space<vmem>>, vector<1x1x128x128xbf16>
    %57 = vector.shape_cast %56 : vector<1x1x128x128xbf16> to vector<128x128xbf16>
    %cst_39 = arith.constant dense<0.000000e+00> : vector<168x128xf32>
    %58 = tpu.matmul %55, %57, %cst_39 {dimension_numbers = #tpu.dot_dimension_numbers<[1], [0], [0], [1], [0, 0, 1, 1], [], []>} : vector<168x128xbf16>, vector<128x128xbf16>, vector<168x128xf32> -> vector<168x128xf32>
    %59 = arith.addf %52, %58 : vector<168x128xf32>
    %60 = arith.index_cast %13 : i32 to index
    %c41 = arith.constant 41 : index
    %c0_40 = arith.constant 0 : index
    %61 = vector.load %arg7[%60, %c41, %c0_40] : memref<2x720x128xbf16, #tpu.memory_space<vmem>>, vector<1x168x128xbf16>
    %62 = vector.shape_cast %61 : vector<1x168x128xbf16> to vector<168x128xbf16>
    %c0_41 = arith.constant 0 : index
    %c6_42 = arith.constant 6 : index
    %c0_43 = arith.constant 0 : index
    %c0_44 = arith.constant 0 : index
    %63 = vector.load %arg3[%c0_41, %c6_42, %c0_43, %c0_44] : memref<1x9x128x128xbf16, #tpu.memory_space<vmem>>, vector<1x1x128x128xbf16>
    %64 = vector.shape_cast %63 : vector<1x1x128x128xbf16> to vector<128x128xbf16>
    %cst_45 = arith.constant dense<0.000000e+00> : vector<168x128xf32>
    %65 = tpu.matmul %62, %64, %cst_45 {dimension_numbers = #tpu.dot_dimension_numbers<[1], [0], [0], [1], [0, 0, 1, 1], [], []>} : vector<168x128xbf16>, vector<128x128xbf16>, vector<168x128xf32> -> vector<168x128xf32>
    %66 = arith.addf %59, %65 : vector<168x128xf32>
    %67 = arith.index_cast %13 : i32 to index
    %c42 = arith.constant 42 : index
    %c0_46 = arith.constant 0 : index
    %68 = vector.load %arg7[%67, %c42, %c0_46] : memref<2x720x128xbf16, #tpu.memory_space<vmem>>, vector<1x168x128xbf16>
    %69 = vector.shape_cast %68 : vector<1x168x128xbf16> to vector<168x128xbf16>
    %c0_47 = arith.constant 0 : index
    %c7_48 = arith.constant 7 : index
    %c0_49 = arith.constant 0 : index
    %c0_50 = arith.constant 0 : index
    %70 = vector.load %arg3[%c0_47, %c7_48, %c0_49, %c0_50] : memref<1x9x128x128xbf16, #tpu.memory_space<vmem>>, vector<1x1x128x128xbf16>
    %71 = vector.shape_cast %70 : vector<1x1x128x128xbf16> to vector<128x128xbf16>
    %cst_51 = arith.constant dense<0.000000e+00> : vector<168x128xf32>
    %72 = tpu.matmul %69, %71, %cst_51 {dimension_numbers = #tpu.dot_dimension_numbers<[1], [0], [0], [1], [0, 0, 1, 1], [], []>} : vector<168x128xbf16>, vector<128x128xbf16>, vector<168x128xf32> -> vector<168x128xf32>
    %73 = arith.addf %66, %72 : vector<168x128xf32>
    %74 = arith.index_cast %13 : i32 to index
    %c43 = arith.constant 43 : index
    %c0_52 = arith.constant 0 : index
    %75 = vector.load %arg7[%74, %c43, %c0_52] : memref<2x720x128xbf16, #tpu.memory_space<vmem>>, vector<1x168x128xbf16>
    %76 = vector.shape_cast %75 : vector<1x168x128xbf16> to vector<168x128xbf16>
    %c0_53 = arith.constant 0 : index
    %c8 = arith.constant 8 : index
    %c0_54 = arith.constant 0 : index
    %c0_55 = arith.constant 0 : index
    %77 = vector.load %arg3[%c0_53, %c8, %c0_54, %c0_55] : memref<1x9x128x128xbf16, #tpu.memory_space<vmem>>, vector<1x1x128x128xbf16>
    %78 = vector.shape_cast %77 : vector<1x1x128x128xbf16> to vector<128x128xbf16>
    %cst_56 = arith.constant dense<0.000000e+00> : vector<168x128xf32>
    %79 = tpu.matmul %76, %78, %cst_56 {dimension_numbers = #tpu.dot_dimension_numbers<[1], [0], [0], [1], [0, 0, 1, 1], [], []>} : vector<168x128xbf16>, vector<128x128xbf16>, vector<168x128xf32> -> vector<168x128xf32>
    %80 = arith.addf %73, %79 : vector<168x128xf32>
    %c0_57 = arith.constant 0 : index
    %c0_58 = arith.constant 0 : index
    %c0_59 = arith.constant 0 : index
    %81 = vector.load %arg4[%c0_57, %c0_58, %c0_59] : memref<1x1x128xf32, #tpu.memory_space<vmem>>, vector<1x1x128xf32>
    %82 = vector.shape_cast %81 : vector<1x1x128xf32> to vector<1x128xf32>
    %83 = vector.broadcast %82 : vector<1x128xf32> to vector<168x128xf32>
    %84 = arith.addf %80, %83 : vector<168x128xf32>
    %85 = vector.broadcast %15 : f32 to vector<168x128xf32>
    %86 = arith.maximumf %84, %85 : vector<168x128xf32>
    %c0_60 = arith.constant 0 : index
    %c0_61 = arith.constant 0 : index
    %87 = vector.load %arg5[%c0_60, %c0_61] : memref<672x128xbf16, #tpu.memory_space<vmem>>, vector<168x128xbf16>
    %cst_62 = arith.constant 0.000000e+00 : bf16
    %88 = vector.broadcast %cst_62 : bf16 to vector<168x128xbf16>
    %89 = arith.cmpf ogt, %87, %88 : vector<168x128xbf16>
    %cst_63 = arith.constant 0.000000e+00 : f32
    %90 = vector.broadcast %cst_63 : f32 to vector<168x128xf32>
    %91 = arith.select %89, %86, %90 : vector<168x128xi1>, vector<168x128xf32>
    %92 = arith.truncf %91 : vector<168x128xf32> to vector<168x128xbf16>
    %c4_i32_64 = arith.constant 4 : i32
    %93 = arith.cmpi slt, %arg1, %c4_i32_64 : i32
    %94 = arith.extui %93 : i1 to i32
    %c0_i32_65 = arith.constant 0 : i32
    %95 = arith.cmpi ne, %94, %c0_i32_65 : i32
    scf.if %95 {
      %341 = arith.index_cast %12 : i32 to index
      %c24_259 = arith.constant 24 : index
      %c0_260 = arith.constant 0 : index
      %342 = vector.load %arg7[%341, %c24_259, %c0_260] : memref<2x720x128xbf16, #tpu.memory_space<vmem>>, vector<1x168x128xbf16>
      %343 = vector.shape_cast %342 : vector<1x168x128xbf16> to vector<168x128xbf16>
      %344 = vector.shape_cast %92 : vector<168x128xbf16> to vector<1x168x128xbf16>
      tpu.vector_store %arg7[%341, %c24_259, %c0_260], %344 {strides = array<i32>} : memref<2x720x128xbf16, #tpu.memory_space<vmem>>, vector<1x168x128xbf16>,
    } else {
    }
    %96 = arith.extui %16 : i1 to i32
    %c0_i32_66 = arith.constant 0 : i32
    %97 = arith.cmpi ne, %96, %c0_i32_66 : i32
    scf.if %97 {
      %c0_259 = arith.constant 0 : index
      %c0_260 = arith.constant 0 : index
      %c0_261 = arith.constant 0 : index
      %341 = vector.load %arg6[%c0_259, %c0_260, %c0_261] : memref<1x672x128xbf16, #tpu.memory_space<vmem>>, vector<1x168x128xbf16>
      %342 = vector.shape_cast %341 : vector<1x168x128xbf16> to vector<168x128xbf16>
      %343 = vector.shape_cast %92 : vector<168x128xbf16> to vector<1x168x128xbf16>
      tpu.vector_store %arg6[%c0_259, %c0_260, %c0_261], %343 {strides = array<i32>} : memref<1x672x128xbf16, #tpu.memory_space<vmem>>, vector<1x168x128xbf16>,
    } else {
    }
    %cst_67 = arith.constant 0.000000e+00 : f32
    %98 = vector.broadcast %cst_67 : f32 to vector<168x128xf32>
    %99 = arith.index_cast %13 : i32 to index
    %c173 = arith.constant 173 : index
    %c0_68 = arith.constant 0 : index
    %100 = vector.load %arg7[%99, %c173, %c0_68] : memref<2x720x128xbf16, #tpu.memory_space<vmem>>, vector<1x168x128xbf16>
    %101 = vector.shape_cast %100 : vector<1x168x128xbf16> to vector<168x128xbf16>
    %c0_69 = arith.constant 0 : index
    %c0_70 = arith.constant 0 : index
    %c0_71 = arith.constant 0 : index
    %c0_72 = arith.constant 0 : index
    %102 = vector.load %arg3[%c0_69, %c0_70, %c0_71, %c0_72] : memref<1x9x128x128xbf16, #tpu.memory_space<vmem>>, vector<1x1x128x128xbf16>
    %103 = vector.shape_cast %102 : vector<1x1x128x128xbf16> to vector<128x128xbf16>
    %cst_73 = arith.constant dense<0.000000e+00> : vector<168x128xf32>
    %104 = tpu.matmul %101, %103, %cst_73 {dimension_numbers = #tpu.dot_dimension_numbers<[1], [0], [0], [1], [0, 0, 1, 1], [], []>} : vector<168x128xbf16>, vector<128x128xbf16>, vector<168x128xf32> -> vector<168x128xf32>
    %105 = arith.addf %98, %104 : vector<168x128xf32>
    %106 = arith.index_cast %13 : i32 to index
    %c174 = arith.constant 174 : index
    %c0_74 = arith.constant 0 : index
    %107 = vector.load %arg7[%106, %c174, %c0_74] : memref<2x720x128xbf16, #tpu.memory_space<vmem>>, vector<1x168x128xbf16>
    %108 = vector.shape_cast %107 : vector<1x168x128xbf16> to vector<168x128xbf16>
    %c0_75 = arith.constant 0 : index
    %c1_76 = arith.constant 1 : index
    %c0_77 = arith.constant 0 : index
    %c0_78 = arith.constant 0 : index
    %109 = vector.load %arg3[%c0_75, %c1_76, %c0_77, %c0_78] : memref<1x9x128x128xbf16, #tpu.memory_space<vmem>>, vector<1x1x128x128xbf16>
    %110 = vector.shape_cast %109 : vector<1x1x128x128xbf16> to vector<128x128xbf16>
    %cst_79 = arith.constant dense<0.000000e+00> : vector<168x128xf32>
    %111 = tpu.matmul %108, %110, %cst_79 {dimension_numbers = #tpu.dot_dimension_numbers<[1], [0], [0], [1], [0, 0, 1, 1], [], []>} : vector<168x128xbf16>, vector<128x128xbf16>, vector<168x128xf32> -> vector<168x128xf32>
    %112 = arith.addf %105, %111 : vector<168x128xf32>
    %113 = arith.index_cast %13 : i32 to index
    %c175 = arith.constant 175 : index
    %c0_80 = arith.constant 0 : index
    %114 = vector.load %arg7[%113, %c175, %c0_80] : memref<2x720x128xbf16, #tpu.memory_space<vmem>>, vector<1x168x128xbf16>
    %115 = vector.shape_cast %114 : vector<1x168x128xbf16> to vector<168x128xbf16>
    %c0_81 = arith.constant 0 : index
    %c2_82 = arith.constant 2 : index
    %c0_83 = arith.constant 0 : index
    %c0_84 = arith.constant 0 : index
    %116 = vector.load %arg3[%c0_81, %c2_82, %c0_83, %c0_84] : memref<1x9x128x128xbf16, #tpu.memory_space<vmem>>, vector<1x1x128x128xbf16>
    %117 = vector.shape_cast %116 : vector<1x1x128x128xbf16> to vector<128x128xbf16>
    %cst_85 = arith.constant dense<0.000000e+00> : vector<168x128xf32>
    %118 = tpu.matmul %115, %117, %cst_85 {dimension_numbers = #tpu.dot_dimension_numbers<[1], [0], [0], [1], [0, 0, 1, 1], [], []>} : vector<168x128xbf16>, vector<128x128xbf16>, vector<168x128xf32> -> vector<168x128xf32>
    %119 = arith.addf %112, %118 : vector<168x128xf32>
    %120 = arith.index_cast %13 : i32 to index
    %c191 = arith.constant 191 : index
    %c0_86 = arith.constant 0 : index
    %121 = vector.load %arg7[%120, %c191, %c0_86] : memref<2x720x128xbf16, #tpu.memory_space<vmem>>, vector<1x168x128xbf16>
    %122 = vector.shape_cast %121 : vector<1x168x128xbf16> to vector<168x128xbf16>
    %c0_87 = arith.constant 0 : index
    %c3_88 = arith.constant 3 : index
    %c0_89 = arith.constant 0 : index
    %c0_90 = arith.constant 0 : index
    %123 = vector.load %arg3[%c0_87, %c3_88, %c0_89, %c0_90] : memref<1x9x128x128xbf16, #tpu.memory_space<vmem>>, vector<1x1x128x128xbf16>
    %124 = vector.shape_cast %123 : vector<1x1x128x128xbf16> to vector<128x128xbf16>
    %cst_91 = arith.constant dense<0.000000e+00> : vector<168x128xf32>
    %125 = tpu.matmul %122, %124, %cst_91 {dimension_numbers = #tpu.dot_dimension_numbers<[1], [0], [0], [1], [0, 0, 1, 1], [], []>} : vector<168x128xbf16>, vector<128x128xbf16>, vector<168x128xf32> -> vector<168x128xf32>
    %126 = arith.addf %119, %125 : vector<168x128xf32>
    %127 = arith.index_cast %13 : i32 to index
    %c192 = arith.constant 192 : index
    %c0_92 = arith.constant 0 : index
    %128 = vector.load %arg7[%127, %c192, %c0_92] : memref<2x720x128xbf16, #tpu.memory_space<vmem>>, vector<1x168x128xbf16>
    %129 = vector.shape_cast %128 : vector<1x168x128xbf16> to vector<168x128xbf16>
    %c0_93 = arith.constant 0 : index
    %c4_94 = arith.constant 4 : index
    %c0_95 = arith.constant 0 : index
    %c0_96 = arith.constant 0 : index
    %130 = vector.load %arg3[%c0_93, %c4_94, %c0_95, %c0_96] : memref<1x9x128x128xbf16, #tpu.memory_space<vmem>>, vector<1x1x128x128xbf16>
    %131 = vector.shape_cast %130 : vector<1x1x128x128xbf16> to vector<128x128xbf16>
    %cst_97 = arith.constant dense<0.000000e+00> : vector<168x128xf32>
    %132 = tpu.matmul %129, %131, %cst_97 {dimension_numbers = #tpu.dot_dimension_numbers<[1], [0], [0], [1], [0, 0, 1, 1], [], []>} : vector<168x128xbf16>, vector<128x128xbf16>, vector<168x128xf32> -> vector<168x128xf32>
    %133 = arith.addf %126, %132 : vector<168x128xf32>
    %134 = arith.index_cast %13 : i32 to index
    %c193 = arith.constant 193 : index
    %c0_98 = arith.constant 0 : index
    %135 = vector.load %arg7[%134, %c193, %c0_98] : memref<2x720x128xbf16, #tpu.memory_space<vmem>>, vector<1x168x128xbf16>
    %136 = vector.shape_cast %135 : vector<1x168x128xbf16> to vector<168x128xbf16>
    %c0_99 = arith.constant 0 : index
    %c5_100 = arith.constant 5 : index
    %c0_101 = arith.constant 0 : index
    %c0_102 = arith.constant 0 : index
    %137 = vector.load %arg3[%c0_99, %c5_100, %c0_101, %c0_102] : memref<1x9x128x128xbf16, #tpu.memory_space<vmem>>, vector<1x1x128x128xbf16>
    %138 = vector.shape_cast %137 : vector<1x1x128x128xbf16> to vector<128x128xbf16>
    %cst_103 = arith.constant dense<0.000000e+00> : vector<168x128xf32>
    %139 = tpu.matmul %136, %138, %cst_103 {dimension_numbers = #tpu.dot_dimension_numbers<[1], [0], [0], [1], [0, 0, 1, 1], [], []>} : vector<168x128xbf16>, vector<128x128xbf16>, vector<168x128xf32> -> vector<168x128xf32>
    %140 = arith.addf %133, %139 : vector<168x128xf32>
    %141 = arith.index_cast %13 : i32 to index
    %c209 = arith.constant 209 : index
    %c0_104 = arith.constant 0 : index
    %142 = vector.load %arg7[%141, %c209, %c0_104] : memref<2x720x128xbf16, #tpu.memory_space<vmem>>, vector<1x168x128xbf16>
    %143 = vector.shape_cast %142 : vector<1x168x128xbf16> to vector<168x128xbf16>
    %c0_105 = arith.constant 0 : index
    %c6_106 = arith.constant 6 : index
    %c0_107 = arith.constant 0 : index
    %c0_108 = arith.constant 0 : index
    %144 = vector.load %arg3[%c0_105, %c6_106, %c0_107, %c0_108] : memref<1x9x128x128xbf16, #tpu.memory_space<vmem>>, vector<1x1x128x128xbf16>
    %145 = vector.shape_cast %144 : vector<1x1x128x128xbf16> to vector<128x128xbf16>
    %cst_109 = arith.constant dense<0.000000e+00> : vector<168x128xf32>
    %146 = tpu.matmul %143, %145, %cst_109 {dimension_numbers = #tpu.dot_dimension_numbers<[1], [0], [0], [1], [0, 0, 1, 1], [], []>} : vector<168x128xbf16>, vector<128x128xbf16>, vector<168x128xf32> -> vector<168x128xf32>
    %147 = arith.addf %140, %146 : vector<168x128xf32>
    %148 = arith.index_cast %13 : i32 to index
    %c210 = arith.constant 210 : index
    %c0_110 = arith.constant 0 : index
    %149 = vector.load %arg7[%148, %c210, %c0_110] : memref<2x720x128xbf16, #tpu.memory_space<vmem>>, vector<1x168x128xbf16>
    %150 = vector.shape_cast %149 : vector<1x168x128xbf16> to vector<168x128xbf16>
    %c0_111 = arith.constant 0 : index
    %c7_112 = arith.constant 7 : index
    %c0_113 = arith.constant 0 : index
    %c0_114 = arith.constant 0 : index
    %151 = vector.load %arg3[%c0_111, %c7_112, %c0_113, %c0_114] : memref<1x9x128x128xbf16, #tpu.memory_space<vmem>>, vector<1x1x128x128xbf16>
    %152 = vector.shape_cast %151 : vector<1x1x128x128xbf16> to vector<128x128xbf16>
    %cst_115 = arith.constant dense<0.000000e+00> : vector<168x128xf32>
    %153 = tpu.matmul %150, %152, %cst_115 {dimension_numbers = #tpu.dot_dimension_numbers<[1], [0], [0], [1], [0, 0, 1, 1], [], []>} : vector<168x128xbf16>, vector<128x128xbf16>, vector<168x128xf32> -> vector<168x128xf32>
    %154 = arith.addf %147, %153 : vector<168x128xf32>
    %155 = arith.index_cast %13 : i32 to index
    %c211 = arith.constant 211 : index
    %c0_116 = arith.constant 0 : index
    %156 = vector.load %arg7[%155, %c211, %c0_116] : memref<2x720x128xbf16, #tpu.memory_space<vmem>>, vector<1x168x128xbf16>
    %157 = vector.shape_cast %156 : vector<1x168x128xbf16> to vector<168x128xbf16>
    %c0_117 = arith.constant 0 : index
    %c8_118 = arith.constant 8 : index
    %c0_119 = arith.constant 0 : index
    %c0_120 = arith.constant 0 : index
    %158 = vector.load %arg3[%c0_117, %c8_118, %c0_119, %c0_120] : memref<1x9x128x128xbf16, #tpu.memory_space<vmem>>, vector<1x1x128x128xbf16>
    %159 = vector.shape_cast %158 : vector<1x1x128x128xbf16> to vector<128x128xbf16>
    %cst_121 = arith.constant dense<0.000000e+00> : vector<168x128xf32>
    %160 = tpu.matmul %157, %159, %cst_121 {dimension_numbers = #tpu.dot_dimension_numbers<[1], [0], [0], [1], [0, 0, 1, 1], [], []>} : vector<168x128xbf16>, vector<128x128xbf16>, vector<168x128xf32> -> vector<168x128xf32>
    %161 = arith.addf %154, %160 : vector<168x128xf32>
    %c0_122 = arith.constant 0 : index
    %c0_123 = arith.constant 0 : index
    %c0_124 = arith.constant 0 : index
    %162 = vector.load %arg4[%c0_122, %c0_123, %c0_124] : memref<1x1x128xf32, #tpu.memory_space<vmem>>, vector<1x1x128xf32>
    %163 = vector.shape_cast %162 : vector<1x1x128xf32> to vector<1x128xf32>
    %164 = vector.broadcast %163 : vector<1x128xf32> to vector<168x128xf32>
    %165 = arith.addf %161, %164 : vector<168x128xf32>
    %166 = vector.broadcast %15 : f32 to vector<168x128xf32>
    %167 = arith.maximumf %165, %166 : vector<168x128xf32>
    %c168 = arith.constant 168 : index
    %c0_125 = arith.constant 0 : index
    %168 = vector.load %arg5[%c168, %c0_125] : memref<672x128xbf16, #tpu.memory_space<vmem>>, vector<168x128xbf16>
    %cst_126 = arith.constant 0.000000e+00 : bf16
    %169 = vector.broadcast %cst_126 : bf16 to vector<168x128xbf16>
    %170 = arith.cmpf ogt, %168, %169 : vector<168x128xbf16>
    %cst_127 = arith.constant 0.000000e+00 : f32
    %171 = vector.broadcast %cst_127 : f32 to vector<168x128xf32>
    %172 = arith.select %170, %167, %171 : vector<168x128xi1>, vector<168x128xf32>
    %173 = arith.truncf %172 : vector<168x128xf32> to vector<168x128xbf16>
    %c4_i32_128 = arith.constant 4 : i32
    %174 = arith.cmpi slt, %arg1, %c4_i32_128 : i32
    %175 = arith.extui %174 : i1 to i32
    %c0_i32_129 = arith.constant 0 : i32
    %176 = arith.cmpi ne, %175, %c0_i32_129 : i32
    scf.if %176 {
      %341 = arith.index_cast %12 : i32 to index
      %c192_259 = arith.constant 192 : index
      %c0_260 = arith.constant 0 : index
      %342 = vector.load %arg7[%341, %c192_259, %c0_260] : memref<2x720x128xbf16, #tpu.memory_space<vmem>>, vector<1x168x128xbf16>
      %343 = vector.shape_cast %342 : vector<1x168x128xbf16> to vector<168x128xbf16>
      %344 = vector.shape_cast %173 : vector<168x128xbf16> to vector<1x168x128xbf16>
      tpu.vector_store %arg7[%341, %c192_259, %c0_260], %344 {strides = array<i32>} : memref<2x720x128xbf16, #tpu.memory_space<vmem>>, vector<1x168x128xbf16>,
    } else {
    }
    %177 = arith.extui %16 : i1 to i32
    %c0_i32_130 = arith.constant 0 : i32
    %178 = arith.cmpi ne, %177, %c0_i32_130 : i32
    scf.if %178 {
      %c0_259 = arith.constant 0 : index
      %c168_260 = arith.constant 168 : index
      %c0_261 = arith.constant 0 : index
      %341 = vector.load %arg6[%c0_259, %c168_260, %c0_261] : memref<1x672x128xbf16, #tpu.memory_space<vmem>>, vector<1x168x128xbf16>
      %342 = vector.shape_cast %341 : vector<1x168x128xbf16> to vector<168x128xbf16>
      %343 = vector.shape_cast %173 : vector<168x128xbf16> to vector<1x168x128xbf16>
      tpu.vector_store %arg6[%c0_259, %c168_260, %c0_261], %343 {strides = array<i32>} : memref<1x672x128xbf16, #tpu.memory_space<vmem>>, vector<1x168x128xbf16>,
    } else {
    }
    %cst_131 = arith.constant 0.000000e+00 : f32
    %179 = vector.broadcast %cst_131 : f32 to vector<168x128xf32>
    %180 = arith.index_cast %13 : i32 to index
    %c341 = arith.constant 341 : index
    %c0_132 = arith.constant 0 : index
    %181 = vector.load %arg7[%180, %c341, %c0_132] : memref<2x720x128xbf16, #tpu.memory_space<vmem>>, vector<1x168x128xbf16>
    %182 = vector.shape_cast %181 : vector<1x168x128xbf16> to vector<168x128xbf16>
    %c0_133 = arith.constant 0 : index
    %c0_134 = arith.constant 0 : index
    %c0_135 = arith.constant 0 : index
    %c0_136 = arith.constant 0 : index
    %183 = vector.load %arg3[%c0_133, %c0_134, %c0_135, %c0_136] : memref<1x9x128x128xbf16, #tpu.memory_space<vmem>>, vector<1x1x128x128xbf16>
    %184 = vector.shape_cast %183 : vector<1x1x128x128xbf16> to vector<128x128xbf16>
    %cst_137 = arith.constant dense<0.000000e+00> : vector<168x128xf32>
    %185 = tpu.matmul %182, %184, %cst_137 {dimension_numbers = #tpu.dot_dimension_numbers<[1], [0], [0], [1], [0, 0, 1, 1], [], []>} : vector<168x128xbf16>, vector<128x128xbf16>, vector<168x128xf32> -> vector<168x128xf32>
    %186 = arith.addf %179, %185 : vector<168x128xf32>
    %187 = arith.index_cast %13 : i32 to index
    %c342 = arith.constant 342 : index
    %c0_138 = arith.constant 0 : index
    %188 = vector.load %arg7[%187, %c342, %c0_138] : memref<2x720x128xbf16, #tpu.memory_space<vmem>>, vector<1x168x128xbf16>
    %189 = vector.shape_cast %188 : vector<1x168x128xbf16> to vector<168x128xbf16>
    %c0_139 = arith.constant 0 : index
    %c1_140 = arith.constant 1 : index
    %c0_141 = arith.constant 0 : index
    %c0_142 = arith.constant 0 : index
    %190 = vector.load %arg3[%c0_139, %c1_140, %c0_141, %c0_142] : memref<1x9x128x128xbf16, #tpu.memory_space<vmem>>, vector<1x1x128x128xbf16>
    %191 = vector.shape_cast %190 : vector<1x1x128x128xbf16> to vector<128x128xbf16>
    %cst_143 = arith.constant dense<0.000000e+00> : vector<168x128xf32>
    %192 = tpu.matmul %189, %191, %cst_143 {dimension_numbers = #tpu.dot_dimension_numbers<[1], [0], [0], [1], [0, 0, 1, 1], [], []>} : vector<168x128xbf16>, vector<128x128xbf16>, vector<168x128xf32> -> vector<168x128xf32>
    %193 = arith.addf %186, %192 : vector<168x128xf32>
    %194 = arith.index_cast %13 : i32 to index
    %c343 = arith.constant 343 : index
    %c0_144 = arith.constant 0 : index
    %195 = vector.load %arg7[%194, %c343, %c0_144] : memref<2x720x128xbf16, #tpu.memory_space<vmem>>, vector<1x168x128xbf16>
    %196 = vector.shape_cast %195 : vector<1x168x128xbf16> to vector<168x128xbf16>
    %c0_145 = arith.constant 0 : index
    %c2_146 = arith.constant 2 : index
    %c0_147 = arith.constant 0 : index
    %c0_148 = arith.constant 0 : index
    %197 = vector.load %arg3[%c0_145, %c2_146, %c0_147, %c0_148] : memref<1x9x128x128xbf16, #tpu.memory_space<vmem>>, vector<1x1x128x128xbf16>
    %198 = vector.shape_cast %197 : vector<1x1x128x128xbf16> to vector<128x128xbf16>
    %cst_149 = arith.constant dense<0.000000e+00> : vector<168x128xf32>
    %199 = tpu.matmul %196, %198, %cst_149 {dimension_numbers = #tpu.dot_dimension_numbers<[1], [0], [0], [1], [0, 0, 1, 1], [], []>} : vector<168x128xbf16>, vector<128x128xbf16>, vector<168x128xf32> -> vector<168x128xf32>
    %200 = arith.addf %193, %199 : vector<168x128xf32>
    %201 = arith.index_cast %13 : i32 to index
    %c359 = arith.constant 359 : index
    %c0_150 = arith.constant 0 : index
    %202 = vector.load %arg7[%201, %c359, %c0_150] : memref<2x720x128xbf16, #tpu.memory_space<vmem>>, vector<1x168x128xbf16>
    %203 = vector.shape_cast %202 : vector<1x168x128xbf16> to vector<168x128xbf16>
    %c0_151 = arith.constant 0 : index
    %c3_152 = arith.constant 3 : index
    %c0_153 = arith.constant 0 : index
    %c0_154 = arith.constant 0 : index
    %204 = vector.load %arg3[%c0_151, %c3_152, %c0_153, %c0_154] : memref<1x9x128x128xbf16, #tpu.memory_space<vmem>>, vector<1x1x128x128xbf16>
    %205 = vector.shape_cast %204 : vector<1x1x128x128xbf16> to vector<128x128xbf16>
    %cst_155 = arith.constant dense<0.000000e+00> : vector<168x128xf32>
    %206 = tpu.matmul %203, %205, %cst_155 {dimension_numbers = #tpu.dot_dimension_numbers<[1], [0], [0], [1], [0, 0, 1, 1], [], []>} : vector<168x128xbf16>, vector<128x128xbf16>, vector<168x128xf32> -> vector<168x128xf32>
    %207 = arith.addf %200, %206 : vector<168x128xf32>
    %208 = arith.index_cast %13 : i32 to index
    %c360 = arith.constant 360 : index
    %c0_156 = arith.constant 0 : index
    %209 = vector.load %arg7[%208, %c360, %c0_156] : memref<2x720x128xbf16, #tpu.memory_space<vmem>>, vector<1x168x128xbf16>
    %210 = vector.shape_cast %209 : vector<1x168x128xbf16> to vector<168x128xbf16>
    %c0_157 = arith.constant 0 : index
    %c4_158 = arith.constant 4 : index
    %c0_159 = arith.constant 0 : index
    %c0_160 = arith.constant 0 : index
    %211 = vector.load %arg3[%c0_157, %c4_158, %c0_159, %c0_160] : memref<1x9x128x128xbf16, #tpu.memory_space<vmem>>, vector<1x1x128x128xbf16>
    %212 = vector.shape_cast %211 : vector<1x1x128x128xbf16> to vector<128x128xbf16>
    %cst_161 = arith.constant dense<0.000000e+00> : vector<168x128xf32>
    %213 = tpu.matmul %210, %212, %cst_161 {dimension_numbers = #tpu.dot_dimension_numbers<[1], [0], [0], [1], [0, 0, 1, 1], [], []>} : vector<168x128xbf16>, vector<128x128xbf16>, vector<168x128xf32> -> vector<168x128xf32>
    %214 = arith.addf %207, %213 : vector<168x128xf32>
    %215 = arith.index_cast %13 : i32 to index
    %c361 = arith.constant 361 : index
    %c0_162 = arith.constant 0 : index
    %216 = vector.load %arg7[%215, %c361, %c0_162] : memref<2x720x128xbf16, #tpu.memory_space<vmem>>, vector<1x168x128xbf16>
    %217 = vector.shape_cast %216 : vector<1x168x128xbf16> to vector<168x128xbf16>
    %c0_163 = arith.constant 0 : index
    %c5_164 = arith.constant 5 : index
    %c0_165 = arith.constant 0 : index
    %c0_166 = arith.constant 0 : index
    %218 = vector.load %arg3[%c0_163, %c5_164, %c0_165, %c0_166] : memref<1x9x128x128xbf16, #tpu.memory_space<vmem>>, vector<1x1x128x128xbf16>
    %219 = vector.shape_cast %218 : vector<1x1x128x128xbf16> to vector<128x128xbf16>
    %cst_167 = arith.constant dense<0.000000e+00> : vector<168x128xf32>
    %220 = tpu.matmul %217, %219, %cst_167 {dimension_numbers = #tpu.dot_dimension_numbers<[1], [0], [0], [1], [0, 0, 1, 1], [], []>} : vector<168x128xbf16>, vector<128x128xbf16>, vector<168x128xf32> -> vector<168x128xf32>
    %221 = arith.addf %214, %220 : vector<168x128xf32>
    %222 = arith.index_cast %13 : i32 to index
    %c377 = arith.constant 377 : index
    %c0_168 = arith.constant 0 : index
    %223 = vector.load %arg7[%222, %c377, %c0_168] : memref<2x720x128xbf16, #tpu.memory_space<vmem>>, vector<1x168x128xbf16>
    %224 = vector.shape_cast %223 : vector<1x168x128xbf16> to vector<168x128xbf16>
    %c0_169 = arith.constant 0 : index
    %c6_170 = arith.constant 6 : index
    %c0_171 = arith.constant 0 : index
    %c0_172 = arith.constant 0 : index
    %225 = vector.load %arg3[%c0_169, %c6_170, %c0_171, %c0_172] : memref<1x9x128x128xbf16, #tpu.memory_space<vmem>>, vector<1x1x128x128xbf16>
    %226 = vector.shape_cast %225 : vector<1x1x128x128xbf16> to vector<128x128xbf16>
    %cst_173 = arith.constant dense<0.000000e+00> : vector<168x128xf32>
    %227 = tpu.matmul %224, %226, %cst_173 {dimension_numbers = #tpu.dot_dimension_numbers<[1], [0], [0], [1], [0, 0, 1, 1], [], []>} : vector<168x128xbf16>, vector<128x128xbf16>, vector<168x128xf32> -> vector<168x128xf32>
    %228 = arith.addf %221, %227 : vector<168x128xf32>
    %229 = arith.index_cast %13 : i32 to index
    %c378 = arith.constant 378 : index
    %c0_174 = arith.constant 0 : index
    %230 = vector.load %arg7[%229, %c378, %c0_174] : memref<2x720x128xbf16, #tpu.memory_space<vmem>>, vector<1x168x128xbf16>
    %231 = vector.shape_cast %230 : vector<1x168x128xbf16> to vector<168x128xbf16>
    %c0_175 = arith.constant 0 : index
    %c7_176 = arith.constant 7 : index
    %c0_177 = arith.constant 0 : index
    %c0_178 = arith.constant 0 : index
    %232 = vector.load %arg3[%c0_175, %c7_176, %c0_177, %c0_178] : memref<1x9x128x128xbf16, #tpu.memory_space<vmem>>, vector<1x1x128x128xbf16>
    %233 = vector.shape_cast %232 : vector<1x1x128x128xbf16> to vector<128x128xbf16>
    %cst_179 = arith.constant dense<0.000000e+00> : vector<168x128xf32>
    %234 = tpu.matmul %231, %233, %cst_179 {dimension_numbers = #tpu.dot_dimension_numbers<[1], [0], [0], [1], [0, 0, 1, 1], [], []>} : vector<168x128xbf16>, vector<128x128xbf16>, vector<168x128xf32> -> vector<168x128xf32>
    %235 = arith.addf %228, %234 : vector<168x128xf32>
    %236 = arith.index_cast %13 : i32 to index
    %c379 = arith.constant 379 : index
    %c0_180 = arith.constant 0 : index
    %237 = vector.load %arg7[%236, %c379, %c0_180] : memref<2x720x128xbf16, #tpu.memory_space<vmem>>, vector<1x168x128xbf16>
    %238 = vector.shape_cast %237 : vector<1x168x128xbf16> to vector<168x128xbf16>
    %c0_181 = arith.constant 0 : index
    %c8_182 = arith.constant 8 : index
    %c0_183 = arith.constant 0 : index
    %c0_184 = arith.constant 0 : index
    %239 = vector.load %arg3[%c0_181, %c8_182, %c0_183, %c0_184] : memref<1x9x128x128xbf16, #tpu.memory_space<vmem>>, vector<1x1x128x128xbf16>
    %240 = vector.shape_cast %239 : vector<1x1x128x128xbf16> to vector<128x128xbf16>
    %cst_185 = arith.constant dense<0.000000e+00> : vector<168x128xf32>
    %241 = tpu.matmul %238, %240, %cst_185 {dimension_numbers = #tpu.dot_dimension_numbers<[1], [0], [0], [1], [0, 0, 1, 1], [], []>} : vector<168x128xbf16>, vector<128x128xbf16>, vector<168x128xf32> -> vector<168x128xf32>
    %242 = arith.addf %235, %241 : vector<168x128xf32>
    %c0_186 = arith.constant 0 : index
    %c0_187 = arith.constant 0 : index
    %c0_188 = arith.constant 0 : index
    %243 = vector.load %arg4[%c0_186, %c0_187, %c0_188] : memref<1x1x128xf32, #tpu.memory_space<vmem>>, vector<1x1x128xf32>
    %244 = vector.shape_cast %243 : vector<1x1x128xf32> to vector<1x128xf32>
    %245 = vector.broadcast %244 : vector<1x128xf32> to vector<168x128xf32>
    %246 = arith.addf %242, %245 : vector<168x128xf32>
    %247 = vector.broadcast %15 : f32 to vector<168x128xf32>
    %248 = arith.maximumf %246, %247 : vector<168x128xf32>
    %c336 = arith.constant 336 : index
    %c0_189 = arith.constant 0 : index
    %249 = vector.load %arg5[%c336, %c0_189] : memref<672x128xbf16, #tpu.memory_space<vmem>>, vector<168x128xbf16>
    %cst_190 = arith.constant 0.000000e+00 : bf16
    %250 = vector.broadcast %cst_190 : bf16 to vector<168x128xbf16>
    %251 = arith.cmpf ogt, %249, %250 : vector<168x128xbf16>
    %cst_191 = arith.constant 0.000000e+00 : f32
    %252 = vector.broadcast %cst_191 : f32 to vector<168x128xf32>
    %253 = arith.select %251, %248, %252 : vector<168x128xi1>, vector<168x128xf32>
    %254 = arith.truncf %253 : vector<168x128xf32> to vector<168x128xbf16>
    %c4_i32_192 = arith.constant 4 : i32
    %255 = arith.cmpi slt, %arg1, %c4_i32_192 : i32
    %256 = arith.extui %255 : i1 to i32
    %c0_i32_193 = arith.constant 0 : i32
    %257 = arith.cmpi ne, %256, %c0_i32_193 : i32
    scf.if %257 {
      %341 = arith.index_cast %12 : i32 to index
      %c360_259 = arith.constant 360 : index
      %c0_260 = arith.constant 0 : index
      %342 = vector.load %arg7[%341, %c360_259, %c0_260] : memref<2x720x128xbf16, #tpu.memory_space<vmem>>, vector<1x168x128xbf16>
      %343 = vector.shape_cast %342 : vector<1x168x128xbf16> to vector<168x128xbf16>
      %344 = vector.shape_cast %254 : vector<168x128xbf16> to vector<1x168x128xbf16>
      tpu.vector_store %arg7[%341, %c360_259, %c0_260], %344 {strides = array<i32>} : memref<2x720x128xbf16, #tpu.memory_space<vmem>>, vector<1x168x128xbf16>,
    } else {
    }
    %258 = arith.extui %16 : i1 to i32
    %c0_i32_194 = arith.constant 0 : i32
    %259 = arith.cmpi ne, %258, %c0_i32_194 : i32
    scf.if %259 {
      %c0_259 = arith.constant 0 : index
      %c336_260 = arith.constant 336 : index
      %c0_261 = arith.constant 0 : index
      %341 = vector.load %arg6[%c0_259, %c336_260, %c0_261] : memref<1x672x128xbf16, #tpu.memory_space<vmem>>, vector<1x168x128xbf16>
      %342 = vector.shape_cast %341 : vector<1x168x128xbf16> to vector<168x128xbf16>
      %343 = vector.shape_cast %254 : vector<168x128xbf16> to vector<1x168x128xbf16>
      tpu.vector_store %arg6[%c0_259, %c336_260, %c0_261], %343 {strides = array<i32>} : memref<1x672x128xbf16, #tpu.memory_space<vmem>>, vector<1x168x128xbf16>,
    } else {
    }
    %cst_195 = arith.constant 0.000000e+00 : f32
    %260 = vector.broadcast %cst_195 : f32 to vector<168x128xf32>
    %261 = arith.index_cast %13 : i32 to index
    %c509 = arith.constant 509 : index
    %c0_196 = arith.constant 0 : index
    %262 = vector.load %arg7[%261, %c509, %c0_196] : memref<2x720x128xbf16, #tpu.memory_space<vmem>>, vector<1x168x128xbf16>
    %263 = vector.shape_cast %262 : vector<1x168x128xbf16> to vector<168x128xbf16>
    %c0_197 = arith.constant 0 : index
    %c0_198 = arith.constant 0 : index
    %c0_199 = arith.constant 0 : index
    %c0_200 = arith.constant 0 : index
    %264 = vector.load %arg3[%c0_197, %c0_198, %c0_199, %c0_200] : memref<1x9x128x128xbf16, #tpu.memory_space<vmem>>, vector<1x1x128x128xbf16>
    %265 = vector.shape_cast %264 : vector<1x1x128x128xbf16> to vector<128x128xbf16>
    %cst_201 = arith.constant dense<0.000000e+00> : vector<168x128xf32>
    %266 = tpu.matmul %263, %265, %cst_201 {dimension_numbers = #tpu.dot_dimension_numbers<[1], [0], [0], [1], [0, 0, 1, 1], [], []>} : vector<168x128xbf16>, vector<128x128xbf16>, vector<168x128xf32> -> vector<168x128xf32>
    %267 = arith.addf %260, %266 : vector<168x128xf32>
    %268 = arith.index_cast %13 : i32 to index
    %c510 = arith.constant 510 : index
    %c0_202 = arith.constant 0 : index
    %269 = vector.load %arg7[%268, %c510, %c0_202] : memref<2x720x128xbf16, #tpu.memory_space<vmem>>, vector<1x168x128xbf16>
    %270 = vector.shape_cast %269 : vector<1x168x128xbf16> to vector<168x128xbf16>
    %c0_203 = arith.constant 0 : index
    %c1_204 = arith.constant 1 : index
    %c0_205 = arith.constant 0 : index
    %c0_206 = arith.constant 0 : index
    %271 = vector.load %arg3[%c0_203, %c1_204, %c0_205, %c0_206] : memref<1x9x128x128xbf16, #tpu.memory_space<vmem>>, vector<1x1x128x128xbf16>
    %272 = vector.shape_cast %271 : vector<1x1x128x128xbf16> to vector<128x128xbf16>
    %cst_207 = arith.constant dense<0.000000e+00> : vector<168x128xf32>
    %273 = tpu.matmul %270, %272, %cst_207 {dimension_numbers = #tpu.dot_dimension_numbers<[1], [0], [0], [1], [0, 0, 1, 1], [], []>} : vector<168x128xbf16>, vector<128x128xbf16>, vector<168x128xf32> -> vector<168x128xf32>
    %274 = arith.addf %267, %273 : vector<168x128xf32>
    %275 = arith.index_cast %13 : i32 to index
    %c511 = arith.constant 511 : index
    %c0_208 = arith.constant 0 : index
    %276 = vector.load %arg7[%275, %c511, %c0_208] : memref<2x720x128xbf16, #tpu.memory_space<vmem>>, vector<1x168x128xbf16>
    %277 = vector.shape_cast %276 : vector<1x168x128xbf16> to vector<168x128xbf16>
    %c0_209 = arith.constant 0 : index
    %c2_210 = arith.constant 2 : index
    %c0_211 = arith.constant 0 : index
    %c0_212 = arith.constant 0 : index
    %278 = vector.load %arg3[%c0_209, %c2_210, %c0_211, %c0_212] : memref<1x9x128x128xbf16, #tpu.memory_space<vmem>>, vector<1x1x128x128xbf16>
    %279 = vector.shape_cast %278 : vector<1x1x128x128xbf16> to vector<128x128xbf16>
    %cst_213 = arith.constant dense<0.000000e+00> : vector<168x128xf32>
    %280 = tpu.matmul %277, %279, %cst_213 {dimension_numbers = #tpu.dot_dimension_numbers<[1], [0], [0], [1], [0, 0, 1, 1], [], []>} : vector<168x128xbf16>, vector<128x128xbf16>, vector<168x128xf32> -> vector<168x128xf32>
    %281 = arith.addf %274, %280 : vector<168x128xf32>
    %282 = arith.index_cast %13 : i32 to index
    %c527 = arith.constant 527 : index
    %c0_214 = arith.constant 0 : index
    %283 = vector.load %arg7[%282, %c527, %c0_214] : memref<2x720x128xbf16, #tpu.memory_space<vmem>>, vector<1x168x128xbf16>
    %284 = vector.shape_cast %283 : vector<1x168x128xbf16> to vector<168x128xbf16>
    %c0_215 = arith.constant 0 : index
    %c3_216 = arith.constant 3 : index
    %c0_217 = arith.constant 0 : index
    %c0_218 = arith.constant 0 : index
    %285 = vector.load %arg3[%c0_215, %c3_216, %c0_217, %c0_218] : memref<1x9x128x128xbf16, #tpu.memory_space<vmem>>, vector<1x1x128x128xbf16>
    %286 = vector.shape_cast %285 : vector<1x1x128x128xbf16> to vector<128x128xbf16>
    %cst_219 = arith.constant dense<0.000000e+00> : vector<168x128xf32>
    %287 = tpu.matmul %284, %286, %cst_219 {dimension_numbers = #tpu.dot_dimension_numbers<[1], [0], [0], [1], [0, 0, 1, 1], [], []>} : vector<168x128xbf16>, vector<128x128xbf16>, vector<168x128xf32> -> vector<168x128xf32>
    %288 = arith.addf %281, %287 : vector<168x128xf32>
    %289 = arith.index_cast %13 : i32 to index
    %c528 = arith.constant 528 : index
    %c0_220 = arith.constant 0 : index
    %290 = vector.load %arg7[%289, %c528, %c0_220] : memref<2x720x128xbf16, #tpu.memory_space<vmem>>, vector<1x168x128xbf16>
    %291 = vector.shape_cast %290 : vector<1x168x128xbf16> to vector<168x128xbf16>
    %c0_221 = arith.constant 0 : index
    %c4_222 = arith.constant 4 : index
    %c0_223 = arith.constant 0 : index
    %c0_224 = arith.constant 0 : index
    %292 = vector.load %arg3[%c0_221, %c4_222, %c0_223, %c0_224] : memref<1x9x128x128xbf16, #tpu.memory_space<vmem>>, vector<1x1x128x128xbf16>
    %293 = vector.shape_cast %292 : vector<1x1x128x128xbf16> to vector<128x128xbf16>
    %cst_225 = arith.constant dense<0.000000e+00> : vector<168x128xf32>
    %294 = tpu.matmul %291, %293, %cst_225 {dimension_numbers = #tpu.dot_dimension_numbers<[1], [0], [0], [1], [0, 0, 1, 1], [], []>} : vector<168x128xbf16>, vector<128x128xbf16>, vector<168x128xf32> -> vector<168x128xf32>
    %295 = arith.addf %288, %294 : vector<168x128xf32>
    %296 = arith.index_cast %13 : i32 to index
    %c529 = arith.constant 529 : index
    %c0_226 = arith.constant 0 : index
    %297 = vector.load %arg7[%296, %c529, %c0_226] : memref<2x720x128xbf16, #tpu.memory_space<vmem>>, vector<1x168x128xbf16>
    %298 = vector.shape_cast %297 : vector<1x168x128xbf16> to vector<168x128xbf16>
    %c0_227 = arith.constant 0 : index
    %c5_228 = arith.constant 5 : index
    %c0_229 = arith.constant 0 : index
    %c0_230 = arith.constant 0 : index
    %299 = vector.load %arg3[%c0_227, %c5_228, %c0_229, %c0_230] : memref<1x9x128x128xbf16, #tpu.memory_space<vmem>>, vector<1x1x128x128xbf16>
    %300 = vector.shape_cast %299 : vector<1x1x128x128xbf16> to vector<128x128xbf16>
    %cst_231 = arith.constant dense<0.000000e+00> : vector<168x128xf32>
    %301 = tpu.matmul %298, %300, %cst_231 {dimension_numbers = #tpu.dot_dimension_numbers<[1], [0], [0], [1], [0, 0, 1, 1], [], []>} : vector<168x128xbf16>, vector<128x128xbf16>, vector<168x128xf32> -> vector<168x128xf32>
    %302 = arith.addf %295, %301 : vector<168x128xf32>
    %303 = arith.index_cast %13 : i32 to index
    %c545 = arith.constant 545 : index
    %c0_232 = arith.constant 0 : index
    %304 = vector.load %arg7[%303, %c545, %c0_232] : memref<2x720x128xbf16, #tpu.memory_space<vmem>>, vector<1x168x128xbf16>
    %305 = vector.shape_cast %304 : vector<1x168x128xbf16> to vector<168x128xbf16>
    %c0_233 = arith.constant 0 : index
    %c6_234 = arith.constant 6 : index
    %c0_235 = arith.constant 0 : index
    %c0_236 = arith.constant 0 : index
    %306 = vector.load %arg3[%c0_233, %c6_234, %c0_235, %c0_236] : memref<1x9x128x128xbf16, #tpu.memory_space<vmem>>, vector<1x1x128x128xbf16>
    %307 = vector.shape_cast %306 : vector<1x1x128x128xbf16> to vector<128x128xbf16>
    %cst_237 = arith.constant dense<0.000000e+00> : vector<168x128xf32>
    %308 = tpu.matmul %305, %307, %cst_237 {dimension_numbers = #tpu.dot_dimension_numbers<[1], [0], [0], [1], [0, 0, 1, 1], [], []>} : vector<168x128xbf16>, vector<128x128xbf16>, vector<168x128xf32> -> vector<168x128xf32>
    %309 = arith.addf %302, %308 : vector<168x128xf32>
    %310 = arith.index_cast %13 : i32 to index
    %c546 = arith.constant 546 : index
    %c0_238 = arith.constant 0 : index
    %311 = vector.load %arg7[%310, %c546, %c0_238] : memref<2x720x128xbf16, #tpu.memory_space<vmem>>, vector<1x168x128xbf16>
    %312 = vector.shape_cast %311 : vector<1x168x128xbf16> to vector<168x128xbf16>
    %c0_239 = arith.constant 0 : index
    %c7_240 = arith.constant 7 : index
    %c0_241 = arith.constant 0 : index
    %c0_242 = arith.constant 0 : index
    %313 = vector.load %arg3[%c0_239, %c7_240, %c0_241, %c0_242] : memref<1x9x128x128xbf16, #tpu.memory_space<vmem>>, vector<1x1x128x128xbf16>
    %314 = vector.shape_cast %313 : vector<1x1x128x128xbf16> to vector<128x128xbf16>
    %cst_243 = arith.constant dense<0.000000e+00> : vector<168x128xf32>
    %315 = tpu.matmul %312, %314, %cst_243 {dimension_numbers = #tpu.dot_dimension_numbers<[1], [0], [0], [1], [0, 0, 1, 1], [], []>} : vector<168x128xbf16>, vector<128x128xbf16>, vector<168x128xf32> -> vector<168x128xf32>
    %316 = arith.addf %309, %315 : vector<168x128xf32>
    %317 = arith.index_cast %13 : i32 to index
    %c547 = arith.constant 547 : index
    %c0_244 = arith.constant 0 : index
    %318 = vector.load %arg7[%317, %c547, %c0_244] : memref<2x720x128xbf16, #tpu.memory_space<vmem>>, vector<1x168x128xbf16>
    %319 = vector.shape_cast %318 : vector<1x168x128xbf16> to vector<168x128xbf16>
    %c0_245 = arith.constant 0 : index
    %c8_246 = arith.constant 8 : index
    %c0_247 = arith.constant 0 : index
    %c0_248 = arith.constant 0 : index
    %320 = vector.load %arg3[%c0_245, %c8_246, %c0_247, %c0_248] : memref<1x9x128x128xbf16, #tpu.memory_space<vmem>>, vector<1x1x128x128xbf16>
    %321 = vector.shape_cast %320 : vector<1x1x128x128xbf16> to vector<128x128xbf16>
    %cst_249 = arith.constant dense<0.000000e+00> : vector<168x128xf32>
    %322 = tpu.matmul %319, %321, %cst_249 {dimension_numbers = #tpu.dot_dimension_numbers<[1], [0], [0], [1], [0, 0, 1, 1], [], []>} : vector<168x128xbf16>, vector<128x128xbf16>, vector<168x128xf32> -> vector<168x128xf32>
    %323 = arith.addf %316, %322 : vector<168x128xf32>
    %c0_250 = arith.constant 0 : index
    %c0_251 = arith.constant 0 : index
    %c0_252 = arith.constant 0 : index
    %324 = vector.load %arg4[%c0_250, %c0_251, %c0_252] : memref<1x1x128xf32, #tpu.memory_space<vmem>>, vector<1x1x128xf32>
    %325 = vector.shape_cast %324 : vector<1x1x128xf32> to vector<1x128xf32>
    %326 = vector.broadcast %325 : vector<1x128xf32> to vector<168x128xf32>
    %327 = arith.addf %323, %326 : vector<168x128xf32>
    %328 = vector.broadcast %15 : f32 to vector<168x128xf32>
    %329 = arith.maximumf %327, %328 : vector<168x128xf32>
    %c504 = arith.constant 504 : index
    %c0_253 = arith.constant 0 : index
    %330 = vector.load %arg5[%c504, %c0_253] : memref<672x128xbf16, #tpu.memory_space<vmem>>, vector<168x128xbf16>
    %cst_254 = arith.constant 0.000000e+00 : bf16
    %331 = vector.broadcast %cst_254 : bf16 to vector<168x128xbf16>
    %332 = arith.cmpf ogt, %330, %331 : vector<168x128xbf16>
    %cst_255 = arith.constant 0.000000e+00 : f32
    %333 = vector.broadcast %cst_255 : f32 to vector<168x128xf32>
    %334 = arith.select %332, %329, %333 : vector<168x128xi1>, vector<168x128xf32>
    %335 = arith.truncf %334 : vector<168x128xf32> to vector<168x128xbf16>
    %c4_i32_256 = arith.constant 4 : i32
    %336 = arith.cmpi slt, %arg1, %c4_i32_256 : i32
    %337 = arith.extui %336 : i1 to i32
    %c0_i32_257 = arith.constant 0 : i32
    %338 = arith.cmpi ne, %337, %c0_i32_257 : i32
    scf.if %338 {
      %341 = arith.index_cast %12 : i32 to index
      %c528_259 = arith.constant 528 : index
      %c0_260 = arith.constant 0 : index
      %342 = vector.load %arg7[%341, %c528_259, %c0_260] : memref<2x720x128xbf16, #tpu.memory_space<vmem>>, vector<1x168x128xbf16>
      %343 = vector.shape_cast %342 : vector<1x168x128xbf16> to vector<168x128xbf16>
      %344 = vector.shape_cast %335 : vector<168x128xbf16> to vector<1x168x128xbf16>
      tpu.vector_store %arg7[%341, %c528_259, %c0_260], %344 {strides = array<i32>} : memref<2x720x128xbf16, #tpu.memory_space<vmem>>, vector<1x168x128xbf16>,
    } else {
    }
    %339 = arith.extui %16 : i1 to i32
    %c0_i32_258 = arith.constant 0 : i32
    %340 = arith.cmpi ne, %339, %c0_i32_258 : i32
    scf.if %340 {
      %c0_259 = arith.constant 0 : index
      %c504_260 = arith.constant 504 : index
      %c0_261 = arith.constant 0 : index
      %341 = vector.load %arg6[%c0_259, %c504_260, %c0_261] : memref<1x672x128xbf16, #tpu.memory_space<vmem>>, vector<1x168x128xbf16>
      %342 = vector.shape_cast %341 : vector<1x168x128xbf16> to vector<168x128xbf16>
      %343 = vector.shape_cast %335 : vector<168x128xbf16> to vector<1x168x128xbf16>
      tpu.vector_store %arg6[%c0_259, %c504_260, %c0_261], %343 {strides = array<i32>} : memref<1x672x128xbf16, #tpu.memory_space<vmem>>, vector<1x168x128xbf16>,
    } else {
    }
    return
  }
  func.func @transform_0(%arg0: i32, %arg1: i32) -> (i32, i32, i32) {
    %c0_i32 = arith.constant 0 : i32
    %c0_i32_0 = arith.constant 0 : i32
    %c0_i32_1 = arith.constant 0 : i32
    return %arg0, %c0_i32, %c0_i32_0 : i32, i32, i32
  }
  func.func @transform_1(%arg0: i32, %arg1: i32) -> (i32, i32, i32, i32) {
    %c0_i32 = arith.constant 0 : i32
    %c0_i32_0 = arith.constant 0 : i32
    %c0_i32_1 = arith.constant 0 : i32
    %c0_i32_2 = arith.constant 0 : i32
    return %arg1, %c0_i32, %c0_i32_0, %c0_i32_1 : i32, i32, i32, i32
  }
  func.func @transform_2(%arg0: i32, %arg1: i32) -> (i32, i32, i32) {
    %c0_i32 = arith.constant 0 : i32
    %c0_i32_0 = arith.constant 0 : i32
    %c0_i32_1 = arith.constant 0 : i32
    return %arg1, %c0_i32, %c0_i32_0 : i32, i32, i32
  }
  func.func @transform_3(%arg0: i32, %arg1: i32) -> (i32, i32) {
    %c0_i32 = arith.constant 0 : i32
    %c0_i32_0 = arith.constant 0 : i32
    %c0_i32_1 = arith.constant 0 : i32
    return %c0_i32, %c0_i32_0 : i32, i32
  }
  func.func @transform_4(%arg0: i32, %arg1: i32) -> (i32, i32, i32) {
    %c0_i32 = arith.constant 0 : i32
    %c0_i32_0 = arith.constant 0 : i32
    %c0_i32_1 = arith.constant 0 : i32
    return %arg0, %c0_i32, %c0_i32_0 : i32, i32, i32
  }
}

</mosaic_0001>

<bundles_post_ra>
// kernel: tile.0
= control target key start
LH: loop header
LB: loop body
LE: loop exit
PB: predicated region body
PF: predicated region fallthrough
CT: control target
= control target key end

     0   :  { %vm59_vm0 = vcmask 490496   ;;  %s87_s12 = smov 68   ;;  %s70_s13 = smov 3  ;;  %vm49_vm1 = vcmask 556032   ;;  %vm63_vm2 = vcmask 64512   ;;  %vm66_vm3 = vcmask 1048096   ;;  %s110_s0 = inlined_call_operand.vmem [shape: bf16[2,324], index: 0, kind: input, shape index: {}]   ;;  %s111_s1 = inlined_call_operand.vmem [shape: bf16[648], index: 1, kind: output, shape index: {}]  }
   0x1   :  { %v84_v0 = vld [vmem:[%s110_s0 + $0x2] sm:$0x1]  ;;  %v85_v1 = vld [vmem:[%s110_s0 + $0x1] sm:$0x1]  ;;  %v43_v2 = vld [vmem:[%s110_s0] sm:$0x1] }
   0x2   :  { %v15_v3 = vunpack.c.l.bf16 %v84_v0  ;;  %v30_v4 = vunpack.c.l.bf16 %v85_v1  ;;  %v44_v5 = vunpack.c.l.bf16 %v43_v2  ;;  %s52_s0 = smov 3 }
   0x4   :  { %18 = vst [vmem:[#allocation1 + $0x10] sm:$0x3] %v15_v3 }
   0x5   :  { %33 = vst [vmem:[#allocation1 + $0x8] sm:$0x3] %v30_v4 }
   0x6   :  { %46 = vst [vmem:[#allocation1] sm:$0x3] %v44_v5 }
   0xb   :  { %v56_v6 = vld [vmem:[#allocation1 + $0x11] sm:$0x1]   ;;  %v48_v11 = vld [vmem:[#allocation1 + $0x10] sm:$0x1]  }
   0xc   :  { %51 = vst.msk [vmem:[#allocation0 + $0x2] sm:$0x1] %vm49_vm1, %v48_v11  }
   0xd   :  { %v58_v7 = vld [vmem:[#allocation1 + $0x1] ss:$8 sm:$0x7]   ;;  %v53_v9 = vld [vmem:[#allocation1] ss:$8 sm:%s52_s0]  }
   0xe   :  { %v60_v8 = vsel %vm59_vm0, %v58_v7, %v56_v6  ;;  %54 = vst [vmem:[#allocation0] sm:$0x3] %v53_v9   ;;  %v71_v10 = vld [vmem:[#allocation1 + $0x1] ss:$8 sm:%s70_s13]  }
   0xf   :  { %61 = vrot.lane.b32.xlu0 %v60_v8, %s87_s12 }
  0x17   :  { %72 = vrot.lane.b32.xlu0 %v71_v10, %s87_s12 }
  0x81   :  { %v62_v12 = vpop.permute.xlu0 %61  }
  0x82   :  { %65 = vst.msk [vmem:[#allocation0 + $0x5] sm:$0x1] %vm63_vm2, %v62_v12  }
  0x83   :  { %68 = vst.msk [vmem:[#allocation0 + $0x2] sm:$0x7] %vm66_vm3, %v62_v12  }
  0x89   :  { %v73_v13 = vpop.permute.xlu0 %72  }
  0x8a   :  { %76 = vst.msk [vmem:[#allocation0 + $0x3] sm:$0x3] %vm49_vm1, %v73_v13  }
  0x91   :  { %v79_v14 = vld [vmem:[#allocation0] sm:$0xff] }
  0x92   :  { %v80_v15 = vpack.c.bf16 0.0, %v79_v14 }
  0x94   :  { %83 = vst [vmem:[%s111_s1] sm:$0xf] %v80_v15 }

// kernel: procedure_cloning_bfs_forward.1
= control target key start
LH: loop header
LB: loop body
LE: loop exit
PB: predicated region body
PF: predicated region fallthrough
CT: control target
= control target key end

     0   :  { %s14157_s15 = smov 0   ;;  %s14159_s16 = smov 0   ;;  %s17244_s0 = inlined_call_operand.vmem [shape: bf16[1,720,128], index: 0, kind: input, shape index: {}]   ;;  %s17245_s1 = inlined_call_operand.vmem [shape: bf16[5,9,128,128], index: 1, kind: input, shape index: {}]   ;;  %s17246_s2 = inlined_call_operand.vmem [shape: f32[5,1,128], index: 2, kind: input, shape index: {}]   ;;  %s17247_s3 = inlined_call_operand.vmem [shape: bf16[672,128], index: 3, kind: input, shape index: {}]   ;;  %s17248_s4 = inlined_call_operand.vmem [shape: bf16[1,672,128], index: 4, kind: output, shape index: {}]  }
   0x1   :  { %s14161_s17 = smov 0  }
   0x2 LB: > { %s23_s18 = sadd.s32 1, %s14126_s16  ;;  %p10338_p0 = scmp.ge.s32.totalorder %s14130_s17, 1  ;;  %s14130_s17 = sphi %s14161_s17, %s14_s17   ;;  %s14126_s16 = sphi %s14159_s16, %s17350_s16   ;;  %s14122_s15 = sphi %s14157_s15, %s17349_s15  }
   0x3   : > { %p24_p1 = scmp.ge.s32.totalorder %s23_s18, 5  ;;  %p192_p2 = scmp.lt.s32.totalorder %s14130_s17, 6 }
   0x5   : > { %s17352_s18 = smov (%p24_p1, %s23_s18), 0  ;;  %p193_p3 = pnand %p10338_p0, %p192_p2 }
   0x6   : > { %p231_p4 = scmp.lt.s32.totalorder (!%p193_p3), %s14122_s15, 4  ;;  %p10340_p5 = scmp.ne.s32.totalorder (!%p193_p3), %s14122_s15, 0 }
   0x7   : > { %196 = sbr.rel (%p193_p3) target bundleno = 2906 (0xb5a), region = 36 }
   0xc   : > { %s232_s19 = scalar_select %p231_p4, %s14122_s15, 4 }
   0xd   : > { %247 = sbr.rel (%p10340_p5) target bundleno = 64 (0x40), region = 40 }
   0xe   : > { %s14053_s20 = smul.u32 576, %s232_s19  ;;  %s14184_s23 = scalar_lea.vmem %s17246_s2, %s232_s19 }
  0x10   : > { %s14189_s26 = scalar_lea.vmem %s17245_s1, %s14053_s20 }
  0x12   : > { %v248_v0 = vld [vmem:[%s17244_s0] sm:$0xff]   ;;  %v250_v1 = vld [vmem:[%s17244_s0 + $0x8] sm:$0xff]   ;;  %v252_v2 = vld [vmem:[%s17244_s0 + $0x10] sm:$0xff]  }
  0x13   : > { %339 = vst [vmem:[#allocation2 + $0x168] sm:$0xff] %v248_v0   ;;  %v254_v3 = vld [vmem:[%s17244_s0 + $0x18] sm:$0xff]   ;;  %v256_v4 = vld [vmem:[%s17244_s0 + $0x20] sm:$0xff]   ;;  %v258_v5 = vld [vmem:[%s17244_s0 + $0x28] sm:$0xff]  }
  0x14   : > { %341 = vst [vmem:[#allocation2 + $0x170] sm:$0xff] %v250_v1   ;;  %v260_v6 = vld [vmem:[%s17244_s0 + $0x30] sm:$0xff]   ;;  %v262_v7 = vld [vmem:[%s17244_s0 + $0x38] sm:$0xff]   ;;  %v264_v8 = vld [vmem:[%s17244_s0 + $0x40] sm:$0xff]  }
  0x15   : > { %343 = vst [vmem:[#allocation2 + $0x178] sm:$0xff] %v252_v2   ;;  %v266_v9 = vld [vmem:[%s17244_s0 + $0x48] sm:$0xff]   ;;  %v268_v10 = vld [vmem:[%s17244_s0 + $0x50] sm:$0xff]   ;;  %v270_v11 = vld [vmem:[%s17244_s0 + $0x58] sm:$0xff]  }
  0x16   : > { %345 = vst [vmem:[#allocation2 + $0x180] sm:$0xff] %v254_v3   ;;  %v272_v12 = vld [vmem:[%s17244_s0 + $0x60] sm:$0xff]   ;;  %v274_v13 = vld [vmem:[%s17244_s0 + $0x68] sm:$0xff]   ;;  %v276_v14 = vld [vmem:[%s17244_s0 + $0x70] sm:$0xff]  }
  0x17   : > { %347 = vst [vmem:[#allocation2 + $0x188] sm:$0xff] %v256_v4   ;;  %v278_v15 = vld [vmem:[%s17244_s0 + $0x78] sm:$0xff]   ;;  %v280_v16 = vld [vmem:[%s17244_s0 + $0x80] sm:$0xff]   ;;  %v282_v17 = vld [vmem:[%s17244_s0 + $0x88] sm:$0xff]  }
  0x18   : > { %349 = vst [vmem:[#allocation2 + $0x190] sm:$0xff] %v258_v5   ;;  %v284_v18 = vld [vmem:[%s17244_s0 + $0x90] sm:$0xff]   ;;  %v286_v19 = vld [vmem:[%s17244_s0 + $0x98] sm:$0xff]   ;;  %v288_v20 = vld [vmem:[%s17244_s0 + $0xa0] sm:$0xff]  }
  0x19   : > { %351 = vst [vmem:[#allocation2 + $0x198] sm:$0xff] %v260_v6   ;;  %v290_v21 = vld [vmem:[%s17244_s0 + $0xa8] sm:$0xff]   ;;  %v292_v22 = vld [vmem:[%s17244_s0 + $0xb0] sm:$0xff]   ;;  %v294_v23 = vld [vmem:[%s17244_s0 + $0xb8] sm:$0xff]  }
  0x1a   : > { %353 = vst [vmem:[#allocation2 + $0x1a0] sm:$0xff] %v262_v7   ;;  %v296_v24 = vld [vmem:[%s17244_s0 + $0xc0] sm:$0xff]   ;;  %v298_v25 = vld [vmem:[%s17244_s0 + $0xc8] sm:$0xff]   ;;  %v300_v26 = vld [vmem:[%s17244_s0 + $0xd0] sm:$0xff]  }
  0x1b   : > { %355 = vst [vmem:[#allocation2 + $0x1a8] sm:$0xff] %v264_v8   ;;  %v302_v27 = vld [vmem:[%s17244_s0 + $0xd8] sm:$0xff]   ;;  %v304_v28 = vld [vmem:[%s17244_s0 + $0xe0] sm:$0xff]   ;;  %v306_v29 = vld [vmem:[%s17244_s0 + $0xe8] sm:$0xff]  }
  0x1c   : > { %357 = vst [vmem:[#allocation2 + $0x1b0] sm:$0xff] %v266_v9   ;;  %v308_v30 = vld [vmem:[%s17244_s0 + $0xf0] sm:$0xff]   ;;  %v310_v31 = vld [vmem:[%s17244_s0 + $0xf8] sm:$0xff]   ;;  %v312_v32 = vld [vmem:[%s17244_s0 + $0x100] sm:$0xff]  }
  0x1d   : > { %359 = vst [vmem:[#allocation2 + $0x1b8] sm:$0xff] %v268_v10   ;;  %v314_v33 = vld [vmem:[%s17244_s0 + $0x108] sm:$0xff]   ;;  %v316_v34 = vld [vmem:[%s17244_s0 + $0x110] sm:$0xff]   ;;  %v318_v35 = vld [vmem:[%s17244_s0 + $0x118] sm:$0xff]  }
  0x1e   : > { %361 = vst [vmem:[#allocation2 + $0x1c0] sm:$0xff] %v270_v11   ;;  %v320_v36 = vld [vmem:[%s17244_s0 + $0x120] sm:$0xff]   ;;  %v322_v37 = vld [vmem:[%s17244_s0 + $0x128] sm:$0xff]   ;;  %v324_v38 = vld [vmem:[%s17244_s0 + $0x130] sm:$0xff]  }
  0x1f   : > { %363 = vst [vmem:[#allocation2 + $0x1c8] sm:$0xff] %v272_v12   ;;  %v326_v39 = vld [vmem:[%s17244_s0 + $0x138] sm:$0xff]   ;;  %v328_v40 = vld [vmem:[%s17244_s0 + $0x140] sm:$0xff]   ;;  %v330_v41 = vld [vmem:[%s17244_s0 + $0x148] sm:$0xff]  }
  0x20   : > { %365 = vst [vmem:[#allocation2 + $0x1d0] sm:$0xff] %v274_v13   ;;  %v332_v42 = vld [vmem:[%s17244_s0 + $0x150] sm:$0xff]   ;;  %v334_v43 = vld [vmem:[%s17244_s0 + $0x158] sm:$0xff]   ;;  %v336_v44 = vld [vmem:[%s17244_s0 + $0x160] sm:$0xff]  }
  0x21   : > { %367 = vst [vmem:[#allocation2 + $0x1d8] sm:$0xff] %v276_v14  }
  0x22   : > { %369 = vst [vmem:[#allocation2 + $0x1e0] sm:$0xff] %v278_v15  }
  0x23   : > { %371 = vst [vmem:[#allocation2 + $0x1e8] sm:$0xff] %v280_v16  }
  0x24   : > { %373 = vst [vmem:[#allocation2 + $0x1f0] sm:$0xff] %v282_v17  }
  0x25   : > { %375 = vst [vmem:[#allocation2 + $0x1f8] sm:$0xff] %v284_v18  }
  0x26   : > { %377 = vst [vmem:[#allocation2 + $0x200] sm:$0xff] %v286_v19  }
  0x27   : > { %379 = vst [vmem:[#allocation2 + $0x208] sm:$0xff] %v288_v20  }
  0x28   : > { %381 = vst [vmem:[#allocation2 + $0x210] sm:$0xff] %v290_v21  }
  0x29   : > { %383 = vst [vmem:[#allocation2 + $0x218] sm:$0xff] %v292_v22  }
  0x2a   : > { %385 = vst [vmem:[#allocation2 + $0x220] sm:$0xff] %v294_v23  }
  0x2b   : > { %387 = vst [vmem:[#allocation2 + $0x228] sm:$0xff] %v296_v24  }
  0x2c   : > { %389 = vst [vmem:[#allocation2 + $0x230] sm:$0xff] %v298_v25  }
  0x2d   : > { %391 = vst [vmem:[#allocation2 + $0x238] sm:$0xff] %v300_v26  }
  0x2e   : > { %393 = vst [vmem:[#allocation2 + $0x240] sm:$0xff] %v302_v27  }
  0x2f   : > { %395 = vst [vmem:[#allocation2 + $0x248] sm:$0xff] %v304_v28  }
  0x30   : > { %397 = vst [vmem:[#allocation2 + $0x250] sm:$0xff] %v306_v29  }
  0x31   : > { %399 = vst [vmem:[#allocation2 + $0x258] sm:$0xff] %v308_v30  }
  0x32   : > { %401 = vst [vmem:[#allocation2 + $0x260] sm:$0xff] %v310_v31  }
  0x33   : > { %403 = vst [vmem:[#allocation2 + $0x268] sm:$0xff] %v312_v32  }
  0x34   : > { %405 = vst [vmem:[#allocation2 + $0x270] sm:$0xff] %v314_v33  }
  0x35   : > { %407 = vst [vmem:[#allocation2 + $0x278] sm:$0xff] %v316_v34  }
  0x36   : > { %409 = vst [vmem:[#allocation2 + $0x280] sm:$0xff] %v318_v35  }
  0x37   : > { %411 = vst [vmem:[#allocation2 + $0x288] sm:$0xff] %v320_v36  }
  0x38   : > { %413 = vst [vmem:[#allocation2 + $0x290] sm:$0xff] %v322_v37  }
  0x39   : > { %415 = vst [vmem:[#allocation2 + $0x298] sm:$0xff] %v324_v38  }
  0x3a   : > { %417 = vst [vmem:[#allocation2 + $0x2a0] sm:$0xff] %v326_v39  }
  0x3b   : > { %419 = vst [vmem:[#allocation2 + $0x2a8] sm:$0xff] %v328_v40  }
  0x3c   : > { %421 = vst [vmem:[#allocation2 + $0x2b0] sm:$0xff] %v330_v41  }
  0x3d   : > { %423 = vst [vmem:[#allocation2 + $0x2b8] sm:$0xff] %v332_v42  }
  0x3e   : > { %425 = vst [vmem:[#allocation2 + $0x2c0] sm:$0xff] %v334_v43  }
  0x3f   : > { %427 = vst [vmem:[#allocation2 + $0x2c8] sm:$0xff] %v336_v44  }
  0x40 PF: > { %v12513_v45 = vld [vmem:[%s14189_s26 + $0x78] sm:$0xff]  ;;  %p429_p6 = scmp.lt.s32.totalorder %s14122_s15, 0  ;;  %s430_s11 = ssub.s32 0, %s14122_s15  ;;  %v12512_v49 = vld [vmem:[%s14189_s26 + $0x70] sm:$0xff]  ;;  %v12511_v53 = vld [vmem:[%s14189_s26 + $0x68] sm:$0xff]  ;;  %vm559_vm0 = vcmask 1044480  }
  0x41   : > { %v12505_v46 = vld [vmem:[%s14189_s26 + $0x38] sm:$0xff]  ;;  %s10341_s12 = smin.u32 %s14122_s15, %s430_s11  ;;  %640 = vmatpush.bf16.msra.mxu0 %v12513_v45  ;;  %v12504_v50 = vld [vmem:[%s14189_s26 + $0x30] sm:$0xff]  ;;  %v12503_v54 = vld [vmem:[%s14189_s26 + $0x28] sm:$0xff]  ;;  %vm706_vm1 = vsmask.f32 5376  ;;  %vm2321_vm4 = vcmask 1046528  }
  0x42   : > { %v12521_v47 = vld [vmem:[%s14189_s26 + $0xb8] sm:$0xff]  ;;  %864 = vmatpush.bf16.msra.mxu1 %v12505_v46  ;;  %s432_s13 = sand.u32 1, %s10341_s12   ;;  %v12520_v51 = vld [vmem:[%s14189_s26 + $0xb0] sm:$0xff]  ;;  %v12519_v55 = vld [vmem:[%s14189_s26 + $0xa8] sm:$0xff]  ;;  %vm948_vm2 = vsmask.f32 4352 }
  0x43   : > { %v12529_v48 = vld [vmem:[%s14189_s26 + $0xf8] sm:$0xff]  ;;  %1061 = vmatpush.bf16.msra.mxu2 %v12521_v47  ;;  %v12528_v52 = vld [vmem:[%s14189_s26 + $0xf0] sm:$0xff]  ;;  %s433_s14 = ssub.s32 0, %s432_s13  ;;  %v12527_v56 = vld [vmem:[%s14189_s26 + $0xe8] sm:$0xff]  ;;  %vm1745_vm3 = vsmask.f32 7424 }
  0x44   : > { %1396 = vmatpush.bf16.msra.mxu3 %v12529_v48  ;;  %s17354_s14 = smov (!%p429_p6, %s433_s14), %s432_s13  ;;  %v12510_v57 = vld [vmem:[%s14189_s26 + $0x60] sm:$0xff]  ;;  %v12509_v61 = vld [vmem:[%s14189_s26 + $0x58] sm:$0xff]  ;;  %v12508_v16 = vld [vmem:[%s14189_s26 + $0x50] sm:$0xff]  ;;  %vm2507_vm5 = vsmask.f32 6400  ;;  %p10877_p8 = scmp.ge.s32.totalorder %s14122_s15, 4 }
  0x45   : > { %641 = vmatpush.bf16.msra.mxu0 %v12512_v49  ;;  %p10343_p7 = scmp.lt.s32.totalorder %s17354_s14, 0  ;;  %s439_s19 = sadd.s32 2, %s17354_s14  ;;  %v12502_v58 = vld [vmem:[%s14189_s26 + $0x20] sm:$0xff]  ;;  %v12501_v62 = vld [vmem:[%s14189_s26 + $0x18] sm:$0xff]  ;;  %v12500_v17 = vld [vmem:[%s14189_s26 + $0x10] sm:$0xff] }
  0x46   : > { %865 = vmatpush.bf16.msra.mxu1 %v12504_v50  ;;  %v12518_v59 = vld [vmem:[%s14189_s26 + $0xa0] sm:$0xff]  ;;  %v12517_v63 = vld [vmem:[%s14189_s26 + $0x98] sm:$0xff]  ;;  %v12516_v19 = vld [vmem:[%s14189_s26 + $0x90] sm:$0xff]  ;;  %s443_s27 = scalar_select %p231_p4, 0.0, -inf }
  0x47   : > { %1062 = vmatpush.bf16.msra.mxu2 %v12520_v51  ;;  %s17356_s19 = smov (!%p10343_p7, %s439_s19), %s17354_s14  ;;  %v12526_v60 = vld [vmem:[%s14189_s26 + $0xe0] sm:$0xff]  ;;  %v12525_v0 = vld [vmem:[%s14189_s26 + $0xd8] sm:$0xff]  ;;  %v12524_v20 = vld [vmem:[%s14189_s26 + $0xd0] sm:$0xff] }
  0x48   : > { %1397 = vmatpush.bf16.msra.mxu3 %v12528_v52  ;;  %s441_s20 = ssub.s32 1, %s17356_s19  ;;  %v12507_v31 = vld [vmem:[%s14189_s26 + $0x48] sm:$0xff]  ;;  %v12506_v47 = vld [vmem:[%s14189_s26 + $0x40] sm:$0xff]  ;;  %s12590_s30 = smul.u32 (!%p10877_p8), 360, %s17356_s19 }
  0x49   : > { %642 = vmatpush.bf16.msra.mxu0 %v12511_v53  ;;  %s12488_s21 = smul.u32 360, %s441_s20  ;;  %v12499_v32 = vld [vmem:[%s14189_s26 + $0x8] sm:$0xff]  ;;  %v12498_v48 = vld [vmem:[%s14189_s26] sm:$0xff] }
  0x4a   : > { %866 = vmatpush.bf16.msra.mxu1 %v12503_v54  ;;  %v12515_v37 = vld [vmem:[%s14189_s26 + $0x88] sm:$0xff]  ;;  %v12514_v53 = vld [vmem:[%s14189_s26 + $0x80] sm:$0xff]  ;;  %s2861_s5 = scalar_lea.vmem (!%p10877_p8), [#allocation2], %s12590_s30 }
  0x4b   : > { %1063 = vmatpush.bf16.msra.mxu2 %v12519_v55  ;;  %s14355_s22 = scalar_lea.vmem [#allocation2], %s12488_s21  ;;  %v12523_v38 = vld [vmem:[%s14189_s26 + $0xc8] sm:$0xff]  ;;  %v12522_v54 = vld [vmem:[%s14189_s26 + $0xc0] sm:$0xff] }
  0x4c   : > { %1398 = vmatpush.bf16.msra.mxu3 %v12527_v56  ;;  %v449_v1 = vld [vmem:[%s14355_s22 + $0x4] sm:$0xf]  ;;  %v14359_v2 = vld [vmem:[%s14355_s22 + $0x8] sm:$0xff]  ;;  %v486_v3 = vld [vmem:[%s14355_s22] sm:$0x8] }
  0x4d   : > { %643 = vmatpush.bf16.msra.mxu0 %v12510_v57  ;;  %v526_v4 = vunpack.c.l.b16 %v486_v3  ;;  %v527_v5 = vunpack.c.l.b16 %v449_v1  ;;  %v448_v6 = vld [vmem:[%s14355_s22] sm:$0xc]  ;;  %v1145_v7 = vld [vmem:[%s14355_s22 + $0x8] sm:$0x8]  ;;  %v14365_v8 = vld [vmem:[%s14355_s22 + $0xc] sm:$0xf] }
  0x4e   : > { %867 = vmatpush.bf16.msra.mxu1 %v12502_v58  ;;  %v704_v9 = vunpack.c.l.b16 %v448_v6  ;;  %v716_v10 = vshrl.u32 %v14359_v2, 16  ;;  %v14369_v11 = vld [vmem:[%s14355_s22 + $0x10] sm:$0xff]   ;;  %v719_v13 = vshll.u32 %v14359_v2, 16  ;;  %v1206_v14 = vunpack.c.l.b16 %v1145_v7  ;;  %v12537_v58 = vld [vmem:[%s14189_s26 + $0x138] sm:$0xff]  ;;  %v12535_v6 = vld [vmem:[%s14189_s26 + $0x128] sm:$0xff] }
  0x4f   : > { %1064 = vmatpush.bf16.msra.mxu2 %v12518_v59  ;;  %v14371_v12 = vpack.c.b16 %v527_v5, %v526_v4  ;;  %v1207_v15 = vunpack.c.l.b16 %v14365_v8  ;;  %v1248_v23 = vshrl.u32 %v14369_v11, 16  ;;  %v1251_v42 = vshll.u32 %v14369_v11, 16  ;;  %v12536_v1 = vld [vmem:[%s14189_s26 + $0x130] sm:$0xff] }
  0x50   : > { %1399 = vmatpush.bf16.msra.mxu3 %v12526_v60  ;;  %v705_v18 = vpack.c.b16 %v527_v5, %v704_v9  ;;  %v718_v27 = vrot.slane %v716_v10, 2  ;;  %v721_v28 = vrot.slane %v719_v13, 3  ;;  %v957_v29 = vrot.slane %v716_v10, 3 }
  0x51   : > { %644 = vmatpush.bf16.msra.mxu0 %v12509_v61  ;;  %v950_v21 = vshrl.u32 %v14371_v12, 16  ;;  %v953_v22 = vshll.u32 %v14371_v12, 16  ;;  %v1228_v26 = vpack.c.b16 %v1207_v15, %v1206_v14  ;;  %v958_v30 = vrot.slane %v719_v13, 4  ;;  %v12490_v61 = vld [vmem:[%s14355_s22 + $0x10] sm:$0xff] }
  0x52   : > { %868 = vmatpush.bf16.msra.mxu1 %v12501_v62  ;;  %v708_v24 = vshrl.u32 %v705_v18, 16  ;;  %v711_v25 = vshll.u32 %v705_v18, 16  ;;  %v1250_v41 = vrot.slane %v1248_v23, 3  ;;  %v561_v45 = vrot.slane %v14359_v2, 3 }
  0x53   : > { %1065 = vmatpush.bf16.msra.mxu2 %v12517_v63  ;;  %v1240_v35 = vshrl.u32 %v1228_v26, 16  ;;  %v1243_v36 = vshll.u32 %v1228_v26, 16  ;;  %v952_v39 = vrot.slane %v950_v21, 3  ;;  %v955_v40 = vrot.slane %v953_v22, 4  ;;  %v12491_v22 = vld [vmem:[%s14355_s22 + $0x18] sm:$0xff] }
  0x54   : > { %1400 = vmatpush.bf16.msra.mxu3 %v12525_v0  ;;  %v710_v33 = vrot.slane %v708_v24, 2  ;;  %v713_v34 = vrot.slane %v711_v25, 3  ;;  %v1253_v46 = vrot.slane %v1251_v42, 4  ;;  %v560_v49 = vrot.slane %v14371_v12, 3  ;;  %v13626_v0 = vld [vmem:[%s14355_s22 + $0x18] sm:$0xff]   ;;  %v13627_v25 = vld [vmem:[%s14355_s22 + $0x20] sm:$0xff]  }
  0x55   : > { %645 = vmatpush.bf16.msra.mxu0 %v12508_v16  ;;  %v1242_v43 = vrot.slane %v1240_v35, 3  ;;  %v1245_v44 = vrot.slane %v1243_v36, 4  ;;  %v722_v51 = vor.u32 %v721_v28, %v718_v27  ;;  %v959_v52 = vor.u32 %v958_v30, %v957_v29  ;;  %v12492_v42 = vld [vmem:[%s14355_s22 + $0x20] sm:$0xff] }
  0x56   : > { %869 = vmatpush.bf16.msra.mxu1 %v12500_v17  ;;  %v714_v50 = vor.u32 %v713_v34, %v710_v33  ;;  %v956_v55 = vor.u32 %v955_v40, %v952_v39  ;;  %v1254_v57 = vor.u32 %v1253_v46, %v1250_v41  ;;  %v562_v59 = vsel %vm559_vm0, %v560_v49, %v561_v45 }
  0x57   : > { %1066 = vmatpush.bf16.msra.mxu2 %v12516_v19  ;;  %v1246_v56 = vor.u32 %v1245_v44, %v1242_v43  ;;  %v725_v2 = vshrl.u32 %v12490_v61, 16  ;;  %v728_v3 = vshll.u32 %v12490_v61, 16  ;;  %v1257_v4 = vshrl.u32 %v13626_v0, 16 }
  0x58   : > { %1401 = vmatpush.bf16.msra.mxu3 %v12524_v20  ;;  %v723_v60 = vsel %vm706_vm1, %v714_v50, %v722_v51  ;;  %v960_v62 = vsel %vm948_vm2, %v956_v55, %v959_v52  ;;  %v1260_v5 = vshll.u32 %v13626_v0, 16  ;;  %v563_v16 = vrot.slane %v12490_v61, 3 }
  0x59   : > { %646 = vmatpush.bf16.msra.mxu0 %v12507_v31  ;;  %v1255_v63 = vsel %vm948_vm2, %v1246_v56, %v1254_v57  ;;  %v727_v7 = vrot.slane %v725_v2, 2  ;;  %v730_v9 = vrot.slane %v728_v3, 3  ;;  %v961_v10 = vrot.slane %v725_v2, 3  ;;  %v13629_v2 = vld [vmem:[%s14355_s22 + $0x30] sm:$0xff]  }
  0x5a   : > { %870 = vmatpush.bf16.msra.mxu1 %v12499_v32  ;;  %v962_v12 = vrot.slane %v728_v3, 4  ;;  %v1259_v13 = vrot.slane %v1257_v4, 3  ;;  %v1262_v14 = vrot.slane %v1260_v5, 4  ;;  %v564_v20 = vsel %vm559_vm0, %v561_v45, %v563_v16  ;;  %v13628_v45 = vld [vmem:[%s14355_s22 + $0x28] sm:$0xff]   ;;  %v12533_v5 = vld [vmem:[%s14189_s26 + $0x118] sm:$0xff] }
  0x5b   : > { %1067 = vmatpush.bf16.msra.mxu2 %v12515_v37  ;;  %v731_v17 = vor.u32 %v730_v9, %v727_v7  ;;  %v734_v26 = vshrl.u32 %v12491_v22, 16  ;;  %v737_v27 = vshll.u32 %v12491_v22, 16  ;;  %v1266_v28 = vshrl.u32 %v13627_v25, 16 }
  0x5c   : > { %1402 = vmatpush.bf16.msra.mxu3 %v12523_v38  ;;  %v963_v18 = vor.u32 %v962_v12, %v961_v10  ;;  %v1263_v19 = vor.u32 %v1262_v14, %v1259_v13  ;;  %v1269_v29 = vshll.u32 %v13627_v25, 16  ;;  %v565_v36 = vrot.slane %v12491_v22, 3 }
  0x5d   : > { %647 = vmatpush.bf16.msra.mxu0 %v12506_v47  ;;  %v732_v21 = vsel %vm706_vm1, %v722_v51, %v731_v17  ;;  %v736_v30 = vrot.slane %v734_v26, 2  ;;  %v739_v31 = vrot.slane %v737_v27, 3  ;;  %v965_v32 = vrot.slane %v734_v26, 3  ;;  %v13630_v26 = vld [vmem:[%s14355_s22 + $0x38] sm:$0xff]  }
  0x5e   : > { %871 = vmatpush.bf16.msra.mxu1 %v12498_v48  ;;  %v964_v23 = vsel %vm948_vm2, %v959_v52, %v963_v18  ;;  %v1264_v24 = vsel %vm948_vm2, %v1254_v57, %v1263_v19  ;;  %v966_v33 = vrot.slane %v737_v27, 4  ;;  %v1268_v34 = vrot.slane %v1266_v28, 3  ;;  %v12534_v48 = vld [vmem:[%s14189_s26 + $0x120] sm:$0xff] }
  0x5f   : > { %1068 = vmatpush.bf16.msra.mxu2 %v12514_v53  ;;  %v1271_v35 = vrot.slane %v1269_v29, 4  ;;  %v740_v37 = vor.u32 %v739_v31, %v736_v30  ;;  %v566_v40 = vsel %vm559_vm0, %v563_v16, %v565_v36  ;;  %v743_v46 = vshrl.u32 %v12492_v42, 16  ;;  %v12532_v29 = vld [vmem:[%s14189_s26 + $0x110] sm:$0xff] }
  0x60   : > { %1403 = vmatpush.bf16.msra.mxu3 %v12522_v54  ;;  %648 = vmatmul.bf16.vlgmr.msra.gmra.mxu0 %v562_v59  ;;  %v967_v38 = vor.u32 %v966_v33, %v965_v32  ;;  %v746_v47 = vshll.u32 %v12492_v42, 16  ;;  %v1275_v49 = vshrl.u32 %v13628_v45, 16  ;;  %v1278_v50 = vshll.u32 %v13628_v45, 16 }
  0x61   : > { %1567 = vmatpush.bf16.msrb.mxu0 %v12537_v58  ;;  %872 = vmatmul.bf16.vlgmr.msra.gmra.mxu1 %v723_v60  ;;  %v1272_v39 = vor.u32 %v1271_v35, %v1268_v34  ;;  %v741_v41 = vsel %vm706_vm1, %v731_v17, %v740_v37  ;;  %v745_v51 = vrot.slane %v743_v46, 2  ;;  %v969_v53 = vrot.slane %v743_v46, 3 }
  0x62   : > { %1069 = vmatmul.bf16.vlgmr.msra.gmra.mxu2 %v960_v62  ;;  %v968_v43 = vsel %vm948_vm2, %v963_v18, %v967_v38  ;;  %v748_v52 = vrot.slane %v746_v47, 3  ;;  %v970_v54 = vrot.slane %v746_v47, 4  ;;  %v1277_v55 = vrot.slane %v1275_v49, 3  ;;  %v13631_v47 = vld [vmem:[%s14355_s22 + $0x40] sm:$0xff]  }
  0x63   : > { %1404 = vmatmul.bf16.vlgmr.msra.gmra.mxu3 %v1255_v63  ;;  %v1273_v44 = vsel %vm948_vm2, %v1263_v19, %v1272_v39  ;;  %v1280_v56 = vrot.slane %v1278_v50, 4  ;;  %v567_v57 = vrot.slane %v12492_v42, 3  ;;  %v12493_v63 = vld [vmem:[%s14355_s22 + $0x28] sm:$0xff]  ;;  %v1287_v7 = vshll.u32 %v13629_v2, 16 }
  0x64   : > { %v749_v58 = vor.u32 %v748_v52, %v745_v51  ;;  %v971_v59 = vor.u32 %v970_v54, %v969_v53  ;;  %v752_v3 = vshrl.u32 %v12493_v63, 16  ;;  %v755_v4 = vshll.u32 %v12493_v63, 16 }
  0x65   : > { %1568 = vmatpush.bf16.msrb.mxu0 %v12536_v1  ;;  %v1281_v60 = vor.u32 %v1280_v56, %v1277_v55  ;;  %v568_v61 = vsel %vm559_vm0, %v565_v36, %v567_v57  ;;  %v1289_v16 = vrot.slane %v1287_v7, 4  ;;  %v569_v17 = vrot.slane %v12493_v63, 3 }
  0x66   : > { %v750_v62 = vsel %vm706_vm1, %v740_v37, %v749_v58  ;;  %v972_v0 = vsel %vm948_vm2, %v967_v38, %v971_v59  ;;  %v754_v9 = vrot.slane %v752_v3, 2  ;;  %v757_v10 = vrot.slane %v755_v4, 3 }
  0x67   : > { %v1282_v1 = vsel %vm948_vm2, %v1272_v39, %v1281_v60  ;;  %v973_v12 = vrot.slane %v752_v3, 3  ;;  %v974_v13 = vrot.slane %v755_v4, 4  ;;  %v1293_v30 = vshrl.u32 %v13630_v26, 16  ;;  %v13632_v3 = vld [vmem:[%s14355_s22 + $0x48] sm:$0xff]  }
  0x68   : > { %v758_v18 = vor.u32 %v757_v10, %v754_v9  ;;  %v1296_v31 = vshll.u32 %v13630_v26, 16  ;;  %v1302_v50 = vshrl.u32 %v13631_v47, 16  ;;  %v1305_v51 = vshll.u32 %v13631_v47, 16  ;;  %v12571_v47 = vld [vmem:[%s14189_s26 + $0x1a8] sm:$0xff] }
  0x69   : > { %1569 = vmatpush.bf16.msrb.mxu0 %v12535_v6  ;;  %v1284_v6 = vshrl.u32 %v13629_v2, 16  ;;  %v975_v19 = vor.u32 %v974_v13, %v973_v12  ;;  %v1295_v36 = vrot.slane %v1293_v30, 3  ;;  %v1314_v7 = vshll.u32 %v13632_v3, 16  ;;  %v12531_v12 = vld [vmem:[%s14189_s26 + $0x108] sm:$0xff] }
  0x6a   : > { %v759_v22 = vsel %vm706_vm1, %v749_v58, %v758_v18  ;;  %v1298_v37 = vrot.slane %v1296_v31, 4  ;;  %v1304_v56 = vrot.slane %v1302_v50, 3 }
  0x6b   : > { %v1286_v14 = vrot.slane %v1284_v6, 3  ;;  %v1311_v6 = vshrl.u32 %v13632_v3, 16  ;;  %v12569_v3 = vld [vmem:[%s14189_s26 + $0x198] sm:$0xff] }
  0x6d   : > { %1570 = vmatpush.bf16.msrb.mxu0 %v12534_v48 }
  0x70   : > { %653 = vmatmul.bf16.gmra.mxu0 %v564_v20  ;;  %v1290_v20 = vor.u32 %v1289_v16, %v1286_v14  ;;  %v1313_v16 = vrot.slane %v1311_v6, 3 }
  0x71   : > { %877 = vmatmul.bf16.gmra.mxu1 %v732_v21  ;;  %1571 = vmatpush.bf16.msrb.mxu0 %v12533_v5  ;;  %v570_v21 = vsel %vm559_vm0, %v567_v57, %v569_v17  ;;  %v1307_v57 = vrot.slane %v1305_v51, 4 }
  0x72   : > { %1074 = vmatmul.bf16.gmra.mxu2 %v964_v23  ;;  %v12494_v23 = vld [vmem:[%s14355_s22 + $0x30] sm:$0xff]  ;;  %v1291_v25 = vsel %vm948_vm2, %v1281_v60, %v1290_v20 }
  0x73   : > { %1409 = vmatmul.bf16.gmra.mxu3 %v1264_v24  ;;  %v976_v24 = vsel %vm948_vm2, %v971_v59, %v975_v19  ;;  %v761_v27 = vshrl.u32 %v12494_v23, 16  ;;  %v764_v28 = vshll.u32 %v12494_v23, 16  ;;  %v571_v38 = vrot.slane %v12494_v23, 3 }
  0x75   : > { %1572 = vmatpush.bf16.msrb.mxu0 %v12532_v29  ;;  %v763_v32 = vrot.slane %v761_v27, 2  ;;  %v766_v33 = vrot.slane %v764_v28, 3  ;;  %v977_v34 = vrot.slane %v761_v27, 3  ;;  %v978_v35 = vrot.slane %v764_v28, 4  ;;  %v13633_v27 = vld [vmem:[%s14355_s22 + $0x50] sm:$0xff]   ;;  %v12573_v28 = vld [vmem:[%s14189_s26 + $0x1b8] sm:$0xff] }
  0x76   : > { %v572_v42 = vsel %vm559_vm0, %v569_v17, %v571_v38  ;;  %v1316_v17 = vrot.slane %v1314_v7, 4  ;;  %v1320_v31 = vshrl.u32 %v13633_v27, 16  ;;  %2216 = vmatpush.bf16.msrb.mxu2 %v12573_v28 }
  0x77   : > { %v767_v39 = vor.u32 %v766_v33, %v763_v32  ;;  %v1323_v32 = vshll.u32 %v13633_v27, 16  ;;  %v12556_v33 = vld [vmem:[%s14189_s26 + $0x178] sm:$0xff] }
  0x78   : > { %1892 = vmatpush.bf16.msrb.mxu1 %v12556_v33 }
  0x79   : > { %1573 = vmatpush.bf16.msrb.mxu0 %v12531_v12  ;;  %v12552_v12 = vld [vmem:[%s14189_s26 + $0x158] sm:$0xff] }
  0x80   : > { %658 = vmatmul.bf16.gmra.mxu0 %v566_v40  ;;  %v979_v40 = vor.u32 %v978_v35, %v977_v34  ;;  %v12581_v34 = vld [vmem:[%s14189_s26 + $0x1f8] sm:$0xff]  ;;  %v12572_v35 = vld [vmem:[%s14189_s26 + $0x1b0] sm:$0xff] }
  0x81   : > { %882 = vmatmul.bf16.gmra.mxu1 %v741_v41  ;;  %v1299_v41 = vor.u32 %v1298_v37, %v1295_v36  ;;  %2402 = vmatpush.bf16.msrb.mxu3 %v12581_v34 }
  0x82   : > { %1079 = vmatmul.bf16.gmra.mxu2 %v968_v43  ;;  %v768_v43 = vsel %vm706_vm1, %v758_v18, %v767_v39  ;;  %v980_v45 = vsel %vm948_vm2, %v975_v19, %v979_v40 }
  0x83   : > { %1414 = vmatmul.bf16.gmra.mxu3 %v1273_v44  ;;  %v12495_v44 = vld [vmem:[%s14355_s22 + $0x38] sm:$0xff]  ;;  %v1300_v46 = vsel %vm948_vm2, %v1290_v20, %v1299_v41  ;;  %2217 = vmatpush.bf16.msrb.mxu2 %v12572_v35 }
  0x84   : > { %v770_v48 = vshrl.u32 %v12495_v44, 16  ;;  %v773_v49 = vshll.u32 %v12495_v44, 16  ;;  %v573_v58 = vrot.slane %v12495_v44, 3  ;;  %v14117_v44 = vld [vmem:[%s14355_s22 + $0x50] sm:$0x70] }
  0x86   : > { %v772_v52 = vrot.slane %v770_v48, 2  ;;  %v775_v53 = vrot.slane %v773_v49, 3  ;;  %v981_v54 = vrot.slane %v770_v48, 3  ;;  %v982_v55 = vrot.slane %v773_v49, 4  ;;  %v12530_v48 = vld [vmem:[%s14189_s26 + $0x100] sm:$0xff] }
  0x87   : > { %1574 = vmatpush.bf16.msrb.mxu0 %v12530_v48  ;;  %2218 = vmatpush.bf16.msrb.mxu2 %v12571_v47 }
  0x88   : > { %v776_v59 = vor.u32 %v775_v53, %v772_v52  ;;  %v983_v60 = vor.u32 %v982_v55, %v981_v54  ;;  %v12554_v53 = vld [vmem:[%s14189_s26 + $0x168] sm:$0xff]  ;;  %v12570_v55 = vld [vmem:[%s14189_s26 + $0x1a0] sm:$0xff] }
  0x89   : > { %v12579_v54 = vld [vmem:[%s14189_s26 + $0x1e8] sm:$0xff] }
  0x8a   : > { %v777_v63 = vsel %vm706_vm1, %v767_v39, %v776_v59 }
  0x8b   : > { %2219 = vmatpush.bf16.msrb.mxu2 %v12570_v55  ;;  %v12574_v55 = vld [vmem:[%s14189_s26 + $0x1c0] sm:$0xff] }
  0x8f   : > { %2220 = vmatpush.bf16.msrb.mxu2 %v12569_v3 }
  0x90   : > { %663 = vmatmul.bf16.gmra.mxu0 %v568_v61  ;;  %v1308_v61 = vor.u32 %v1307_v57, %v1304_v56 }
  0x91   : > { %887 = vmatmul.bf16.gmra.mxu1 %v750_v62  ;;  %v574_v62 = vsel %vm559_vm0, %v571_v38, %v573_v58 }
  0x92   : > { %1084 = vmatmul.bf16.gmra.mxu2 %v972_v0  ;;  %v14440_v0 = vld [vmem:[%s14355_s22 + $0x40] sm:$0xff]  ;;  %v1309_v2 = vsel %vm948_vm2, %v1299_v41, %v1308_v61  ;;  %v14106_v41 = vld [vmem:[%s14355_s22 + $0x50] sm:$0xf]  }
  0x93   : > { %1419 = vmatmul.bf16.gmra.mxu3 %v1282_v1  ;;  %v984_v1 = vsel %vm948_vm2, %v979_v40, %v983_v60  ;;  %v779_v4 = vshrl.u32 %v14440_v0, 16  ;;  %v782_v5 = vshll.u32 %v14440_v0, 16  ;;  %v575_v18 = vrot.slane %v14440_v0, 3  ;;  %v468_v40 = vld [vmem:[%s14355_s22 + $0x50] sm:$0xff]   ;;  %v12553_v0 = vld [vmem:[%s14189_s26 + $0x160] sm:$0xff] }
  0x94   : > { %v994_v6 = vshrl.u32 %v468_v40, 16  ;;  %v997_v7 = vshll.u32 %v468_v40, 16 }
  0x95   : > { %v781_v9 = vrot.slane %v779_v4, 2  ;;  %v784_v10 = vrot.slane %v782_v5, 3  ;;  %v985_v13 = vrot.slane %v779_v4, 3  ;;  %v986_v14 = vrot.slane %v782_v5, 4 }
  0x97   : > { %v785_v19 = vor.u32 %v784_v10, %v781_v9  ;;  %v987_v20 = vor.u32 %v986_v14, %v985_v13  ;;  %v12577_v13 = vld [vmem:[%s14189_s26 + $0x1d8] sm:$0xff] }
  0x99   : > { %v786_v23 = vsel %vm706_vm1, %v776_v59, %v785_v19 }
  0xa0   : > { %668 = vmatmul.bf16.gmra.mxu0 %v570_v21  ;;  %v1317_v21 = vor.u32 %v1316_v17, %v1313_v16  ;;  %v12568_v17 = vld [vmem:[%s14189_s26 + $0x190] sm:$0xff] }
  0xa1   : > { %892 = vmatmul.bf16.gmra.mxu1 %v759_v22  ;;  %v576_v22 = vsel %vm559_vm0, %v573_v58, %v575_v18  ;;  %2221 = vmatpush.bf16.msrb.mxu2 %v12568_v17 }
  0xa2   : > { %1089 = vmatmul.bf16.gmra.mxu2 %v976_v24  ;;  %v14452_v24 = vld [vmem:[%s14355_s22 + $0x48] sm:$0xff]  ;;  %v1318_v26 = vsel %vm948_vm2, %v1308_v61, %v1317_v21 }
  0xa3   : > { %1424 = vmatmul.bf16.gmra.mxu3 %v1291_v25  ;;  %v988_v25 = vsel %vm948_vm2, %v983_v60, %v987_v20  ;;  %v788_v29 = vshrl.u32 %v14452_v24, 16  ;;  %v791_v30 = vshll.u32 %v14452_v24, 16  ;;  %v577_v49 = vrot.slane %v14452_v24, 3  ;;  %v12589_v24 = vld [vmem:[%s14189_s26 + $0x238] sm:$0xff] }
  0xa4   : > { %v14485_v60 = vor.u32 %v14117_v44, %v14106_v41  ;;  %v12566_v41 = vld [vmem:[%s14189_s26 + $0x180] sm:$0xff]  ;;  %2620 = vmatpush.bf16.msra.mxu0 %v12589_v24 }
  0xa5   : > { %v790_v36 = vrot.slane %v788_v29, 2  ;;  %v793_v37 = vrot.slane %v791_v30, 3  ;;  %v989_v38 = vrot.slane %v788_v29, 3  ;;  %v990_v39 = vrot.slane %v791_v30, 4  ;;  %v12551_v29 = vld [vmem:[%s14189_s26 + $0x150] sm:$0xff] }
  0xa6   : > { %v578_v58 = vsel %vm559_vm0, %v575_v18, %v577_v49  ;;  %v797_v4 = vshrl.u32 %v14485_v60, 16  ;;  %v800_v5 = vshll.u32 %v14485_v60, 16  ;;  %v12576_v30 = vld [vmem:[%s14189_s26 + $0x1d0] sm:$0xff]  ;;  %v579_v33 = vrot.slane %v14485_v60, 3 }
  0xa7   : > { %v14471_v50 = vor.u32 %v793_v37, %v790_v36  ;;  %v14473_v51 = vor.u32 %v990_v39, %v989_v38  ;;  %v12550_v37 = vld [vmem:[%s14189_s26 + $0x148] sm:$0xff]  ;;  %v1976_v60 = vld [vmem:[%s14355_s22 + $0x14] sm:$0xff]  }
  0xa8   : > { %v12575_v38 = vld [vmem:[%s14189_s26 + $0x1c8] sm:$0xff]  ;;  %v2071_v17 = vshrl.u32 %v1976_v60, 16 }
  0xa9   : > { %v795_v59 = vsel %vm706_vm1, %v785_v19, %v14471_v50 }
  0xb0   : > { %673 = vmatmul.bf16.gmra.mxu0 %v572_v42  ;;  %v1322_v42 = vrot.slane %v1320_v31, 3 }
  0xb1   : > { %897 = vmatmul.bf16.gmra.mxu1 %v768_v43  ;;  %v1325_v43 = vrot.slane %v1323_v32, 4  ;;  %v12567_v32 = vld [vmem:[%s14189_s26 + $0x188] sm:$0xff] }
  0xb2   : > { %1094 = vmatmul.bf16.gmra.mxu2 %v980_v45  ;;  %v12555_v45 = vld [vmem:[%s14189_s26 + $0x170] sm:$0xff] }
  0xb3   : > { %1429 = vmatmul.bf16.gmra.mxu3 %v1300_v46  ;;  %v12580_v46 = vld [vmem:[%s14189_s26 + $0x1f0] sm:$0xff]  ;;  %1893 = vmatpush.bf16.msrb.mxu1 %v12555_v45  ;;  %v14475_v52 = vor.u32 %v1325_v43, %v1322_v42  ;;  %v580_v45 = vsel %vm559_vm0, %v577_v49, %v579_v33 }
  0xb4   : > { %2403 = vmatpush.bf16.msrb.mxu3 %v12580_v46  ;;  %2222 = vmatpush.bf16.msrb.mxu2 %v12567_v32  ;;  %v12899_v32 = vunpack.c.l.b16 %v14369_v11 }
  0xb6   : > { %v1497_v11 = vpack.c.b16 %v12899_v32, %v1207_v15 }
  0xb7   : > { %1894 = vmatpush.bf16.msrb.mxu1 %v12554_v53 }
  0xb8   : > { %2404 = vmatpush.bf16.msrb.mxu3 %v12579_v54  ;;  %v12549_v54 = vld [vmem:[%s14189_s26 + $0x140] sm:$0xff]  ;;  %2223 = vmatpush.bf16.msrb.mxu2 %v12566_v41 }
  0xbb   : > { %1895 = vmatpush.bf16.msrb.mxu1 %v12553_v0 }
  0xbf   : > { %1896 = vmatpush.bf16.msrb.mxu1 %v12552_v12  ;;  %v14537_v12 = vld [vmem:[%s14355_s22 + $0x1c] sm:$0xff] }
  0xc0   : > { %678 = vmatmul.bf16.gmra.mxu0 %v574_v62  ;;  %v992_v62 = vsel %vm948_vm2, %v987_v20, %v14473_v51 }
  0xc1   : > { %902 = vmatmul.bf16.gmra.mxu1 %v777_v63  ;;  %v1327_v63 = vsel %vm948_vm2, %v1317_v21, %v14475_v52  ;;  %v799_v21 = vrot.slane %v797_v4, 2  ;;  %v12538_v4 = vld [vmem:[%s14355_s22 + $0xc] sm:$0xff] }
  0xc2   : > { %1099 = vmatmul.bf16.gmra.mxu2 %v984_v1  ;;  %v12578_v1 = vld [vmem:[%s14189_s26 + $0x1e0] sm:$0xff] }
  0xc3   : > { %1434 = vmatmul.bf16.gmra.mxu3 %v1309_v2  ;;  %v14494_v2 = vld [vmem:[%s14355_s22 + $0x58] sm:$0xff]   ;;  %1897 = vmatpush.bf16.msrb.mxu1 %v12551_v29 }
  0xc4   : > { %v1329_v9 = vshrl.u32 %v14494_v2, 16  ;;  %v1332_v10 = vshll.u32 %v14494_v2, 16  ;;  %2405 = vmatpush.bf16.msrb.mxu3 %v12578_v1 }
  0xc6   : > { %v1331_v27 = vrot.slane %v1329_v9, 3  ;;  %v1334_v28 = vrot.slane %v1332_v10, 4  ;;  %v12539_v9 = vld [vmem:[%s14355_s22 + $0x14] sm:$0xff]  ;;  %v1749_v10 = vshll.u32 %v12538_v4, 16 }
  0xc7   : > { %1898 = vmatpush.bf16.msrb.mxu1 %v12550_v37 }
  0xc8   : > { %2406 = vmatpush.bf16.msrb.mxu3 %v12577_v13  ;;  %v1335_v36 = vor.u32 %v1334_v28, %v1331_v27  ;;  %v2073_v13 = vshll.u32 %v1976_v60, 16  ;;  %v2078_v27 = vshll.u32 %v14537_v12, 16 }
  0xca   : > { %v1336_v53 = vsel %vm948_vm2, %v14475_v52, %v1335_v36 }
  0xcb   : > { %1899 = vmatpush.bf16.msrb.mxu1 %v12549_v54  ;;  %v14559_v54 = vld [vmem:[%s14355_s22 + $0x24] sm:$0xff] }
  0xcc   : > { %2407 = vmatpush.bf16.msrb.mxu3 %v12576_v30  ;;  %v12588_v30 = vld [vmem:[%s14189_s26 + $0x230] sm:$0xff] }
  0xcd   : > { %2621 = vmatpush.bf16.msra.mxu0 %v12588_v30 }
  0xd0   : > { %683 = vmatmul.bf16.gmra.mxu0 %v576_v22  ;;  %v802_v22 = vrot.slane %v800_v5, 3  ;;  %2408 = vmatpush.bf16.msrb.mxu3 %v12575_v38  ;;  %v2323_v38 = vrot.slane %v14537_v12, 1 }
  0xd1   : > { %907 = vmatmul.bf16.gmra.mxu1 %v786_v23  ;;  %v996_v23 = vrot.slane %v994_v6, 3 }
  0xd2   : > { %1104 = vmatmul.bf16.gmra.mxu2 %v988_v25  ;;  %v803_v34 = vor.u32 %v802_v22, %v799_v21  ;;  %v1747_v21 = vshrl.u32 %v12538_v4, 16  ;;  %v1751_v22 = vrot.slane %v1749_v10, 1 }
  0xd3   : > { %1439 = vmatmul.bf16.gmra.mxu3 %v1318_v26  ;;  %v999_v26 = vrot.slane %v997_v7, 4  ;;  %v14083_v7 = vld [vmem:[%s14355_s22 + $0x14] sm:$0xe] }
  0xd4   : > { %v804_v46 = vsel %vm706_vm1, %v14471_v50, %v803_v34  ;;  %2409 = vmatpush.bf16.msrb.mxu3 %v12574_v55 }
  0xd5   : > { %v1000_v35 = vor.u32 %v999_v26, %v996_v23  ;;  %v1754_v23 = vshll.u32 %v12539_v9, 16  ;;  %v2075_v26 = vrot.slane %v2073_v13, 1 }
  0xd7   : > { %v1001_v48 = vsel %vm948_vm2, %v14473_v51, %v1000_v35 }
  0xdd   : > { %v649_v56 = vpop.f32.mrf.mxu0 }
  0xde   : > { %v873_v57 = vpop.f32.mrf.mxu1 }
  0xdf   : > { %v874_v61 = vadd.f32 %v873_v57, %v649_v56 }
  0xe0   : > { %688 = vmatmul.bf16.gmra.mxu0 %v578_v58 }
  0xe1   : > { %912 = vmatmul.bf16.gmra.mxu1 %v795_v59 }
  0xe2   : > { %1109 = vmatmul.bf16.gmra.mxu2 %v992_v62 }
  0xe3   : > { %1444 = vmatmul.bf16.gmra.mxu3 %v1327_v63 }
  0xe5   : > { %v1070_v14 = vpop.f32.mrf.mxu2  ;;  %v651_v19 = vpop.f32.mrf.mxu0 }
  0xe6   : > { %v1405_v16 = vpop.f32.mrf.mxu3  ;;  %v1124_v18 = vadd.f32 %v1070_v14, %v874_v61  ;;  %v875_v20 = vpop.f32.mrf.mxu1  ;;  %v14082_v61 = vld [vmem:[%s14355_s22 + $0x14] sm:$0xf0] }
  0xe7   : > { %v876_v25 = vadd.f32 %v875_v20, %v651_v19  ;;  %v14540_v28 = vor.u32 %v14083_v7, %v14082_v61 }
  0xe8   : > { %v14506_v31 = vadd.f32 %v1405_v16, %v1124_v18 }
  0xe9   : > { %v2322_v37 = vrot.slane %v14540_v28, 1 }
  0xed   : > { %v1072_v39 = vpop.f32.mrf.mxu2  ;;  %v654_v43 = vpop.f32.mrf.mxu0 }
  0xee   : > { %v1407_v40 = vpop.f32.mrf.mxu3  ;;  %v1125_v42 = vadd.f32 %v1072_v39, %v876_v25  ;;  %v878_v44 = vpop.f32.mrf.mxu1 }
  0xef   : > { %v879_v47 = vadd.f32 %v878_v44, %v654_v43 }
  0xf0   : > { %v14524_v56 = vadd.f32 %v1407_v40, %v1125_v42  ;;  %693 = vmatmul.bf16.gmra.mxu0 %v580_v45 }
  0xf1   : > { %917 = vmatmul.bf16.gmra.mxu1 %v804_v46 }
  0xf2   : > { %1114 = vmatmul.bf16.gmra.mxu2 %v1001_v48 }
  0xf3   : > { %1449 = vmatmul.bf16.gmra.mxu3 %v1336_v53  ;;  %v12540_v53 = vld [vmem:[%s14355_s22 + $0x1c] sm:$0xff] }
  0xf4   : > { %v1766_v32 = vshrl.u32 %v12540_v53, 16 }
  0xf5   : > { %v1075_v49 = vpop.f32.mrf.mxu2  ;;  %v656_v52 = vpop.f32.mrf.mxu0 }
  0xf6   : > { %v1410_v50 = vpop.f32.mrf.mxu3  ;;  %v1126_v51 = vadd.f32 %v1075_v49, %v879_v47  ;;  %v880_v57 = vpop.f32.mrf.mxu1  ;;  %v2324_v47 = vsel %vm2321_vm4, %v2322_v37, %v2323_v38 }
  0xf7   : > { %v881_v58 = vadd.f32 %v880_v57, %v656_v52  ;;  %v2082_v57 = vshrl.u32 %v14537_v12, 16 }
  0xf8   : > { %v14527_v59 = vadd.f32 %v1410_v50, %v1126_v51  ;;  %v1758_v50 = vshrl.u32 %v12539_v9, 16  ;;  %v1762_v51 = vshll.u32 %v12540_v53, 16 }
  0xfd   : > { %v1077_v62 = vpop.f32.mrf.mxu2  ;;  %v659_v1 = vpop.f32.mrf.mxu0 }
  0xfe   : > { %v1412_v63 = vpop.f32.mrf.mxu3  ;;  %v1127_v0 = vadd.f32 %v1077_v62, %v881_v58  ;;  %v883_v3 = vpop.f32.mrf.mxu1  ;;  %v2086_v58 = vshll.u32 %v14559_v54, 16  ;;  %v1764_v62 = vrot.slane %v1762_v51, 1  ;;  %v14599_v51 = vld [vmem:[%s14355_s22 + $0x34] sm:$0xff] }
  0xff   : > { %v884_v5 = vadd.f32 %v883_v3, %v659_v1  ;;  %v2325_v1 = vrot.slane %v14559_v54, 1 }
 0x100   : > { %v14532_v6 = vadd.f32 %v1412_v63, %v1127_v0  ;;  %698 = vmatmul.bf16.gmra.mxu0 %v579_v33  ;;  %v1752_v33 = vor.u32 %v1751_v22, %v1747_v21  ;;  %v2088_v0 = vrot.slane %v2086_v58, 1  ;;  %v14579_v21 = vld [vmem:[%s14355_s22 + $0x2c] sm:$0xff] }
 0x101   : > { %922 = vmatmul.bf16.gmra.mxu1 %v803_v34  ;;  %v1756_v34 = vrot.slane %v1754_v23, 1 }
 0x102   : > { %1119 = vmatmul.bf16.gmra.mxu2 %v1000_v35  ;;  %v2076_v35 = vor.u32 %v2075_v26, %v2071_v17 }
 0x103   : > { %1454 = vmatmul.bf16.gmra.mxu3 %v1335_v36  ;;  %v2080_v36 = vrot.slane %v2078_v27, 1  ;;  %v1757_v44 = vsel %vm1745_vm3, %v1752_v33, %v1756_v34  ;;  %v1760_v61 = vor.u32 %v1758_v50, %v1756_v34  ;;  %v12586_v50 = vld [vmem:[%s14189_s26 + $0x220] sm:$0xff] }
 0x105   : > { %v1080_v14 = vpop.f32.mrf.mxu2  ;;  %v661_v19 = vpop.f32.mrf.mxu0  ;;  %v2081_v46 = vsel %vm1745_vm3, %v2076_v35, %v2080_v36  ;;  %v2084_v63 = vor.u32 %v2082_v57, %v2080_v36  ;;  %v1765_v13 = vsel %vm1745_vm3, %v1760_v61, %v1764_v62  ;;  %v2090_v35 = vshrl.u32 %v14559_v54, 16 }
 0x106   : > { %v1415_v16 = vpop.f32.mrf.mxu3  ;;  %v1128_v18 = vadd.f32 %v1080_v14, %v884_v5  ;;  %v885_v20 = vpop.f32.mrf.mxu1  ;;  %v13883_v5 = vld [vmem:[%s14355_s22 + $0x14] sm:$0xff]   ;;  %v12587_v14 = vld [vmem:[%s14189_s26 + $0x228] sm:$0xff]  ;;  %v2094_v36 = vshll.u32 %v14579_v21, 16 }
 0x107   : > { %v886_v25 = vadd.f32 %v885_v20, %v661_v19  ;;  %v2089_v17 = vsel %vm1745_vm3, %v2084_v63, %v2088_v0  ;;  %2622 = vmatpush.bf16.msra.mxu0 %v12587_v14  ;;  %v12541_v20 = vld [vmem:[%s14355_s22 + $0x24] sm:$0xff] }
 0x108   : > { %v14542_v29 = vadd.f32 %v1415_v16, %v1128_v18  ;;  %v2326_v18 = vsel %vm2321_vm4, %v2323_v38, %v2325_v1  ;;  %v1770_v33 = vshll.u32 %v12541_v20, 16  ;;  %v1768_v38 = vor.u32 %v1766_v32, %v1764_v62 }
 0x10b   : > { %2623 = vmatpush.bf16.msra.mxu0 %v12586_v50 }
 0x10d   : > { %v1082_v39 = vpop.f32.mrf.mxu2  ;;  %v664_v42 = vpop.f32.mrf.mxu0 }
 0x10e   : > { %v1417_v40 = vpop.f32.mrf.mxu3  ;;  %v1129_v41 = vadd.f32 %v1082_v39, %v886_v25  ;;  %v888_v43 = vpop.f32.mrf.mxu1  ;;  %v1772_v39 = vrot.slane %v1770_v33, 1 }
 0x10f   : > { %v889_v45 = vadd.f32 %v888_v43, %v664_v42 }
 0x110   : > { %v14555_v48 = vadd.f32 %v1417_v40, %v1129_v41  ;;  %1575 = vmatmul.bf16.vlgmr.msrb.gmra.mxu0 %v1497_v11  ;;  %v2092_v40 = vor.u32 %v2090_v35, %v2088_v0  ;;  %v2096_v11 = vrot.slane %v2094_v36, 1  ;;  %v2327_v41 = vrot.slane %v14579_v21, 1 }
 0x111   : > { %1900 = vmatmul.bf16.vlgmr.msrb.gmra.mxu1 %v1757_v44  ;;  %v13885_v44 = vld [vmem:[%s14355_s22 + $0x1c] sm:$0xff]   ;;  %v1773_v53 = vsel %vm1745_vm3, %v1768_v38, %v1772_v39 }
 0x112   : > { %2224 = vmatmul.bf16.vlgmr.msrb.gmra.mxu2 %v2081_v46 }
 0x113   : > { %2410 = vmatmul.bf16.vlgmr.msrb.gmra.mxu3 %v2324_v47 }
 0x115   : > { %v1085_v8 = vpop.f32.mrf.mxu2  ;;  %v666_v24 = vpop.f32.mrf.mxu0 }
 0x116   : > { %v1420_v15 = vpop.f32.mrf.mxu3  ;;  %v1130_v55 = vadd.f32 %v1085_v8, %v889_v45  ;;  %v890_v49 = vpop.f32.mrf.mxu1 }
 0x117   : > { %v891_v52 = vadd.f32 %v890_v49, %v666_v24  ;;  %v12542_v49 = vld [vmem:[%s14355_s22 + $0x2c] sm:$0xff] }
 0x118   : > { %v14563_v60 = vadd.f32 %v1420_v15, %v1130_v55  ;;  %v2097_v15 = vsel %vm1745_vm3, %v2092_v40, %v2096_v11  ;;  %v2328_v55 = vsel %vm2321_vm4, %v2325_v1, %v2327_v41  ;;  %v14618_v40 = vld [vmem:[%s14355_s22 + $0x3c] sm:$0xff] }
 0x11d   : > { %v1087_v3 = vpop.f32.mrf.mxu2  ;;  %v669_v9 = vpop.f32.mrf.mxu0 }
 0x11e   : > { %v1422_v4 = vpop.f32.mrf.mxu3  ;;  %v1131_v7 = vadd.f32 %v1087_v3, %v891_v52  ;;  %v893_v10 = vpop.f32.mrf.mxu1  ;;  %v1774_v3 = vshrl.u32 %v12541_v20, 16 }
 0x11f   : > { %v894_v16 = vadd.f32 %v893_v10, %v669_v9 }
 0x120   : > { %v14575_v19 = vadd.f32 %v1422_v4, %v1131_v7  ;;  %1580 = vmatmul.bf16.gmra.mxu0 %v13883_v5  ;;  %v1778_v4 = vshll.u32 %v12542_v49, 16  ;;  %v2098_v5 = vshrl.u32 %v14579_v21, 16  ;;  %v17258_v7 = vshll.u32 %v14599_v51, 16 }
 0x121   : > { %1905 = vmatmul.bf16.gmra.mxu1 %v1765_v13  ;;  %v1776_v10 = vor.u32 %v1774_v3, %v1772_v39  ;;  %v12543_v39 = vld [vmem:[%s14355_s22 + $0x34] sm:$0xff]  ;;  %v13889_v3 = vld [vmem:[%s14355_s22 + $0x2c] sm:$0xff]  }
 0x122   : > { %2229 = vmatmul.bf16.gmra.mxu2 %v2089_v17  ;;  %v1780_v13 = vrot.slane %v1778_v4, 1  ;;  %v2100_v14 = vor.u32 %v2098_v5, %v2096_v11  ;;  %v2329_v17 = vrot.slane %v14599_v51, 1 }
 0x123   : > { %2415 = vmatmul.bf16.gmra.mxu3 %v2326_v18 }
 0x125   : > { %v1090_v22 = vpop.f32.mrf.mxu2  ;;  %v671_v26 = vpop.f32.mrf.mxu0 }
 0x126   : > { %v1425_v23 = vpop.f32.mrf.mxu3  ;;  %v1132_v25 = vadd.f32 %v1090_v22, %v894_v16  ;;  %v895_v30 = vpop.f32.mrf.mxu1  ;;  %v2104_v16 = vrot.slane %v17258_v7, 1  ;;  %v13887_v22 = vld [vmem:[%s14355_s22 + $0x24] sm:$0xff]  }
 0x127   : > { %v896_v34 = vadd.f32 %v895_v30, %v671_v26  ;;  %v1781_v30 = vsel %vm1745_vm3, %v1776_v10, %v1780_v13 }
 0x128   : > { %v14583_v37 = vadd.f32 %v1425_v23, %v1132_v25  ;;  %v2105_v33 = vsel %vm1745_vm3, %v2100_v14, %v2104_v16 }
 0x12d   : > { %v1092_v42 = vpop.f32.mrf.mxu2  ;;  %v674_v46 = vpop.f32.mrf.mxu0 }
 0x12e   : > { %v1427_v43 = vpop.f32.mrf.mxu3  ;;  %v1133_v45 = vadd.f32 %v1092_v42, %v896_v34  ;;  %v898_v47 = vpop.f32.mrf.mxu1  ;;  %v2330_v34 = vsel %vm2321_vm4, %v2327_v41, %v2329_v17  ;;  %v2106_v41 = vshrl.u32 %v14599_v51, 16 }
 0x12f   : > { %v899_v8 = vadd.f32 %v898_v47, %v674_v46  ;;  %v1782_v46 = vshrl.u32 %v12542_v49, 16  ;;  %v1786_v47 = vshll.u32 %v12543_v39, 16  ;;  %v2331_v49 = vrot.slane %v14618_v40, 1 }
 0x130   : > { %v14594_v24 = vadd.f32 %v1427_v43, %v1133_v45  ;;  %1585 = vmatmul.bf16.gmra.mxu0 %v13885_v44 }
 0x131   : > { %1910 = vmatmul.bf16.gmra.mxu1 %v1773_v53  ;;  %v1784_v50 = vor.u32 %v1782_v46, %v1780_v13 }
 0x132   : > { %2234 = vmatmul.bf16.gmra.mxu2 %v2097_v15 }
 0x133   : > { %2420 = vmatmul.bf16.gmra.mxu3 %v2328_v55  ;;  %v12585_v55 = vld [vmem:[%s14189_s26 + $0x218] sm:$0xff] }
 0x134   : > { %2624 = vmatpush.bf16.msra.mxu0 %v12585_v55 }
 0x135   : > { %v1095_v52 = vpop.f32.mrf.mxu2  ;;  %v676_v63 = vpop.f32.mrf.mxu0 }
 0x136   : > { %v1430_v61 = vpop.f32.mrf.mxu3  ;;  %v1134_v62 = vadd.f32 %v1095_v52, %v899_v8  ;;  %v900_v0 = vpop.f32.mrf.mxu1  ;;  %v17256_v8 = vshll.u32 %v14618_v40, 16  ;;  %v1788_v52 = vrot.slane %v1786_v47, 1 }
 0x137   : > { %v901_v1 = vadd.f32 %v900_v0, %v676_v63 }
 0x138   : > { %v14603_v9 = vadd.f32 %v1430_v61, %v1134_v62  ;;  %v2108_v61 = vor.u32 %v2106_v41, %v2104_v16  ;;  %v2112_v62 = vrot.slane %v17256_v8, 1  ;;  %v1789_v13 = vsel %vm1745_vm3, %v1784_v50, %v1788_v52 }
 0x139   : > { %v2332_v16 = vsel %vm2321_vm4, %v2329_v17, %v2331_v49  ;;  %v17257_v17 = vshrl.u32 %v14618_v40, 16 }
 0x13b   : > { %v2116_v47 = vor.u32 %v17257_v17, %v2112_v62 }
 0x13d   : > { %v1097_v18 = vpop.f32.mrf.mxu2  ;;  %v679_v25 = vpop.f32.mrf.mxu0 }
 0x13e   : > { %v1432_v20 = vpop.f32.mrf.mxu3  ;;  %v1135_v23 = vadd.f32 %v1097_v18, %v901_v1  ;;  %v903_v26 = vpop.f32.mrf.mxu1  ;;  %v2113_v18 = vsel %vm1745_vm3, %v2108_v61, %v2112_v62  ;;  %v13891_v61 = vld [vmem:[%s14355_s22 + $0x34] sm:$0xff]  }
 0x13f   : > { %v904_v32 = vadd.f32 %v903_v26, %v679_v25 }
 0x140   : > { %v14614_v38 = vadd.f32 %v1432_v20, %v1135_v23  ;;  %1590 = vmatmul.bf16.gmra.mxu0 %v13887_v22  ;;  %v12544_v22 = vld [vmem:[%s14355_s22 + $0x3c] sm:$0xff]  ;;  %v14638_v23 = vld [vmem:[%s14355_s22 + $0x44] sm:$0xff] }
 0x141   : > { %1915 = vmatmul.bf16.gmra.mxu1 %v1781_v30  ;;  %v2333_v55 = vrot.slane %v14638_v23, 1 }
 0x142   : > { %2239 = vmatmul.bf16.gmra.mxu2 %v2105_v33 }
 0x143   : > { %2425 = vmatmul.bf16.gmra.mxu3 %v2330_v34  ;;  %v1790_v34 = vshrl.u32 %v12543_v39, 16  ;;  %v2334_v62 = vsel %vm2321_vm4, %v2331_v49, %v2333_v55 }
 0x145   : > { %v1100_v11 = vpop.f32.mrf.mxu2  ;;  %v681_v44 = vpop.f32.mrf.mxu0 }
 0x146   : > { %v1435_v42 = vpop.f32.mrf.mxu3  ;;  %v1136_v43 = vadd.f32 %v1100_v11, %v904_v32  ;;  %v905_v45 = vpop.f32.mrf.mxu1  ;;  %v1794_v11 = vshll.u32 %v12544_v22, 16 }
 0x147   : > { %v906_v53 = vadd.f32 %v905_v45, %v681_v44  ;;  %v1792_v45 = vor.u32 %v1790_v34, %v1788_v52 }
 0x148   : > { %v14622_v15 = vadd.f32 %v1435_v42, %v1136_v43  ;;  %v17252_v43 = vshll.u32 %v14638_v23, 16  ;;  %v1796_v46 = vrot.slane %v1794_v11, 1  ;;  %v17255_v11 = vshrl.u32 %v14638_v23, 16 }
 0x14a   : > { %v1797_v52 = vsel %vm1745_vm3, %v1792_v45, %v1796_v46 }
 0x14d   : > { %v1102_v63 = vpop.f32.mrf.mxu2  ;;  %v684_v1 = vpop.f32.mrf.mxu0 }
 0x14e   : > { %v1437_v0 = vpop.f32.mrf.mxu3  ;;  %v1137_v4 = vadd.f32 %v1102_v63, %v906_v53  ;;  %v908_v10 = vpop.f32.mrf.mxu1  ;;  %v2120_v53 = vrot.slane %v17252_v43, 1 }
 0x14f   : > { %v909_v14 = vadd.f32 %v908_v10, %v684_v1 }
 0x150   : > { %v14634_v20 = vadd.f32 %v1437_v0, %v1137_v4  ;;  %1595 = vmatmul.bf16.gmra.mxu0 %v13889_v3  ;;  %v2121_v1 = vsel %vm1745_vm3, %v2116_v47, %v2120_v53 }
 0x151   : > { %1920 = vmatmul.bf16.gmra.mxu1 %v1789_v13  ;;  %v12584_v13 = vld [vmem:[%s14189_s26 + $0x210] sm:$0xff] }
 0x152   : > { %2244 = vmatmul.bf16.gmra.mxu2 %v2113_v18  ;;  %v14658_v18 = vld [vmem:[%s14355_s22 + $0x4c] sm:$0xff]  ;;  %2625 = vmatpush.bf16.msra.mxu0 %v12584_v13 }
 0x153   : > { %2430 = vmatmul.bf16.gmra.mxu3 %v2332_v16 }
 0x155   : > { %v1105_v25 = vpop.f32.mrf.mxu2  ;;  %v686_v32 = vpop.f32.mrf.mxu0 }
 0x156   : > { %v1440_v26 = vpop.f32.mrf.mxu3  ;;  %v1138_v30 = vadd.f32 %v1105_v25, %v909_v14  ;;  %v910_v33 = vpop.f32.mrf.mxu1  ;;  %v12545_v14 = vld [vmem:[%s14355_s22 + $0x44] sm:$0xff] }
 0x157   : > { %v911_v42 = vadd.f32 %v910_v33, %v686_v32  ;;  %v1798_v33 = vshrl.u32 %v12544_v22, 16  ;;  %v1802_v34 = vshll.u32 %v12545_v14, 16 }
 0x158   : > { %v14642_v44 = vadd.f32 %v1440_v26, %v1138_v30 }
 0x159   : > { %v1800_v47 = vor.u32 %v1798_v33, %v1796_v46 }
 0x15d   : > { %v1107_v39 = vpop.f32.mrf.mxu2  ;;  %v689_v0 = vpop.f32.mrf.mxu0 }
 0x15e   : > { %v1442_v50 = vpop.f32.mrf.mxu3  ;;  %v1139_v63 = vadd.f32 %v1107_v39, %v911_v42  ;;  %v913_v3 = vpop.f32.mrf.mxu1  ;;  %v17250_v42 = vshll.u32 %v14658_v18, 16  ;;  %v1804_v39 = vrot.slane %v1802_v34, 1 }
 0x15f   : > { %v914_v4 = vadd.f32 %v913_v3, %v689_v0  ;;  %v13893_v3 = vld [vmem:[%s14355_s22 + $0x3c] sm:$0xff]  }
 0x160   : > { %v14653_v10 = vadd.f32 %v1442_v50, %v1139_v63  ;;  %1600 = vmatmul.bf16.gmra.mxu0 %v13891_v61  ;;  %v2124_v50 = vor.u32 %v17255_v11, %v2120_v53  ;;  %v2128_v61 = vrot.slane %v17250_v42, 1  ;;  %v2335_v63 = vrot.slane %v14658_v18, 1  ;;  %v12548_v11 = vld [vmem:[%s14355_s22 + $0x5c] sm:$0x10] }
 0x161   : > { %1925 = vmatmul.bf16.gmra.mxu1 %v1797_v52 }
 0x162   : > { %2249 = vmatmul.bf16.gmra.mxu2 %v2121_v1  ;;  %v2129_v13 = vsel %vm1745_vm3, %v2124_v50, %v2128_v61  ;;  %v2336_v53 = vsel %vm2321_vm4, %v2333_v55, %v2335_v63  ;;  %v17251_v55 = vshrl.u32 %v14658_v18, 16 }
 0x163   : > { %2435 = vmatmul.bf16.gmra.mxu3 %v2334_v62  ;;  %v1805_v62 = vsel %vm1745_vm3, %v1800_v47, %v1804_v39  ;;  %v1806_v47 = vshrl.u32 %v12545_v14, 16 }
 0x165   : > { %v1110_v16 = vpop.f32.mrf.mxu2  ;;  %v691_v30 = vpop.f32.mrf.mxu0 }
 0x166   : > { %v1445_v25 = vpop.f32.mrf.mxu3  ;;  %v1140_v26 = vadd.f32 %v1110_v16, %v914_v4  ;;  %v915_v32 = vpop.f32.mrf.mxu1 }
 0x167   : > { %v916_v49 = vadd.f32 %v915_v32, %v691_v30 }
 0x168   : > { %v14662_v45 = vadd.f32 %v1445_v25, %v1140_v26  ;;  %v12546_v25 = vld [vmem:[%s14355_s22 + $0x4c] sm:$0xff]  ;;  %v14677_v26 = vld [vmem:[%s14355_s22 + $0x54] sm:$0xff] }
 0x169   : > { %v1810_v50 = vshll.u32 %v12546_v25, 16  ;;  %v2337_v14 = vrot.slane %v14677_v26, 1 }
 0x16d   : > { %v1112_v22 = vpop.f32.mrf.mxu2  ;;  %v694_v4 = vpop.f32.mrf.mxu0 }
 0x16e   : > { %v1447_v0 = vpop.f32.mrf.mxu3  ;;  %v1141_v52 = vadd.f32 %v1112_v22, %v916_v49  ;;  %v918_v1 = vpop.f32.mrf.mxu1  ;;  %v12583_v22 = vld [vmem:[%s14189_s26 + $0x208] sm:$0xff] }
 0x16f   : > { %v919_v46 = vadd.f32 %v918_v1, %v694_v4  ;;  %2626 = vmatpush.bf16.msra.mxu0 %v12583_v22  ;;  %v1812_v1 = vrot.slane %v1810_v50, 1  ;;  %v14696_v22 = vld [vmem:[%s14355_s22 + $0x5c] sm:$0xff] }
 0x170   : > { %v14673_v16 = vadd.f32 %v1447_v0, %v1141_v52  ;;  %1605 = vmatmul.bf16.gmra.mxu0 %v13893_v3  ;;  %v17249_v0 = vshll.u32 %v14677_v26, 16  ;;  %v1808_v52 = vor.u32 %v1806_v47, %v1804_v39 }
 0x171   : > { %1930 = vmatmul.bf16.gmra.mxu1 %v1805_v62  ;;  %v2132_v62 = vor.u32 %v17251_v55, %v2128_v61  ;;  %v2338_v61 = vsel %vm2321_vm4, %v2335_v63, %v2337_v14  ;;  %v17254_v63 = vshll.u32 %v14696_v22, 16 }
 0x172   : > { %2254 = vmatmul.bf16.gmra.mxu2 %v2129_v13 }
 0x173   : > { %2440 = vmatmul.bf16.gmra.mxu3 %v2336_v53 }
 0x175   : > { %v1115_v30 = vpop.f32.mrf.mxu2  ;;  %v696_v34 = vpop.f32.mrf.mxu0 }
 0x176   : > { %v1450_v32 = vpop.f32.mrf.mxu3  ;;  %v1142_v33 = vadd.f32 %v1115_v30, %v919_v46  ;;  %v920_v49 = vpop.f32.mrf.mxu1  ;;  %v2136_v46 = vrot.slane %v17249_v0, 1  ;;  %v13895_v30 = vld [vmem:[%s14355_s22 + $0x44] sm:$0xff]   ;;  %v12547_v0 = vld [vmem:[%s14355_s22 + $0x54] sm:$0xff] }
 0x177   : > { %v921_v4 = vadd.f32 %v920_v49, %v696_v34 }
 0x178   : > { %v14682_v3 = vadd.f32 %v1450_v32, %v1142_v33  ;;  %v1813_v33 = vsel %vm1745_vm3, %v1808_v52, %v1812_v1  ;;  %v2137_v47 = vsel %vm1745_vm3, %v2132_v62, %v2136_v46  ;;  %v17253_v52 = vshrl.u32 %v14677_v26, 16 }
 0x17d   : > { %v1117_v13 = vpop.f32.mrf.mxu2  ;;  %v699_v49 = vpop.f32.mrf.mxu0 }
 0x17e   : > { %v1452_v53 = vpop.f32.mrf.mxu3  ;;  %v1143_v34 = vadd.f32 %v1117_v13, %v921_v4  ;;  %v923_v32 = vpop.f32.mrf.mxu1 }
 0x17f   : > { %v924_v39 = vadd.f32 %v923_v32, %v699_v49 }
 0x180   : > { %v14693_v50 = vadd.f32 %v1452_v53, %v1143_v34  ;;  %1610 = vmatmul.bf16.gmra.mxu0 %v13895_v30  ;;  %v1814_v53 = vshrl.u32 %v12546_v25, 16  ;;  %v1818_v30 = vshll.u32 %v12547_v0, 16  ;;  %v1997_v25 = vld [vmem:[%s14355_s22 + $0x68] sm:$0x1] }
 0x181   : > { %1935 = vmatmul.bf16.gmra.mxu1 %v1813_v33  ;;  %v12582_v33 = vld [vmem:[%s14189_s26 + $0x200] sm:$0xff] }
 0x182   : > { %2259 = vmatmul.bf16.gmra.mxu2 %v2137_v47  ;;  %v2140_v47 = vor.u32 %v17253_v52, %v2136_v46  ;;  %v1816_v42 = vor.u32 %v1814_v53, %v1812_v1  ;;  %v1820_v55 = vrot.slane %v1818_v30, 1  ;;  %2627 = vmatpush.bf16.msra.mxu0 %v12582_v33  ;;  %v10663_v33 = vld [vmem:[%s14355_s22 + $0x5c] sm:$0xf] }
 0x183   : > { %2445 = vmatmul.bf16.gmra.mxu3 %v2338_v61  ;;  %v2144_v61 = vrot.slane %v17254_v63, 1  ;;  %v2058_v63 = vunpack.c.l.b16 %v1997_v25 }
 0x184   : > { %v1821_v52 = vsel %vm1745_vm3, %v1816_v42, %v1820_v55 }
 0x185   : > { %v1120_v4 = vpop.f32.mrf.mxu2  ;;  %v701_v62 = vpop.f32.mrf.mxu0  ;;  %v2145_v46 = vsel %vm1745_vm3, %v2140_v47, %v2144_v61 }
 0x186   : > { %v1455_v13 = vpop.f32.mrf.mxu3  ;;  %v1144_v49 = vadd.f32 %v1120_v4, %v924_v39  ;;  %v925_v32 = vpop.f32.mrf.mxu1  ;;  %v2339_v39 = vrot.slane %v14696_v22, 1  ;;  %v14710_v4 = vld [vmem:[%s14355_s22 + $0x64] sm:$0xf] }
 0x187   : > { %v17259_v30 = vunpack.c.l.b16 %v14710_v4 }
 0x188   : > { %v14701_v34 = vadd.f32 %v1455_v13, %v1144_v49  ;;  %v13897_v49 = vld [vmem:[%s14355_s22 + $0x4c] sm:$0xff]   ;;  %v2340_v53 = vsel %vm2321_vm4, %v2337_v14, %v2339_v39  ;;  %v1822_v14 = vshrl.u32 %v12547_v0, 16 }
 0x189   : > { %v2069_v47 = vpack.c.b16 %v2058_v63, %v17259_v30 }
 0x18a   : > { %v1824_v63 = vor.u32 %v1822_v14, %v1820_v55 }
 0x18d   : > { %v1122_v62 = vpop.f32.mrf.mxu2  ;;  %v1576_v32 = vpop.f32.mrf.mxu0 }
 0x18e   : > { %v1457_v13 = vpop.f32.mrf.mxu3  ;;  %v1901_v43 = vpop.f32.mrf.mxu1  ;;  %v1630_v1 = vadd.f32 %v1576_v32, %v14506_v31  ;;  %v10664_v62 = vor.u32 %v12548_v11, %v10663_v33  ;;  %v2517_v11 = vrot.slane %v2078_v27, 2  ;;  %v2341_v33 = vrot.slane %v2069_v47, 1 }
 0x190   : > { %v1955_v8 = vadd.f32 %v1901_v43, %v1630_v1  ;;  %1615 = vmatmul.bf16.gmra.mxu0 %v13897_v49  ;;  %v1826_v7 = vshll.u32 %v10664_v62, 16  ;;  %v2146_v43 = vshrl.u32 %v14696_v22, 16  ;;  %v2150_v49 = vshll.u32 %v2069_v47, 16 }
 0x191   : > { %1940 = vmatmul.bf16.gmra.mxu1 %v1821_v52  ;;  %v2342_v12 = vsel %vm2321_vm4, %v2339_v39, %v2341_v33  ;;  %v12936_v39 = vunpack.c.h.b16 %v14494_v2  ;;  %v2509_v2 = vshrl.u32 %v14540_v28, 16 }
 0x192   : > { %2264 = vmatmul.bf16.gmra.mxu2 %v2145_v46  ;;  %v1828_v1 = vrot.slane %v1826_v7, 1  ;;  %v2148_v0 = vor.u32 %v2146_v43, %v2144_v61 }
 0x193   : > { %2450 = vmatmul.bf16.gmra.mxu3 %v2340_v53  ;;  %v2152_v53 = vrot.slane %v2150_v49, 1 }
 0x195   : > { %v2225_v13 = vpop.f32.mrf.mxu2  ;;  %v1578_v31 = vpop.f32.mrf.mxu0  ;;  %v2153_v7 = vsel %vm1745_vm3, %v2148_v0, %v2152_v53 }
 0x196   : > { %v2411_v42 = vpop.f32.mrf.mxu3  ;;  %v2279_v17 = vadd.f32 %v2225_v13, %v1955_v8  ;;  %v1903_v32 = vpop.f32.mrf.mxu1  ;;  %v1631_v25 = vadd.f32 %v1578_v31, %v14524_v56  ;;  %v2516_v8 = vrot.slane %v2082_v57, 1  ;;  %v13898_v31 = vld [vmem:[%s14355_s22 + $0x54] sm:$0xff]  }
 0x198   : > { %v14725_v52 = vadd.f32 %v2411_v42, %v2279_v17  ;;  %v1956_v46 = vadd.f32 %v1903_v32, %v1631_v25  ;;  %v1829_v32 = vsel %vm1745_vm3, %v1824_v63, %v1828_v1  ;;  %v14738_v57 = vor.u32 %v2517_v11, %v2516_v8 }
 0x199   : > { %v1830_v11 = vshrl.u32 %v10664_v62, 16  ;;  %v2512_v62 = vshll.u32 %v14540_v28, 16 }
 0x19d   : > { %v2227_v56 = vpop.f32.mrf.mxu2  ;;  %v1581_v17 = vpop.f32.mrf.mxu0 }
 0x19e   : > { %v2413_v13 = vpop.f32.mrf.mxu3  ;;  %v2280_v30 = vadd.f32 %v2227_v56, %v1956_v46  ;;  %v1906_v42 = vpop.f32.mrf.mxu1  ;;  %v1632_v27 = vadd.f32 %v1581_v17, %v14527_v59  ;;  %v1832_v17 = vor.u32 %v1830_v11, %v1828_v1 }
 0x1a0   : > { %v14740_v55 = vadd.f32 %v2413_v13, %v2280_v30  ;;  %v1957_v61 = vadd.f32 %v1906_v42, %v1632_v27  ;;  %1620 = vmatmul.bf16.gmra.mxu0 %v13898_v31  ;;  %v2154_v30 = vshrl.u32 %v2069_v47, 16  ;;  %v1507_v31 = vpack.c.b16 %v12936_v39, %v12936_v39 }
 0x1a1   : > { %1945 = vmatmul.bf16.gmra.mxu1 %v1829_v32 }
 0x1a2   : > { %2269 = vmatmul.bf16.gmra.mxu2 %v2153_v7  ;;  %v2156_v7 = vor.u32 %v2154_v30, %v2152_v53  ;;  %v2514_v53 = vrot.slane %v2512_v62, 2 }
 0x1a3   : > { %2455 = vmatmul.bf16.gmra.mxu3 %v2342_v12 }
 0x1a5   : > { %v2230_v14 = vpop.f32.mrf.mxu2  ;;  %v1583_v46 = vpop.f32.mrf.mxu0 }
 0x1a6   : > { %v2416_v25 = vpop.f32.mrf.mxu3  ;;  %v2281_v49 = vadd.f32 %v2230_v14, %v1957_v61  ;;  %v1908_v63 = vpop.f32.mrf.mxu1  ;;  %v1633_v59 = vadd.f32 %v1583_v46, %v14532_v6  ;;  %v2511_v46 = vrot.slane %v2509_v2, 1 }
 0x1a8   : > { %v14743_v56 = vadd.f32 %v2416_v25, %v2281_v49  ;;  %v1958_v0 = vadd.f32 %v1908_v63, %v1633_v59 }
 0x1ad   : > { %v2232_v8 = vpop.f32.mrf.mxu2  ;;  %v1586_v32 = vpop.f32.mrf.mxu0 }
 0x1ae   : > { %v2418_v13 = vpop.f32.mrf.mxu3  ;;  %v2282_v42 = vadd.f32 %v2232_v8, %v1958_v0  ;;  %v1911_v27 = vpop.f32.mrf.mxu1  ;;  %v1634_v12 = vadd.f32 %v1586_v32, %v14542_v29  ;;  %v2515_v0 = vor.u32 %v2514_v53, %v2511_v46 }
 0x1b0   : > { %v14747_v61 = vadd.f32 %v2418_v13, %v2282_v42  ;;  %v1959_v6 = vadd.f32 %v1911_v27, %v1634_v12  ;;  %1625 = vmatmul.bf16.gmra.mxu0 %v1507_v31  ;;  %v2519_v28 = vsel %vm2507_vm5, %v2515_v0, %v14738_v57  ;;  %v2520_v12 = vrot.slane %v2090_v35, 1 }
 0x1b1   : > { %1950 = vmatmul.bf16.gmra.mxu1 %v1832_v17 }
 0x1b2   : > { %2274 = vmatmul.bf16.gmra.mxu2 %v2156_v7 }
 0x1b3   : > { %2460 = vmatmul.bf16.gmra.mxu3 %v2341_v33 }
 0x1b5   : > { %v2235_v47 = vpop.f32.mrf.mxu2  ;;  %v1588_v25 = vpop.f32.mrf.mxu0 }
 0x1b6   : > { %v2421_v14 = vpop.f32.mrf.mxu3  ;;  %v2283_v1 = vadd.f32 %v2235_v47, %v1959_v6  ;;  %v1913_v49 = vpop.f32.mrf.mxu1  ;;  %v1635_v29 = vadd.f32 %v1588_v25, %v14555_v48  ;;  %v2521_v6 = vrot.slane %v2086_v58, 2 }
 0x1b8   : > { %v14752_v63 = vadd.f32 %v2421_v14, %v2283_v1  ;;  %v1960_v59 = vadd.f32 %v1913_v49, %v1635_v29  ;;  %v2522_v47 = vor.u32 %v2521_v6, %v2520_v12 }
 0x1ba   : > { %v2523_v53 = vsel %vm2507_vm5, %v14738_v57, %v2522_v47 }
 0x1bd   : > { %v2237_v39 = vpop.f32.mrf.mxu2  ;;  %v1591_v30 = vpop.f32.mrf.mxu0 }
 0x1be   : > { %v2423_v33 = vpop.f32.mrf.mxu3  ;;  %v2284_v11 = vadd.f32 %v2237_v39, %v1960_v59  ;;  %v1916_v8 = vpop.f32.mrf.mxu1  ;;  %v1636_v13 = vadd.f32 %v1591_v30, %v14563_v60 }
 0x1c0   : > { %v14757_v31 = vadd.f32 %v2423_v33, %v2284_v11  ;;  %v1961_v17 = vadd.f32 %v1916_v8, %v1636_v13  ;;  %2628 = vmatmul.bf16.vlgmr.msra.gmra.mxu0 %v2519_v28  ;;  %v2524_v33 = vrot.slane %v2098_v5, 1  ;;  %v2525_v11 = vrot.slane %v2094_v36, 2 }
 0x1c2   : > { %v2526_v8 = vor.u32 %v2525_v11, %v2524_v33  ;;  %v17300_v11 = vshrl.u32 %v14618_v40, 16 }
 0x1c5   : > { %v2240_v48 = vpop.f32.mrf.mxu2  ;;  %v1593_v27 = vpop.f32.mrf.mxu0 }
 0x1c6   : > { %v2426_v42 = vpop.f32.mrf.mxu3  ;;  %v2285_v32 = vadd.f32 %v2240_v48, %v1961_v17  ;;  %v1918_v7 = vpop.f32.mrf.mxu1  ;;  %v1637_v2 = vadd.f32 %v1593_v27, %v14575_v19 }
 0x1c8   : > { %v14764_v62 = vadd.f32 %v2426_v42, %v2285_v32  ;;  %v1962_v60 = vadd.f32 %v1918_v7, %v1637_v2  ;;  %v2527_v32 = vsel %vm2507_vm5, %v2522_v47, %v2526_v8  ;;  %v2528_v2 = vrot.slane %v2106_v41, 1 }
 0x1cd   : > { %v2242_v14 = vpop.f32.mrf.mxu2  ;;  %v1596_v49 = vpop.f32.mrf.mxu0 }
 0x1ce   : > { %v2428_v1 = vpop.f32.mrf.mxu3  ;;  %v2286_v25 = vadd.f32 %v2242_v14, %v1962_v60  ;;  %v1921_v46 = vpop.f32.mrf.mxu1  ;;  %v1638_v29 = vadd.f32 %v1596_v49, %v14583_v37  ;;  %v17299_v60 = vshll.u32 %v14599_v51, 16 }
 0x1d0   : > { %v14769_v35 = vadd.f32 %v2428_v1, %v2286_v25  ;;  %v1963_v54 = vadd.f32 %v1921_v46, %v1638_v29  ;;  %2633 = vmatmul.bf16.gmra.mxu0 %v2523_v53  ;;  %v2529_v14 = vrot.slane %v17299_v60, 2 }
 0x1d2   : > { %v2530_v25 = vor.u32 %v2529_v14, %v2528_v2  ;;  %v17302_v14 = vshrl.u32 %v14638_v23, 16 }
 0x1d5   : > { %v2245_v58 = vpop.f32.mrf.mxu2  ;;  %v1598_v0 = vpop.f32.mrf.mxu0 }
 0x1d6   : > { %v2431_v19 = vpop.f32.mrf.mxu3  ;;  %v2287_v59 = vadd.f32 %v2245_v58, %v1963_v54  ;;  %v1923_v39 = vpop.f32.mrf.mxu1  ;;  %v1639_v30 = vadd.f32 %v1598_v0, %v14594_v24  ;;  %v2531_v58 = vsel %vm2507_vm5, %v2526_v8, %v2530_v25 }
 0x1d8   : > { %v14776_v57 = vadd.f32 %v2431_v19, %v2287_v59  ;;  %v1964_v37 = vadd.f32 %v1923_v39, %v1639_v30  ;;  %v2532_v30 = vrot.slane %v17300_v11, 1 }
 0x1dd   : > { %v2247_v28 = vpop.f32.mrf.mxu2  ;;  %v1601_v48 = vpop.f32.mrf.mxu0 }
 0x1de   : > { %v2433_v13 = vpop.f32.mrf.mxu3  ;;  %v2288_v17 = vadd.f32 %v2247_v28, %v1964_v37  ;;  %v1926_v42 = vpop.f32.mrf.mxu1  ;;  %v1640_v27 = vadd.f32 %v1601_v48, %v14603_v9  ;;  %v17301_v37 = vshll.u32 %v14618_v40, 16 }
 0x1e0   : > { %v14780_v7 = vadd.f32 %v2433_v13, %v2288_v17  ;;  %v1965_v5 = vadd.f32 %v1926_v42, %v1640_v27  ;;  %2638 = vmatmul.bf16.gmra.mxu0 %v2527_v32  ;;  %v2533_v28 = vrot.slane %v17301_v37, 2  ;;  %v17304_v37 = vshrl.u32 %v14658_v18, 16 }
 0x1e2   : > { %v2534_v17 = vor.u32 %v2533_v28, %v2532_v30  ;;  %v2540_v28 = vrot.slane %v17304_v37, 1  ;;  %v17308_v37 = vshll.u32 %v14696_v22, 16 }
 0x1e5   : > { %v2250_v21 = vpop.f32.mrf.mxu2  ;;  %v1603_v12 = vpop.f32.mrf.mxu0 }
 0x1e6   : > { %v2436_v36 = vpop.f32.mrf.mxu3  ;;  %v2289_v24 = vadd.f32 %v2250_v21, %v1965_v5  ;;  %v1928_v6 = vpop.f32.mrf.mxu1  ;;  %v1641_v1 = vadd.f32 %v1603_v12, %v14614_v38  ;;  %v2535_v21 = vsel %vm2507_vm5, %v2530_v25, %v2534_v17 }
 0x1e8   : > { %v14787_v47 = vadd.f32 %v2436_v36, %v2289_v24  ;;  %v1966_v9 = vadd.f32 %v1928_v6, %v1641_v1  ;;  %v2536_v1 = vrot.slane %v17302_v14, 1 }
 0x1ed   : > { %v2252_v49 = vpop.f32.mrf.mxu2  ;;  %v1606_v29 = vpop.f32.mrf.mxu0 }
 0x1ee   : > { %v2438_v46 = vpop.f32.mrf.mxu3  ;;  %v2290_v53 = vadd.f32 %v2252_v49, %v1966_v9  ;;  %v1931_v54 = vpop.f32.mrf.mxu1  ;;  %v1642_v19 = vadd.f32 %v1606_v29, %v14622_v15  ;;  %v17303_v9 = vshll.u32 %v14638_v23, 16 }
 0x1f0   : > { %v14791_v59 = vadd.f32 %v2438_v46, %v2290_v53  ;;  %v1967_v41 = vadd.f32 %v1931_v54, %v1642_v19  ;;  %2643 = vmatmul.bf16.gmra.mxu0 %v2531_v58  ;;  %v2537_v49 = vrot.slane %v17303_v9, 2 }
 0x1f2   : > { %v2538_v53 = vor.u32 %v2537_v49, %v2536_v1  ;;  %v17306_v1 = vshrl.u32 %v14677_v26, 16  ;;  %v17307_v49 = vshll.u32 %v14677_v26, 16 }
 0x1f4   : > { %v2544_v9 = vrot.slane %v17306_v1, 1 }
 0x1f5   : > { %v2255_v51 = vpop.f32.mrf.mxu2  ;;  %v1608_v39 = vpop.f32.mrf.mxu0 }
 0x1f6   : > { %v2441_v0 = vpop.f32.mrf.mxu3  ;;  %v2291_v38 = vadd.f32 %v2255_v51, %v1967_v41  ;;  %v1933_v33 = vpop.f32.mrf.mxu1  ;;  %v1643_v13 = vadd.f32 %v1608_v39, %v14634_v20  ;;  %v2539_v51 = vsel %vm2507_vm5, %v2534_v17, %v2538_v53 }
 0x1f8   : > { %v14798_v8 = vadd.f32 %v2441_v0, %v2291_v38  ;;  %v1968_v15 = vadd.f32 %v1933_v33, %v1643_v13  ;;  %v17305_v13 = vshll.u32 %v14658_v18, 16 }
 0x1fd   : > { %v2257_v48 = vpop.f32.mrf.mxu2  ;;  %v1611_v27 = vpop.f32.mrf.mxu0 }
 0x1fe   : > { %v2443_v42 = vpop.f32.mrf.mxu3  ;;  %v2292_v32 = vadd.f32 %v2257_v48, %v1968_v15  ;;  %v1936_v5 = vpop.f32.mrf.mxu1  ;;  %v1644_v36 = vadd.f32 %v1611_v27, %v14642_v44  ;;  %v2541_v15 = vrot.slane %v17305_v13, 2 }
 0x200   : > { %v14802_v24 = vadd.f32 %v2443_v42, %v2292_v32  ;;  %v1969_v12 = vadd.f32 %v1936_v5, %v1644_v36  ;;  %2648 = vmatmul.bf16.gmra.mxu0 %v2535_v21  ;;  %v2542_v42 = vor.u32 %v2541_v15, %v2540_v28  ;;  %v2549_v28 = vrot.slane %v17308_v37, 2  ;;  %v2486_v15 = vld [vmem:[%s14355_s22 + $0x68] sm:$0x3] }
 0x205   : > { %v2260_v40 = vpop.f32.mrf.mxu2  ;;  %v1613_v2 = vpop.f32.mrf.mxu0 }
 0x206   : > { %v2446_v6 = vpop.f32.mrf.mxu3  ;;  %v2293_v20 = vadd.f32 %v2260_v40, %v1969_v12  ;;  %v1938_v60 = vpop.f32.mrf.mxu1  ;;  %v1645_v46 = vadd.f32 %v1613_v2, %v14653_v10  ;;  %v2543_v12 = vsel %vm2507_vm5, %v2538_v53, %v2542_v42 }
 0x208   : > { %v14809_v25 = vadd.f32 %v2446_v6, %v2293_v20  ;;  %v1970_v44 = vadd.f32 %v1938_v60, %v1645_v46  ;;  %v2545_v46 = vrot.slane %v17307_v49, 2 }
 0x20d   : > { %v2262_v29 = vpop.f32.mrf.mxu2  ;;  %v1616_v19 = vpop.f32.mrf.mxu0 }
 0x20e   : > { %v2448_v54 = vpop.f32.mrf.mxu3  ;;  %v2294_v58 = vadd.f32 %v2262_v29, %v1970_v44  ;;  %v1941_v41 = vpop.f32.mrf.mxu1  ;;  %v1646_v0 = vadd.f32 %v1616_v19, %v14662_v45  ;;  %v2546_v29 = vor.u32 %v2545_v46, %v2544_v9 }
 0x210   : > { %v14813_v38 = vadd.f32 %v2448_v54, %v2294_v58  ;;  %v1971_v39 = vadd.f32 %v1941_v41, %v1646_v0  ;;  %2653 = vmatmul.bf16.gmra.mxu0 %v2539_v51  ;;  %v2547_v0 = vsel %vm2507_vm5, %v2542_v42, %v2546_v29  ;;  %v12938_v42 = vld [vmem:[%s17247_s3] sm:$0xff]  }
 0x215   : > { %v2265_v23 = vpop.f32.mrf.mxu2  ;;  %v1618_v11 = vpop.f32.mrf.mxu0 }
 0x216   : > { %v2451_v33 = vpop.f32.mrf.mxu3  ;;  %v2295_v10 = vadd.f32 %v2265_v23, %v1971_v39  ;;  %v1943_v30 = vpop.f32.mrf.mxu1  ;;  %v1647_v48 = vadd.f32 %v1618_v11, %v14673_v16 }
 0x218   : > { %v14820_v17 = vadd.f32 %v2451_v33, %v2295_v10  ;;  %v1972_v45 = vadd.f32 %v1943_v30, %v1647_v48  ;;  %v2548_v30 = vrot.slane %v2146_v43, 1 }
 0x21d   : > { %v2267_v32 = vpop.f32.mrf.mxu2  ;;  %v1621_v21 = vpop.f32.mrf.mxu0 }
 0x21e   : > { %v2453_v27 = vpop.f32.mrf.mxu3  ;;  %v2296_v5 = vadd.f32 %v2267_v32, %v1972_v45  ;;  %v1946_v36 = vpop.f32.mrf.mxu1  ;;  %v1648_v40 = vadd.f32 %v1621_v21, %v14682_v3  ;;  %v2505_v45 = vunpack.c.l.b16 %v2486_v15  ;;  %v14850_v32 = vld [vmem:[%s14184_s23] ss:$0 sm:$0xff]  ;;  %v12939_v21 = vunpack.c.l.bf16 %v12938_v42 }
 0x220   : > { %v14824_v6 = vadd.f32 %v2453_v27, %v2296_v5  ;;  %v1973_v20 = vadd.f32 %v1946_v36, %v1648_v40  ;;  %2658 = vmatmul.bf16.gmra.mxu0 %v2543_v12  ;;  %v17309_v36 = vunpack.c.l.b16 %v14710_v4  ;;  %vm2793_vm6 = vcmp.gt.f32.partialorder %v12939_v21, 0.0 }
 0x221   : > { %v12940_v4 = vunpack.c.h.bf16 %v12938_v42 }
 0x222   : > { %v2506_v12 = vpack.c.b16 %v2505_v45, %v17309_v36 }
 0x223   : > { %vm2794_vm7 = vcmp.gt.f32.partialorder %v12940_v4, 0.0 }
 0x225   : > { %v2270_v18 = vpop.f32.mrf.mxu2  ;;  %v1623_v60 = vpop.f32.mrf.mxu0 }
 0x226   : > { %v2456_v2 = vpop.f32.mrf.mxu3  ;;  %v2297_v16 = vadd.f32 %v2270_v18, %v1973_v20  ;;  %v1948_v14 = vpop.f32.mrf.mxu1  ;;  %v1649_v44 = vadd.f32 %v1623_v60, %v14693_v50  ;;  %v14856_v20 = vstv %s443_s27 }
 0x228   : > { %v14831_v53 = vadd.f32 %v2456_v2, %v2297_v16  ;;  %v1974_v3 = vadd.f32 %v1948_v14, %v1649_v44  ;;  %v2553_v2 = vshrl.u32 %v2506_v12, 16  ;;  %v2556_v16 = vshll.u32 %v2506_v12, 16 }
 0x22a   : > { %v2555_v49 = vrot.slane %v2553_v2, 1  ;;  %v2558_v46 = vrot.slane %v2556_v16, 2 }
 0x22d   : > { %v2272_v54 = vpop.f32.mrf.mxu2  ;;  %v1626_v41 = vpop.f32.mrf.mxu0 }
 0x22e   : > { %v2458_v58 = vpop.f32.mrf.mxu3  ;;  %v2298_v19 = vadd.f32 %v2272_v54, %v1974_v3  ;;  %v1951_v51 = vpop.f32.mrf.mxu1  ;;  %v1650_v39 = vadd.f32 %v1626_v41, %v14701_v34  ;;  %v2550_v34 = vor.u32 %v2549_v28, %v2548_v30  ;;  %v2559_v3 = vor.u32 %v2558_v46, %v2555_v49  ;;  %v13680_v54 = vld [vmem:[%s17247_s3 + $0x8] sm:$0xff]  }
 0x22f   : > { %v12943_v41 = vunpack.c.l.bf16 %v13680_v54 }
 0x230   : > { %v14835_v23 = vadd.f32 %v2458_v58, %v2298_v19  ;;  %v1975_v26 = vadd.f32 %v1951_v51, %v1650_v39  ;;  %2663 = vmatmul.bf16.gmra.mxu0 %v2547_v0  ;;  %v2551_v22 = vsel %vm2507_vm5, %v2546_v29, %v2550_v34  ;;  %v2560_v51 = vsel %vm2507_vm5, %v2550_v34, %v2559_v3 }
 0x231   : > { %vm2795_vm8 = vcmp.gt.f32.partialorder %v12943_v41, 0.0 }
 0x235   : > { %v2275_v50 = vpop.f32.mrf.mxu2  ;;  %v1628_v11 = vpop.f32.mrf.mxu0 }
 0x236   : > { %v2461_v33 = vpop.f32.mrf.mxu3  ;;  %v2299_v10 = vadd.f32 %v2275_v50, %v1975_v26  ;;  %v1953_v13 = vpop.f32.mrf.mxu1 }
 0x238   : > { %v14842_v48 = vadd.f32 %v2461_v33, %v2299_v10  ;;  %v12944_v33 = vunpack.c.h.bf16 %v13680_v54 }
 0x23a   : > { %vm2796_vm9 = vcmp.gt.f32.partialorder %v12944_v33, 0.0 }
 0x23d   : > { %v2277_v27 = vpop.f32.mrf.mxu2  ;;  %v2629_v43 = vpop.f32.mrf.mxu0 }
 0x23e   : > { %v2463_v5 = vpop.f32.mrf.mxu3  ;;  %v2683_v40 = vadd.f32 %v2629_v43, %v14725_v52 }
 0x240   : > { %v2708_v18 = vadd.f32 %v14850_v32, %v2683_v40  ;;  %2668 = vmatmul.bf16.gmra.mxu0 %v2551_v22 }
 0x242   : > { %v2730_v60 = vmax.f32 %v2708_v18, %v14856_v20 }
 0x244   : > { %v14860_v14 = vsel %vm2793_vm6, %v2730_v60, 0.0 }
 0x245   : > { %v2835_v1 = vpack.c.bf16 %v14860_v14, %v14860_v14  ;;  %v2631_v9 = vpop.f32.mrf.mxu0 }
 0x246   : > { %v2684_v52 = vadd.f32 %v2631_v9, %v14740_v55 }
 0x248   : > { %v2709_v44 = vadd.f32 %v14850_v32, %v2684_v52 }
 0x24a   : > { %v2731_v29 = vmax.f32 %v2709_v44, %v14856_v20 }
 0x24c   : > { %v14870_v58 = vsel %vm2794_vm7, %v2731_v29, 0.0 }
 0x24d   : > { %v2634_v19 = vpop.f32.mrf.mxu0 }
 0x24e   : > { %v2685_v0 = vadd.f32 %v2634_v19, %v14743_v56  ;;  %v13681_v56 = vld [vmem:[%s17247_s3 + $0x10] sm:$0xff]  }
 0x24f   : > { %v12947_v13 = vunpack.c.l.bf16 %v13681_v56  ;;  %v12948_v27 = vunpack.c.h.bf16 %v13681_v56 }
 0x250   : > { %v2710_v55 = vadd.f32 %v14850_v32, %v2685_v0  ;;  %2673 = vmatmul.bf16.gmra.mxu0 %v2560_v51 }
 0x251   : > { %vm2797_vm10 = vcmp.gt.f32.partialorder %v12947_v13, 0.0  ;;  %vm2798_vm11 = vcmp.gt.f32.partialorder %v12948_v27, 0.0 }
 0x252   : > { %v2732_v39 = vmax.f32 %v2710_v55, %v14856_v20 }
 0x254   : > { %v14876_v26 = vsel %vm2795_vm8, %v2732_v39, 0.0 }
 0x255   : > { %v2636_v50 = vpop.f32.mrf.mxu0 }
 0x256   : > { %v2686_v10 = vadd.f32 %v2636_v50, %v14747_v61 }
 0x258   : > { %v2711_v11 = vadd.f32 %v14850_v32, %v2686_v10 }
 0x25a   : > { %v2733_v30 = vmax.f32 %v2711_v11, %v14856_v20 }
 0x25c   : > { %v14884_v37 = vsel %vm2796_vm9, %v2733_v30, 0.0 }
 0x25d   : > { %v2639_v28 = vpop.f32.mrf.mxu0 }
 0x25e   : > { %v2687_v15 = vadd.f32 %v2639_v28, %v14752_v63  ;;  %v13682_v63 = vld [vmem:[%s17247_s3 + $0x18] sm:$0xff]  }
 0x25f   : > { %v12951_v12 = vunpack.c.l.bf16 %v13682_v63  ;;  %v12952_v60 = vunpack.c.h.bf16 %v13682_v63 }
 0x260   : > { %v2712_v34 = vadd.f32 %v14850_v32, %v2687_v15  ;;  %2678 = vmatmul.bf16.gmra.mxu0 %v2559_v3 }
 0x261   : > { %vm2799_vm12 = vcmp.gt.f32.partialorder %v12951_v12, 0.0  ;;  %vm2800_vm13 = vcmp.gt.f32.partialorder %v12952_v60, 0.0 }
 0x262   : > { %v2734_v61 = vmax.f32 %v2712_v34, %v14856_v20 }
 0x264   : > { %v14889_v45 = vsel %vm2797_vm10, %v2734_v61, 0.0 }
 0x265   : > { %v2641_v42 = vpop.f32.mrf.mxu0 }
 0x266   : > { %v2688_v5 = vadd.f32 %v2641_v42, %v14757_v31 }
 0x268   : > { %v2713_v43 = vadd.f32 %v14850_v32, %v2688_v5 }
 0x26a   : > { %v2735_v21 = vmax.f32 %v2713_v43, %v14856_v20 }
 0x26c   : > { %v14897_v22 = vsel %vm2798_vm11, %v2735_v21, 0.0 }
 0x26d   : > { %v2644_v36 = vpop.f32.mrf.mxu0 }
 0x26e   : > { %v2689_v40 = vadd.f32 %v2644_v36, %v14764_v62  ;;  %v13683_v62 = vld [vmem:[%s17247_s3 + $0x20] sm:$0xff]  }
 0x26f   : > { %v12955_v44 = vunpack.c.l.bf16 %v13683_v62  ;;  %v12956_v41 = vunpack.c.h.bf16 %v13683_v62 }
 0x270   : > { %v2714_v18 = vadd.f32 %v14850_v32, %v2689_v40 }
 0x271   : > { %vm2801_vm14 = vcmp.gt.f32.partialorder %v12955_v44, 0.0  ;;  %vm2802_vm15 = vcmp.gt.f32.partialorder %v12956_v41, 0.0 }
 0x272   : > { %v2736_v31 = vmax.f32 %v2714_v18, %v14856_v20 }
 0x274   : > { %v14902_v2 = vsel %vm2799_vm12, %v2736_v31, 0.0 }
 0x275   : > { %v2646_v16 = vpop.f32.mrf.mxu0 }
 0x276   : > { %v2690_v9 = vadd.f32 %v2646_v16, %v14769_v35 }
 0x278   : > { %v2715_v4 = vadd.f32 %v14850_v32, %v2690_v9 }
 0x27a   : > { %v2737_v49 = vmax.f32 %v2715_v4, %v14856_v20 }
 0x27c   : > { %v14910_v46 = vsel %vm2800_vm13, %v2737_v49, 0.0 }
 0x27d   : > { %v2649_v52 = vpop.f32.mrf.mxu0 }
 0x27e   : > { %v2691_v3 = vadd.f32 %v2649_v52, %v14776_v57  ;;  %v13684_v57 = vld [vmem:[%s17247_s3 + $0x28] sm:$0xff]  }
 0x27f   : > { %v12959_v33 = vunpack.c.l.bf16 %v13684_v57  ;;  %v12960_v28 = vunpack.c.h.bf16 %v13684_v57 }
 0x280   : > { %v2716_v29 = vadd.f32 %v14850_v32, %v2691_v3 }
 0x281   : > { %vm2803_vm6 = vcmp.gt.f32.partialorder %v12959_v33, 0.0  ;;  %vm2804_vm7 = vcmp.gt.f32.partialorder %v12960_v28, 0.0 }
 0x282   : > { %v2738_v35 = vmax.f32 %v2716_v29, %v14856_v20 }
 0x284   : > { %v14915_v54 = vsel %vm2801_vm14, %v2738_v35, 0.0 }
 0x285   : > { %v2651_v19 = vpop.f32.mrf.mxu0 }
 0x286   : > { %v2692_v51 = vadd.f32 %v2651_v19, %v14780_v7 }
 0x288   : > { %v2717_v0 = vadd.f32 %v14850_v32, %v2692_v51 }
 0x28a   : > { %v2739_v55 = vmax.f32 %v2717_v0, %v14856_v20 }
 0x28c   : > { %v14923_v39 = vsel %vm2802_vm15, %v2739_v55, 0.0 }
 0x28d   : > { %v2654_v50 = vpop.f32.mrf.mxu0 }
 0x28e   : > { %v2693_v10 = vadd.f32 %v2654_v50, %v14787_v47  ;;  %v13685_v47 = vld [vmem:[%s17247_s3 + $0x30] sm:$0xff]  }
 0x28f   : > { %v12963_v27 = vunpack.c.l.bf16 %v13685_v47  ;;  %v12964_v36 = vunpack.c.h.bf16 %v13685_v47 }
 0x290   : > { %v2718_v11 = vadd.f32 %v14850_v32, %v2693_v10 }
 0x291   : > { %vm2805_vm8 = vcmp.gt.f32.partialorder %v12963_v27, 0.0  ;;  %vm2806_vm9 = vcmp.gt.f32.partialorder %v12964_v36, 0.0 }
 0x292   : > { %v2740_v7 = vmax.f32 %v2718_v11, %v14856_v20 }
 0x294   : > { %v14928_v30 = vsel %vm2803_vm6, %v2740_v7, 0.0 }
 0x295   : > { %v2656_v56 = vpop.f32.mrf.mxu0 }
 0x296   : > { %v2694_v13 = vadd.f32 %v2656_v56, %v14791_v59 }
 0x298   : > { %v2719_v15 = vadd.f32 %v14850_v32, %v2694_v13 }
 0x29a   : > { %v2741_v34 = vmax.f32 %v2719_v15, %v14856_v20 }
 0x29c   : > { %v14936_v61 = vsel %vm2804_vm7, %v2741_v34, 0.0 }
 0x29d   : > { %v2659_v42 = vpop.f32.mrf.mxu0 }
 0x29e   : > { %v2695_v5 = vadd.f32 %v2659_v42, %v14798_v8  ;;  %v13686_v8 = vld [vmem:[%s17247_s3 + $0x38] sm:$0xff]  }
 0x29f   : > { %v12967_v60 = vunpack.c.l.bf16 %v13686_v8  ;;  %v12968_v52 = vunpack.c.h.bf16 %v13686_v8 }
 0x2a0   : > { %v2720_v43 = vadd.f32 %v14850_v32, %v2695_v5 }
 0x2a1   : > { %vm2807_vm10 = vcmp.gt.f32.partialorder %v12967_v60, 0.0  ;;  %vm2808_vm11 = vcmp.gt.f32.partialorder %v12968_v52, 0.0 }
 0x2a2   : > { %v2742_v59 = vmax.f32 %v2720_v43, %v14856_v20 }
 0x2a4   : > { %v14941_v21 = vsel %vm2805_vm8, %v2742_v59, 0.0 }
 0x2a5   : > { %v2661_v63 = vpop.f32.mrf.mxu0 }
 0x2a6   : > { %v2696_v12 = vadd.f32 %v2661_v63, %v14802_v24 }
 0x2a8   : > { %v2721_v40 = vadd.f32 %v14850_v32, %v2696_v12 }
 0x2aa   : > { %v2743_v18 = vmax.f32 %v2721_v40, %v14856_v20 }
 0x2ac   : > { %v14949_v31 = vsel %vm2806_vm9, %v2743_v18, 0.0 }
 0x2ad   : > { %v2664_v16 = vpop.f32.mrf.mxu0 }
 0x2ae   : > { %v2697_v9 = vadd.f32 %v2664_v16, %v14809_v25  ;;  %v13687_v25 = vld [vmem:[%s17247_s3 + $0x40] sm:$0xff]  }
 0x2af   : > { %v12971_v41 = vunpack.c.l.bf16 %v13687_v25  ;;  %v12972_v50 = vunpack.c.h.bf16 %v13687_v25 }
 0x2b0   : > { %v2722_v4 = vadd.f32 %v14850_v32, %v2697_v9 }
 0x2b1   : > { %vm2809_vm12 = vcmp.gt.f32.partialorder %v12971_v41, 0.0  ;;  %vm2810_vm13 = vcmp.gt.f32.partialorder %v12972_v50, 0.0 }
 0x2b2   : > { %v2744_v24 = vmax.f32 %v2722_v4, %v14856_v20 }
 0x2b4   : > { %v14954_v49 = vsel %vm2807_vm10, %v2744_v24, 0.0 }
 0x2b5   : > { %v2666_v62 = vpop.f32.mrf.mxu0 }
 0x2b6   : > { %v2698_v44 = vadd.f32 %v2666_v62, %v14813_v38 }
 0x2b8   : > { %v2723_v3 = vadd.f32 %v14850_v32, %v2698_v44 }
 0x2ba   : > { %v2745_v29 = vmax.f32 %v2723_v3, %v14856_v20 }
 0x2bc   : > { %v14962_v35 = vsel %vm2808_vm11, %v2745_v29, 0.0 }
 0x2bd   : > { %v2669_v19 = vpop.f32.mrf.mxu0 }
 0x2be   : > { %v2699_v51 = vadd.f32 %v2669_v19, %v14820_v17  ;;  %v13688_v17 = vld [vmem:[%s17247_s3 + $0x48] sm:$0xff]  }
 0x2bf   : > { %v12975_v28 = vunpack.c.l.bf16 %v13688_v17  ;;  %v12976_v42 = vunpack.c.h.bf16 %v13688_v17 }
 0x2c0   : > { %v2724_v0 = vadd.f32 %v14850_v32, %v2699_v51 }
 0x2c1   : > { %vm2811_vm14 = vcmp.gt.f32.partialorder %v12975_v28, 0.0  ;;  %vm2812_vm15 = vcmp.gt.f32.partialorder %v12976_v42, 0.0 }
 0x2c2   : > { %v2746_v38 = vmax.f32 %v2724_v0, %v14856_v20 }
 0x2c4   : > { %v14967_v55 = vsel %vm2809_vm12, %v2746_v38, 0.0 }
 0x2c5   : > { %v2671_v57 = vpop.f32.mrf.mxu0 }
 0x2c6   : > { %v2700_v33 = vadd.f32 %v2671_v57, %v14824_v6 }
 0x2c8   : > { %v2725_v10 = vadd.f32 %v14850_v32, %v2700_v33 }
 0x2ca   : > { %v2747_v11 = vmax.f32 %v2725_v10, %v14856_v20 }
 0x2cc   : > { %v14975_v7 = vsel %vm2810_vm13, %v2747_v11, 0.0 }
 0x2cd   : > { %v2674_v56 = vpop.f32.mrf.mxu0 }
 0x2ce   : > { %v2701_v13 = vadd.f32 %v2674_v56, %v14831_v53  ;;  %v2771_v53 = vld [vmem:[%s17247_s3 + $0x50] sm:$0xf] }
 0x2cf   : > { %v2792_v36 = vunpack.c.l.bf16 %v2771_v53 }
 0x2d0   : > { %v2726_v15 = vadd.f32 %v14850_v32, %v2701_v13 }
 0x2d1   : > { %vm2813_vm6 = vcmp.gt.f32.partialorder %v2792_v36, 0.0 }
 0x2d2   : > { %v2748_v6 = vmax.f32 %v2726_v15, %v14856_v20 }
 0x2d4   : > { %v14980_v34 = vsel %vm2811_vm14, %v2748_v6, 0.0 }
 0x2d5   : > { %v2676_v47 = vpop.f32.mrf.mxu0 }
 0x2d6   : > { %v2702_v27 = vadd.f32 %v2676_v47, %v14835_v23 }
 0x2d8   : > { %v2727_v5 = vadd.f32 %v14850_v32, %v2702_v27 }
 0x2da   : > { %v2749_v43 = vmax.f32 %v2727_v5, %v14856_v20 }
 0x2dc   : > { %v2833_v59 = vsel %vm2812_vm15, %v2749_v43, 0.0 }
 0x2dd   : > { %v2679_v63 = vpop.f32.mrf.mxu0 }
 0x2de   : > { %v2703_v12 = vadd.f32 %v2679_v63, %v14842_v48 }
 0x2e0   : > { %v2728_v40 = vadd.f32 %v14850_v32, %v2703_v12 }
 0x2e1   : > { %2858 = sbr.rel (%p10877_p8) target bundleno = 754 (0x2f2), region = 44 }
 0x2e2   : > { %v2750_v18 = vmax.f32 %v2728_v40, %v14856_v20 }
 0x2e4   : > { %v2834_v23 = vsel %vm2813_vm6, %v2750_v18, 0.0 }
 0x2e5   : > { %v2855_v8 = vpack.c.bf16 %v2834_v23, %v2834_v23  ;;  %v2681_v16 = vpop.f32.mrf.mxu0 }
 0x2e6   : > { %v12980_v60 = vpack.c.bf16 %v14876_v26, %v14870_v58  ;;  %v12985_v48 = vpack.c.bf16 %v14889_v45, %v14884_v37  ;;  %v12990_v32 = vpack.c.bf16 %v14902_v2, %v14897_v22  ;;  %2862 = vst [vmem:[%s2861_s5 + $0xc] sm:$0xf] %v2835_v1  ;;  %v12995_v9 = vpack.c.bf16 %v14915_v54, %v14910_v46 }
 0x2e7   : > { %v13000_v4 = vpack.c.bf16 %v14928_v30, %v14923_v39  ;;  %v13005_v24 = vpack.c.bf16 %v14941_v21, %v14936_v61  ;;  %v13010_v62 = vpack.c.bf16 %v14954_v49, %v14949_v31  ;;  %v13015_v52 = vpack.c.bf16 %v14967_v55, %v14962_v35 }
 0x2e8   : > { %13689 = vst [vmem:[%s2861_s5 + $0x10] sm:$0xff] %v12980_v60   ;;  %v13020_v1 = vpack.c.bf16 %v14980_v34, %v14975_v7  ;;  %v13025_v44 = vpack.c.bf16 %v2834_v23, %v2833_v59 }
 0x2e9   : > { %13690 = vst [vmem:[%s2861_s5 + $0x18] sm:$0xff] %v12985_v48  }
 0x2ea   : > { %13691 = vst [vmem:[%s2861_s5 + $0x20] sm:$0xff] %v12990_v32  }
 0x2eb   : > { %13692 = vst [vmem:[%s2861_s5 + $0x28] sm:$0xff] %v12995_v9  }
 0x2ec   : > { %13693 = vst [vmem:[%s2861_s5 + $0x30] sm:$0xff] %v13000_v4  }
 0x2ed   : > { %13694 = vst [vmem:[%s2861_s5 + $0x38] sm:$0xff] %v13005_v24  }
 0x2ee   : > { %13695 = vst [vmem:[%s2861_s5 + $0x40] sm:$0xff] %v13010_v62  }
 0x2ef   : > { %13696 = vst [vmem:[%s2861_s5 + $0x48] sm:$0xff] %v13015_v52  }
 0x2f0   : > { %13697 = vst [vmem:[%s2861_s5 + $0x50] sm:$0xff] %v13020_v1  }
 0x2f1   : > { %13698 = vst [vmem:[%s2861_s5 + $0x58] sm:$0xff] %v13025_v44  }
 0x2f2 PF: > { %p10879_p9 = scmp.ne.s32.totalorder %s14122_s15, 4 }
 0x2f4   : > { %2885 = sbr.rel (%p10879_p9) target bundleno = 773 (0x305), region = 48 }
 0x2f9   : > { %v13030_v3 = vpack.c.bf16 %v14870_v58, %v14860_v14  ;;  %v13035_v29 = vpack.c.bf16 %v14884_v37, %v14876_v26  ;;  %v13040_v25 = vpack.c.bf16 %v14897_v22, %v14889_v45  ;;  %2906 = vst [vmem:[%s17248_s4 + $0x50] sm:$0xf] %v2855_v8  ;;  %v13045_v19 = vpack.c.bf16 %v14910_v46, %v14902_v2 }
 0x2fa   : > { %v13050_v14 = vpack.c.bf16 %v14923_v39, %v14915_v54  ;;  %v13055_v58 = vpack.c.bf16 %v14936_v61, %v14928_v30  ;;  %v13060_v26 = vpack.c.bf16 %v14949_v31, %v14941_v21  ;;  %v13065_v37 = vpack.c.bf16 %v14962_v35, %v14954_v49 }
 0x2fb   : > { %13031 = vst [vmem:[%s17248_s4] sm:$0xff] %v13030_v3   ;;  %v13070_v45 = vpack.c.bf16 %v14975_v7, %v14967_v55  ;;  %v13075_v22 = vpack.c.bf16 %v2833_v59, %v14980_v34 }
 0x2fc   : > { %13699 = vst [vmem:[%s17248_s4 + $0x8] sm:$0xff] %v13035_v29  }
 0x2fd   : > { %13700 = vst [vmem:[%s17248_s4 + $0x10] sm:$0xff] %v13040_v25  }
 0x2fe   : > { %13701 = vst [vmem:[%s17248_s4 + $0x18] sm:$0xff] %v13045_v19  }
 0x2ff   : > { %13702 = vst [vmem:[%s17248_s4 + $0x20] sm:$0xff] %v13050_v14  }
 0x300   : > { %13703 = vst [vmem:[%s17248_s4 + $0x28] sm:$0xff] %v13055_v58  }
 0x301   : > { %13704 = vst [vmem:[%s17248_s4 + $0x30] sm:$0xff] %v13060_v26  }
 0x302   : > { %13705 = vst [vmem:[%s17248_s4 + $0x38] sm:$0xff] %v13065_v37  }
 0x303   : > { %13706 = vst [vmem:[%s17248_s4 + $0x40] sm:$0xff] %v13070_v45  }
 0x304   : > { %13707 = vst [vmem:[%s17248_s4 + $0x48] sm:$0xff] %v13075_v22  }
 0x305 PF: > { %v12615_v2 = vld [vmem:[%s14189_s26 + $0x78] sm:$0xff]  ;;  %v12614_v39 = vld [vmem:[%s14189_s26 + $0x70] sm:$0xff]  ;;  %v12613_v49 = vld [vmem:[%s14189_s26 + $0x68] sm:$0xff]  ;;  %s12692_s14 = smul.u32 (!%p10877_p8), 360, %s17356_s19 }
 0x306   : > { %v12607_v46 = vld [vmem:[%s14189_s26 + $0x38] sm:$0xff]  ;;  %3097 = vmatpush.bf16.msra.mxu1 %v12615_v2  ;;  %v12606_v30 = vld [vmem:[%s14189_s26 + $0x30] sm:$0xff]  ;;  %v12605_v35 = vld [vmem:[%s14189_s26 + $0x28] sm:$0xff] }
 0x307   : > { %v12623_v54 = vld [vmem:[%s14189_s26 + $0xb8] sm:$0xff]  ;;  %3320 = vmatpush.bf16.msra.mxu2 %v12607_v46  ;;  %v12622_v61 = vld [vmem:[%s14189_s26 + $0xb0] sm:$0xff]  ;;  %v12621_v41 = vld [vmem:[%s14189_s26 + $0xa8] sm:$0xff]  ;;  %s5305_s20 = scalar_lea.vmem (!%p10877_p8), [#allocation2], %s12692_s14 }
 0x308   : > { %3515 = vmatpush.bf16.msra.mxu3 %v12623_v54  ;;  %v12631_v21 = vld [vmem:[%s14189_s26 + $0xf8] sm:$0xff]  ;;  %v12630_v31 = vld [vmem:[%s14189_s26 + $0xf0] sm:$0xff]  ;;  %v12612_v51 = vld [vmem:[%s14189_s26 + $0x60] sm:$0xff] }
 0x309   : > { %3849 = vmatpush.bf16.msrb.mxu0 %v12631_v21  ;;  %v12629_v0 = vld [vmem:[%s14189_s26 + $0xe8] sm:$0xff]  ;;  %v12604_v38 = vld [vmem:[%s14189_s26 + $0x20] sm:$0xff]  ;;  %v2908_v55 = vld [vmem:[%s14355_s22 + $0x58] sm:$0xf] }
 0x30a   : > { %3098 = vmatpush.bf16.msra.mxu1 %v12614_v39  ;;  %v2945_v57 = vld [vmem:[%s14355_s22 + $0x54] sm:$0x8]  ;;  %v12620_v50 = vld [vmem:[%s14189_s26 + $0xa0] sm:$0xff]  ;;  %v2985_v10 = vunpack.c.l.b16 %v2908_v55  ;;  %v12611_v28 = vld [vmem:[%s14189_s26 + $0x58] sm:$0xff] }
 0x30b   : > { %3321 = vmatpush.bf16.msra.mxu2 %v12606_v30  ;;  %v2984_v33 = vunpack.c.l.b16 %v2945_v57  ;;  %v2907_v11 = vld [vmem:[%s14355_s22 + $0x54] sm:$0xc]  ;;  %v12628_v7 = vld [vmem:[%s14189_s26 + $0xe0] sm:$0xff]  ;;  %v12603_v13 = vld [vmem:[%s14189_s26 + $0x18] sm:$0xff] }
 0x30c   : > { %3516 = vmatpush.bf16.msra.mxu3 %v12622_v61  ;;  %v3161_v17 = vunpack.c.l.b16 %v2907_v11  ;;  %v15091_v56 = vld [vmem:[%s14355_s22 + $0x5c] sm:$0xff]  ;;  %v12610_v63 = vld [vmem:[%s14189_s26 + $0x50] sm:$0xff]  ;;  %v14018_v12 = vld [vmem:[%s14355_s22 + $0x64] sm:$0xff]  }
 0x30d   : > { %3850 = vmatpush.bf16.msrb.mxu0 %v12630_v31  ;;  %v12619_v6 = vld [vmem:[%s14189_s26 + $0x98] sm:$0xff]  ;;  %v3006_v34 = vpack.c.b16 %v2985_v10, %v2984_v33  ;;  %v14016_v42 = vld [vmem:[%s14355_s22 + $0x5c] sm:$0xf0]   ;;  %v3172_v53 = vshrl.u32 %v15091_v56, 16  ;;  %v3175_v59 = vshll.u32 %v15091_v56, 16  ;;  %v12602_v36 = vld [vmem:[%s14189_s26 + $0x10] sm:$0xff] }
 0x30e   : > { %3099 = vmatpush.bf16.msra.mxu1 %v12613_v49  ;;  %v3162_v15 = vpack.c.b16 %v2985_v10, %v3161_v17  ;;  %v13901_v47 = vld [vmem:[%s14355_s22 + $0x5c] sm:$0x8]  ;;  %v12618_v18 = vld [vmem:[%s14189_s26 + $0x90] sm:$0xff]  ;;  %v12609_v4 = vld [vmem:[%s14189_s26 + $0x48] sm:$0xff]  ;;  %v3701_v1 = vshrl.u32 %v14018_v12, 16  ;;  %v3704_v44 = vshll.u32 %v14018_v12, 16 }
 0x30f   : > { %3322 = vmatpush.bf16.msra.mxu2 %v12605_v35  ;;  %v12627_v27 = vld [vmem:[%s14189_s26 + $0xd8] sm:$0xff]  ;;  %v13902_v40 = vor.u32 %v14016_v42, %v13901_v47  ;;  %v3404_v23 = vshrl.u32 %v3006_v34, 16  ;;  %v3407_v8 = vshll.u32 %v3006_v34, 16  ;;  %v12626_v16 = vld [vmem:[%s14189_s26 + $0xd0] sm:$0xff]  ;;  %v3174_v32 = vrot.slane %v3172_v53, 2  ;;  %v12601_v24 = vld [vmem:[%s14189_s26 + $0x8] sm:$0xff] }
 0x310   : > { %3517 = vmatpush.bf16.msra.mxu3 %v12621_v41  ;;  %v3164_v5 = vshrl.u32 %v3162_v15, 16  ;;  %v3167_v43 = vshll.u32 %v3162_v15, 16  ;;  %v3177_v9 = vrot.slane %v3175_v59, 3  ;;  %v12617_v3 = vld [vmem:[%s14189_s26 + $0x88] sm:$0xff]  ;;  %v3411_v19 = vrot.slane %v3172_v53, 3  ;;  %v12608_v2 = vld [vmem:[%s14189_s26 + $0x40] sm:$0xff] }
 0x311   : > { %3851 = vmatpush.bf16.msrb.mxu0 %v12629_v0  ;;  %v3693_v62 = vshrl.u32 %v13902_v40, 16  ;;  %v3696_v52 = vshll.u32 %v13902_v40, 16  ;;  %v3406_v29 = vrot.slane %v3404_v23, 3  ;;  %v3409_v25 = vrot.slane %v3407_v8, 4  ;;  %v12625_v22 = vld [vmem:[%s14189_s26 + $0xc8] sm:$0xff]  ;;  %v12600_v46 = vld [vmem:[%s14189_s26] sm:$0xff] }
 0x312   : > { %3100 = vmatpush.bf16.msra.mxu1 %v12612_v51  ;;  %v3166_v60 = vrot.slane %v3164_v5, 2  ;;  %v3169_v48 = vrot.slane %v3167_v43, 3  ;;  %v3412_v14 = vrot.slane %v3175_v59, 4  ;;  %v3017_v58 = vrot.slane %v3006_v34, 3  ;;  %v12616_v21 = vld [vmem:[%s14189_s26 + $0x80] sm:$0xff]  ;;  %v12639_v31 = vld [vmem:[%s14189_s26 + $0x138] sm:$0xff] }
 0x313   : > { %3323 = vmatpush.bf16.msra.mxu2 %v12604_v38  ;;  %v3018_v26 = vrot.slane %v15091_v56, 3  ;;  %v3178_v45 = vor.u32 %v3177_v9, %v3174_v32  ;;  %v3695_v54 = vrot.slane %v3693_v62, 3  ;;  %v3698_v39 = vrot.slane %v3696_v52, 4  ;;  %v12624_v0 = vld [vmem:[%s14189_s26 + $0xc0] sm:$0xff]  ;;  %v12638_v33 = vld [vmem:[%s14189_s26 + $0x130] sm:$0xff]  ;;  %v12637_v56 = vld [vmem:[%s14189_s26 + $0x128] sm:$0xff] }
 0x314   : > { %3518 = vmatpush.bf16.msra.mxu3 %v12620_v50  ;;  %v3170_v37 = vor.u32 %v3169_v48, %v3166_v60  ;;  %v3703_v30 = vrot.slane %v3701_v1, 3  ;;  %v3706_v61 = vrot.slane %v3704_v44, 4  ;;  %v3410_v49 = vor.u32 %v3409_v25, %v3406_v29  ;;  %v12592_v57 = vld [vmem:[%s14355_s22 + $0x64] sm:$0xff]  ;;  %v12593_v12 = vld [vmem:[%s14355_s22 + $0x6c] sm:$0xff] }
 0x315   : > { %3852 = vmatpush.bf16.msrb.mxu0 %v12628_v7  ;;  %v3413_v35 = vor.u32 %v3412_v14, %v3411_v19  ;;  %v3019_v41 = vsel %vm559_vm0, %v3017_v58, %v3018_v26  ;;  %v3699_v38 = vor.u32 %v3698_v39, %v3695_v54  ;;  %v3181_v11 = vshrl.u32 %v12592_v57, 16  ;;  %v14020_v7 = vld [vmem:[%s14355_s22 + $0x6c] sm:$0xff]   ;;  %v12594_v14 = vld [vmem:[%s14355_s22 + $0x74] sm:$0xff] }
 0x316   : > { %3101 = vmatpush.bf16.msra.mxu1 %v12611_v28  ;;  %v3179_v51 = vsel %vm706_vm1, %v3170_v37, %v3178_v45  ;;  %v3707_v55 = vor.u32 %v3706_v61, %v3703_v30  ;;  %v3184_v17 = vshll.u32 %v12592_v57, 16  ;;  %v3710_v15 = vshrl.u32 %v14020_v7, 16 }
 0x317   : > { %3324 = vmatpush.bf16.msra.mxu2 %v12603_v13  ;;  %v3414_v50 = vsel %vm948_vm2, %v3410_v49, %v3413_v35  ;;  %v3183_v28 = vrot.slane %v3181_v11, 2  ;;  %v3415_v34 = vrot.slane %v3181_v11, 3  ;;  %v3020_v42 = vrot.slane %v12592_v57, 3  ;;  %v12595_v57 = vld [vmem:[%s14355_s22 + $0x7c] sm:$0xff] }
 0x318   : > { %3519 = vmatpush.bf16.msra.mxu3 %v12619_v6  ;;  %v3708_v10 = vsel %vm948_vm2, %v3699_v38, %v3707_v55  ;;  %v3186_v13 = vrot.slane %v3184_v17, 3  ;;  %v3713_v6 = vshll.u32 %v14020_v7, 16  ;;  %v3416_v47 = vrot.slane %v3184_v17, 4  ;;  %v14026_v17 = vld [vmem:[%s14355_s22 + $0x84] sm:$0xff]   ;;  %v12635_v7 = vld [vmem:[%s14189_s26 + $0x118] sm:$0xff] }
 0x319   : > { %3853 = vmatpush.bf16.msrb.mxu0 %v12627_v27  ;;  %v3712_v5 = vrot.slane %v3710_v15, 3  ;;  %v3021_v59 = vsel %vm559_vm0, %v3018_v26, %v3020_v42  ;;  %v3190_v23 = vshrl.u32 %v12593_v12, 16  ;;  %v3193_v8 = vshll.u32 %v12593_v12, 16 }
 0x31a   : > { %3102 = vmatpush.bf16.msra.mxu1 %v12610_v63  ;;  %v3187_v27 = vor.u32 %v3186_v13, %v3183_v28  ;;  %v3715_v43 = vrot.slane %v3713_v6, 4  ;;  %v3417_v53 = vor.u32 %v3416_v47, %v3415_v34  ;;  %v3022_v62 = vrot.slane %v12593_v12, 3 }
 0x31b   : > { %3325 = vmatpush.bf16.msra.mxu2 %v12602_v36  ;;  %v3192_v60 = vrot.slane %v3190_v23, 2  ;;  %v3195_v48 = vrot.slane %v3193_v8, 3  ;;  %v3199_v37 = vshrl.u32 %v12594_v14, 16  ;;  %v3211_v11 = vshll.u32 %v12595_v57, 16 }
 0x31c   : > { %3520 = vmatpush.bf16.msra.mxu3 %v12618_v18  ;;  %v3188_v63 = vsel %vm706_vm1, %v3178_v45, %v3187_v27  ;;  %v3716_v36 = vor.u32 %v3715_v43, %v3712_v5  ;;  %v3418_v40 = vsel %vm948_vm2, %v3413_v35, %v3417_v53  ;;  %v3023_v29 = vsel %vm559_vm0, %v3020_v42, %v3022_v62 }
 0x31d   : > { %3854 = vmatpush.bf16.msrb.mxu0 %v12626_v16  ;;  %v14022_v16 = vld [vmem:[%s14355_s22 + $0x74] sm:$0xff]   ;;  %v3196_v52 = vor.u32 %v3195_v48, %v3192_v60  ;;  %v3202_v45 = vshll.u32 %v12594_v14, 16  ;;  %v3423_v61 = vrot.slane %v3199_v37, 3  ;;  %v3213_v28 = vrot.slane %v3211_v11, 3 }
 0x31e   : > { %3103 = vmatpush.bf16.msra.mxu1 %v12609_v4  ;;  %v3717_v18 = vsel %vm948_vm2, %v3707_v55, %v3716_v36  ;;  %v3719_v32 = vshrl.u32 %v14022_v16, 16  ;;  %v3722_v9 = vshll.u32 %v14022_v16, 16  ;;  %v3419_v4 = vrot.slane %v3190_v23, 3  ;;  %v12634_v16 = vld [vmem:[%s14189_s26 + $0x110] sm:$0xff] }
 0x31f   : > { %3326 = vmatpush.bf16.msra.mxu2 %v12601_v24  ;;  %v3420_v24 = vrot.slane %v3193_v8, 4  ;;  %v3197_v25 = vsel %vm706_vm1, %v3187_v27, %v3196_v52  ;;  %v3204_v54 = vrot.slane %v3202_v45, 3  ;;  %v3737_v13 = vshrl.u32 %v14026_v17, 16  ;;  %v14028_v8 = vld [vmem:[%s14355_s22 + $0x8c] sm:$0xff]  }
 0x320   : > { %3521 = vmatpush.bf16.msra.mxu3 %v12617_v3  ;;  %v3721_v1 = vrot.slane %v3719_v32, 3  ;;  %v3724_v44 = vrot.slane %v3722_v9, 4  ;;  %v3740_v15 = vshll.u32 %v14026_v17, 16  ;;  %v3428_v34 = vrot.slane %v3211_v11, 4  ;;  %v14032_v11 = vld [vmem:[%s14355_s22 + $0x9c] sm:$0xff]   ;;  %v12633_v17 = vld [vmem:[%s14189_s26 + $0x108] sm:$0xff] }
 0x321   : > { %3855 = vmatpush.bf16.msrb.mxu0 %v12625_v22  ;;  %v3421_v3 = vor.u32 %v3420_v24, %v3419_v4  ;;  %v14024_v22 = vld [vmem:[%s14355_s22 + $0x7c] sm:$0xff]   ;;  %v3026_v47 = vrot.slane %v12595_v57, 3  ;;  %v3739_v27 = vrot.slane %v3737_v13, 3  ;;  %v3746_v32 = vshrl.u32 %v14028_v8, 16 }
 0x322   : > { %3104 = vmatpush.bf16.msra.mxu1 %v12608_v2  ;;  %v3725_v19 = vor.u32 %v3724_v44, %v3721_v1  ;;  %v12636_v2 = vld [vmem:[%s14189_s26 + $0x120] sm:$0xff]  ;;  %v3728_v39 = vshrl.u32 %v14024_v22, 16  ;;  %v3731_v30 = vshll.u32 %v14024_v22, 16  ;;  %v3742_v5 = vrot.slane %v3740_v15, 4  ;;  %v14030_v22 = vld [vmem:[%s14355_s22 + $0x94] sm:$0xff]  }
 0x323   : > { %3327 = vmatpush.bf16.msra.mxu2 %v12600_v46  ;;  %v3422_v58 = vsel %vm948_vm2, %v3417_v53, %v3421_v3  ;;  %v3201_v46 = vrot.slane %v3199_v37, 2  ;;  %v3749_v9 = vshll.u32 %v14028_v8, 16  ;;  %v3748_v1 = vrot.slane %v3746_v32, 3  ;;  %v14033_v8 = vld [vmem:[%s14355_s22 + $0xa4] sm:$0xff]  }
 0x324   : > { %3522 = vmatpush.bf16.msra.mxu3 %v12616_v21  ;;  %v3726_v26 = vsel %vm948_vm2, %v3716_v36, %v3725_v19  ;;  %v3424_v21 = vrot.slane %v3202_v45, 4  ;;  %v3730_v35 = vrot.slane %v3728_v39, 3  ;;  %v12596_v36 = vld [vmem:[%s14355_s22 + $0x84] sm:$0xff]  ;;  %v3758_v39 = vshll.u32 %v14030_v22, 16 }
 0x325   : > { %3105 = vmatmul.bf16.vlgmr.msra.gmra.mxu1 %v3019_v41  ;;  %3856 = vmatpush.bf16.msrb.mxu0 %v12624_v0  ;;  %v3205_v49 = vor.u32 %v3204_v54, %v3201_v46  ;;  %v3733_v41 = vrot.slane %v3731_v30, 4  ;;  %v3220_v23 = vshll.u32 %v12596_v36, 16  ;;  %v3751_v44 = vrot.slane %v3749_v9, 4 }
 0x326   : > { %4019 = vmatpush.bf16.msrb.mxu1 %v12639_v31  ;;  %3328 = vmatmul.bf16.vlgmr.msra.gmra.mxu2 %v3179_v51  ;;  %v3024_v31 = vrot.slane %v12594_v14, 3  ;;  %v3425_v51 = vor.u32 %v3424_v21, %v3423_v61  ;;  %v12597_v14 = vld [vmem:[%s14355_s22 + $0x8c] sm:$0xff]  ;;  %v3755_v54 = vshrl.u32 %v14030_v22, 16  ;;  %v3767_v13 = vshll.u32 %v14032_v11, 16 }
 0x327   : > { %3523 = vmatmul.bf16.vlgmr.msra.gmra.mxu3 %v3414_v50  ;;  %v3206_v38 = vsel %vm706_vm1, %v3196_v52, %v3205_v49  ;;  %v3734_v55 = vor.u32 %v3733_v41, %v3730_v35  ;;  %v3222_v48 = vrot.slane %v3220_v23, 3  ;;  %v3432_v24 = vrot.slane %v3220_v23, 4 }
 0x328   : > { %3857 = vmatmul.bf16.vlgmr.msrb.gmra.mxu0 %v3708_v10  ;;  %v3025_v0 = vsel %vm559_vm0, %v3022_v62, %v3024_v31  ;;  %v3426_v50 = vsel %vm948_vm2, %v3421_v3, %v3425_v51  ;;  %v3208_v10 = vshrl.u32 %v12595_v57, 16  ;;  %v3027_v53 = vsel %vm559_vm0, %v3024_v31, %v3026_v47 }
 0x329   : > { %v3028_v62 = vrot.slane %v12596_v36, 3  ;;  %v3226_v37 = vshrl.u32 %v12597_v14, 16  ;;  %v3229_v45 = vshll.u32 %v12597_v14, 16  ;;  %v3030_v21 = vrot.slane %v12597_v14, 3  ;;  %v12632_v14 = vld [vmem:[%s14189_s26 + $0x100] sm:$0xff] }
 0x32a   : > { %4020 = vmatpush.bf16.msrb.mxu1 %v12638_v33  ;;  %v3735_v33 = vsel %vm948_vm2, %v3725_v19, %v3734_v55  ;;  %v3427_v6 = vrot.slane %v3208_v10, 3  ;;  %v3752_v19 = vor.u32 %v3751_v44, %v3748_v1  ;;  %v3760_v35 = vrot.slane %v3758_v39, 4  ;;  %v15184_v1 = vld [vmem:[%s14355_s22 + $0xa4] sm:$0xff]  }
 0x32b   : > { %v3231_v46 = vrot.slane %v3229_v45, 3  ;;  %v3435_v30 = vrot.slane %v3226_v37, 3  ;;  %v3436_v61 = vrot.slane %v3229_v45, 4  ;;  %v3773_v9 = vshrl.u32 %v14033_v8, 16  ;;  %v14110_v44 = vld [vmem:[%s14355_s22 + $0xa4] sm:$0xf]  }
 0x32c   : > { %v3429_v43 = vor.u32 %v3428_v34, %v3427_v6  ;;  %v12683_v45 = vld [vmem:[%s14189_s26 + $0x1f8] sm:$0xff] }
 0x32d   : > { %v3437_v41 = vor.u32 %v3436_v61, %v3435_v30  ;;  %4849 = vmatpush.bf16.msra.mxu0 %v12683_v45 }
 0x32e   : > { %4021 = vmatpush.bf16.msrb.mxu1 %v12637_v56  ;;  %v3210_v56 = vrot.slane %v3208_v10, 2  ;;  %v3430_v12 = vsel %vm948_vm2, %v3425_v51, %v3429_v43  ;;  %v3031_v51 = vsel %vm559_vm0, %v3028_v62, %v3030_v21 }
 0x330   : > { %v3214_v42 = vor.u32 %v3213_v28, %v3210_v56  ;;  %v3764_v28 = vshrl.u32 %v14032_v11, 16  ;;  %v12671_v11 = vld [vmem:[%s14189_s26 + $0x198] sm:$0xff] }
 0x332   : > { %4022 = vmatpush.bf16.msrb.mxu1 %v12636_v2  ;;  %v3228_v2 = vrot.slane %v3226_v37, 2  ;;  %v12673_v37 = vld [vmem:[%s14189_s26 + $0x1a8] sm:$0xff] }
 0x334   : > { %v3232_v31 = vor.u32 %v3231_v46, %v3228_v2  ;;  %v15198_v2 = vld [vmem:[%s14355_s22 + $0xa8] sm:$0xff]   ;;  %v3620_v46 = vld [vmem:[%s14355_s22 + $0xb0] sm:$0xf] }
 0x335   : > { %3110 = vmatmul.bf16.gmra.mxu1 %v3021_v59  ;;  %v3215_v59 = vsel %vm706_vm1, %v3205_v49, %v3214_v42  ;;  %v3757_v49 = vrot.slane %v3755_v54, 3  ;;  %v12655_v54 = vld [vmem:[%s14189_s26 + $0x160] sm:$0xff] }
 0x336   : > { %3333 = vmatmul.bf16.gmra.mxu2 %v3188_v63  ;;  %4023 = vmatpush.bf16.msrb.mxu1 %v12635_v7  ;;  %v3743_v63 = vor.u32 %v3742_v5, %v3739_v27  ;;  %v3769_v27 = vrot.slane %v3767_v13, 4  ;;  %v12653_v13 = vld [vmem:[%s14189_s26 + $0x150] sm:$0xff] }
 0x337   : > { %3528 = vmatmul.bf16.gmra.mxu3 %v3418_v40 }
 0x338   : > { %3862 = vmatmul.bf16.gmra.mxu0 %v3717_v18  ;;  %v3744_v40 = vsel %vm948_vm2, %v3734_v55, %v3743_v63  ;;  %v3217_v18 = vshrl.u32 %v12596_v36, 16  ;;  %v15160_v55 = vld [vmem:[%s14355_s22 + $0x94] sm:$0xff] }
 0x339   : > { %v3238_v10 = vshll.u32 %v15160_v55, 16  ;;  %v3032_v34 = vrot.slane %v15160_v55, 3 }
 0x33a   : > { %v3219_v60 = vrot.slane %v3217_v18, 2  ;;  %v3431_v4 = vrot.slane %v3217_v18, 3  ;;  %4024 = vmatpush.bf16.msrb.mxu1 %v12634_v16  ;;  %v12675_v16 = vld [vmem:[%s14189_s26 + $0x1b8] sm:$0xff] }
 0x33b   : > { %v3240_v56 = vrot.slane %v3238_v10, 3  ;;  %v3440_v6 = vrot.slane %v3238_v10, 4  ;;  %4665 = vmatpush.bf16.msrb.mxu3 %v12675_v16 }
 0x33c   : > { %v3223_v52 = vor.u32 %v3222_v48, %v3219_v60  ;;  %v3433_v3 = vor.u32 %v3432_v24, %v3431_v4  ;;  %v12657_v60 = vld [vmem:[%s14189_s26 + $0x170] sm:$0xff]  ;;  %v3776_v4 = vshll.u32 %v14033_v8, 16 }
 0x33d   : > { %v12674_v24 = vld [vmem:[%s14189_s26 + $0x1b0] sm:$0xff] }
 0x33e   : > { %v3438_v57 = vsel %vm948_vm2, %v3433_v3, %v3437_v41  ;;  %4025 = vmatpush.bf16.msrb.mxu1 %v12633_v17  ;;  %v12681_v17 = vld [vmem:[%s14189_s26 + $0x1e8] sm:$0xff] }
 0x33f   : > { %4666 = vmatpush.bf16.msrb.mxu3 %v12674_v24 }
 0x342   : > { %4026 = vmatpush.bf16.msrb.mxu1 %v12632_v14 }
 0x343   : > { %4667 = vmatpush.bf16.msrb.mxu3 %v12673_v37 }
 0x345   : > { %3115 = vmatmul.bf16.gmra.mxu1 %v3023_v29  ;;  %v3029_v29 = vsel %vm559_vm0, %v3026_v47, %v3028_v62 }
 0x346   : > { %3338 = vmatmul.bf16.gmra.mxu2 %v3197_v25  ;;  %v3224_v25 = vsel %vm706_vm1, %v3214_v42, %v3223_v52  ;;  %v3766_v42 = vrot.slane %v3764_v28, 3 }
 0x347   : > { %3533 = vmatmul.bf16.gmra.mxu3 %v3422_v58  ;;  %v3434_v58 = vsel %vm948_vm2, %v3429_v43, %v3433_v3  ;;  %v15170_v43 = vld [vmem:[%s14355_s22 + $0x9c] sm:$0xff]  ;;  %v14118_v3 = vld [vmem:[%s14355_s22 + $0xa4] sm:$0x70] }
 0x348   : > { %3867 = vmatmul.bf16.gmra.mxu0 %v3726_v26  ;;  %v3753_v26 = vsel %vm948_vm2, %v3743_v63, %v3752_v19  ;;  %v3770_v63 = vor.u32 %v3769_v27, %v3766_v42  ;;  %v3247_v18 = vshll.u32 %v15170_v43, 16 }
 0x34a   : > { %v3249_v32 = vrot.slane %v3247_v18, 3 }
 0x355   : > { %3120 = vmatmul.bf16.gmra.mxu1 %v3025_v0  ;;  %v3233_v0 = vsel %vm706_vm1, %v3223_v52, %v3232_v31  ;;  %v3444_v52 = vrot.slane %v3247_v18, 4 }
 0x356   : > { %3343 = vmatmul.bf16.gmra.mxu2 %v3206_v38  ;;  %v3761_v38 = vor.u32 %v3760_v35, %v3757_v49  ;;  %v13116_v49 = vunpack.c.h.b16 %v15198_v2  ;;  %v15212_v35 = vunpack.c.l.b16 %v3620_v46 }
 0x357   : > { %3538 = vmatmul.bf16.gmra.mxu3 %v3426_v50 }
 0x358   : > { %3872 = vmatmul.bf16.gmra.mxu0 %v3735_v33  ;;  %v3762_v50 = vsel %vm948_vm2, %v3752_v19, %v3761_v38  ;;  %v3235_v33 = vshrl.u32 %v15160_v55, 16  ;;  %v3771_v23 = vsel %vm948_vm2, %v3761_v38, %v3770_v63  ;;  %v12654_v38 = vld [vmem:[%s14189_s26 + $0x158] sm:$0xff]  ;;  %v3691_v10 = vpack.c.b16 %v15212_v35, %v13116_v49 }
 0x35a   : > { %v3237_v7 = vrot.slane %v3235_v33, 2  ;;  %v3439_v15 = vrot.slane %v3235_v33, 3  ;;  %v3782_v27 = vshrl.u32 %v3691_v10, 16 }
 0x35c   : > { %v3241_v47 = vor.u32 %v3240_v56, %v3237_v7  ;;  %v3441_v5 = vor.u32 %v3440_v6, %v3439_v15  ;;  %v3448_v7 = vshrl.u32 %v15184_v1, 16  ;;  %v3451_v56 = vshll.u32 %v15184_v1, 16 }
 0x35e   : > { %v3442_v36 = vsel %vm948_vm2, %v3437_v41, %v3441_v5  ;;  %v12672_v41 = vld [vmem:[%s14189_s26 + $0x1a0] sm:$0xff] }
 0x35f   : > { %4668 = vmatpush.bf16.msrb.mxu3 %v12672_v41 }
 0x363   : > { %4669 = vmatpush.bf16.msrb.mxu3 %v12671_v11 }
 0x365   : > { %3125 = vmatmul.bf16.gmra.mxu1 %v3027_v53  ;;  %v3033_v53 = vsel %vm559_vm0, %v3030_v21, %v3032_v34 }
 0x366   : > { %3348 = vmatmul.bf16.gmra.mxu2 %v3215_v59  ;;  %v3242_v59 = vsel %vm706_vm1, %v3232_v31, %v3241_v47  ;;  %v15209_v31 = vor.u32 %v14118_v3, %v14110_v44 }
 0x367   : > { %3543 = vmatmul.bf16.gmra.mxu3 %v3430_v12  ;;  %v12658_v12 = vld [vmem:[%s14189_s26 + $0x178] sm:$0xff] }
 0x368   : > { %3877 = vmatmul.bf16.gmra.mxu0 %v3744_v40  ;;  %v3244_v40 = vshrl.u32 %v15170_v43, 16  ;;  %4342 = vmatpush.bf16.msrb.mxu2 %v12658_v12  ;;  %v3256_v33 = vshll.u32 %v15209_v31, 16  ;;  %v3453_v12 = vrot.slane %v3451_v56, 4  ;;  %v3036_v8 = vrot.slane %v15209_v31, 3 }
 0x36a   : > { %v3246_v48 = vrot.slane %v3244_v40, 2  ;;  %v3443_v62 = vrot.slane %v3244_v40, 3  ;;  %v3258_v42 = vrot.slane %v3256_v33, 3  ;;  %v12652_v40 = vld [vmem:[%s14189_s26 + $0x148] sm:$0xff] }
 0x36b   : > { %v15258_v33 = vld [vmem:[%s14355_s22 + $0x68] sm:$0xff]  }
 0x36c   : > { %4343 = vmatpush.bf16.msrb.mxu2 %v12657_v60  ;;  %v15190_v19 = vor.u32 %v3249_v32, %v3246_v48  ;;  %v15195_v22 = vor.u32 %v3444_v52, %v3443_v62  ;;  %v3784_v60 = vrot.slane %v3782_v27, 3  ;;  %v12669_v32 = vld [vmem:[%s14189_s26 + $0x188] sm:$0xff]  ;;  %v12651_v62 = vld [vmem:[%s14189_s26 + $0x140] sm:$0xff]  ;;  %v4522_v56 = vshll.u32 %v15258_v33, 16 }
 0x36e   : > { %v3251_v30 = vsel %vm706_vm1, %v3241_v47, %v15190_v19 }
 0x375   : > { %3130 = vmatmul.bf16.gmra.mxu1 %v3029_v29  ;;  %v12656_v29 = vld [vmem:[%s14189_s26 + $0x168] sm:$0xff] }
 0x376   : > { %3353 = vmatmul.bf16.gmra.mxu2 %v3224_v25  ;;  %v3034_v25 = vrot.slane %v15170_v43, 3  ;;  %v12691_v43 = vld [vmem:[%s14189_s26 + $0x238] sm:$0xff] }
 0x377   : > { %3548 = vmatmul.bf16.gmra.mxu3 %v3434_v58  ;;  %v3775_v58 = vrot.slane %v3773_v9, 3  ;;  %4344 = vmatpush.bf16.msrb.mxu2 %v12656_v29  ;;  %v12679_v9 = vld [vmem:[%s14189_s26 + $0x1d8] sm:$0xff] }
 0x378   : > { %3882 = vmatmul.bf16.gmra.mxu0 %v3753_v26  ;;  %v3778_v26 = vrot.slane %v3776_v4, 4  ;;  %v3035_v39 = vsel %vm559_vm0, %v3032_v34, %v3034_v25  ;;  %v3037_v3 = vsel %vm559_vm0, %v3034_v25, %v3036_v8  ;;  %5065 = vmatpush.bf16.msra.mxu1 %v12691_v43  ;;  %v12642_v43 = vld [vmem:[%s14355_s22 + $0x70] sm:$0xff] }
 0x37a   : > { %v15207_v21 = vor.u32 %v3778_v26, %v3775_v58  ;;  %v12668_v58 = vld [vmem:[%s14189_s26 + $0x180] sm:$0xff]  ;;  %v12678_v26 = vld [vmem:[%s14189_s26 + $0x1d0] sm:$0xff] }
 0x37b   : > { %4345 = vmatpush.bf16.msrb.mxu2 %v12655_v54  ;;  %v12677_v54 = vld [vmem:[%s14189_s26 + $0x1c8] sm:$0xff] }
 0x37f   : > { %4346 = vmatpush.bf16.msrb.mxu2 %v12654_v38 }
 0x383   : > { %4347 = vmatpush.bf16.msrb.mxu2 %v12653_v13 }
 0x385   : > { %3135 = vmatmul.bf16.gmra.mxu1 %v3031_v51  ;;  %v12682_v51 = vld [vmem:[%s14189_s26 + $0x1f0] sm:$0xff] }
 0x386   : > { %3358 = vmatmul.bf16.gmra.mxu2 %v3233_v0  ;;  %v3446_v0 = vsel %vm948_vm2, %v3441_v5, %v15195_v22  ;;  %4850 = vmatpush.bf16.msra.mxu0 %v12682_v51  ;;  %v3785_v5 = vshll.u32 %v3691_v10, 16 }
 0x387   : > { %3553 = vmatmul.bf16.gmra.mxu3 %v3438_v57  ;;  %v3780_v57 = vsel %vm948_vm2, %v3770_v63, %v15207_v21  ;;  %4348 = vmatpush.bf16.msrb.mxu2 %v12652_v40  ;;  %v12690_v40 = vld [vmem:[%s14189_s26 + $0x230] sm:$0xff] }
 0x388   : > { %3887 = vmatmul.bf16.gmra.mxu0 %v3762_v50  ;;  %v3253_v50 = vshrl.u32 %v15209_v31, 16  ;;  %v3787_v48 = vrot.slane %v3785_v5, 4  ;;  %v12676_v31 = vld [vmem:[%s14189_s26 + $0x1c0] sm:$0xff]  ;;  %v4520_v5 = vshrl.u32 %v15258_v33, 16  ;;  %5066 = vmatpush.bf16.msra.mxu1 %v12690_v40 }
 0x38a   : > { %4851 = vmatpush.bf16.msra.mxu0 %v12681_v17  ;;  %v3255_v47 = vrot.slane %v3253_v50, 2  ;;  %v3788_v14 = vor.u32 %v3787_v48, %v3784_v60  ;;  %v12641_v17 = vld [vmem:[%s14355_s22 + $0x68] sm:$0xff] }
 0x38b   : > { %4349 = vmatpush.bf16.msrb.mxu2 %v12651_v62  ;;  %v4204_v27 = vshll.u32 %v12641_v17, 16 }
 0x38c   : > { %v3259_v16 = vor.u32 %v3258_v42, %v3255_v47 }
 0x38d   : > { %v4206_v60 = vrot.slane %v4204_v27, 1 }
 0x38e   : > { %v3260_v29 = vsel %vm706_vm1, %v15190_v19, %v3259_v16  ;;  %v3789_v19 = vsel %vm948_vm2, %v15207_v21, %v3788_v14 }
 0x395   : > { %3140 = vmatmul.bf16.gmra.mxu1 %v3033_v53  ;;  %v12670_v53 = vld [vmem:[%s14189_s26 + $0x190] sm:$0xff] }
 0x396   : > { %3363 = vmatmul.bf16.gmra.mxu2 %v3242_v59  ;;  %v12680_v59 = vld [vmem:[%s14189_s26 + $0x1e0] sm:$0xff]  ;;  %4670 = vmatpush.bf16.msrb.mxu3 %v12670_v53  ;;  %v4524_v53 = vrot.slane %v4522_v56, 1  ;;  %v12689_v56 = vld [vmem:[%s14189_s26 + $0x228] sm:$0xff] }
 0x397   : > { %3558 = vmatmul.bf16.gmra.mxu3 %v3442_v36  ;;  %v3450_v36 = vrot.slane %v3448_v7, 3  ;;  %4852 = vmatpush.bf16.msra.mxu0 %v12680_v59 }
 0x398   : > { %3892 = vmatmul.bf16.gmra.mxu0 %v3771_v23  ;;  %5067 = vmatpush.bf16.msra.mxu1 %v12689_v56 }
 0x399   : > { %v3454_v4 = vor.u32 %v3453_v12, %v3450_v36  ;;  %v13719_v36 = vld [vmem:[%s14355_s22 + $0x68] sm:$0xf0]  ;;  %v13720_v12 = vld [vmem:[%s14355_s22 + $0x68] sm:$0xe] }
 0x39a   : > { %4671 = vmatpush.bf16.msrb.mxu3 %v12669_v32  ;;  %v15274_v48 = vor.u32 %v13720_v12, %v13719_v36  ;;  %v4525_v32 = vor.u32 %v4524_v53, %v4520_v5  ;;  %v12643_v53 = vld [vmem:[%s14355_s22 + $0x78] sm:$0xff] }
 0x39b   : > { %4853 = vmatpush.bf16.msra.mxu0 %v12679_v9  ;;  %v3455_v45 = vsel %vm948_vm2, %v15195_v22, %v3454_v4 }
 0x39e   : > { %4672 = vmatpush.bf16.msrb.mxu3 %v12668_v58 }
 0x39f   : > { %4854 = vmatpush.bf16.msra.mxu0 %v12678_v26 }
 0x3a2   : > { %v3106_v61 = vpop.f32.mrf.mxu1 }
 0x3a3   : > { %4855 = vmatpush.bf16.msra.mxu0 %v12677_v54 }
 0x3a5   : > { %3145 = vmatmul.bf16.gmra.mxu1 %v3035_v39  ;;  %v3858_v55 = vpop.f32.mrf.mxu0 }
 0x3a6   : > { %3368 = vmatmul.bf16.gmra.mxu2 %v3251_v30 }
 0x3a7   : > { %3563 = vmatmul.bf16.gmra.mxu3 %v3446_v0  ;;  %4856 = vmatpush.bf16.msra.mxu0 %v12676_v31 }
 0x3a8   : > { %3897 = vmatmul.bf16.gmra.mxu0 %v3780_v57  ;;  %v12640_v57 = vld [vmem:[%s14355_s22 + $0x60] sm:$0xff] }
 0x3a9   : > { %v3329_v28 = vpop.f32.mrf.mxu2  ;;  %v4199_v7 = vshll.u32 %v12640_v57, 16 }
 0x3aa   : > { %v3330_v15 = vadd.f32 %v3329_v28, %v3106_v61  ;;  %v3524_v6 = vpop.f32.mrf.mxu3  ;;  %v3108_v34 = vpop.f32.mrf.mxu1  ;;  %v15265_v28 = vld [vmem:[%s14355_s22 + $0x70] sm:$0xff] }
 0x3ab   : > { %v4201_v42 = vrot.slane %v4199_v7, 1 }
 0x3ac   : > { %v3578_v63 = vadd.f32 %v3524_v6, %v3330_v15 }
 0x3ad   : > { %v3860_v23 = vpop.f32.mrf.mxu0 }
 0x3ae   : > { %v15232_v18 = vadd.f32 %v3858_v55, %v3578_v63  ;;  %v4527_v63 = vshll.u32 %v15265_v28, 16 }
 0x3b0   : > { %v4529_v9 = vrot.slane %v4527_v63, 1 }
 0x3b1   : > { %v3331_v24 = vpop.f32.mrf.mxu2 }
 0x3b2   : > { %v3332_v52 = vadd.f32 %v3331_v24, %v3108_v34  ;;  %v3526_v1 = vpop.f32.mrf.mxu3  ;;  %v3111_v44 = vpop.f32.mrf.mxu1  ;;  %v4197_v34 = vshrl.u32 %v12640_v57, 16  ;;  %v4530_v58 = vsel %vm1745_vm3, %v4525_v32, %v4529_v9 }
 0x3b4   : > { %v3579_v37 = vadd.f32 %v3526_v1, %v3332_v52  ;;  %v13708_v1 = vld [vmem:[%s14355_s22 + $0x60] sm:$0xff]  }
 0x3b5   : > { %3150 = vmatmul.bf16.gmra.mxu1 %v3037_v3  ;;  %v3863_v25 = vpop.f32.mrf.mxu0  ;;  %v4769_v3 = vrot.slane %v15274_v48, 1 }
 0x3b6   : > { %v15247_v46 = vadd.f32 %v3860_v23, %v3579_v37  ;;  %3373 = vmatmul.bf16.gmra.mxu2 %v3260_v29  ;;  %v4770_v29 = vrot.slane %v15265_v28, 1 }
 0x3b7   : > { %3568 = vmatmul.bf16.gmra.mxu3 %v3455_v45 }
 0x3b8   : > { %3902 = vmatmul.bf16.gmra.mxu0 %v3789_v19  ;;  %v4771_v45 = vsel %vm2321_vm4, %v4769_v3, %v4770_v29 }
 0x3b9   : > { %v3334_v39 = vpop.f32.mrf.mxu2 }
 0x3ba   : > { %v3335_v22 = vadd.f32 %v3334_v39, %v3111_v44  ;;  %v3529_v30 = vpop.f32.mrf.mxu3  ;;  %v3113_v61 = vpop.f32.mrf.mxu1 }
 0x3bc   : > { %v3580_v49 = vadd.f32 %v3529_v30, %v3335_v22  ;;  %v4208_v30 = vshrl.u32 %v12641_v17, 16 }
 0x3bd   : > { %v3865_v51 = vpop.f32.mrf.mxu0 }
 0x3be   : > { %v15254_v41 = vadd.f32 %v3863_v25, %v3580_v49  ;;  %v15288_v25 = vld [vmem:[%s14355_s22 + $0x78] sm:$0xff]  ;;  %v4531_v49 = vshrl.u32 %v15265_v28, 16 }
 0x3c0   : > { %v4533_v57 = vor.u32 %v4531_v49, %v4529_v9  ;;  %v4539_v9 = vshrl.u32 %v15288_v25, 16 }
 0x3c1   : > { %v3336_v0 = vpop.f32.mrf.mxu2 }
 0x3c2   : > { %v3337_v21 = vadd.f32 %v3336_v0, %v3113_v61  ;;  %v3531_v38 = vpop.f32.mrf.mxu3  ;;  %v3116_v55 = vpop.f32.mrf.mxu1  ;;  %v4212_v61 = vshll.u32 %v12642_v43, 16 }
 0x3c4   : > { %v3581_v50 = vadd.f32 %v3531_v38, %v3337_v21  ;;  %v4210_v38 = vor.u32 %v4208_v30, %v4206_v60 }
 0x3c5   : > { %3155 = vmatmul.bf16.gmra.mxu1 %v3036_v8  ;;  %v3868_v11 = vpop.f32.mrf.mxu0 }
 0x3c6   : > { %v15260_v10 = vadd.f32 %v3865_v51, %v3581_v50  ;;  %3378 = vmatmul.bf16.gmra.mxu2 %v3259_v16  ;;  %v4202_v16 = vor.u32 %v4201_v42, %v4197_v34  ;;  %v4535_v51 = vshll.u32 %v15288_v25, 16 }
 0x3c7   : > { %3573 = vmatmul.bf16.gmra.mxu3 %v3454_v4 }
 0x3c8   : > { %3907 = vmatmul.bf16.gmra.mxu0 %v3788_v14  ;;  %v4207_v44 = vsel %vm1745_vm3, %v4202_v16, %v4206_v60  ;;  %v4537_v50 = vrot.slane %v4535_v51, 1  ;;  %v4216_v16 = vshrl.u32 %v12642_v43, 16  ;;  %v4220_v60 = vshll.u32 %v12643_v53, 16 }
 0x3c9   : > { %v3339_v13 = vpop.f32.mrf.mxu2 }
 0x3ca   : > { %v3340_v15 = vadd.f32 %v3339_v13, %v3116_v55  ;;  %v3534_v6 = vpop.f32.mrf.mxu3  ;;  %v3118_v47 = vpop.f32.mrf.mxu1  ;;  %v4214_v55 = vrot.slane %v4212_v61, 1  ;;  %v12644_v61 = vld [vmem:[%s14355_s22 + $0x80] sm:$0xff] }
 0x3cc   : > { %v3582_v59 = vadd.f32 %v3534_v6, %v3340_v15  ;;  %v4215_v15 = vsel %vm1745_vm3, %v4210_v38, %v4214_v55  ;;  %v4772_v6 = vrot.slane %v15288_v25, 1 }
 0x3cd   : > { %v3870_v8 = vpop.f32.mrf.mxu0 }
 0x3ce   : > { %v15272_v23 = vadd.f32 %v3868_v11, %v3582_v59  ;;  %v4773_v5 = vsel %vm2321_vm4, %v4770_v29, %v4772_v6  ;;  %v15308_v59 = vld [vmem:[%s14355_s22 + $0x80] sm:$0xff] }
 0x3cf   : > { %v4774_v43 = vrot.slane %v15308_v59, 1  ;;  %v4547_v56 = vshrl.u32 %v15308_v59, 16 }
 0x3d1   : > { %v3341_v4 = vpop.f32.mrf.mxu2  ;;  %v4775_v30 = vsel %vm2321_vm4, %v4772_v6, %v4774_v43 }
 0x3d2   : > { %v3342_v24 = vadd.f32 %v3341_v4, %v3118_v47  ;;  %v3536_v62 = vpop.f32.mrf.mxu3  ;;  %v3121_v52 = vpop.f32.mrf.mxu1  ;;  %v4538_v47 = vsel %vm1745_vm3, %v4533_v57, %v4537_v50 }
 0x3d4   : > { %v3583_v14 = vadd.f32 %v3536_v62, %v3342_v24  ;;  %v4218_v62 = vor.u32 %v4216_v16, %v4214_v55 }
 0x3d5   : > { %4027 = vmatmul.bf16.vlgmr.msrb.gmra.mxu1 %v13708_v1  ;;  %v3873_v37 = vpop.f32.mrf.mxu0  ;;  %v4541_v1 = vor.u32 %v4539_v9, %v4537_v50 }
 0x3d6   : > { %v15283_v26 = vadd.f32 %v3870_v8, %v3583_v14  ;;  %4350 = vmatmul.bf16.vlgmr.msrb.gmra.mxu2 %v4207_v44 }
 0x3d7   : > { %4673 = vmatmul.bf16.vlgmr.msrb.gmra.mxu3 %v4530_v58 }
 0x3d8   : > { %4857 = vmatmul.bf16.vlgmr.msra.gmra.mxu0 %v4771_v45 }
 0x3d9   : > { %v3344_v19 = vpop.f32.mrf.mxu2 }
 0x3da   : > { %v3345_v54 = vadd.f32 %v3344_v19, %v3121_v52  ;;  %v3539_v39 = vpop.f32.mrf.mxu3  ;;  %v3123_v22 = vpop.f32.mrf.mxu1  ;;  %v4222_v52 = vrot.slane %v4220_v60, 1 }
 0x3dc   : > { %v3584_v31 = vadd.f32 %v3539_v39, %v3345_v54  ;;  %v4223_v45 = vsel %vm1745_vm3, %v4218_v62, %v4222_v52 }
 0x3dd   : > { %v3875_v21 = vpop.f32.mrf.mxu0 }
 0x3de   : > { %v15292_v0 = vadd.f32 %v3873_v37, %v3584_v31  ;;  %v13710_v37 = vld [vmem:[%s14355_s22 + $0x70] sm:$0xff]   ;;  %v12688_v31 = vld [vmem:[%s14189_s26 + $0x220] sm:$0xff] }
 0x3df   : > { %5068 = vmatpush.bf16.msra.mxu1 %v12688_v31 }
 0x3e1   : > { %v3346_v11 = vpop.f32.mrf.mxu2 }
 0x3e2   : > { %v3347_v17 = vadd.f32 %v3346_v11, %v3123_v22  ;;  %v3541_v7 = vpop.f32.mrf.mxu3  ;;  %v3126_v13 = vpop.f32.mrf.mxu1  ;;  %v4224_v11 = vshrl.u32 %v12643_v53, 16 }
 0x3e4   : > { %v3585_v34 = vadd.f32 %v3541_v7, %v3347_v17  ;;  %v4228_v17 = vshll.u32 %v12644_v61, 16 }
 0x3e5   : > { %4032 = vmatmul.bf16.gmra.mxu1 %v15258_v33  ;;  %v3878_v27 = vpop.f32.mrf.mxu0  ;;  %v4543_v33 = vshll.u32 %v15308_v59, 16 }
 0x3e6   : > { %v15302_v42 = vadd.f32 %v3875_v21, %v3585_v34  ;;  %4355 = vmatmul.bf16.gmra.mxu2 %v4215_v15  ;;  %v15328_v21 = vld [vmem:[%s14355_s22 + $0x88] sm:$0xff]  ;;  %v4226_v34 = vor.u32 %v4224_v11, %v4222_v52 }
 0x3e7   : > { %4678 = vmatmul.bf16.gmra.mxu3 %v4538_v47  ;;  %v4545_v44 = vrot.slane %v4543_v33, 1  ;;  %v4230_v47 = vrot.slane %v4228_v17, 1  ;;  %v4776_v60 = vrot.slane %v15328_v21, 1 }
 0x3e8   : > { %4862 = vmatmul.bf16.gmra.mxu0 %v4773_v5 }
 0x3e9   : > { %v3349_v36 = vpop.f32.mrf.mxu2  ;;  %v4546_v54 = vsel %vm1745_vm3, %v4541_v1, %v4545_v44  ;;  %v4231_v16 = vsel %vm1745_vm3, %v4226_v34, %v4230_v47  ;;  %v4777_v1 = vsel %vm2321_vm4, %v4774_v43, %v4776_v60  ;;  %v13712_v34 = vld [vmem:[%s14355_s22 + $0x80] sm:$0xff]  }
 0x3ea   : > { %v3350_v12 = vadd.f32 %v3349_v36, %v3126_v13  ;;  %v3544_v40 = vpop.f32.mrf.mxu3  ;;  %v3128_v8 = vpop.f32.mrf.mxu1  ;;  %v17269_v13 = vshll.u32 %v15328_v21, 16 }
 0x3ec   : > { %v3586_v32 = vadd.f32 %v3544_v40, %v3350_v12  ;;  %v4553_v5 = vrot.slane %v17269_v13, 1 }
 0x3ed   : > { %v3880_v24 = vpop.f32.mrf.mxu0 }
 0x3ee   : > { %v15312_v4 = vadd.f32 %v3878_v27, %v3586_v32  ;;  %v4549_v27 = vor.u32 %v4547_v56, %v4545_v44  ;;  %v12645_v44 = vld [vmem:[%s14355_s22 + $0x88] sm:$0xff] }
 0x3f1   : > { %v3351_v3 = vpop.f32.mrf.mxu2 }
 0x3f2   : > { %v3352_v29 = vadd.f32 %v3351_v3, %v3128_v8  ;;  %v3546_v14 = vpop.f32.mrf.mxu3  ;;  %v3131_v58 = vpop.f32.mrf.mxu1  ;;  %v13711_v8 = vld [vmem:[%s14355_s22 + $0x78] sm:$0xff]   ;;  %v15347_v3 = vld [vmem:[%s14355_s22 + $0x90] sm:$0xff] }
 0x3f4   : > { %v3587_v19 = vadd.f32 %v3546_v14, %v3352_v29 }
 0x3f5   : > { %4037 = vmatmul.bf16.gmra.mxu1 %v13710_v37  ;;  %v3883_v22 = vpop.f32.mrf.mxu0 }
 0x3f6   : > { %v15322_v39 = vadd.f32 %v3880_v24, %v3587_v19  ;;  %4360 = vmatmul.bf16.gmra.mxu2 %v4223_v45  ;;  %v4554_v24 = vsel %vm1745_vm3, %v4549_v27, %v4553_v5  ;;  %v4232_v45 = vshrl.u32 %v12644_v61, 16  ;;  %v4236_v19 = vshll.u32 %v12645_v44, 16 }
 0x3f7   : > { %4683 = vmatmul.bf16.gmra.mxu3 %v4546_v54 }
 0x3f8   : > { %4867 = vmatmul.bf16.gmra.mxu0 %v4775_v30  ;;  %v17267_v30 = vshll.u32 %v15347_v3, 16 }
 0x3f9   : > { %v3354_v38 = vpop.f32.mrf.mxu2 }
 0x3fa   : > { %v3355_v55 = vadd.f32 %v3354_v38, %v3131_v58  ;;  %v3549_v57 = vpop.f32.mrf.mxu3  ;;  %v3133_v50 = vpop.f32.mrf.mxu1  ;;  %v12687_v38 = vld [vmem:[%s14189_s26 + $0x218] sm:$0xff]  ;;  %v4561_v11 = vrot.slane %v17267_v30, 1 }
 0x3fb   : > { %5069 = vmatpush.bf16.msra.mxu1 %v12687_v38 }
 0x3fc   : > { %v3588_v7 = vadd.f32 %v3549_v57, %v3355_v55  ;;  %v4234_v55 = vor.u32 %v4232_v45, %v4230_v47  ;;  %v4238_v57 = vrot.slane %v4236_v19, 1 }
 0x3fd   : > { %v3885_v6 = vpop.f32.mrf.mxu0 }
 0x3fe   : > { %v15332_v15 = vadd.f32 %v3883_v22, %v3588_v7  ;;  %v17270_v22 = vshrl.u32 %v15328_v21, 16  ;;  %v4239_v27 = vsel %vm1745_vm3, %v4234_v55, %v4238_v57 }
 0x401   : > { %v3356_v36 = vpop.f32.mrf.mxu2 }
 0x402   : > { %v3357_v53 = vadd.f32 %v3356_v36, %v3133_v50  ;;  %v3551_v12 = vpop.f32.mrf.mxu3  ;;  %v3136_v40 = vpop.f32.mrf.mxu1  ;;  %v4557_v50 = vor.u32 %v17270_v22, %v4553_v5  ;;  %v4778_v36 = vrot.slane %v15347_v3, 1 }
 0x404   : > { %v3589_v32 = vadd.f32 %v3551_v12, %v3357_v53  ;;  %v4562_v53 = vsel %vm1745_vm3, %v4557_v50, %v4561_v11 }
 0x405   : > { %4042 = vmatmul.bf16.gmra.mxu1 %v13711_v8  ;;  %v3888_v52 = vpop.f32.mrf.mxu0  ;;  %v12646_v8 = vld [vmem:[%s14355_s22 + $0x90] sm:$0xff] }
 0x406   : > { %v15342_v62 = vadd.f32 %v3885_v6, %v3589_v32  ;;  %4365 = vmatmul.bf16.gmra.mxu2 %v4231_v16  ;;  %v15367_v16 = vld [vmem:[%s14355_s22 + $0x98] sm:$0xff] }
 0x407   : > { %4688 = vmatmul.bf16.gmra.mxu3 %v4554_v24  ;;  %v17261_v45 = vshll.u32 %v15367_v16, 16 }
 0x408   : > { %4872 = vmatmul.bf16.gmra.mxu0 %v4777_v1 }
 0x409   : > { %v3359_v29 = vpop.f32.mrf.mxu2  ;;  %v4569_v55 = vrot.slane %v17261_v45, 1  ;;  %v13715_v45 = vld [vmem:[%s14355_s22 + $0x98] sm:$0xff]  }
 0x40a   : > { %v3360_v14 = vadd.f32 %v3359_v29, %v3136_v40  ;;  %v3554_v58 = vpop.f32.mrf.mxu3  ;;  %v3138_v37 = vpop.f32.mrf.mxu1  ;;  %v4779_v40 = vsel %vm2321_vm4, %v4776_v60, %v4778_v36  ;;  %v4240_v29 = vshrl.u32 %v12645_v44, 16 }
 0x40c   : > { %v3590_v54 = vadd.f32 %v3554_v58, %v3360_v14  ;;  %v4244_v14 = vshll.u32 %v12646_v8, 16 }
 0x40d   : > { %v3890_v43 = vpop.f32.mrf.mxu0 }
 0x40e   : > { %v15351_v31 = vadd.f32 %v3888_v52, %v3590_v54  ;;  %v4242_v54 = vor.u32 %v4240_v29, %v4238_v57  ;;  %v4246_v38 = vrot.slane %v4244_v14, 1  ;;  %v4248_v14 = vshrl.u32 %v12646_v8, 16 }
 0x411   : > { %v3361_v61 = vpop.f32.mrf.mxu2 }
 0x412   : > { %v3362_v17 = vadd.f32 %v3361_v61, %v3138_v37  ;;  %v3556_v7 = vpop.f32.mrf.mxu3  ;;  %v3141_v6 = vpop.f32.mrf.mxu1  ;;  %v17268_v37 = vshrl.u32 %v15347_v3, 16 }
 0x414   : > { %v3591_v47 = vadd.f32 %v3556_v7, %v3362_v17  ;;  %v13713_v7 = vld [vmem:[%s14355_s22 + $0x88] sm:$0xff]  }
 0x415   : > { %4047 = vmatmul.bf16.gmra.mxu1 %v13712_v34  ;;  %v3893_v5 = vpop.f32.mrf.mxu0  ;;  %v4780_v34 = vrot.slane %v15367_v16, 1 }
 0x416   : > { %v15362_v12 = vadd.f32 %v3890_v43, %v3591_v47  ;;  %4370 = vmatmul.bf16.gmra.mxu2 %v4239_v27  ;;  %v4565_v43 = vor.u32 %v17268_v37, %v4561_v11  ;;  %v12686_v47 = vld [vmem:[%s14189_s26 + $0x210] sm:$0xff] }
 0x417   : > { %4693 = vmatmul.bf16.gmra.mxu3 %v4562_v53  ;;  %5070 = vmatpush.bf16.msra.mxu1 %v12686_v47  ;;  %v13714_v47 = vld [vmem:[%s14355_s22 + $0x90] sm:$0xff]  }
 0x418   : > { %4877 = vmatmul.bf16.gmra.mxu0 %v4779_v40  ;;  %v4570_v57 = vsel %vm1745_vm3, %v4565_v43, %v4569_v55  ;;  %v12647_v40 = vld [vmem:[%s14355_s22 + $0x98] sm:$0xff] }
 0x419   : > { %v3364_v32 = vpop.f32.mrf.mxu2 }
 0x41a   : > { %v3365_v24 = vadd.f32 %v3364_v32, %v3141_v6  ;;  %v3559_v52 = vpop.f32.mrf.mxu3  ;;  %v3143_v1 = vpop.f32.mrf.mxu1  ;;  %v4247_v6 = vsel %vm1745_vm3, %v4242_v54, %v4246_v38  ;;  %v15387_v32 = vld [vmem:[%s14355_s22 + $0xa0] sm:$0xff]  ;;  %v17264_v54 = vshrl.u32 %v15367_v16, 16 }
 0x41b   : > { %v17260_v43 = vshll.u32 %v15387_v32, 16 }
 0x41c   : > { %v3592_v58 = vadd.f32 %v3559_v52, %v3365_v24 }
 0x41d   : > { %v3895_v60 = vpop.f32.mrf.mxu0 }
 0x41e   : > { %v15371_v19 = vadd.f32 %v3893_v5, %v3592_v58  ;;  %v4781_v5 = vsel %vm2321_vm4, %v4778_v36, %v4780_v34  ;;  %v4252_v58 = vshll.u32 %v12647_v40, 16 }
 0x421   : > { %v3366_v50 = vpop.f32.mrf.mxu2 }
 0x422   : > { %v3367_v44 = vadd.f32 %v3366_v50, %v3143_v1  ;;  %v3561_v61 = vpop.f32.mrf.mxu3  ;;  %v3146_v17 = vpop.f32.mrf.mxu1 }
 0x424   : > { %v3593_v27 = vadd.f32 %v3561_v61, %v3367_v44  ;;  %v4250_v44 = vor.u32 %v4248_v14, %v4246_v38  ;;  %v4254_v61 = vrot.slane %v4252_v58, 1  ;;  %v15406_v14 = vld [vmem:[%s14355_s22 + $0xa8] sm:$0xff] }
 0x425   : > { %4052 = vmatmul.bf16.gmra.mxu1 %v13713_v7  ;;  %v3898_v11 = vpop.f32.mrf.mxu0  ;;  %v4573_v7 = vor.u32 %v17264_v54, %v4569_v55 }
 0x426   : > { %v15382_v53 = vadd.f32 %v3895_v60, %v3593_v27  ;;  %4375 = vmatmul.bf16.gmra.mxu2 %v4247_v6 }
 0x427   : > { %4698 = vmatmul.bf16.gmra.mxu3 %v4570_v57 }
 0x428   : > { %4882 = vmatmul.bf16.gmra.mxu0 %v4781_v5  ;;  %v4255_v5 = vsel %vm1745_vm3, %v4250_v44, %v4254_v61 }
 0x429   : > { %v3369_v24 = vpop.f32.mrf.mxu2 }
 0x42a   : > { %v3370_v52 = vadd.f32 %v3369_v24, %v3146_v17  ;;  %v3564_v1 = vpop.f32.mrf.mxu3  ;;  %v3148_v29 = vpop.f32.mrf.mxu1  ;;  %v4577_v17 = vrot.slane %v17260_v43, 1 }
 0x42c   : > { %v3594_v60 = vadd.f32 %v3564_v1, %v3370_v52  ;;  %v4578_v24 = vsel %vm1745_vm3, %v4573_v7, %v4577_v17 }
 0x42d   : > { %v3900_v36 = vpop.f32.mrf.mxu0 }
 0x42e   : > { %v15391_v50 = vadd.f32 %v3898_v11, %v3594_v60  ;;  %v4782_v11 = vrot.slane %v15387_v32, 1 }
 0x430   : > { %v4783_v1 = vsel %vm2321_vm4, %v4780_v34, %v4782_v11 }
 0x431   : > { %v3371_v6 = vpop.f32.mrf.mxu2 }
 0x432   : > { %v3372_v8 = vadd.f32 %v3371_v6, %v3148_v29  ;;  %v3566_v27 = vpop.f32.mrf.mxu3  ;;  %v3151_v57 = vpop.f32.mrf.mxu1  ;;  %v12648_v29 = vld [vmem:[%s14355_s22 + $0xa0] sm:$0xff]  ;;  %v12685_v6 = vld [vmem:[%s14189_s26 + $0x208] sm:$0xff] }
 0x433   : > { %v4260_v7 = vshll.u32 %v12648_v29, 16  ;;  %5071 = vmatpush.bf16.msra.mxu1 %v12685_v6 }
 0x434   : > { %v3595_v38 = vadd.f32 %v3566_v27, %v3372_v8  ;;  %v4256_v8 = vshrl.u32 %v12647_v40, 16  ;;  %v17263_v27 = vshrl.u32 %v15387_v32, 16 }
 0x435   : > { %4057 = vmatmul.bf16.gmra.mxu1 %v13714_v47  ;;  %v3903_v55 = vpop.f32.mrf.mxu0  ;;  %v17262_v47 = vshll.u32 %v15406_v14, 16 }
 0x436   : > { %v15401_v52 = vadd.f32 %v3900_v36, %v3595_v38  ;;  %4380 = vmatmul.bf16.gmra.mxu2 %v4255_v5  ;;  %v4258_v38 = vor.u32 %v4256_v8, %v4254_v61 }
 0x437   : > { %4703 = vmatmul.bf16.gmra.mxu3 %v4578_v24  ;;  %v4262_v24 = vrot.slane %v4260_v7, 1 }
 0x438   : > { %4887 = vmatmul.bf16.gmra.mxu0 %v4783_v1  ;;  %v4585_v1 = vrot.slane %v17262_v47, 1 }
 0x439   : > { %v3374_v58 = vpop.f32.mrf.mxu2  ;;  %v4263_v6 = vsel %vm1745_vm3, %v4258_v38, %v4262_v24 }
 0x43a   : > { %v3375_v60 = vadd.f32 %v3374_v58, %v3151_v57  ;;  %v3569_v44 = vpop.f32.mrf.mxu3  ;;  %v3153_v43 = vpop.f32.mrf.mxu1  ;;  %v4581_v57 = vor.u32 %v17263_v27, %v4577_v17 }
 0x43c   : > { %v3596_v36 = vadd.f32 %v3569_v44, %v3375_v60  ;;  %v4586_v61 = vsel %vm1745_vm3, %v4581_v57, %v4585_v1  ;;  %v4264_v57 = vshrl.u32 %v12648_v29, 16 }
 0x43d   : > { %v3905_v34 = vpop.f32.mrf.mxu0 }
 0x43e   : > { %v15411_v5 = vadd.f32 %v3903_v55, %v3596_v36  ;;  %v4784_v55 = vrot.slane %v15406_v14, 1  ;;  %v4266_v54 = vor.u32 %v4264_v57, %v4262_v24 }
 0x440   : > { %v4785_v7 = vsel %vm2321_vm4, %v4782_v11, %v4784_v55  ;;  %v12684_v11 = vld [vmem:[%s14189_s26 + $0x200] sm:$0xff] }
 0x441   : > { %v3376_v40 = vpop.f32.mrf.mxu2  ;;  %5072 = vmatpush.bf16.msra.mxu1 %v12684_v11 }
 0x442   : > { %v3377_v58 = vadd.f32 %v3376_v40, %v3153_v43  ;;  %v3571_v60 = vpop.f32.mrf.mxu3  ;;  %v3156_v44 = vpop.f32.mrf.mxu1  ;;  %v12649_v43 = vld [vmem:[%s14355_s22 + $0xa8] sm:$0xff]  ;;  %v15426_v40 = vld [vmem:[%s14355_s22 + $0xb0] sm:$0xff] }
 0x443   : > { %v4786_v24 = vrot.slane %v15426_v40, 1  ;;  %v4272_v13 = vshrl.u32 %v12649_v43, 16 }
 0x444   : > { %v3597_v36 = vadd.f32 %v3571_v60, %v3377_v58 }
 0x445   : > { %4062 = vmatmul.bf16.gmra.mxu1 %v13715_v45  ;;  %v3908_v17 = vpop.f32.mrf.mxu0  ;;  %v17265_v45 = vshrl.u32 %v15406_v14, 16 }
 0x446   : > { %v15421_v8 = vadd.f32 %v3905_v34, %v3597_v36  ;;  %4385 = vmatmul.bf16.gmra.mxu2 %v4263_v6  ;;  %v4268_v34 = vshll.u32 %v12649_v43, 16  ;;  %v17266_v6 = vshll.u32 %v15426_v40, 16 }
 0x447   : > { %4708 = vmatmul.bf16.gmra.mxu3 %v4586_v61 }
 0x448   : > { %4892 = vmatmul.bf16.gmra.mxu0 %v4785_v7  ;;  %v4593_v29 = vrot.slane %v17266_v6, 1  ;;  %v15438_v7 = vld [vmem:[%s14355_s22 + $0xb8] sm:$0xf] }
 0x449   : > { %v3379_v47 = vpop.f32.mrf.mxu2  ;;  %v17271_v6 = vunpack.c.l.b16 %v15438_v7 }
 0x44a   : > { %v3380_v27 = vadd.f32 %v3379_v47, %v3156_v44  ;;  %v3574_v38 = vpop.f32.mrf.mxu3  ;;  %v3158_v58 = vpop.f32.mrf.mxu1  ;;  %v4270_v47 = vrot.slane %v4268_v34, 1  ;;  %v4589_v44 = vor.u32 %v17265_v45, %v4585_v1  ;;  %v11198_v1 = vld [vmem:[%s14355_s22 + $0xb0] sm:$0xf]  ;;  %v12650_v45 = vld [vmem:[%s14355_s22 + $0xb0] sm:$0x10] }
 0x44b   : > { %v11199_v30 = vor.u32 %v12650_v45, %v11198_v1  ;;  %v4962_v45 = vrot.slane %v4527_v63, 2 }
 0x44c   : > { %v3598_v60 = vadd.f32 %v3574_v38, %v3380_v27  ;;  %v4447_v38 = vld [vmem:[%s14355_s22 + $0xbc] sm:$0x1]  ;;  %v4594_v34 = vsel %vm1745_vm3, %v4589_v44, %v4593_v29  ;;  %v4274_v1 = vor.u32 %v4272_v13, %v4270_v47 }
 0x44d   : > { %v3910_v61 = vpop.f32.mrf.mxu0  ;;  %v4507_v11 = vunpack.c.l.b16 %v4447_v38  ;;  %v4276_v22 = vshll.u32 %v11199_v30, 16 }
 0x44e   : > { %v15430_v36 = vadd.f32 %v3908_v17, %v3598_v60  ;;  %v13716_v60 = vld [vmem:[%s14355_s22 + $0xa0] sm:$0xff]   ;;  %v4271_v61 = vsel %vm1745_vm3, %v4266_v54, %v4270_v47 }
 0x44f   : > { %v15452_v54 = vpack.c.b16 %v4507_v11, %v17271_v6  ;;  %v4278_v11 = vrot.slane %v4276_v22, 1 }
 0x451   : > { %v3381_v27 = vpop.f32.mrf.mxu2 }
 0x452   : > { %v3576_v58 = vpop.f32.mrf.mxu3  ;;  %v4028_v17 = vpop.f32.mrf.mxu1 }
 0x453   : > { %v4082_v57 = vadd.f32 %v4028_v17, %v15232_v18  ;;  %v4787_v58 = vsel %vm2321_vm4, %v4784_v55, %v4786_v24 }
 0x455   : > { %4067 = vmatmul.bf16.gmra.mxu1 %v13716_v60  ;;  %v4858_v27 = vpop.f32.mrf.mxu0 }
 0x456   : > { %4390 = vmatmul.bf16.gmra.mxu2 %v4271_v61  ;;  %v4595_v61 = vshrl.u32 %v15426_v40, 16 }
 0x457   : > { %4713 = vmatmul.bf16.gmra.mxu3 %v4594_v34  ;;  %v4599_v34 = vshll.u32 %v15452_v54, 16 }
 0x458   : > { %4897 = vmatmul.bf16.gmra.mxu0 %v4787_v58  ;;  %v4597_v43 = vor.u32 %v4595_v61, %v4593_v29 }
 0x459   : > { %v4351_v37 = vpop.f32.mrf.mxu2 }
 0x45a   : > { %v4405_v18 = vadd.f32 %v4351_v37, %v4082_v57  ;;  %v4674_v17 = vpop.f32.mrf.mxu3  ;;  %v4030_v44 = vpop.f32.mrf.mxu1  ;;  %v4961_v37 = vrot.slane %v4531_v49, 1 }
 0x45b   : > { %v4083_v38 = vadd.f32 %v4030_v44, %v15247_v46  ;;  %v4601_v46 = vrot.slane %v4599_v34, 1 }
 0x45c   : > { %v4728_v60 = vadd.f32 %v4674_v17, %v4405_v18  ;;  %v15467_v6 = vor.u32 %v4962_v45, %v4961_v37 }
 0x45d   : > { %v4860_v57 = vpop.f32.mrf.mxu0  ;;  %v4602_v49 = vsel %vm1745_vm3, %v4597_v43, %v4601_v46  ;;  %v4280_v43 = vshrl.u32 %v11199_v30, 16 }
 0x45e   : > { %v15457_v55 = vadd.f32 %v4858_v27, %v4728_v60  ;;  %v4279_v27 = vsel %vm1745_vm3, %v4274_v1, %v4278_v11  ;;  %v4788_v60 = vrot.slane %v15452_v54, 1 }
 0x460   : > { %v4789_v47 = vsel %vm2321_vm4, %v4786_v24, %v4788_v60  ;;  %v3959_v24 = vpack.c.b16 %v15212_v35, %v15212_v35 }
 0x461   : > { %v4353_v58 = vpop.f32.mrf.mxu2 }
 0x462   : > { %v4406_v18 = vadd.f32 %v4353_v58, %v4083_v38  ;;  %v4676_v17 = vpop.f32.mrf.mxu3  ;;  %v4033_v44 = vpop.f32.mrf.mxu1  ;;  %v4603_v58 = vshrl.u32 %v15452_v54, 16  ;;  %v4954_v54 = vshrl.u32 %v15274_v48, 16 }
 0x463   : > { %v4084_v28 = vadd.f32 %v4033_v44, %v15254_v41  ;;  %v4282_v44 = vor.u32 %v4280_v43, %v4278_v11 }
 0x464   : > { %v4729_v63 = vadd.f32 %v4676_v17, %v4406_v18  ;;  %v4956_v11 = vrot.slane %v4954_v54, 1 }
 0x465   : > { %4072 = vmatmul.bf16.gmra.mxu1 %v15198_v2  ;;  %v4863_v22 = vpop.f32.mrf.mxu0 }
 0x466   : > { %v15471_v13 = vadd.f32 %v4860_v57, %v4729_v63  ;;  %4395 = vmatmul.bf16.gmra.mxu2 %v4279_v27 }
 0x467   : > { %4718 = vmatmul.bf16.gmra.mxu3 %v4602_v49 }
 0x468   : > { %4902 = vmatmul.bf16.gmra.mxu0 %v4789_v47 }
 0x469   : > { %v4356_v29 = vpop.f32.mrf.mxu2 }
 0x46a   : > { %v4407_v38 = vadd.f32 %v4356_v29, %v4084_v28  ;;  %v4679_v34 = vpop.f32.mrf.mxu3  ;;  %v4035_v45 = vpop.f32.mrf.mxu1  ;;  %v4605_v28 = vor.u32 %v4603_v58, %v4601_v46 }
 0x46b   : > { %v4085_v37 = vadd.f32 %v4035_v45, %v15260_v10 }
 0x46c   : > { %v4730_v41 = vadd.f32 %v4679_v34, %v4407_v38 }
 0x46d   : > { %v4865_v57 = vpop.f32.mrf.mxu0 }
 0x46e   : > { %v15476_v1 = vadd.f32 %v4863_v22, %v4730_v41  ;;  %v4957_v22 = vshll.u32 %v15274_v48, 16 }
 0x470   : > { %v4959_v46 = vrot.slane %v4957_v22, 2 }
 0x471   : > { %v4358_v2 = vpop.f32.mrf.mxu2 }
 0x472   : > { %v4408_v18 = vadd.f32 %v4358_v2, %v4085_v37  ;;  %v4681_v17 = vpop.f32.mrf.mxu3  ;;  %v4038_v27 = vpop.f32.mrf.mxu1  ;;  %v4960_v41 = vor.u32 %v4959_v46, %v4956_v11 }
 0x473   : > { %v4086_v63 = vadd.f32 %v4038_v27, %v15272_v23 }
 0x474   : > { %v4731_v49 = vadd.f32 %v4681_v17, %v4408_v18  ;;  %v4964_v48 = vsel %vm2507_vm5, %v4960_v41, %v15467_v6 }
 0x475   : > { %4077 = vmatmul.bf16.gmra.mxu1 %v3959_v24  ;;  %v4868_v30 = vpop.f32.mrf.mxu0 }
 0x476   : > { %v15482_v10 = vadd.f32 %v4865_v57, %v4731_v49  ;;  %4400 = vmatmul.bf16.gmra.mxu2 %v4282_v44  ;;  %v4966_v49 = vrot.slane %v4535_v51, 2 }
 0x477   : > { %4723 = vmatmul.bf16.gmra.mxu3 %v4605_v28 }
 0x478   : > { %4907 = vmatmul.bf16.gmra.mxu0 %v4788_v60 }
 0x479   : > { %v4361_v47 = vpop.f32.mrf.mxu2 }
 0x47a   : > { %v4409_v29 = vadd.f32 %v4361_v47, %v4086_v63  ;;  %v4684_v38 = vpop.f32.mrf.mxu3  ;;  %v4040_v35 = vpop.f32.mrf.mxu1  ;;  %v4965_v63 = vrot.slane %v4539_v9, 1 }
 0x47b   : > { %v4087_v23 = vadd.f32 %v4040_v35, %v15283_v26 }
 0x47c   : > { %v4732_v34 = vadd.f32 %v4684_v38, %v4409_v29  ;;  %v4967_v47 = vor.u32 %v4966_v49, %v4965_v63 }
 0x47d   : > { %v4870_v37 = vpop.f32.mrf.mxu0 }
 0x47e   : > { %v15487_v45 = vadd.f32 %v4868_v30, %v4732_v34  ;;  %v4968_v46 = vsel %vm2507_vm5, %v15467_v6, %v4967_v47 }
 0x481   : > { %v4363_v43 = vpop.f32.mrf.mxu2 }
 0x482   : > { %v4410_v57 = vadd.f32 %v4363_v43, %v4087_v23  ;;  %v4686_v58 = vpop.f32.mrf.mxu3  ;;  %v4043_v2 = vpop.f32.mrf.mxu1  ;;  %v4969_v43 = vrot.slane %v4547_v56, 1 }
 0x483   : > { %v4088_v18 = vadd.f32 %v4043_v2, %v15292_v0 }
 0x484   : > { %v4733_v60 = vadd.f32 %v4686_v58, %v4410_v57  ;;  %v4970_v57 = vrot.slane %v4543_v33, 2 }
 0x485   : > { %5073 = vmatmul.bf16.vlgmr.msra.gmra.mxu1 %v4964_v48  ;;  %v4873_v24 = vpop.f32.mrf.mxu0 }
 0x486   : > { %v15492_v17 = vadd.f32 %v4870_v37, %v4733_v60  ;;  %v4971_v48 = vor.u32 %v4970_v57, %v4969_v43 }
 0x489   : > { %v4366_v26 = vpop.f32.mrf.mxu2 }
 0x48a   : > { %v4411_v44 = vadd.f32 %v4366_v26, %v4088_v18  ;;  %v4689_v27 = vpop.f32.mrf.mxu3  ;;  %v4045_v28 = vpop.f32.mrf.mxu1 }
 0x48b   : > { %v4089_v30 = vadd.f32 %v4045_v28, %v15302_v42 }
 0x48c   : > { %v4734_v54 = vadd.f32 %v4689_v27, %v4411_v44  ;;  %v4972_v44 = vsel %vm2507_vm5, %v4967_v47, %v4971_v48 }
 0x48d   : > { %v4875_v0 = vpop.f32.mrf.mxu0 }
 0x48e   : > { %v15499_v22 = vadd.f32 %v4873_v24, %v4734_v54 }
 0x491   : > { %v4368_v29 = vpop.f32.mrf.mxu2 }
 0x492   : > { %v4412_v38 = vadd.f32 %v4368_v29, %v4089_v30  ;;  %v4691_v35 = vpop.f32.mrf.mxu3  ;;  %v4048_v11 = vpop.f32.mrf.mxu1  ;;  %v17310_v30 = vshrl.u32 %v15328_v21, 16 }
 0x493   : > { %v4090_v23 = vadd.f32 %v4048_v11, %v15312_v4 }
 0x494   : > { %v4735_v9 = vadd.f32 %v4691_v35, %v4412_v38  ;;  %v4973_v54 = vrot.slane %v17310_v30, 1 }
 0x495   : > { %5078 = vmatmul.bf16.gmra.mxu1 %v4968_v46  ;;  %v4878_v25 = vpop.f32.mrf.mxu0 }
 0x496   : > { %v15504_v34 = vadd.f32 %v4875_v0, %v4735_v9  ;;  %v17311_v0 = vshll.u32 %v15328_v21, 16 }
 0x498   : > { %v4974_v29 = vrot.slane %v17311_v0, 2 }
 0x499   : > { %v4371_v51 = vpop.f32.mrf.mxu2 }
 0x49a   : > { %v4413_v42 = vadd.f32 %v4371_v51, %v4090_v23  ;;  %v4694_v37 = vpop.f32.mrf.mxu3  ;;  %v4050_v41 = vpop.f32.mrf.mxu1  ;;  %v4975_v11 = vor.u32 %v4974_v29, %v4973_v54 }
 0x49b   : > { %v4091_v58 = vadd.f32 %v4050_v41, %v15322_v39 }
 0x49c   : > { %v4736_v6 = vadd.f32 %v4694_v37, %v4413_v42  ;;  %v4976_v51 = vsel %vm2507_vm5, %v4971_v48, %v4975_v11 }
 0x49d   : > { %v4880_v4 = vpop.f32.mrf.mxu0 }
 0x49e   : > { %v15511_v2 = vadd.f32 %v4878_v25, %v4736_v6  ;;  %v17312_v6 = vshrl.u32 %v15347_v3, 16 }
 0x4a1   : > { %v4373_v18 = vpop.f32.mrf.mxu2 }
 0x4a2   : > { %v4414_v60 = vadd.f32 %v4373_v18, %v4091_v58  ;;  %v4696_v24 = vpop.f32.mrf.mxu3  ;;  %v4053_v26 = vpop.f32.mrf.mxu1  ;;  %v17313_v18 = vshll.u32 %v15347_v3, 16 }
 0x4a3   : > { %v4092_v27 = vadd.f32 %v4053_v26, %v15332_v15 }
 0x4a4   : > { %v4737_v28 = vadd.f32 %v4696_v24, %v4414_v60  ;;  %v4978_v60 = vrot.slane %v17313_v18, 2 }
 0x4a5   : > { %5083 = vmatmul.bf16.gmra.mxu1 %v4972_v44  ;;  %v4883_v59 = vpop.f32.mrf.mxu0 }
 0x4a6   : > { %v15515_v56 = vadd.f32 %v4880_v4, %v4737_v28  ;;  %v4977_v4 = vrot.slane %v17312_v6, 1 }
 0x4a8   : > { %v4979_v44 = vor.u32 %v4978_v60, %v4977_v4  ;;  %v17316_v60 = vshrl.u32 %v15387_v32, 16 }
 0x4a9   : > { %v4376_v33 = vpop.f32.mrf.mxu2 }
 0x4aa   : > { %v4415_v39 = vadd.f32 %v4376_v33, %v4092_v27  ;;  %v4699_v63 = vpop.f32.mrf.mxu3  ;;  %v4055_v49 = vpop.f32.mrf.mxu1 }
 0x4ab   : > { %v4093_v38 = vadd.f32 %v4055_v49, %v15342_v62 }
 0x4ac   : > { %v4738_v47 = vadd.f32 %v4699_v63, %v4415_v39  ;;  %v4980_v39 = vsel %vm2507_vm5, %v4975_v11, %v4979_v44 }
 0x4ad   : > { %v4885_v15 = vpop.f32.mrf.mxu0 }
 0x4ae   : > { %v15522_v35 = vadd.f32 %v4883_v59, %v4738_v47 }
 0x4b1   : > { %v4378_v46 = vpop.f32.mrf.mxu2 }
 0x4b2   : > { %v4416_v23 = vadd.f32 %v4378_v46, %v4093_v38  ;;  %v4701_v9 = vpop.f32.mrf.mxu3  ;;  %v4058_v25 = vpop.f32.mrf.mxu1  ;;  %v17314_v38 = vshrl.u32 %v15367_v16, 16 }
 0x4b3   : > { %v4094_v42 = vadd.f32 %v4058_v25, %v15351_v31 }
 0x4b4   : > { %v4739_v37 = vadd.f32 %v4701_v9, %v4416_v23  ;;  %v4981_v47 = vrot.slane %v17314_v38, 1 }
 0x4b5   : > { %5088 = vmatmul.bf16.gmra.mxu1 %v4976_v51  ;;  %v4888_v21 = vpop.f32.mrf.mxu0 }
 0x4b6   : > { %v15526_v41 = vadd.f32 %v4885_v15, %v4739_v37  ;;  %v17315_v15 = vshll.u32 %v15367_v16, 16 }
 0x4b8   : > { %v4982_v46 = vrot.slane %v17315_v15, 2  ;;  %v17318_v15 = vshrl.u32 %v15406_v14, 16 }
 0x4b9   : > { %v4381_v43 = vpop.f32.mrf.mxu2 }
 0x4ba   : > { %v4417_v62 = vadd.f32 %v4381_v43, %v4094_v42  ;;  %v4704_v57 = vpop.f32.mrf.mxu3  ;;  %v4060_v58 = vpop.f32.mrf.mxu1  ;;  %v4983_v25 = vor.u32 %v4982_v46, %v4981_v47  ;;  %v4989_v46 = vrot.slane %v17318_v15, 1 }
 0x4bb   : > { %v4095_v24 = vadd.f32 %v4060_v58, %v15362_v12 }
 0x4bc   : > { %v4740_v48 = vadd.f32 %v4704_v57, %v4417_v62  ;;  %v4984_v43 = vsel %vm2507_vm5, %v4979_v44, %v4983_v25 }
 0x4bd   : > { %v4890_v31 = vpop.f32.mrf.mxu0 }
 0x4be   : > { %v15533_v26 = vadd.f32 %v4888_v21, %v4740_v48  ;;  %v17317_v48 = vshll.u32 %v15387_v32, 16 }
 0x4c1   : > { %v4383_v27 = vpop.f32.mrf.mxu2 }
 0x4c2   : > { %v4418_v28 = vadd.f32 %v4383_v27, %v4095_v24  ;;  %v4706_v59 = vpop.f32.mrf.mxu3  ;;  %v4063_v33 = vpop.f32.mrf.mxu1  ;;  %v4985_v24 = vrot.slane %v17316_v60, 1 }
 0x4c3   : > { %v4096_v63 = vadd.f32 %v4063_v33, %v15371_v19 }
 0x4c4   : > { %v4741_v49 = vadd.f32 %v4706_v59, %v4418_v28 }
 0x4c5   : > { %5093 = vmatmul.bf16.gmra.mxu1 %v4980_v39  ;;  %v4893_v3 = vpop.f32.mrf.mxu0 }
 0x4c6   : > { %v15537_v30 = vadd.f32 %v4890_v31, %v4741_v49  ;;  %v4986_v31 = vrot.slane %v17317_v48, 2  ;;  %v17320_v48 = vshll.u32 %v15426_v40, 16 }
 0x4c8   : > { %v4987_v59 = vor.u32 %v4986_v31, %v4985_v24  ;;  %v4993_v24 = vrot.slane %v4595_v61, 1  ;;  %v4994_v31 = vrot.slane %v17320_v48, 2 }
 0x4c9   : > { %v4386_v54 = vpop.f32.mrf.mxu2 }
 0x4ca   : > { %v4419_v12 = vadd.f32 %v4386_v54, %v4096_v63  ;;  %v4709_v0 = vpop.f32.mrf.mxu3  ;;  %v4065_v29 = vpop.f32.mrf.mxu1 }
 0x4cb   : > { %v4097_v23 = vadd.f32 %v4065_v29, %v15382_v53 }
 0x4cc   : > { %v4742_v11 = vadd.f32 %v4709_v0, %v4419_v12 }
 0x4cd   : > { %v4895_v19 = vpop.f32.mrf.mxu0 }
 0x4ce   : > { %v15544_v9 = vadd.f32 %v4893_v3, %v4742_v11  ;;  %v4988_v3 = vsel %vm2507_vm5, %v4983_v25, %v4987_v59 }
 0x4d1   : > { %v4388_v51 = vpop.f32.mrf.mxu2 }
 0x4d2   : > { %v4420_v42 = vadd.f32 %v4388_v51, %v4097_v23  ;;  %v4711_v37 = vpop.f32.mrf.mxu3  ;;  %v4068_v21 = vpop.f32.mrf.mxu1  ;;  %v17319_v23 = vshll.u32 %v15406_v14, 16 }
 0x4d3   : > { %v4098_v62 = vadd.f32 %v4068_v21, %v15391_v50 }
 0x4d4   : > { %v4743_v57 = vadd.f32 %v4711_v37, %v4420_v42  ;;  %v4990_v11 = vrot.slane %v17319_v23, 2 }
 0x4d5   : > { %5098 = vmatmul.bf16.gmra.mxu1 %v4984_v43  ;;  %v4898_v16 = vpop.f32.mrf.mxu0 }
 0x4d6   : > { %v15548_v58 = vadd.f32 %v4895_v19, %v4743_v57  ;;  %v4991_v42 = vor.u32 %v4990_v11, %v4989_v46  ;;  %v13722_v46 = vld [vmem:[%s17247_s3 + $0x58] sm:$0xff]  }
 0x4d8   : > { %v4992_v57 = vsel %vm2507_vm5, %v4987_v59, %v4991_v42 }
 0x4d9   : > { %v4391_v6 = vpop.f32.mrf.mxu2 }
 0x4da   : > { %v4421_v53 = vadd.f32 %v4391_v6, %v4098_v62  ;;  %v4714_v4 = vpop.f32.mrf.mxu3  ;;  %v4070_v18 = vpop.f32.mrf.mxu1 }
 0x4db   : > { %v4099_v27 = vadd.f32 %v4070_v18, %v15401_v52 }
 0x4dc   : > { %v4744_v44 = vadd.f32 %v4714_v4, %v4421_v53 }
 0x4dd   : > { %v4900_v50 = vpop.f32.mrf.mxu0 }
 0x4de   : > { %v15555_v28 = vadd.f32 %v4898_v16, %v4744_v44  ;;  %v4933_v44 = vld [vmem:[%s14355_s22 + $0xbc] sm:$0x3] }
 0x4df   : > { %v4951_v59 = vunpack.c.l.b16 %v4933_v44 }
 0x4e1   : > { %v4393_v33 = vpop.f32.mrf.mxu2 }
 0x4e2   : > { %v4422_v39 = vadd.f32 %v4393_v33, %v4099_v27  ;;  %v4716_v63 = vpop.f32.mrf.mxu3  ;;  %v4073_v49 = vpop.f32.mrf.mxu1 }
 0x4e3   : > { %v4100_v54 = vadd.f32 %v4073_v49, %v15411_v5  ;;  %v15583_v49 = vld [vmem:[%s14184_s23] ss:$0 sm:$0xff] }
 0x4e4   : > { %v4745_v12 = vadd.f32 %v4716_v63, %v4422_v39  ;;  %v5195_v39 = vld [vmem:[%s17247_s3 + $0x54] sm:$0xf] }
 0x4e5   : > { %5103 = vmatmul.bf16.gmra.mxu1 %v4988_v3  ;;  %v4903_v32 = vpop.f32.mrf.mxu0  ;;  %v5216_v61 = vunpack.c.l.bf16 %v5195_v39 }
 0x4e6   : > { %v15559_v0 = vadd.f32 %v4900_v50, %v4745_v12  ;;  %v17321_v12 = vunpack.c.l.b16 %v15438_v7 }
 0x4e7   : > { %vm5237_vm7 = vcmp.gt.f32.partialorder %v5216_v61, 0.0 }
 0x4e9   : > { %v4396_v29 = vpop.f32.mrf.mxu2 }
 0x4ea   : > { %v4423_v52 = vadd.f32 %v4396_v29, %v4100_v54  ;;  %v4719_v38 = vpop.f32.mrf.mxu3  ;;  %v4075_v47 = vpop.f32.mrf.mxu1 }
 0x4eb   : > { %v4101_v19 = vadd.f32 %v4075_v47, %v15421_v8 }
 0x4ec   : > { %v4746_v25 = vadd.f32 %v4719_v38, %v4423_v52 }
 0x4ed   : > { %v4905_v5 = vpop.f32.mrf.mxu0 }
 0x4ee   : > { %v15566_v51 = vadd.f32 %v4903_v32, %v4746_v25  ;;  %v4952_v32 = vpack.c.b16 %v4951_v59, %v17321_v12 }
 0x4f0   : > { %v4998_v38 = vshrl.u32 %v4952_v32, 16  ;;  %v5001_v47 = vshll.u32 %v4952_v32, 16 }
 0x4f1   : > { %v4398_v37 = vpop.f32.mrf.mxu2 }
 0x4f2   : > { %v4424_v21 = vadd.f32 %v4398_v37, %v4101_v19  ;;  %v4721_v43 = vpop.f32.mrf.mxu3  ;;  %v4078_v62 = vpop.f32.mrf.mxu1  ;;  %v13123_v19 = vunpack.c.l.bf16 %v13722_v46  ;;  %v5003_v25 = vrot.slane %v5001_v47, 2 }
 0x4f3   : > { %v4102_v16 = vadd.f32 %v4078_v62, %v15430_v36  ;;  %v4995_v36 = vor.u32 %v4994_v31, %v4993_v24 }
 0x4f4   : > { %v4747_v6 = vadd.f32 %v4721_v43, %v4424_v21  ;;  %vm5238_vm8 = vcmp.gt.f32.partialorder %v13123_v19, 0.0 }
 0x4f5   : > { %5108 = vmatmul.bf16.gmra.mxu1 %v4992_v57  ;;  %v4908_v14 = vpop.f32.mrf.mxu0  ;;  %v4996_v40 = vsel %vm2507_vm5, %v4991_v42, %v4995_v36  ;;  %v13124_v57 = vunpack.c.h.bf16 %v13722_v46 }
 0x4f6   : > { %v15570_v53 = vadd.f32 %v4905_v5, %v4747_v6 }
 0x4f7   : > { %vm5239_vm9 = vcmp.gt.f32.partialorder %v13124_v57, 0.0 }
 0x4f9   : > { %v4401_v8 = vpop.f32.mrf.mxu2 }
 0x4fa   : > { %v4425_v4 = vadd.f32 %v4401_v8, %v4102_v16  ;;  %v4724_v18 = vpop.f32.mrf.mxu3  ;;  %v4080_v60 = vpop.f32.mrf.mxu1  ;;  %v13723_v8 = vld [vmem:[%s17247_s3 + $0x60] sm:$0xff]  }
 0x4fb   : > { %v13127_v60 = vunpack.c.l.bf16 %v13723_v8  ;;  %v13128_v44 = vunpack.c.h.bf16 %v13723_v8 }
 0x4fc   : > { %v4748_v27 = vadd.f32 %v4724_v18, %v4425_v4 }
 0x4fd   : > { %v4910_v33 = vpop.f32.mrf.mxu0  ;;  %vm5240_vm10 = vcmp.gt.f32.partialorder %v13127_v60, 0.0  ;;  %vm5241_vm11 = vcmp.gt.f32.partialorder %v13128_v44, 0.0 }
 0x4fe   : > { %v15577_v50 = vadd.f32 %v4908_v14, %v4748_v27 }
 0x501   : > { %v4403_v63 = vpop.f32.mrf.mxu2 }
 0x502   : > { %v4726_v3 = vpop.f32.mrf.mxu3  ;;  %v5074_v54 = vpop.f32.mrf.mxu1 }
 0x503   : > { %v5128_v29 = vadd.f32 %v5074_v54, %v15457_v55  ;;  %v5000_v55 = vrot.slane %v4998_v38, 1 }
 0x505   : > { %v5153_v52 = vadd.f32 %v15583_v49, %v5128_v29  ;;  %5113 = vmatmul.bf16.gmra.mxu1 %v4996_v40  ;;  %v5004_v37 = vor.u32 %v5003_v25, %v5000_v55 }
 0x507   : > { %v5174_v15 = vmax.f32 %v5153_v52, %v14856_v20  ;;  %v5005_v16 = vsel %vm2507_vm5, %v4995_v36, %v5004_v37 }
 0x509   : > { %v15594_v23 = vsel %vm5237_vm7, %v5174_v15, 0.0 }
 0x50a   : > { %v5279_v7 = vpack.c.bf16 %v15594_v23, %v15594_v23  ;;  %v5076_v11 = vpop.f32.mrf.mxu1 }
 0x50b   : > { %v5129_v5 = vadd.f32 %v5076_v11, %v15471_v13 }
 0x50d   : > { %v5154_v42 = vadd.f32 %v15583_v49, %v5129_v5 }
 0x50f   : > { %v5175_v21 = vmax.f32 %v5154_v42, %v14856_v20 }
 0x511   : > { %v15601_v43 = vsel %vm5238_vm8, %v5175_v21, 0.0 }
 0x512   : > { %v5079_v62 = vpop.f32.mrf.mxu1 }
 0x513   : > { %v5130_v6 = vadd.f32 %v5079_v62, %v15476_v1 }
 0x515   : > { %v5155_v14 = vadd.f32 %v15583_v49, %v5130_v6  ;;  %5118 = vmatmul.bf16.gmra.mxu1 %v5005_v16 }
 0x517   : > { %v5176_v13 = vmax.f32 %v5155_v14, %v14856_v20 }
 0x519   : > { %v15610_v4 = vsel %vm5239_vm9, %v5176_v13, 0.0 }
 0x51a   : > { %v5081_v18 = vpop.f32.mrf.mxu1 }
 0x51b   : > { %v5131_v24 = vadd.f32 %v5081_v18, %v15482_v10  ;;  %v13724_v10 = vld [vmem:[%s17247_s3 + $0x68] sm:$0xff]  }
 0x51c   : > { %v13131_v3 = vunpack.c.l.bf16 %v13724_v10  ;;  %v13132_v32 = vunpack.c.h.bf16 %v13724_v10 }
 0x51d   : > { %v5156_v48 = vadd.f32 %v15583_v49, %v5131_v24 }
 0x51e   : > { %vm5242_vm12 = vcmp.gt.f32.partialorder %v13131_v3, 0.0  ;;  %vm5243_vm13 = vcmp.gt.f32.partialorder %v13132_v32, 0.0 }
 0x51f   : > { %v5177_v1 = vmax.f32 %v5156_v48, %v14856_v20 }
 0x521   : > { %v15615_v31 = vsel %vm5240_vm10, %v5177_v1, 0.0 }
 0x522   : > { %v5084_v27 = vpop.f32.mrf.mxu1 }
 0x523   : > { %v5132_v36 = vadd.f32 %v5084_v27, %v15487_v45 }
 0x525   : > { %v5157_v59 = vadd.f32 %v15583_v49, %v5132_v36  ;;  %5123 = vmatmul.bf16.gmra.mxu1 %v5004_v37 }
 0x527   : > { %v5178_v33 = vmax.f32 %v5157_v59, %v14856_v20 }
 0x529   : > { %v15623_v39 = vsel %vm5241_vm11, %v5178_v33, 0.0 }
 0x52a   : > { %v5086_v63 = vpop.f32.mrf.mxu1 }
 0x52b   : > { %v5133_v54 = vadd.f32 %v5086_v63, %v15492_v17  ;;  %v13725_v17 = vld [vmem:[%s17247_s3 + $0x70] sm:$0xff]  }
 0x52c   : > { %v13135_v46 = vunpack.c.l.bf16 %v13725_v17  ;;  %v13136_v5 = vunpack.c.h.bf16 %v13725_v17 }
 0x52d   : > { %v5158_v61 = vadd.f32 %v15583_v49, %v5133_v54 }
 0x52e   : > { %vm5244_vm14 = vcmp.gt.f32.partialorder %v13135_v46, 0.0  ;;  %vm5245_vm15 = vcmp.gt.f32.partialorder %v13136_v5, 0.0 }
 0x52f   : > { %v5179_v45 = vmax.f32 %v5158_v61, %v14856_v20 }
 0x531   : > { %v15628_v40 = vsel %vm5242_vm12, %v5179_v45, 0.0 }
 0x532   : > { %v5089_v12 = vpop.f32.mrf.mxu1 }
 0x533   : > { %v5134_v29 = vadd.f32 %v5089_v12, %v15499_v22 }
 0x535   : > { %v5159_v52 = vadd.f32 %v15583_v49, %v5134_v29 }
 0x537   : > { %v5180_v38 = vmax.f32 %v5159_v52, %v14856_v20 }
 0x539   : > { %v15636_v47 = vsel %vm5243_vm13, %v5180_v38, 0.0 }
 0x53a   : > { %v5091_v15 = vpop.f32.mrf.mxu1 }
 0x53b   : > { %v5135_v11 = vadd.f32 %v5091_v15, %v15504_v34  ;;  %v13726_v34 = vld [vmem:[%s17247_s3 + $0x78] sm:$0xff]  }
 0x53c   : > { %v13139_v16 = vunpack.c.l.bf16 %v13726_v34  ;;  %v13140_v18 = vunpack.c.h.bf16 %v13726_v34 }
 0x53d   : > { %v5160_v19 = vadd.f32 %v15583_v49, %v5135_v11 }
 0x53e   : > { %vm5246_vm6 = vcmp.gt.f32.partialorder %v13139_v16, 0.0  ;;  %vm5247_vm7 = vcmp.gt.f32.partialorder %v13140_v18, 0.0 }
 0x53f   : > { %v5181_v22 = vmax.f32 %v5160_v19, %v14856_v20 }
 0x541   : > { %v15641_v55 = vsel %vm5244_vm14, %v5181_v22, 0.0 }
 0x542   : > { %v5094_v25 = vpop.f32.mrf.mxu1 }
 0x543   : > { %v5136_v42 = vadd.f32 %v5094_v25, %v15511_v2 }
 0x545   : > { %v5161_v37 = vadd.f32 %v15583_v49, %v5136_v42 }
 0x547   : > { %v5182_v21 = vmax.f32 %v5161_v37, %v14856_v20 }
 0x549   : > { %v15649_v62 = vsel %vm5245_vm15, %v5182_v21, 0.0 }
 0x54a   : > { %v5096_v57 = vpop.f32.mrf.mxu1 }
 0x54b   : > { %v5137_v6 = vadd.f32 %v5096_v57, %v15515_v56  ;;  %v13727_v56 = vld [vmem:[%s17247_s3 + $0x80] sm:$0xff]  }
 0x54c   : > { %v13143_v44 = vunpack.c.l.bf16 %v13727_v56  ;;  %v13144_v63 = vunpack.c.h.bf16 %v13727_v56 }
 0x54d   : > { %v5162_v14 = vadd.f32 %v15583_v49, %v5137_v6 }
 0x54e   : > { %vm5248_vm8 = vcmp.gt.f32.partialorder %v13143_v44, 0.0  ;;  %vm5249_vm9 = vcmp.gt.f32.partialorder %v13144_v63, 0.0 }
 0x54f   : > { %v5183_v2 = vmax.f32 %v5162_v14, %v14856_v20 }
 0x551   : > { %v15654_v13 = vsel %vm5246_vm6, %v5183_v2, 0.0 }
 0x552   : > { %v5099_v8 = vpop.f32.mrf.mxu1 }
 0x553   : > { %v5138_v60 = vadd.f32 %v5099_v8, %v15522_v35 }
 0x555   : > { %v5163_v24 = vadd.f32 %v15583_v49, %v5138_v60 }
 0x557   : > { %v5184_v48 = vmax.f32 %v5163_v24, %v14856_v20 }
 0x559   : > { %v15662_v1 = vsel %vm5247_vm7, %v5184_v48, 0.0 }
 0x55a   : > { %v5101_v27 = vpop.f32.mrf.mxu1 }
 0x55b   : > { %v5139_v36 = vadd.f32 %v5101_v27, %v15526_v41  ;;  %v13728_v41 = vld [vmem:[%s17247_s3 + $0x88] sm:$0xff]  }
 0x55c   : > { %v13147_v32 = vunpack.c.l.bf16 %v13728_v41  ;;  %v13148_v15 = vunpack.c.h.bf16 %v13728_v41 }
 0x55d   : > { %v5164_v59 = vadd.f32 %v15583_v49, %v5139_v36 }
 0x55e   : > { %vm5250_vm10 = vcmp.gt.f32.partialorder %v13147_v32, 0.0  ;;  %vm5251_vm11 = vcmp.gt.f32.partialorder %v13148_v15, 0.0 }
 0x55f   : > { %v5185_v35 = vmax.f32 %v5164_v59, %v14856_v20 }
 0x561   : > { %v15667_v33 = vsel %vm5248_vm8, %v5185_v35, 0.0 }
 0x562   : > { %v5104_v10 = vpop.f32.mrf.mxu1 }
 0x563   : > { %v5140_v3 = vadd.f32 %v5104_v10, %v15533_v26 }
 0x565   : > { %v5165_v54 = vadd.f32 %v15583_v49, %v5140_v3 }
 0x567   : > { %v5186_v61 = vmax.f32 %v5165_v54, %v14856_v20 }
 0x569   : > { %v15675_v45 = vsel %vm5249_vm9, %v5186_v61, 0.0 }
 0x56a   : > { %v5106_v12 = vpop.f32.mrf.mxu1 }
 0x56b   : > { %v5141_v29 = vadd.f32 %v5106_v12, %v15537_v30  ;;  %v13729_v30 = vld [vmem:[%s17247_s3 + $0x90] sm:$0xff]  }
 0x56c   : > { %v13151_v5 = vunpack.c.l.bf16 %v13729_v30  ;;  %v13152_v57 = vunpack.c.h.bf16 %v13729_v30 }
 0x56d   : > { %v5166_v52 = vadd.f32 %v15583_v49, %v5141_v29 }
 0x56e   : > { %vm5252_vm12 = vcmp.gt.f32.partialorder %v13151_v5, 0.0  ;;  %vm5253_vm13 = vcmp.gt.f32.partialorder %v13152_v57, 0.0 }
 0x56f   : > { %v5187_v26 = vmax.f32 %v5166_v52, %v14856_v20 }
 0x571   : > { %v15680_v38 = vsel %vm5250_vm10, %v5187_v26, 0.0 }
 0x572   : > { %v5109_v17 = vpop.f32.mrf.mxu1 }
 0x573   : > { %v5142_v46 = vadd.f32 %v5109_v17, %v15544_v9 }
 0x575   : > { %v5167_v11 = vadd.f32 %v15583_v49, %v5142_v46 }
 0x577   : > { %v5188_v19 = vmax.f32 %v5167_v11, %v14856_v20 }
 0x579   : > { %v15688_v22 = vsel %vm5251_vm11, %v5188_v19, 0.0 }
 0x57a   : > { %v5111_v25 = vpop.f32.mrf.mxu1 }
 0x57b   : > { %v5143_v42 = vadd.f32 %v5111_v25, %v15548_v58  ;;  %v13730_v58 = vld [vmem:[%s17247_s3 + $0x98] sm:$0xff]  }
 0x57c   : > { %v13155_v18 = vunpack.c.l.bf16 %v13730_v58  ;;  %v13156_v27 = vunpack.c.h.bf16 %v13730_v58 }
 0x57d   : > { %v5168_v37 = vadd.f32 %v15583_v49, %v5143_v42 }
 0x57e   : > { %vm5254_vm14 = vcmp.gt.f32.partialorder %v13155_v18, 0.0  ;;  %vm5255_vm15 = vcmp.gt.f32.partialorder %v13156_v27, 0.0 }
 0x57f   : > { %v5189_v9 = vmax.f32 %v5168_v37, %v14856_v20 }
 0x581   : > { %v15693_v21 = vsel %vm5252_vm12, %v5189_v9, 0.0 }
 0x582   : > { %v5114_v34 = vpop.f32.mrf.mxu1 }
 0x583   : > { %v5144_v16 = vadd.f32 %v5114_v34, %v15555_v28 }
 0x585   : > { %v5169_v6 = vadd.f32 %v15583_v49, %v5144_v16 }
 0x587   : > { %v5190_v14 = vmax.f32 %v5169_v6, %v14856_v20 }
 0x589   : > { %v15701_v2 = vsel %vm5253_vm13, %v5190_v14, 0.0 }
 0x58a   : > { %v5116_v8 = vpop.f32.mrf.mxu1 }
 0x58b   : > { %v5145_v60 = vadd.f32 %v5116_v8, %v15559_v0  ;;  %v13731_v0 = vld [vmem:[%s17247_s3 + $0xa0] sm:$0xff]  }
 0x58c   : > { %v13159_v63 = vunpack.c.l.bf16 %v13731_v0  ;;  %v13160_v12 = vunpack.c.h.bf16 %v13731_v0 }
 0x58d   : > { %v5170_v24 = vadd.f32 %v15583_v49, %v5145_v60 }
 0x58e   : > { %vm5256_vm6 = vcmp.gt.f32.partialorder %v13159_v63, 0.0  ;;  %vm5257_vm7 = vcmp.gt.f32.partialorder %v13160_v12, 0.0 }
 0x58f   : > { %v5191_v28 = vmax.f32 %v5170_v24, %v14856_v20 }
 0x591   : > { %v15706_v48 = vsel %vm5254_vm14, %v5191_v28, 0.0 }
 0x592   : > { %v5119_v56 = vpop.f32.mrf.mxu1 }
 0x593   : > { %v5146_v44 = vadd.f32 %v5119_v56, %v15566_v51 }
 0x595   : > { %v5171_v36 = vadd.f32 %v15583_v49, %v5146_v44 }
 0x597   : > { %v5192_v59 = vmax.f32 %v5171_v36, %v14856_v20 }
 0x599   : > { %v5276_v35 = vsel %vm5255_vm15, %v5192_v59, 0.0 }
 0x59a   : > { %v5121_v10 = vpop.f32.mrf.mxu1 }
 0x59b   : > { %v5147_v3 = vadd.f32 %v5121_v10, %v15570_v53 }
 0x59d   : > { %v5172_v54 = vadd.f32 %v15583_v49, %v5147_v3 }
 0x59f   : > { %v5193_v61 = vmax.f32 %v5172_v54, %v14856_v20 }
 0x5a1   : > { %v5277_v51 = vsel %vm5256_vm6, %v5193_v61, 0.0 }
 0x5a2   : > { %v5124_v41 = vpop.f32.mrf.mxu1 }
 0x5a3   : > { %v5148_v32 = vadd.f32 %v5124_v41, %v15577_v50 }
 0x5a5   : > { %v5173_v29 = vadd.f32 %v15583_v49, %v5148_v32 }
 0x5a6   : > { %5302 = sbr.rel (%p10877_p8) target bundleno = 1463 (0x5b7), region = 52 }
 0x5a7   : > { %v5194_v52 = vmax.f32 %v5173_v29, %v14856_v20 }
 0x5a9   : > { %v5278_v26 = vsel %vm5257_vm7, %v5194_v52, 0.0 }
 0x5aa   : > { %v5299_v17 = vpack.c.bf16 %v5278_v26, %v5278_v26  ;;  %v5126_v15 = vpop.f32.mrf.mxu1 }
 0x5ab   : > { %v13164_v53 = vpack.c.bf16 %v15601_v43, %v15594_v23  ;;  %v13169_v46 = vpack.c.bf16 %v15615_v31, %v15610_v4  ;;  %v13174_v50 = vpack.c.bf16 %v15628_v40, %v15623_v39  ;;  %v13179_v49 = vpack.c.bf16 %v15641_v55, %v15636_v47 }
 0x5ac   : > { %5326 = vst [vmem:[%s5305_s20 + $0xb0] sm:$0xf] %v5299_v17  ;;  %v13184_v11 = vpack.c.bf16 %v15654_v13, %v15649_v62  ;;  %v13189_v19 = vpack.c.bf16 %v15667_v33, %v15662_v1  ;;  %v13194_v30 = vpack.c.bf16 %v15680_v38, %v15675_v45  ;;  %v13199_v25 = vpack.c.bf16 %v15693_v21, %v15688_v22 }
 0x5ad   : > { %13732 = vst [vmem:[%s5305_s20 + $0x60] sm:$0xff] %v13164_v53   ;;  %v13204_v5 = vpack.c.bf16 %v15706_v48, %v15701_v2  ;;  %v13209_v42 = vpack.c.bf16 %v5277_v51, %v5276_v35 }
 0x5ae   : > { %13733 = vst [vmem:[%s5305_s20 + $0x68] sm:$0xff] %v13169_v46  }
 0x5af   : > { %13734 = vst [vmem:[%s5305_s20 + $0x70] sm:$0xff] %v13174_v50  }
 0x5b0   : > { %13735 = vst [vmem:[%s5305_s20 + $0x78] sm:$0xff] %v13179_v49  }
 0x5b1   : > { %13736 = vst [vmem:[%s5305_s20 + $0x80] sm:$0xff] %v13184_v11  }
 0x5b2   : > { %13737 = vst [vmem:[%s5305_s20 + $0x88] sm:$0xff] %v13189_v19  }
 0x5b3   : > { %13738 = vst [vmem:[%s5305_s20 + $0x90] sm:$0xff] %v13194_v30  }
 0x5b4   : > { %13739 = vst [vmem:[%s5305_s20 + $0x98] sm:$0xff] %v13199_v25  }
 0x5b5   : > { %13740 = vst [vmem:[%s5305_s20 + $0xa0] sm:$0xff] %v13204_v5  }
 0x5b6   : > { %13741 = vst [vmem:[%s5305_s20 + $0xa8] sm:$0xff] %v13209_v42  }
 0x5b7 PF: > { %5329 = sbr.rel (%p10879_p9) target bundleno = 1480 (0x5c8), region = 56 }
 0x5bc   : > { %5330 = vst [vmem:[%s17248_s4 + $0x54] sm:$0xf] %v5279_v7  ;;  %v13214_v37 = vpack.c.bf16 %v15610_v4, %v15601_v43  ;;  %v13219_v9 = vpack.c.bf16 %v15623_v39, %v15615_v31  ;;  %v13224_v34 = vpack.c.bf16 %v15636_v47, %v15628_v40  ;;  %v13229_v57 = vpack.c.bf16 %v15649_v62, %v15641_v55 }
 0x5bd   : > { %v13234_v23 = vpack.c.bf16 %v15662_v1, %v15654_v13  ;;  %v13239_v7 = vpack.c.bf16 %v15675_v45, %v15667_v33  ;;  %v13244_v43 = vpack.c.bf16 %v15688_v22, %v15680_v38  ;;  %v13249_v4 = vpack.c.bf16 %v15701_v2, %v15693_v21 }
 0x5be   : > { %13742 = vst [vmem:[%s17248_s4 + $0x58] sm:$0xff] %v13214_v37   ;;  %v13254_v31 = vpack.c.bf16 %v5276_v35, %v15706_v48  ;;  %v13259_v39 = vpack.c.bf16 %v5278_v26, %v5277_v51 }
 0x5bf   : > { %13743 = vst [vmem:[%s17248_s4 + $0x60] sm:$0xff] %v13219_v9  }
 0x5c0   : > { %13744 = vst [vmem:[%s17248_s4 + $0x68] sm:$0xff] %v13224_v34  }
 0x5c1   : > { %13745 = vst [vmem:[%s17248_s4 + $0x70] sm:$0xff] %v13229_v57  }
 0x5c2   : > { %13746 = vst [vmem:[%s17248_s4 + $0x78] sm:$0xff] %v13234_v23  }
 0x5c3   : > { %13747 = vst [vmem:[%s17248_s4 + $0x80] sm:$0xff] %v13239_v7  }
 0x5c4   : > { %13748 = vst [vmem:[%s17248_s4 + $0x88] sm:$0xff] %v13244_v43  }
 0x5c5   : > { %13749 = vst [vmem:[%s17248_s4 + $0x90] sm:$0xff] %v13249_v4  }
 0x5c6   : > { %13750 = vst [vmem:[%s17248_s4 + $0x98] sm:$0xff] %v13254_v31  }
 0x5c7   : > { %13751 = vst [vmem:[%s17248_s4 + $0xa0] sm:$0xff] %v13259_v39  }
 0x5c8 PF: > { %v12717_v40 = vld [vmem:[%s14189_s26 + $0x78] sm:$0xff]  ;;  %v12716_v55 = vld [vmem:[%s14189_s26 + $0x70] sm:$0xff]  ;;  %v12715_v38 = vld [vmem:[%s14189_s26 + $0x68] sm:$0xff]  ;;  %s12794_s6 = smul.u32 (!%p10877_p8), 360, %s17356_s19 }
 0x5c9   : > { %v12709_v47 = vld [vmem:[%s14189_s26 + $0x38] sm:$0xff]  ;;  %5541 = vmatpush.bf16.msra.mxu2 %v12717_v40  ;;  %v12708_v62 = vld [vmem:[%s14189_s26 + $0x30] sm:$0xff]  ;;  %v12707_v22 = vld [vmem:[%s14189_s26 + $0x28] sm:$0xff] }
 0x5ca   : > { %5764 = vmatpush.bf16.msra.mxu3 %v12709_v47  ;;  %v12725_v13 = vld [vmem:[%s14189_s26 + $0xb8] sm:$0xff]  ;;  %v12724_v33 = vld [vmem:[%s14189_s26 + $0xb0] sm:$0xff]  ;;  %v12723_v21 = vld [vmem:[%s14189_s26 + $0xa8] sm:$0xff]  ;;  %s7749_s7 = scalar_lea.vmem (!%p10877_p8), [#allocation2], %s12794_s6 }
 0x5cb   : > { %v12733_v1 = vld [vmem:[%s14189_s26 + $0xf8] sm:$0xff]  ;;  %5959 = vmatpush.bf16.msrb.mxu0 %v12725_v13  ;;  %v12732_v45 = vld [vmem:[%s14189_s26 + $0xf0] sm:$0xff]  ;;  %v12731_v16 = vld [vmem:[%s14189_s26 + $0xe8] sm:$0xff] }
 0x5cc   : > { %6293 = vmatpush.bf16.msrb.mxu1 %v12733_v1  ;;  %v12714_v6 = vld [vmem:[%s14189_s26 + $0x60] sm:$0xff]  ;;  %v5352_v14 = vld [vmem:[%s14355_s22 + $0xac] sm:$0xf]  ;;  %v5389_v2 = vld [vmem:[%s14355_s22 + $0xa8] sm:$0x8] }
 0x5cd   : > { %5542 = vmatpush.bf16.msra.mxu2 %v12716_v55  ;;  %v12706_v58 = vld [vmem:[%s14189_s26 + $0x20] sm:$0xff]  ;;  %v5429_v8 = vunpack.c.l.b16 %v5352_v14  ;;  %v5351_v18 = vld [vmem:[%s14355_s22 + $0xa8] sm:$0xc]  ;;  %v6043_v48 = vld [vmem:[%s14355_s22 + $0xb0] sm:$0x8]  ;;  %v5428_v27 = vunpack.c.l.b16 %v5389_v2 }
 0x5ce   : > { %5765 = vmatpush.bf16.msra.mxu3 %v12708_v62  ;;  %v12722_v60 = vld [vmem:[%s14189_s26 + $0xa0] sm:$0xff]  ;;  %v5605_v24 = vunpack.c.l.b16 %v5351_v18  ;;  %v15817_v56 = vld [vmem:[%s14355_s22 + $0xb4] sm:$0xf]  ;;  %v12713_v44 = vld [vmem:[%s14189_s26 + $0x58] sm:$0xff]  ;;  %v6103_v35 = vunpack.c.l.b16 %v6043_v48 }
 0x5cf   : > { %5960 = vmatpush.bf16.msrb.mxu0 %v12724_v33  ;;  %v12730_v28 = vld [vmem:[%s14189_s26 + $0xe0] sm:$0xff]  ;;  %v12705_v36 = vld [vmem:[%s14189_s26 + $0x18] sm:$0xff]  ;;  %v15822_v59 = vld [vmem:[%s14355_s22 + $0xb0] sm:$0xff]  ;;  %v6104_v10 = vunpack.c.l.b16 %v15817_v56  ;;  %v5450_v61 = vpack.c.b16 %v5429_v8, %v5428_v27 }
 0x5d0   : > { %6294 = vmatpush.bf16.msrb.mxu1 %v12732_v45  ;;  %v5606_v0 = vpack.c.b16 %v5429_v8, %v5605_v24  ;;  %v12721_v63 = vld [vmem:[%s14189_s26 + $0x98] sm:$0xff]  ;;  %v12712_v41 = vld [vmem:[%s14189_s26 + $0x50] sm:$0xff]  ;;  %v5616_v52 = vshrl.u32 %v15822_v59, 16  ;;  %v5619_v26 = vshll.u32 %v15822_v59, 16  ;;  %v12711_v30 = vld [vmem:[%s14189_s26 + $0x48] sm:$0xff]  ;;  %v5462_v1 = vrot.slane %v15822_v59, 3 }
 0x5d1   : > { %5543 = vmatpush.bf16.msra.mxu2 %v12715_v38  ;;  %v12729_v3 = vld [vmem:[%s14189_s26 + $0xd8] sm:$0xff]  ;;  %v6125_v54 = vpack.c.b16 %v6104_v10, %v6103_v35  ;;  %v12704_v12 = vld [vmem:[%s14189_s26 + $0x10] sm:$0xff]  ;;  %v5848_v17 = vshrl.u32 %v5450_v61, 16  ;;  %v5851_v15 = vshll.u32 %v5450_v61, 16  ;;  %v12703_v25 = vld [vmem:[%s14189_s26 + $0x8] sm:$0xff]  ;;  %v5461_v13 = vrot.slane %v5450_v61, 3 }
 0x5d2   : > { %5766 = vmatpush.bf16.msra.mxu3 %v12707_v22  ;;  %v15830_v51 = vld [vmem:[%s14355_s22 + $0xb8] sm:$0xff]   ;;  %v5608_v32 = vshrl.u32 %v5606_v0, 16  ;;  %v5611_v29 = vshll.u32 %v5606_v0, 16  ;;  %v12720_v53 = vld [vmem:[%s14189_s26 + $0x90] sm:$0xff]  ;;  %v5618_v37 = vrot.slane %v5616_v52, 2  ;;  %v5621_v9 = vrot.slane %v5619_v26, 3 }
 0x5d3   : > { %5961 = vmatpush.bf16.msrb.mxu0 %v12723_v21  ;;  %v12728_v46 = vld [vmem:[%s14189_s26 + $0xd0] sm:$0xff]  ;;  %v6137_v50 = vshrl.u32 %v6125_v54, 16  ;;  %v6140_v49 = vshll.u32 %v6125_v54, 16  ;;  %v6145_v11 = vshrl.u32 %v15830_v51, 16  ;;  %v6148_v19 = vshll.u32 %v15830_v51, 16  ;;  %v12719_v43 = vld [vmem:[%s14189_s26 + $0x88] sm:$0xff] }
 0x5d4   : > { %6295 = vmatpush.bf16.msrb.mxu1 %v12731_v16  ;;  %v5610_v5 = vrot.slane %v5608_v32, 2  ;;  %v5613_v42 = vrot.slane %v5611_v29, 3  ;;  %v5850_v34 = vrot.slane %v5848_v17, 3  ;;  %v5853_v57 = vrot.slane %v5851_v15, 4  ;;  %v12727_v4 = vld [vmem:[%s14189_s26 + $0xc8] sm:$0xff]  ;;  %v12710_v55 = vld [vmem:[%s14189_s26 + $0x40] sm:$0xff] }
 0x5d5   : > { %5544 = vmatpush.bf16.msra.mxu2 %v12714_v6  ;;  %v5855_v23 = vrot.slane %v5616_v52, 3  ;;  %v5856_v7 = vrot.slane %v5619_v26, 4  ;;  %v6139_v31 = vrot.slane %v6137_v50, 3  ;;  %v6142_v39 = vrot.slane %v6140_v49, 4  ;;  %v12702_v62 = vld [vmem:[%s14189_s26] sm:$0xff]  ;;  %v12741_v38 = vld [vmem:[%s14189_s26 + $0x138] sm:$0xff] }
 0x5d6   : > { %5767 = vmatpush.bf16.msra.mxu3 %v12706_v58  ;;  %v6147_v40 = vrot.slane %v6145_v11, 3  ;;  %v6150_v47 = vrot.slane %v6148_v19, 4  ;;  %v5614_v33 = vor.u32 %v5613_v42, %v5610_v5  ;;  %v5622_v45 = vor.u32 %v5621_v9, %v5618_v37  ;;  %v12718_v21 = vld [vmem:[%s14189_s26 + $0x80] sm:$0xff]  ;;  %v12694_v18 = vld [vmem:[%s14355_s22 + $0xb8] sm:$0xff]  ;;  %v12739_v0 = vld [vmem:[%s14189_s26 + $0x128] sm:$0xff] }
 0x5d7   : > { %5962 = vmatpush.bf16.msrb.mxu0 %v12722_v60  ;;  %v5857_v22 = vor.u32 %v5856_v7, %v5855_v23  ;;  %v12726_v16 = vld [vmem:[%s14189_s26 + $0xc0] sm:$0xff]  ;;  %v5854_v6 = vor.u32 %v5853_v57, %v5850_v34  ;;  %v6143_v14 = vor.u32 %v6142_v39, %v6139_v31  ;;  %v5463_v2 = vsel %vm559_vm0, %v5461_v13, %v5462_v1  ;;  %v13754_v50 = vld [vmem:[%s14355_s22 + $0xc8] sm:$0xff]  }
 0x5d8   : > { %6296 = vmatpush.bf16.msrb.mxu1 %v12730_v28  ;;  %v6151_v58 = vor.u32 %v6150_v47, %v6147_v40  ;;  %v5623_v8 = vsel %vm706_vm1, %v5614_v33, %v5622_v45  ;;  %v12740_v28 = vld [vmem:[%s14189_s26 + $0x130] sm:$0xff]  ;;  %v13753_v48 = vld [vmem:[%s14355_s22 + $0xc0] sm:$0xff]   ;;  %v5625_v27 = vshrl.u32 %v12694_v18, 16  ;;  %v6163_v19 = vshrl.u32 %v13754_v50, 16  ;;  %v12696_v39 = vld [vmem:[%s14355_s22 + $0xc8] sm:$0xff] }
 0x5d9   : > { %5545 = vmatpush.bf16.msra.mxu2 %v12713_v44  ;;  %v5858_v60 = vsel %vm948_vm2, %v5854_v6, %v5857_v22  ;;  %v5628_v44 = vshll.u32 %v12694_v18, 16  ;;  %v6157_v59 = vshll.u32 %v13753_v48, 16  ;;  %v12695_v15 = vld [vmem:[%s14355_s22 + $0xc0] sm:$0xff]  ;;  %v5643_v13 = vshrl.u32 %v12696_v39, 16 }
 0x5da   : > { %5768 = vmatpush.bf16.msra.mxu3 %v12705_v36  ;;  %v6152_v24 = vsel %vm948_vm2, %v6143_v14, %v6151_v58  ;;  %v6154_v36 = vshrl.u32 %v13753_v48, 16  ;;  %v5627_v35 = vrot.slane %v5625_v27, 2  ;;  %v5634_v49 = vshrl.u32 %v12695_v15, 16 }
 0x5db   : > { %5963 = vmatpush.bf16.msrb.mxu0 %v12721_v63  ;;  %v5630_v63 = vrot.slane %v5628_v44, 3  ;;  %v5860_v54 = vrot.slane %v5628_v44, 4  ;;  %v5637_v11 = vshll.u32 %v12695_v15, 16  ;;  %v6165_v9 = vrot.slane %v6163_v19, 3  ;;  %v13756_v44 = vld [vmem:[%s14355_s22 + $0xd8] sm:$0xff]  }
 0x5dc   : > { %6297 = vmatpush.bf16.msrb.mxu1 %v12729_v3  ;;  %v5859_v3 = vrot.slane %v5625_v27, 3  ;;  %v6156_v61 = vrot.slane %v6154_v36, 3  ;;  %v5863_v42 = vrot.slane %v5634_v49, 3  ;;  %v5466_v57 = vrot.slane %v12695_v15, 3 }
 0x5dd   : > { %5546 = vmatpush.bf16.msra.mxu2 %v12712_v41  ;;  %v6159_v41 = vrot.slane %v6157_v59, 4  ;;  %v5631_v32 = vor.u32 %v5630_v63, %v5627_v35  ;;  %v5639_v5 = vrot.slane %v5637_v11, 3  ;;  %v5864_v37 = vrot.slane %v5637_v11, 4  ;;  %v13757_v11 = vld [vmem:[%s14355_s22 + $0xe0] sm:$0xff]  }
 0x5de   : > { %5769 = vmatpush.bf16.msra.mxu3 %v12704_v12  ;;  %v5464_v12 = vrot.slane %v12694_v18, 3  ;;  %v5861_v29 = vor.u32 %v5860_v54, %v5859_v3  ;;  %v6181_v35 = vshrl.u32 %v13756_v44, 16  ;;  %v6184_v63 = vshll.u32 %v13756_v44, 16 }
 0x5df   : > { %5964 = vmatpush.bf16.msrb.mxu0 %v12720_v53  ;;  %v6160_v52 = vor.u32 %v6159_v41, %v6156_v61  ;;  %v5632_v17 = vsel %vm706_vm1, %v5622_v45, %v5631_v32  ;;  %v5865_v7 = vor.u32 %v5864_v37, %v5863_v42  ;;  %v6193_v42 = vshll.u32 %v13757_v11, 16 }
 0x5e0   : > { %6298 = vmatpush.bf16.msrb.mxu1 %v12728_v46  ;;  %v5465_v26 = vsel %vm559_vm0, %v5462_v1, %v5464_v12  ;;  %v5862_v53 = vsel %vm948_vm2, %v5857_v22, %v5861_v29  ;;  %v5646_v1 = vshll.u32 %v12696_v39, 16 }
 0x5e1   : > { %5547 = vmatpush.bf16.msra.mxu2 %v12711_v30  ;;  %v6161_v46 = vsel %vm948_vm2, %v6151_v58, %v6160_v52  ;;  %v6166_v30 = vshll.u32 %v13754_v50, 16  ;;  %v5866_v40 = vsel %vm948_vm2, %v5861_v29, %v5865_v7  ;;  %v5468_v58 = vrot.slane %v12696_v39, 3 }
 0x5e2   : > { %5770 = vmatpush.bf16.msra.mxu3 %v12703_v25  ;;  %v5636_v25 = vrot.slane %v5634_v49, 2  ;;  %v5648_v22 = vrot.slane %v5646_v1, 3 }
 0x5e3   : > { %5965 = vmatpush.bf16.msrb.mxu0 %v12719_v43  ;;  %v6168_v34 = vrot.slane %v6166_v30, 4 }
 0x5e4   : > { %6299 = vmatpush.bf16.msrb.mxu1 %v12727_v4  ;;  %v5640_v23 = vor.u32 %v5639_v5, %v5636_v25  ;;  %v5467_v4 = vsel %vm559_vm0, %v5464_v12, %v5466_v57  ;;  %v6183_v12 = vrot.slane %v6181_v35, 3  ;;  %v12736_v25 = vld [vmem:[%s14189_s26 + $0x110] sm:$0xff]  ;;  %v6190_v5 = vshrl.u32 %v13757_v11, 16 }
 0x5e5   : > { %5548 = vmatpush.bf16.msra.mxu2 %v12710_v55  ;;  %v6169_v43 = vor.u32 %v6168_v34, %v6165_v9  ;;  %v13755_v55 = vld [vmem:[%s14355_s22 + $0xd0] sm:$0xff]  }
 0x5e6   : > { %5771 = vmatpush.bf16.msra.mxu3 %v12702_v62  ;;  %v5641_v31 = vsel %vm706_vm1, %v5631_v32, %v5640_v23  ;;  %v12738_v62 = vld [vmem:[%s14189_s26 + $0x120] sm:$0xff]  ;;  %v6172_v33 = vshrl.u32 %v13755_v55, 16  ;;  %v6175_v45 = vshll.u32 %v13755_v55, 16  ;;  %v6186_v32 = vrot.slane %v6184_v63, 4 }
 0x5e7   : > { %5966 = vmatpush.bf16.msrb.mxu0 %v12718_v21  ;;  %v6170_v47 = vsel %vm948_vm2, %v6160_v52, %v6169_v43  ;;  %v5867_v21 = vrot.slane %v5643_v13, 3  ;;  %v12699_v55 = vld [vmem:[%s14355_s22 + $0xe0] sm:$0xff] }
 0x5e8   : > { %6300 = vmatpush.bf16.msrb.mxu1 %v12726_v16  ;;  %5549 = vmatmul.bf16.vlgmr.msra.gmra.mxu2 %v5463_v2  ;;  %v5868_v16 = vrot.slane %v5646_v1, 4  ;;  %v6174_v6 = vrot.slane %v6172_v33, 3  ;;  %v6177_v14 = vrot.slane %v6175_v45, 4  ;;  %v13758_v1 = vld [vmem:[%s14355_s22 + $0xe8] sm:$0xff]   ;;  %v5670_v33 = vshrl.u32 %v12699_v55, 16 }
 0x5e9   : > { %6463 = vmatpush.bf16.msrb.mxu2 %v12741_v38  ;;  %5772 = vmatmul.bf16.vlgmr.msra.gmra.mxu3 %v5623_v8  ;;  %v5645_v38 = vrot.slane %v5643_v13, 2  ;;  %v5673_v45 = vshll.u32 %v12699_v55, 16 }
 0x5ea   : > { %5967 = vmatmul.bf16.vlgmr.msrb.gmra.mxu0 %v5858_v60  ;;  %v5869_v8 = vor.u32 %v5868_v16, %v5867_v21  ;;  %v6178_v18 = vor.u32 %v6177_v14, %v6174_v6  ;;  %v5469_v60 = vsel %vm559_vm0, %v5466_v57, %v5468_v58  ;;  %v5672_v21 = vrot.slane %v5670_v33, 2 }
 0x5eb   : > { %6301 = vmatmul.bf16.vlgmr.msrb.gmra.mxu1 %v6152_v24  ;;  %v5649_v2 = vor.u32 %v5648_v22, %v5645_v38  ;;  %v6199_v38 = vshrl.u32 %v13758_v1, 16  ;;  %v6202_v22 = vshll.u32 %v13758_v1, 16  ;;  %v5675_v16 = vrot.slane %v5673_v45, 3  ;;  %v12758_v1 = vld [vmem:[%s14189_s26 + $0x168] sm:$0xff] }
 0x5ec   : > { %v5870_v48 = vsel %vm948_vm2, %v5865_v7, %v5869_v8  ;;  %v6179_v27 = vsel %vm948_vm2, %v6169_v43, %v6178_v18  ;;  %v6195_v7 = vrot.slane %v6193_v42, 4  ;;  %v5879_v6 = vrot.slane %v5670_v33, 3  ;;  %v12760_v42 = vld [vmem:[%s14189_s26 + $0x178] sm:$0xff] }
 0x5ed   : > { %6464 = vmatpush.bf16.msrb.mxu2 %v12740_v28  ;;  %v5650_v24 = vsel %vm706_vm1, %v5640_v23, %v5649_v2  ;;  %v12697_v28 = vld [vmem:[%s14355_s22 + $0xd0] sm:$0xff]  ;;  %v6192_v23 = vrot.slane %v6190_v5, 3  ;;  %v5880_v14 = vrot.slane %v5673_v45, 4  ;;  %6786 = vmatpush.bf16.msrb.mxu3 %v12760_v42  ;;  %v12777_v33 = vld [vmem:[%s14189_s26 + $0x1b8] sm:$0xff]  ;;  %v12754_v42 = vld [vmem:[%s14189_s26 + $0x148] sm:$0xff] }
 0x5ee   : > { %v5652_v36 = vshrl.u32 %v12697_v28, 16  ;;  %v5655_v59 = vshll.u32 %v12697_v28, 16  ;;  %v5470_v29 = vrot.slane %v12697_v28, 3  ;;  %7109 = vmatpush.bf16.msra.mxu0 %v12777_v33 }
 0x5ef   : > { %v6196_v39 = vor.u32 %v6195_v7, %v6192_v23  ;;  %v12759_v23 = vld [vmem:[%s14189_s26 + $0x170] sm:$0xff]  ;;  %v5371_v7 = vld [vmem:[%s14355_s22 + $0xf8] sm:$0xff]  }
 0x5f0   : > { %v5654_v3 = vrot.slane %v5652_v36, 2  ;;  %v5657_v54 = vrot.slane %v5655_v59, 3  ;;  %v5871_v61 = vrot.slane %v5652_v36, 3  ;;  %v5872_v41 = vrot.slane %v5655_v59, 4  ;;  %v13759_v59 = vld [vmem:[%s14355_s22 + $0xf0] sm:$0xff]  }
 0x5f1   : > { %6465 = vmatpush.bf16.msrb.mxu2 %v12739_v0  ;;  %v12737_v0 = vld [vmem:[%s14189_s26 + $0x118] sm:$0xff]  ;;  %v5471_v15 = vsel %vm559_vm0, %v5468_v58, %v5470_v29  ;;  %v6201_v58 = vrot.slane %v6199_v38, 3  ;;  %v6208_v63 = vshrl.u32 %v13759_v59, 16  ;;  %6787 = vmatpush.bf16.msrb.mxu3 %v12759_v23 }
 0x5f2   : > { %v5658_v52 = vor.u32 %v5657_v54, %v5654_v3  ;;  %v6211_v3 = vshll.u32 %v13759_v59, 16  ;;  %v12735_v54 = vld [vmem:[%s14189_s26 + $0x108] sm:$0xff] }
 0x5f5   : > { %6466 = vmatpush.bf16.msrb.mxu2 %v12738_v62  ;;  %6788 = vmatpush.bf16.msrb.mxu3 %v12758_v1 }
 0x5f8   : > { %5554 = vmatmul.bf16.gmra.mxu2 %v5465_v26  ;;  %v5873_v26 = vor.u32 %v5872_v41, %v5871_v61 }
 0x5f9   : > { %5777 = vmatmul.bf16.gmra.mxu3 %v5632_v17  ;;  %6467 = vmatpush.bf16.msrb.mxu2 %v12737_v0  ;;  %v6187_v17 = vor.u32 %v6186_v32, %v6183_v12 }
 0x5fa   : > { %5972 = vmatmul.bf16.gmra.mxu0 %v5862_v53  ;;  %v5659_v53 = vsel %vm706_vm1, %v5649_v2, %v5658_v52  ;;  %v5874_v50 = vsel %vm948_vm2, %v5869_v8, %v5873_v26  ;;  %v6204_v2 = vrot.slane %v6202_v22, 4  ;;  %v5474_v8 = vrot.slane %v12699_v55, 3  ;;  %v12734_v55 = vld [vmem:[%s14189_s26 + $0x100] sm:$0xff]  ;;  %v12785_v22 = vld [vmem:[%s14189_s26 + $0x1f8] sm:$0xff] }
 0x5fb   : > { %6306 = vmatmul.bf16.gmra.mxu1 %v6161_v46  ;;  %v12698_v46 = vld [vmem:[%s14355_s22 + $0xd8] sm:$0xff]  ;;  %v6188_v49 = vsel %vm948_vm2, %v6178_v18, %v6187_v17  ;;  %v6197_v13 = vsel %vm948_vm2, %v6187_v17, %v6196_v39  ;;  %v5676_v18 = vor.u32 %v5675_v16, %v5672_v21 }
 0x5fc   : > { %v5661_v19 = vshrl.u32 %v12698_v46, 16  ;;  %v5664_v30 = vshll.u32 %v12698_v46, 16  ;;  %v5472_v43 = vrot.slane %v12698_v46, 3  ;;  %7293 = vmatpush.bf16.msra.mxu1 %v12785_v22 }
 0x5fd   : > { %6468 = vmatpush.bf16.msrb.mxu2 %v12736_v25 }
 0x5fe   : > { %v5663_v37 = vrot.slane %v5661_v19, 2  ;;  %v5666_v9 = vrot.slane %v5664_v30, 3  ;;  %v5875_v34 = vrot.slane %v5661_v19, 3  ;;  %v5876_v57 = vrot.slane %v5664_v30, 4  ;;  %v13760_v30 = vld [vmem:[%s14355_s22 + $0xf8] sm:$0xff]  }
 0x5ff   : > { %v5475_v28 = vsel %vm559_vm0, %v5472_v43, %v5474_v8 }
 0x601   : > { %6469 = vmatpush.bf16.msrb.mxu2 %v12735_v54 }
 0x605   : > { %6470 = vmatpush.bf16.msrb.mxu2 %v12734_v55 }
 0x608   : > { %5559 = vmatmul.bf16.gmra.mxu2 %v5467_v4  ;;  %v5667_v4 = vor.u32 %v5666_v9, %v5663_v37  ;;  %v6217_v37 = vshrl.u32 %v13760_v30, 16  ;;  %v6220_v9 = vshll.u32 %v13760_v30, 16 }
 0x609   : > { %5782 = vmatmul.bf16.gmra.mxu3 %v5641_v31  ;;  %v5877_v31 = vor.u32 %v5876_v57, %v5875_v34 }
 0x60a   : > { %5977 = vmatmul.bf16.gmra.mxu0 %v5866_v40  ;;  %v5473_v40 = vsel %vm559_vm0, %v5470_v29, %v5472_v43  ;;  %v6210_v29 = vrot.slane %v6208_v63, 3  ;;  %v14114_v43 = vld [vmem:[%s14355_s22 + $0xf8] sm:$0xf]   ;;  %v5895_v63 = vshll.u32 %v5371_v7, 16 }
 0x60b   : > { %6311 = vmatmul.bf16.gmra.mxu1 %v6170_v47  ;;  %v5668_v47 = vsel %vm706_vm1, %v5658_v52, %v5667_v4  ;;  %v5878_v62 = vsel %vm948_vm2, %v5873_v26, %v5877_v31  ;;  %v6213_v52 = vrot.slane %v6211_v3, 4 }
 0x618   : > { %5564 = vmatmul.bf16.gmra.mxu2 %v5469_v60  ;;  %v5881_v60 = vor.u32 %v5880_v14, %v5879_v6  ;;  %v12757_v14 = vld [vmem:[%s14189_s26 + $0x160] sm:$0xff] }
 0x619   : > { %5787 = vmatmul.bf16.gmra.mxu3 %v5650_v24  ;;  %v6205_v24 = vor.u32 %v6204_v2, %v6201_v58  ;;  %v12776_v58 = vld [vmem:[%s14189_s26 + $0x1b0] sm:$0xff] }
 0x61a   : > { %5982 = vmatmul.bf16.gmra.mxu0 %v5870_v48  ;;  %v5677_v48 = vsel %vm706_vm1, %v5667_v4, %v5676_v18  ;;  %v5882_v44 = vsel %vm948_vm2, %v5877_v31, %v5881_v60  ;;  %v14119_v4 = vld [vmem:[%s14355_s22 + $0xf8] sm:$0x70]  ;;  %6789 = vmatpush.bf16.msrb.mxu3 %v12757_v14  ;;  %v12770_v14 = vld [vmem:[%s14189_s26 + $0x180] sm:$0xff] }
 0x61b   : > { %6316 = vmatmul.bf16.gmra.mxu1 %v6179_v27  ;;  %v15894_v27 = vld [vmem:[%s14355_s22 + $0xe8] sm:$0xff]  ;;  %v6206_v36 = vsel %vm948_vm2, %v6196_v39, %v6205_v24  ;;  %v15934_v6 = vor.u32 %v14119_v4, %v14114_v43  ;;  %7110 = vmatpush.bf16.msra.mxu0 %v12776_v58 }
 0x61c   : > { %v5679_v0 = vshrl.u32 %v15894_v27, 16  ;;  %v5682_v35 = vshll.u32 %v15894_v27, 16  ;;  %v5476_v26 = vrot.slane %v15894_v27, 3 }
 0x61d   : > { %v5700_v27 = vshll.u32 %v15934_v6, 16 }
 0x61e   : > { %v5681_v61 = vrot.slane %v5679_v0, 2  ;;  %v5684_v41 = vrot.slane %v5682_v35, 3  ;;  %v5883_v12 = vrot.slane %v5679_v0, 3  ;;  %v5884_v32 = vrot.slane %v5682_v35, 4 }
 0x61f   : > { %v5477_v46 = vsel %vm559_vm0, %v5474_v8, %v5476_v26  ;;  %v5892_v35 = vshrl.u32 %v5371_v7, 16  ;;  %v12781_v7 = vld [vmem:[%s14189_s26 + $0x1d8] sm:$0xff] }
 0x620   : > { %v5685_v17 = vor.u32 %v5684_v41, %v5681_v61  ;;  %v12783_v61 = vld [vmem:[%s14189_s26 + $0x1e8] sm:$0xff] }
 0x628   : > { %5569 = vmatmul.bf16.gmra.mxu2 %v5471_v15  ;;  %v5885_v15 = vor.u32 %v5884_v32, %v5883_v12  ;;  %v5702_v32 = vrot.slane %v5700_v27, 3 }
 0x629   : > { %5792 = vmatmul.bf16.gmra.mxu3 %v5659_v53  ;;  %v6214_v53 = vor.u32 %v6213_v52, %v6210_v29  ;;  %v12755_v29 = vld [vmem:[%s14189_s26 + $0x150] sm:$0xff]  ;;  %v12774_v52 = vld [vmem:[%s14189_s26 + $0x1a0] sm:$0xff] }
 0x62a   : > { %5987 = vmatmul.bf16.gmra.mxu0 %v5874_v50  ;;  %v5686_v50 = vsel %vm706_vm1, %v5676_v18, %v5685_v17  ;;  %v5886_v11 = vsel %vm948_vm2, %v5881_v60, %v5885_v15 }
 0x62b   : > { %6321 = vmatmul.bf16.gmra.mxu1 %v6188_v49  ;;  %v15906_v49 = vld [vmem:[%s14355_s22 + $0xf0] sm:$0xff]  ;;  %v6215_v19 = vsel %vm948_vm2, %v6205_v24, %v6214_v53 }
 0x62c   : > { %v5688_v25 = vshrl.u32 %v15906_v49, 16  ;;  %v5691_v5 = vshll.u32 %v15906_v49, 16  ;;  %v12784_v24 = vld [vmem:[%s14189_s26 + $0x1f0] sm:$0xff] }
 0x62d   : > { %7294 = vmatpush.bf16.msra.mxu1 %v12784_v24  ;;  %v6870_v24 = vld [vmem:[%s14355_s22 + $0xbc] sm:$0xff]  }
 0x62e   : > { %v5690_v34 = vrot.slane %v5688_v25, 2  ;;  %v5693_v57 = vrot.slane %v5691_v5, 3  ;;  %v5887_v31 = vrot.slane %v5688_v25, 3  ;;  %v5888_v39 = vrot.slane %v5691_v5, 4 }
 0x62f   : > { %v5480_v25 = vrot.slane %v15934_v6, 3 }
 0x630   : > { %v15924_v45 = vor.u32 %v5888_v39, %v5887_v31  ;;  %v12753_v39 = vld [vmem:[%s14189_s26 + $0x140] sm:$0xff] }
 0x631   : > { %7295 = vmatpush.bf16.msra.mxu1 %v12783_v61  ;;  %v12743_v61 = vld [vmem:[%s14355_s22 + $0xbc] sm:$0xff] }
 0x632   : > { %v5890_v18 = vsel %vm948_vm2, %v5885_v15, %v15924_v45 }
 0x638   : > { %5574 = vmatmul.bf16.gmra.mxu2 %v5473_v40  ;;  %v6219_v40 = vrot.slane %v6217_v37, 3  ;;  %v12773_v37 = vld [vmem:[%s14189_s26 + $0x198] sm:$0xff] }
 0x639   : > { %5797 = vmatmul.bf16.gmra.mxu3 %v5668_v47  ;;  %v6222_v47 = vrot.slane %v6220_v9, 4 }
 0x63a   : > { %5992 = vmatmul.bf16.gmra.mxu0 %v5878_v62  ;;  %v5478_v62 = vrot.slane %v15906_v49, 3  ;;  %v12780_v49 = vld [vmem:[%s14189_s26 + $0x1d0] sm:$0xff] }
 0x63b   : > { %6326 = vmatmul.bf16.gmra.mxu1 %v6197_v13  ;;  %v15920_v13 = vor.u32 %v5693_v57, %v5690_v34  ;;  %v15926_v38 = vor.u32 %v6222_v47, %v6219_v40  ;;  %v12772_v40 = vld [vmem:[%s14189_s26 + $0x190] sm:$0xff] }
 0x63c   : > { %v5479_v21 = vsel %vm559_vm0, %v5476_v26, %v5478_v62  ;;  %v5481_v4 = vsel %vm559_vm0, %v5478_v62, %v5480_v25 }
 0x63d   : > { %v5695_v16 = vsel %vm706_vm1, %v5685_v17, %v15920_v13  ;;  %v6224_v60 = vsel %vm948_vm2, %v6214_v53, %v15926_v38  ;;  %v5894_v53 = vrot.slane %v5892_v35, 3 }
 0x648   : > { %5579 = vmatmul.bf16.gmra.mxu2 %v5475_v28  ;;  %v15944_v28 = vld [vmem:[%s14355_s22 + $0x100] sm:$0xff]  }
 0x649   : > { %5802 = vmatmul.bf16.gmra.mxu3 %v5677_v48  ;;  %v5697_v48 = vshrl.u32 %v15934_v6, 16  ;;  %v6226_v3 = vshrl.u32 %v15944_v28, 16  ;;  %v6229_v54 = vshll.u32 %v15944_v28, 16 }
 0x64a   : > { %5997 = vmatmul.bf16.gmra.mxu0 %v5882_v44  ;;  %v12756_v44 = vld [vmem:[%s14189_s26 + $0x158] sm:$0xff] }
 0x64b   : > { %6331 = vmatmul.bf16.gmra.mxu1 %v6206_v36  ;;  %v12775_v36 = vld [vmem:[%s14189_s26 + $0x1a8] sm:$0xff]  ;;  %6790 = vmatpush.bf16.msrb.mxu3 %v12756_v44  ;;  %v5699_v12 = vrot.slane %v5697_v48, 2  ;;  %v14085_v48 = vld [vmem:[%s14355_s22 + $0xbc] sm:$0xf0] }
 0x64c   : > { %7111 = vmatpush.bf16.msra.mxu0 %v12775_v36 }
 0x64d   : > { %v5703_v5 = vor.u32 %v5702_v32, %v5699_v12 }
 0x64f   : > { %6791 = vmatpush.bf16.msrb.mxu3 %v12755_v29  ;;  %v5704_v31 = vsel %vm706_vm1, %v15920_v13, %v5703_v5  ;;  %v12793_v13 = vld [vmem:[%s14189_s26 + $0x238] sm:$0xff]  ;;  %v15991_v29 = vld [vmem:[%s14355_s22 + $0xc4] sm:$0xff] }
 0x650   : > { %7112 = vmatpush.bf16.msra.mxu0 %v12774_v52  ;;  %7509 = vmatpush.bf16.msra.mxu2 %v12793_v13  ;;  %v6966_v52 = vshll.u32 %v6870_v24, 16 }
 0x653   : > { %6792 = vmatpush.bf16.msrb.mxu3 %v12754_v42  ;;  %v6971_v42 = vshll.u32 %v15991_v29, 16 }
 0x654   : > { %7113 = vmatpush.bf16.msra.mxu0 %v12773_v37 }
 0x657   : > { %6793 = vmatpush.bf16.msrb.mxu3 %v12753_v39 }
 0x658   : > { %5584 = vmatmul.bf16.gmra.mxu2 %v5477_v46  ;;  %v5897_v46 = vrot.slane %v5895_v63, 4  ;;  %7114 = vmatpush.bf16.msra.mxu0 %v12772_v40  ;;  %v7214_v40 = vrot.slane %v15991_v29, 1 }
 0x659   : > { %5807 = vmatmul.bf16.gmra.mxu3 %v5686_v50  ;;  %v6228_v50 = vrot.slane %v6226_v3, 3 }
 0x65a   : > { %6002 = vmatmul.bf16.gmra.mxu0 %v5886_v11  ;;  %v6231_v11 = vrot.slane %v6229_v54, 4  ;;  %v5898_v57 = vor.u32 %v5897_v46, %v5894_v53  ;;  %v14086_v54 = vld [vmem:[%s14355_s22 + $0xbc] sm:$0xe]  ;;  %v6648_v53 = vshll.u32 %v12743_v61, 16 }
 0x65b   : > { %6336 = vmatmul.bf16.gmra.mxu1 %v6215_v19  ;;  %v12782_v19 = vld [vmem:[%s14189_s26 + $0x1e0] sm:$0xff]  ;;  %v15995_v37 = vor.u32 %v14086_v54, %v14085_v48 }
 0x65c   : > { %7296 = vmatpush.bf16.msra.mxu1 %v12782_v19  ;;  %v6232_v23 = vor.u32 %v6231_v11, %v6228_v50  ;;  %v5899_v33 = vsel %vm948_vm2, %v15924_v45, %v5898_v57  ;;  %v12792_v50 = vld [vmem:[%s14189_s26 + $0x230] sm:$0xff] }
 0x65d   : > { %7510 = vmatpush.bf16.msra.mxu2 %v12792_v50  ;;  %v7213_v39 = vrot.slane %v15995_v37, 1 }
 0x65e   : > { %v6233_v22 = vsel %vm948_vm2, %v15926_v38, %v6232_v23  ;;  %v12779_v38 = vld [vmem:[%s14189_s26 + $0x1c8] sm:$0xff] }
 0x65f   : > { %v7215_v13 = vsel %vm2321_vm4, %v7213_v39, %v7214_v40 }
 0x660   : > { %7297 = vmatpush.bf16.msra.mxu1 %v12781_v7 }
 0x664   : > { %7298 = vmatpush.bf16.msra.mxu1 %v12780_v49 }
 0x667   : > { %v5968_v2 = vpop.f32.mrf.mxu0 }
 0x668   : > { %v6302_v8 = vpop.f32.mrf.mxu1  ;;  %5589 = vmatmul.bf16.gmra.mxu2 %v5479_v21  ;;  %v12771_v21 = vld [vmem:[%s14189_s26 + $0x188] sm:$0xff]  ;;  %7299 = vmatpush.bf16.msra.mxu1 %v12779_v38 }
 0x669   : > { %5812 = vmatmul.bf16.gmra.mxu3 %v5695_v16  ;;  %7115 = vmatpush.bf16.msra.mxu0 %v12771_v21  ;;  %v16013_v38 = vld [vmem:[%s14355_s22 + $0xcc] sm:$0xff] }
 0x66a   : > { %6007 = vmatmul.bf16.gmra.mxu0 %v5890_v18  ;;  %v12778_v18 = vld [vmem:[%s14189_s26 + $0x1c0] sm:$0xff] }
 0x66b   : > { %6341 = vmatmul.bf16.gmra.mxu1 %v6224_v60  ;;  %v5550_v59 = vpop.f32.mrf.mxu2 }
 0x66c   : > { %v5773_v0 = vpop.f32.mrf.mxu3  ;;  %7300 = vmatpush.bf16.msra.mxu1 %v12778_v18  ;;  %v6975_v18 = vshrl.u32 %v15991_v29, 16 }
 0x66d   : > { %v5774_v41 = vadd.f32 %v5773_v0, %v5550_v59  ;;  %7116 = vmatpush.bf16.msra.mxu0 %v12770_v14  ;;  %v12742_v59 = vld [vmem:[%s14355_s22 + $0xb4] sm:$0xff] }
 0x66f   : > { %v6022_v26 = vadd.f32 %v5968_v2, %v5774_v41  ;;  %v5970_v17 = vpop.f32.mrf.mxu0  ;;  %v6643_v41 = vshll.u32 %v12742_v59, 16 }
 0x670   : > { %v6304_v15 = vpop.f32.mrf.mxu1 }
 0x671   : > { %v15956_v30 = vadd.f32 %v6302_v8, %v6022_v26 }
 0x673   : > { %v5552_v9 = vpop.f32.mrf.mxu2 }
 0x674   : > { %v5775_v34 = vpop.f32.mrf.mxu3 }
 0x675   : > { %v5776_v43 = vadd.f32 %v5775_v34, %v5552_v9  ;;  %v13263_v34 = vunpack.c.l.b16 %v15830_v51 }
 0x677   : > { %v6023_v47 = vadd.f32 %v5970_v17, %v5776_v43  ;;  %v5973_v55 = vpop.f32.mrf.mxu0  ;;  %v6641_v17 = vshrl.u32 %v12742_v59, 16 }
 0x678   : > { %v6307_v1 = vpop.f32.mrf.mxu1  ;;  %5594 = vmatmul.bf16.gmra.mxu2 %v5481_v4 }
 0x679   : > { %v15974_v62 = vadd.f32 %v6304_v15, %v6023_v47  ;;  %5817 = vmatmul.bf16.gmra.mxu3 %v5704_v31  ;;  %v6645_v15 = vrot.slane %v6643_v41, 1  ;;  %v6973_v31 = vrot.slane %v6971_v42, 1  ;;  %v12791_v41 = vld [vmem:[%s14189_s26 + $0x228] sm:$0xff] }
 0x67a   : > { %6012 = vmatmul.bf16.gmra.mxu0 %v5899_v33  ;;  %7511 = vmatpush.bf16.msra.mxu2 %v12791_v41 }
 0x67b   : > { %6346 = vmatmul.bf16.gmra.mxu1 %v6233_v22  ;;  %v5555_v45 = vpop.f32.mrf.mxu2 }
 0x67c   : > { %v5778_v16 = vpop.f32.mrf.mxu3 }
 0x67d   : > { %v5779_v6 = vadd.f32 %v5778_v16, %v5555_v45  ;;  %v12744_v45 = vld [vmem:[%s14355_s22 + $0xc4] sm:$0xff] }
 0x67e   : > { %v6656_v14 = vshll.u32 %v12744_v45, 16 }
 0x67f   : > { %v6024_v58 = vadd.f32 %v5973_v55, %v5779_v6  ;;  %v5975_v2 = vpop.f32.mrf.mxu0  ;;  %v6393_v55 = vpack.c.b16 %v13263_v34, %v6104_v10  ;;  %v6652_v6 = vshrl.u32 %v12743_v61, 16  ;;  %v13950_v61 = vld [vmem:[%s14355_s22 + $0xbc] sm:$0xff]  }
 0x680   : > { %v6309_v8 = vpop.f32.mrf.mxu1 }
 0x681   : > { %v15981_v60 = vadd.f32 %v6307_v1, %v6024_v58 }
 0x683   : > { %v5557_v27 = vpop.f32.mrf.mxu2 }
 0x684   : > { %v5780_v44 = vpop.f32.mrf.mxu3 }
 0x685   : > { %v5781_v36 = vadd.f32 %v5780_v44, %v5557_v27  ;;  %v6658_v44 = vrot.slane %v6656_v14, 1 }
 0x687   : > { %v6025_v0 = vadd.f32 %v5975_v2, %v5781_v36  ;;  %v5978_v35 = vpop.f32.mrf.mxu0 }
 0x688   : > { %v6312_v63 = vpop.f32.mrf.mxu1  ;;  %5599 = vmatmul.bf16.gmra.mxu2 %v5480_v25  ;;  %v6964_v25 = vshrl.u32 %v6870_v24, 16  ;;  %v6979_v24 = vshll.u32 %v16013_v38, 16 }
 0x689   : > { %v15986_v3 = vadd.f32 %v6309_v8, %v6025_v0  ;;  %5822 = vmatmul.bf16.gmra.mxu3 %v5703_v5  ;;  %v6968_v5 = vrot.slane %v6966_v52, 1  ;;  %v6977_v0 = vor.u32 %v6975_v18, %v6973_v31 }
 0x68a   : > { %6017 = vmatmul.bf16.gmra.mxu0 %v5898_v57  ;;  %v6646_v57 = vor.u32 %v6645_v15, %v6641_v17 }
 0x68b   : > { %6351 = vmatmul.bf16.gmra.mxu1 %v6232_v23  ;;  %v5560_v12 = vpop.f32.mrf.mxu2  ;;  %v6650_v23 = vrot.slane %v6648_v53, 1  ;;  %v6969_v4 = vor.u32 %v6968_v5, %v6964_v25  ;;  %v6660_v5 = vshrl.u32 %v12744_v45, 16 }
 0x68c   : > { %v5783_v32 = vpop.f32.mrf.mxu3 }
 0x68d   : > { %v5784_v26 = vadd.f32 %v5783_v32, %v5560_v12  ;;  %v6651_v51 = vsel %vm1745_vm3, %v6646_v57, %v6650_v23  ;;  %v6974_v49 = vsel %vm1745_vm3, %v6969_v4, %v6973_v31  ;;  %v6654_v27 = vor.u32 %v6652_v6, %v6650_v23 }
 0x68e   : > { %v6662_v39 = vor.u32 %v6660_v5, %v6658_v44 }
 0x68f   : > { %v6026_v46 = vadd.f32 %v5978_v35, %v5784_v26  ;;  %v5980_v11 = vpop.f32.mrf.mxu0  ;;  %v6981_v35 = vrot.slane %v6979_v24, 1  ;;  %v6659_v12 = vsel %vm1745_vm3, %v6654_v27, %v6658_v44  ;;  %v16053_v44 = vld [vmem:[%s14355_s22 + $0xdc] sm:$0xff] }
 0x690   : > { %v6314_v19 = vpop.f32.mrf.mxu1  ;;  %v17281_v41 = vshll.u32 %v16053_v44, 16 }
 0x691   : > { %v15997_v9 = vadd.f32 %v6312_v63, %v6026_v46  ;;  %v7216_v63 = vrot.slane %v16013_v38, 1  ;;  %v6982_v17 = vsel %vm1745_vm3, %v6977_v0, %v6981_v35  ;;  %v12745_v46 = vld [vmem:[%s14355_s22 + $0xcc] sm:$0xff] }
 0x692   : > { %v6664_v34 = vshll.u32 %v12745_v46, 16 }
 0x693   : > { %v5562_v7 = vpop.f32.mrf.mxu2  ;;  %v7217_v15 = vsel %vm2321_vm4, %v7214_v40, %v7216_v63 }
 0x694   : > { %v5785_v43 = vpop.f32.mrf.mxu3  ;;  %v6666_v40 = vrot.slane %v6664_v34, 1 }
 0x695   : > { %v5786_v47 = vadd.f32 %v5785_v43, %v5562_v7  ;;  %v6983_v43 = vshrl.u32 %v16013_v38, 16 }
 0x697   : > { %v6027_v1 = vadd.f32 %v5980_v11, %v5786_v47  ;;  %v5983_v33 = vpop.f32.mrf.mxu0 }
 0x698   : > { %v6317_v22 = vpop.f32.mrf.mxu1  ;;  %6471 = vmatmul.bf16.vlgmr.msrb.gmra.mxu2 %v6393_v55 }
 0x699   : > { %v16009_v21 = vadd.f32 %v6314_v19, %v6027_v1  ;;  %6794 = vmatmul.bf16.vlgmr.msrb.gmra.mxu3 %v6651_v51  ;;  %v16033_v19 = vld [vmem:[%s14355_s22 + $0xd4] sm:$0xff]  ;;  %v6985_v51 = vor.u32 %v6983_v43, %v6981_v35 }
 0x69a   : > { %7117 = vmatmul.bf16.vlgmr.msra.gmra.mxu0 %v6974_v49  ;;  %v17283_v4 = vshll.u32 %v16033_v19, 16  ;;  %v13952_v49 = vld [vmem:[%s14355_s22 + $0xc4] sm:$0xff]  }
 0x69b   : > { %7301 = vmatmul.bf16.vlgmr.msra.gmra.mxu1 %v7215_v13  ;;  %v5565_v16 = vpop.f32.mrf.mxu2  ;;  %v6667_v13 = vsel %vm1745_vm3, %v6662_v39, %v6666_v40 }
 0x69c   : > { %v5788_v56 = vpop.f32.mrf.mxu3  ;;  %v6989_v1 = vrot.slane %v17283_v4, 1 }
 0x69d   : > { %v5789_v10 = vadd.f32 %v5788_v56, %v5565_v16 }
 0x69f   : > { %v6028_v58 = vadd.f32 %v5983_v33, %v5789_v10  ;;  %v5985_v2 = vpop.f32.mrf.mxu0  ;;  %v7218_v33 = vrot.slane %v16033_v19, 1  ;;  %v6990_v10 = vsel %vm1745_vm3, %v6985_v51, %v6989_v1 }
 0x6a0   : > { %v6319_v8 = vpop.f32.mrf.mxu1 }
 0x6a1   : > { %v16017_v48 = vadd.f32 %v6317_v22, %v6028_v58  ;;  %v7219_v6 = vsel %vm2321_vm4, %v7216_v63, %v7218_v33  ;;  %v12790_v58 = vld [vmem:[%s14189_s26 + $0x220] sm:$0xff] }
 0x6a2   : > { %7512 = vmatpush.bf16.msra.mxu2 %v12790_v58  ;;  %v12789_v58 = vld [vmem:[%s14189_s26 + $0x218] sm:$0xff] }
 0x6a3   : > { %v5567_v36 = vpop.f32.mrf.mxu2 }
 0x6a4   : > { %v5790_v59 = vpop.f32.mrf.mxu3 }
 0x6a5   : > { %v5791_v54 = vadd.f32 %v5790_v59, %v5567_v36  ;;  %v6668_v59 = vshrl.u32 %v12745_v46, 16  ;;  %v6997_v46 = vrot.slane %v17281_v41, 1 }
 0x6a6   : > { %7513 = vmatpush.bf16.msra.mxu2 %v12789_v58 }
 0x6a7   : > { %v6029_v32 = vadd.f32 %v5985_v2, %v5791_v54  ;;  %v5988_v52 = vpop.f32.mrf.mxu0  ;;  %v12746_v2 = vld [vmem:[%s14355_s22 + $0xd4] sm:$0xff] }
 0x6a8   : > { %v6322_v26 = vpop.f32.mrf.mxu1  ;;  %6476 = vmatmul.bf16.gmra.mxu2 %v13950_v61  ;;  %v6672_v0 = vshll.u32 %v12746_v2, 16  ;;  %v6991_v61 = vshrl.u32 %v16033_v19, 16 }
 0x6a9   : > { %v16029_v53 = vadd.f32 %v6319_v8, %v6029_v32  ;;  %6799 = vmatmul.bf16.gmra.mxu3 %v6659_v12  ;;  %v6670_v32 = vor.u32 %v6668_v59, %v6666_v40 }
 0x6aa   : > { %7122 = vmatmul.bf16.gmra.mxu0 %v6982_v17 }
 0x6ab   : > { %7306 = vmatmul.bf16.gmra.mxu1 %v7217_v15  ;;  %v5570_v50 = vpop.f32.mrf.mxu2  ;;  %v6993_v15 = vor.u32 %v6991_v61, %v6989_v1  ;;  %v16072_v1 = vld [vmem:[%s14355_s22 + $0xe4] sm:$0xff] }
 0x6ac   : > { %v5793_v11 = vpop.f32.mrf.mxu3 }
 0x6ad   : > { %v5794_v25 = vadd.f32 %v5793_v11, %v5570_v50  ;;  %v7220_v50 = vrot.slane %v16053_v44, 1 }
 0x6af   : > { %v6030_v57 = vadd.f32 %v5988_v52, %v5794_v25  ;;  %v5990_v23 = vpop.f32.mrf.mxu0  ;;  %v6674_v52 = vrot.slane %v6672_v0, 1  ;;  %v13954_v25 = vld [vmem:[%s14355_s22 + $0xcc] sm:$0xff]   ;;  %v7221_v39 = vsel %vm2321_vm4, %v7218_v33, %v7220_v50  ;;  %v17282_v33 = vshrl.u32 %v16053_v44, 16 }
 0x6b0   : > { %v6324_v7 = vpop.f32.mrf.mxu1 }
 0x6b1   : > { %v16037_v31 = vadd.f32 %v6322_v26, %v6030_v57  ;;  %v6675_v5 = vsel %vm1745_vm3, %v6670_v32, %v6674_v52 }
 0x6b3   : > { %v5572_v47 = vpop.f32.mrf.mxu2 }
 0x6b4   : > { %v5795_v55 = vpop.f32.mrf.mxu3 }
 0x6b5   : > { %v5796_v22 = vadd.f32 %v5795_v55, %v5572_v47  ;;  %v12747_v47 = vld [vmem:[%s14355_s22 + $0xdc] sm:$0xff] }
 0x6b7   : > { %v6031_v45 = vadd.f32 %v5990_v23, %v5796_v22  ;;  %v5993_v16 = vpop.f32.mrf.mxu0 }
 0x6b8   : > { %v6327_v56 = vpop.f32.mrf.mxu1  ;;  %6481 = vmatmul.bf16.gmra.mxu2 %v13952_v49  ;;  %v6676_v49 = vshrl.u32 %v12746_v2, 16  ;;  %v7001_v2 = vor.u32 %v17282_v33, %v6997_v46 }
 0x6b9   : > { %v16048_v14 = vadd.f32 %v6324_v7, %v6031_v45  ;;  %6804 = vmatmul.bf16.gmra.mxu3 %v6667_v13  ;;  %v6998_v7 = vsel %vm1745_vm3, %v6993_v15, %v6997_v46  ;;  %v6680_v13 = vshll.u32 %v12747_v47, 16  ;;  %v12748_v46 = vld [vmem:[%s14355_s22 + $0xe4] sm:$0xff] }
 0x6ba   : > { %7127 = vmatmul.bf16.gmra.mxu0 %v6990_v10  ;;  %v17279_v10 = vshll.u32 %v16072_v1, 16 }
 0x6bb   : > { %7311 = vmatmul.bf16.gmra.mxu1 %v7219_v6  ;;  %v5575_v8 = vpop.f32.mrf.mxu2 }
 0x6bc   : > { %v5798_v27 = vpop.f32.mrf.mxu3  ;;  %v7005_v0 = vrot.slane %v17279_v10, 1 }
 0x6bd   : > { %v5799_v36 = vadd.f32 %v5798_v27, %v5575_v8  ;;  %v6678_v8 = vor.u32 %v6676_v49, %v6674_v52  ;;  %v6682_v27 = vrot.slane %v6680_v13, 1 }
 0x6be   : > { %v7006_v15 = vsel %vm1745_vm3, %v7001_v2, %v7005_v0  ;;  %v13958_v2 = vld [vmem:[%s14355_s22 + $0xdc] sm:$0xff]  }
 0x6bf   : > { %v6032_v35 = vadd.f32 %v5993_v16, %v5799_v36  ;;  %v5995_v54 = vpop.f32.mrf.mxu0  ;;  %v6683_v32 = vsel %vm1745_vm3, %v6678_v8, %v6682_v27 }
 0x6c0   : > { %v6329_v63 = vpop.f32.mrf.mxu1 }
 0x6c1   : > { %v16057_v12 = vadd.f32 %v6327_v56, %v6032_v35  ;;  %v7222_v35 = vrot.slane %v16072_v1, 1 }
 0x6c3   : > { %v5577_v26 = vpop.f32.mrf.mxu2 }
 0x6c4   : > { %v5800_v17 = vpop.f32.mrf.mxu3 }
 0x6c5   : > { %v5801_v11 = vadd.f32 %v5800_v17, %v5577_v26 }
 0x6c7   : > { %v6033_v34 = vadd.f32 %v5995_v54, %v5801_v11  ;;  %v5998_v57 = vpop.f32.mrf.mxu0  ;;  %v7223_v11 = vsel %vm2321_vm4, %v7220_v50, %v7222_v35  ;;  %v17280_v50 = vshrl.u32 %v16072_v1, 16 }
 0x6c8   : > { %v6332_v23 = vpop.f32.mrf.mxu1  ;;  %6486 = vmatmul.bf16.gmra.mxu2 %v13954_v25 }
 0x6c9   : > { %v16068_v40 = vadd.f32 %v6329_v63, %v6033_v34  ;;  %6809 = vmatmul.bf16.gmra.mxu3 %v6675_v5  ;;  %v13956_v63 = vld [vmem:[%s14355_s22 + $0xd4] sm:$0xff]  }
 0x6ca   : > { %7132 = vmatmul.bf16.gmra.mxu0 %v6998_v7  ;;  %v6684_v7 = vshrl.u32 %v12747_v47, 16  ;;  %v7009_v47 = vor.u32 %v17280_v50, %v7005_v0  ;;  %v12749_v0 = vld [vmem:[%s14355_s22 + $0xec] sm:$0xff] }
 0x6cb   : > { %7316 = vmatmul.bf16.gmra.mxu1 %v7221_v39  ;;  %v5580_v55 = vpop.f32.mrf.mxu2  ;;  %v6688_v39 = vshll.u32 %v12748_v46, 16 }
 0x6cc   : > { %v5803_v51 = vpop.f32.mrf.mxu3 }
 0x6cd   : > { %v5804_v22 = vadd.f32 %v5803_v51, %v5580_v55 }
 0x6cf   : > { %v6034_v45 = vadd.f32 %v5998_v57, %v5804_v22  ;;  %v6000_v16 = vpop.f32.mrf.mxu0  ;;  %v16092_v57 = vld [vmem:[%s14355_s22 + $0xec] sm:$0xff] }
 0x6d0   : > { %v6334_v56 = vpop.f32.mrf.mxu1  ;;  %v17273_v49 = vshll.u32 %v16092_v57, 16 }
 0x6d1   : > { %v16076_v6 = vadd.f32 %v6332_v23, %v6034_v45  ;;  %v6686_v45 = vor.u32 %v6684_v7, %v6682_v27  ;;  %v6692_v7 = vshrl.u32 %v12748_v46, 16 }
 0x6d2   : > { %v7013_v8 = vrot.slane %v17273_v49, 1 }
 0x6d3   : > { %v5582_v36 = vpop.f32.mrf.mxu2 }
 0x6d4   : > { %v5805_v59 = vpop.f32.mrf.mxu3 }
 0x6d5   : > { %v5806_v54 = vadd.f32 %v5805_v59, %v5582_v36  ;;  %v7224_v36 = vrot.slane %v16092_v57, 1 }
 0x6d7   : > { %v6035_v26 = vadd.f32 %v6000_v16, %v5806_v54  ;;  %v6003_v52 = vpop.f32.mrf.mxu0  ;;  %v6690_v16 = vrot.slane %v6688_v39, 1  ;;  %v6696_v39 = vshll.u32 %v12749_v0, 16 }
 0x6d8   : > { %v6337_v17 = vpop.f32.mrf.mxu1  ;;  %6491 = vmatmul.bf16.gmra.mxu2 %v13956_v63 }
 0x6d9   : > { %v16088_v25 = vadd.f32 %v6334_v56, %v6035_v26  ;;  %6814 = vmatmul.bf16.gmra.mxu3 %v6683_v32  ;;  %v6691_v54 = vsel %vm1745_vm3, %v6686_v45, %v6690_v16  ;;  %v12788_v32 = vld [vmem:[%s14189_s26 + $0x210] sm:$0xff] }
 0x6da   : > { %7137 = vmatmul.bf16.gmra.mxu0 %v7006_v15  ;;  %7514 = vmatpush.bf16.msra.mxu2 %v12788_v32 }
 0x6db   : > { %7321 = vmatmul.bf16.gmra.mxu1 %v7223_v11  ;;  %v5585_v5 = vpop.f32.mrf.mxu2 }
 0x6dc   : > { %v5808_v34 = vpop.f32.mrf.mxu3 }
 0x6dd   : > { %v5809_v23 = vadd.f32 %v5808_v34, %v5585_v5  ;;  %v16112_v34 = vld [vmem:[%s14355_s22 + $0xf4] sm:$0xff] }
 0x6df   : > { %v6036_v55 = vadd.f32 %v6003_v52, %v5809_v23  ;;  %v6005_v51 = vpop.f32.mrf.mxu0  ;;  %v7014_v52 = vsel %vm1745_vm3, %v7009_v47, %v7013_v8  ;;  %v6698_v47 = vrot.slane %v6696_v39, 1 }
 0x6e0   : > { %v6339_v22 = vpop.f32.mrf.mxu1 }
 0x6e1   : > { %v16096_v13 = vadd.f32 %v6337_v17, %v6036_v55  ;;  %v7225_v17 = vsel %vm2321_vm4, %v7222_v35, %v7224_v36  ;;  %v17276_v35 = vshrl.u32 %v16092_v57, 16 }
 0x6e3   : > { %v5587_v56 = vpop.f32.mrf.mxu2 }
 0x6e4   : > { %v5810_v58 = vpop.f32.mrf.mxu3 }
 0x6e5   : > { %v5811_v59 = vadd.f32 %v5810_v58, %v5587_v56  ;;  %v6694_v58 = vor.u32 %v6692_v7, %v6690_v16 }
 0x6e7   : > { %v6037_v63 = vadd.f32 %v6005_v51, %v5811_v59  ;;  %v6008_v27 = vpop.f32.mrf.mxu0 }
 0x6e8   : > { %v6342_v26 = vpop.f32.mrf.mxu1  ;;  %6496 = vmatmul.bf16.gmra.mxu2 %v13958_v2 }
 0x6e9   : > { %v16108_v15 = vadd.f32 %v6339_v22, %v6037_v63  ;;  %6819 = vmatmul.bf16.gmra.mxu3 %v6691_v54  ;;  %v17272_v22 = vshll.u32 %v16112_v34, 16  ;;  %v7017_v54 = vor.u32 %v17276_v35, %v7013_v8  ;;  %v7226_v63 = vrot.slane %v16112_v34, 1  ;;  %v12750_v8 = vld [vmem:[%s14355_s22 + $0xf4] sm:$0xff]  ;;  %v6891_v35 = vld [vmem:[%s14355_s22 + $0x110] sm:$0x1] }
 0x6ea   : > { %7142 = vmatmul.bf16.gmra.mxu0 %v7014_v52  ;;  %v6699_v52 = vsel %vm1745_vm3, %v6694_v58, %v6698_v47 }
 0x6eb   : > { %7326 = vmatmul.bf16.gmra.mxu1 %v7225_v17  ;;  %v5590_v11 = vpop.f32.mrf.mxu2  ;;  %v7021_v46 = vrot.slane %v17272_v22, 1 }
 0x6ec   : > { %v5813_v5 = vpop.f32.mrf.mxu3 }
 0x6ed   : > { %v5814_v23 = vadd.f32 %v5813_v5, %v5590_v11  ;;  %v7022_v11 = vsel %vm1745_vm3, %v7017_v54, %v7021_v46  ;;  %v7227_v5 = vsel %vm2321_vm4, %v7224_v36, %v7226_v63 }
 0x6ef   : > { %v6038_v55 = vadd.f32 %v6008_v27, %v5814_v23  ;;  %v6010_v51 = vpop.f32.mrf.mxu0  ;;  %v13960_v27 = vld [vmem:[%s14355_s22 + $0xe4] sm:$0xff]  }
 0x6f0   : > { %v6344_v45 = vpop.f32.mrf.mxu1 }
 0x6f1   : > { %v16116_v56 = vadd.f32 %v6342_v26, %v6038_v55  ;;  %v16131_v55 = vld [vmem:[%s14355_s22 + $0xfc] sm:$0xff] }
 0x6f3   : > { %v5592_v59 = vpop.f32.mrf.mxu2 }
 0x6f4   : > { %v5815_v2 = vpop.f32.mrf.mxu3 }
 0x6f5   : > { %v5816_v32 = vadd.f32 %v5815_v2, %v5592_v59  ;;  %v12787_v59 = vld [vmem:[%s14189_s26 + $0x208] sm:$0xff]  ;;  %v6704_v2 = vshll.u32 %v12750_v8, 16 }
 0x6f6   : > { %7515 = vmatpush.bf16.msra.mxu2 %v12787_v59 }
 0x6f7   : > { %v6039_v26 = vadd.f32 %v6010_v51, %v5816_v32  ;;  %v6013_v16 = vpop.f32.mrf.mxu0  ;;  %v6700_v51 = vshrl.u32 %v12749_v0, 16 }
 0x6f8   : > { %v6347_v17 = vpop.f32.mrf.mxu1  ;;  %6501 = vmatmul.bf16.gmra.mxu2 %v13960_v27  ;;  %v17274_v27 = vshll.u32 %v16131_v55, 16 }
 0x6f9   : > { %v16127_v23 = vadd.f32 %v6344_v45, %v6039_v26  ;;  %6824 = vmatmul.bf16.gmra.mxu3 %v6699_v52  ;;  %v17275_v45 = vshrl.u32 %v16112_v34, 16  ;;  %v6702_v26 = vor.u32 %v6700_v51, %v6698_v47 }
 0x6fa   : > { %7147 = vmatmul.bf16.gmra.mxu0 %v7022_v11  ;;  %v6706_v11 = vrot.slane %v6704_v2, 1 }
 0x6fb   : > { %7331 = vmatmul.bf16.gmra.mxu1 %v7227_v5  ;;  %v5595_v7 = vpop.f32.mrf.mxu2  ;;  %v7025_v0 = vor.u32 %v17275_v45, %v7021_v46  ;;  %v12751_v46 = vld [vmem:[%s14355_s22 + $0xfc] sm:$0xff] }
 0x6fc   : > { %v5818_v39 = vpop.f32.mrf.mxu3  ;;  %v6707_v59 = vsel %vm1745_vm3, %v6702_v26, %v6706_v11  ;;  %v12786_v45 = vld [vmem:[%s14189_s26 + $0x200] sm:$0xff]  ;;  %v6716_v41 = vshrl.u32 %v12751_v46, 16 }
 0x6fd   : > { %v5819_v58 = vadd.f32 %v5818_v39, %v5595_v7  ;;  %v7228_v7 = vrot.slane %v16131_v55, 1  ;;  %7516 = vmatpush.bf16.msra.mxu2 %v12786_v45 }
 0x6ff   : > { %v6040_v32 = vadd.f32 %v6013_v16, %v5819_v58  ;;  %v6015_v54 = vpop.f32.mrf.mxu0  ;;  %v7029_v16 = vrot.slane %v17274_v27, 1  ;;  %v13962_v58 = vld [vmem:[%s14355_s22 + $0xec] sm:$0xff]   ;;  %v7229_v2 = vsel %vm2321_vm4, %v7226_v63, %v7228_v7  ;;  %v16151_v27 = vld [vmem:[%s14355_s22 + $0x104] sm:$0xff] }
 0x700   : > { %v6349_v36 = vpop.f32.mrf.mxu1 }
 0x701   : > { %v16136_v52 = vadd.f32 %v6347_v17, %v6040_v32  ;;  %v7030_v51 = vsel %vm1745_vm3, %v7025_v0, %v7029_v16 }
 0x703   : > { %v5597_v5 = vpop.f32.mrf.mxu2 }
 0x704   : > { %v5820_v22 = vpop.f32.mrf.mxu3 }
 0x705   : > { %v5821_v39 = vadd.f32 %v5820_v22, %v5597_v5 }
 0x707   : > { %v6041_v17 = vadd.f32 %v6015_v54, %v5821_v39  ;;  %v6018_v32 = vpop.f32.mrf.mxu0  ;;  %v6708_v54 = vshrl.u32 %v12750_v8, 16  ;;  %v6712_v39 = vshll.u32 %v12751_v46, 16 }
 0x708   : > { %v6352_v47 = vpop.f32.mrf.mxu1  ;;  %6506 = vmatmul.bf16.gmra.mxu2 %v13962_v58  ;;  %v17278_v58 = vshrl.u32 %v16131_v55, 16 }
 0x709   : > { %v16147_v49 = vadd.f32 %v6349_v36, %v6041_v17  ;;  %6829 = vmatmul.bf16.gmra.mxu3 %v6707_v59  ;;  %v17277_v59 = vshll.u32 %v16151_v27, 16 }
 0x70a   : > { %7152 = vmatmul.bf16.gmra.mxu0 %v7030_v51  ;;  %v6710_v51 = vor.u32 %v6708_v54, %v6706_v11  ;;  %v11733_v11 = vld [vmem:[%s14355_s22 + $0x104] sm:$0xf]  ;;  %v12752_v54 = vld [vmem:[%s14355_s22 + $0x104] sm:$0x10] }
 0x70b   : > { %7336 = vmatmul.bf16.gmra.mxu1 %v7229_v2  ;;  %v5600_v22 = vpop.f32.mrf.mxu2  ;;  %v6714_v2 = vrot.slane %v6712_v39, 1 }
 0x70c   : > { %v5823_v5 = vpop.f32.mrf.mxu3 }
 0x70d   : > { %v5824_v26 = vadd.f32 %v5823_v5, %v5600_v22  ;;  %v7033_v5 = vor.u32 %v17278_v58, %v7029_v16  ;;  %v11734_v58 = vor.u32 %v12752_v54, %v11733_v11  ;;  %v7406_v11 = vrot.slane %v6971_v42, 2 }
 0x70e   : > { %v7405_v54 = vrot.slane %v6975_v18, 1 }
 0x70f   : > { %v6042_v0 = vadd.f32 %v6018_v32, %v5824_v26  ;;  %v6020_v63 = vpop.f32.mrf.mxu0  ;;  %v7037_v32 = vrot.slane %v17277_v59, 1  ;;  %v7230_v26 = vrot.slane %v16151_v27, 1  ;;  %v6951_v59 = vunpack.c.l.b16 %v6891_v35 }
 0x710   : > { %v6354_v36 = vpop.f32.mrf.mxu1  ;;  %v13964_v63 = vld [vmem:[%s14355_s22 + $0xf4] sm:$0xff]   ;;  %v6720_v33 = vshll.u32 %v11734_v58, 16  ;;  %v7039_v35 = vshrl.u32 %v16151_v27, 16  ;;  %v16189_v42 = vor.u32 %v7406_v11, %v7405_v54 }
 0x711   : > { %v16155_v17 = vadd.f32 %v6352_v47, %v6042_v0  ;;  %v16165_v36 = vld [vmem:[%s14355_s22 + $0x10c] sm:$0xf]  ;;  %v6715_v47 = vsel %vm1745_vm3, %v6710_v51, %v6714_v2  ;;  %v7231_v16 = vsel %vm2321_vm4, %v7228_v7, %v7230_v26 }
 0x713   : > { %v5602_v22 = vpop.f32.mrf.mxu2 }
 0x714   : > { %v5825_v8 = vpop.f32.mrf.mxu3  ;;  %v7038_v22 = vsel %vm1745_vm3, %v7033_v5, %v7037_v32 }
 0x715   : > { %v17284_v8 = vunpack.c.l.b16 %v16165_v36 }
 0x717   : > { %v7118_v39 = vpop.f32.mrf.mxu0  ;;  %v6962_v51 = vpack.c.b16 %v6951_v59, %v17284_v8  ;;  %v6722_v59 = vrot.slane %v6720_v33, 1 }
 0x718   : > { %v7302_v0 = vpop.f32.mrf.mxu1  ;;  %6511 = vmatmul.bf16.gmra.mxu2 %v13964_v63 }
 0x719   : > { %6834 = vmatmul.bf16.gmra.mxu3 %v6715_v47  ;;  %v7043_v63 = vshll.u32 %v6962_v51, 16 }
 0x71a   : > { %7157 = vmatmul.bf16.gmra.mxu0 %v7038_v22  ;;  %v6718_v22 = vor.u32 %v6716_v41, %v6714_v2 }
 0x71b   : > { %7341 = vmatmul.bf16.gmra.mxu1 %v7231_v16  ;;  %v6472_v10 = vpop.f32.mrf.mxu2  ;;  %v7045_v46 = vrot.slane %v7043_v63, 1 }
 0x71c   : > { %v6795_v45 = vpop.f32.mrf.mxu3  ;;  %v6526_v50 = vadd.f32 %v6472_v10, %v15956_v30 }
 0x71e   : > { %v6849_v5 = vadd.f32 %v6795_v45, %v6526_v50  ;;  %v7041_v50 = vor.u32 %v7039_v35, %v7037_v32  ;;  %v7232_v45 = vrot.slane %v6962_v51, 1 }
 0x71f   : > { %v7120_v4 = vpop.f32.mrf.mxu0 }
 0x720   : > { %v7304_v7 = vpop.f32.mrf.mxu1  ;;  %v7172_v47 = vadd.f32 %v7118_v39, %v6849_v5  ;;  %v13965_v39 = vld [vmem:[%s14355_s22 + $0xfc] sm:$0xff]   ;;  %v6723_v5 = vsel %vm1745_vm3, %v6718_v22, %v6722_v59  ;;  %v7046_v33 = vsel %vm1745_vm3, %v7041_v50, %v7045_v46  ;;  %v7233_v2 = vsel %vm2321_vm4, %v7230_v26, %v7232_v45 }
 0x722   : > { %v16182_v16 = vadd.f32 %v7302_v0, %v7172_v47 }
 0x723   : > { %v6474_v30 = vpop.f32.mrf.mxu2 }
 0x724   : > { %v6797_v10 = vpop.f32.mrf.mxu3  ;;  %v6527_v8 = vadd.f32 %v6474_v30, %v15974_v62  ;;  %v13300_v30 = vunpack.c.h.b16 %v15944_v28  ;;  %v7401_v28 = vshll.u32 %v15995_v37, 16 }
 0x726   : > { %v6850_v29 = vadd.f32 %v6797_v10, %v6527_v8  ;;  %v6724_v10 = vshrl.u32 %v11734_v58, 16 }
 0x727   : > { %v7123_v18 = vpop.f32.mrf.mxu0 }
 0x728   : > { %v7307_v41 = vpop.f32.mrf.mxu1  ;;  %v7173_v0 = vadd.f32 %v7120_v4, %v6850_v29  ;;  %6516 = vmatmul.bf16.gmra.mxu2 %v13965_v39  ;;  %v7047_v4 = vshrl.u32 %v6962_v51, 16  ;;  %v6726_v29 = vor.u32 %v6724_v10, %v6722_v59 }
 0x729   : > { %6839 = vmatmul.bf16.gmra.mxu3 %v6723_v5  ;;  %v6403_v5 = vpack.c.b16 %v13300_v30, %v13300_v30 }
 0x72a   : > { %v16193_v32 = vadd.f32 %v7304_v7, %v7173_v0  ;;  %7162 = vmatmul.bf16.gmra.mxu0 %v7046_v33 }
 0x72b   : > { %7346 = vmatmul.bf16.gmra.mxu1 %v7233_v2  ;;  %v6477_v62 = vpop.f32.mrf.mxu2  ;;  %v7049_v2 = vor.u32 %v7047_v4, %v7045_v46 }
 0x72c   : > { %v6800_v63 = vpop.f32.mrf.mxu3  ;;  %v6528_v47 = vadd.f32 %v6477_v62, %v15981_v60 }
 0x72e   : > { %v6851_v11 = vadd.f32 %v6800_v63, %v6528_v47  ;;  %v7403_v63 = vrot.slane %v7401_v28, 2 }
 0x72f   : > { %v7125_v54 = vpop.f32.mrf.mxu0 }
 0x730   : > { %v7309_v8 = vpop.f32.mrf.mxu1  ;;  %v7174_v22 = vadd.f32 %v7123_v18, %v6851_v11  ;;  %v7398_v18 = vshrl.u32 %v15995_v37, 16 }
 0x732   : > { %v16197_v50 = vadd.f32 %v7307_v41, %v7174_v22  ;;  %v7400_v59 = vrot.slane %v7398_v18, 1 }
 0x733   : > { %v6479_v26 = vpop.f32.mrf.mxu2 }
 0x734   : > { %v6802_v39 = vpop.f32.mrf.mxu3  ;;  %v6529_v7 = vadd.f32 %v6479_v26, %v15986_v3  ;;  %v7404_v22 = vor.u32 %v7403_v63, %v7400_v59 }
 0x736   : > { %v6852_v33 = vadd.f32 %v6802_v39, %v6529_v7 }
 0x737   : > { %v7128_v0 = vpop.f32.mrf.mxu0 }
 0x738   : > { %v7312_v60 = vpop.f32.mrf.mxu1  ;;  %v7175_v62 = vadd.f32 %v7125_v54, %v6852_v33  ;;  %6521 = vmatmul.bf16.gmra.mxu2 %v6403_v5 }
 0x739   : > { %6844 = vmatmul.bf16.gmra.mxu3 %v6726_v29 }
 0x73a   : > { %v16202_v58 = vadd.f32 %v7309_v8, %v7175_v62  ;;  %7167 = vmatmul.bf16.gmra.mxu0 %v7049_v2  ;;  %v7409_v2 = vrot.slane %v6983_v43, 1 }
 0x73b   : > { %7351 = vmatmul.bf16.gmra.mxu1 %v7232_v45  ;;  %v6482_v51 = vpop.f32.mrf.mxu2  ;;  %v7408_v45 = vsel %vm2507_vm5, %v7404_v22, %v16189_v42  ;;  %v7413_v22 = vrot.slane %v6991_v61, 1 }
 0x73c   : > { %v6805_v41 = vpop.f32.mrf.mxu3  ;;  %v6530_v3 = vadd.f32 %v6482_v51, %v15997_v9 }
 0x73e   : > { %v6853_v46 = vadd.f32 %v6805_v41, %v6530_v3 }
 0x73f   : > { %v7130_v47 = vpop.f32.mrf.mxu0 }
 0x740   : > { %v7314_v11 = vpop.f32.mrf.mxu1  ;;  %v7176_v54 = vadd.f32 %v7128_v0, %v6853_v46 }
 0x742   : > { %v16205_v30 = vadd.f32 %v7312_v60, %v7176_v54 }
 0x743   : > { %v6484_v10 = vpop.f32.mrf.mxu2 }
 0x744   : > { %v6807_v4 = vpop.f32.mrf.mxu3  ;;  %v6531_v37 = vadd.f32 %v6484_v10, %v16009_v21  ;;  %v7410_v21 = vrot.slane %v6979_v24, 2  ;;  %v17322_v10 = vshll.u32 %v16033_v19, 16 }
 0x746   : > { %v6854_v8 = vadd.f32 %v6807_v4, %v6531_v37  ;;  %v7411_v28 = vor.u32 %v7410_v21, %v7409_v2 }
 0x747   : > { %v7133_v26 = vpop.f32.mrf.mxu0 }
 0x748   : > { %v7317_v39 = vpop.f32.mrf.mxu1  ;;  %v7177_v9 = vadd.f32 %v7130_v47, %v6854_v8  ;;  %7517 = vmatmul.bf16.vlgmr.msra.gmra.mxu2 %v7408_v45 }
 0x74a   : > { %v16210_v7 = vadd.f32 %v7314_v11, %v7177_v9 }
 0x74b   : > { %v6487_v5 = vpop.f32.mrf.mxu2 }
 0x74c   : > { %v6810_v29 = vpop.f32.mrf.mxu3  ;;  %v6532_v33 = vadd.f32 %v6487_v5, %v16017_v48  ;;  %v7412_v48 = vsel %vm2507_vm5, %v16189_v42, %v7411_v28 }
 0x74e   : > { %v6855_v0 = vadd.f32 %v6810_v29, %v6532_v33 }
 0x74f   : > { %v7135_v60 = vpop.f32.mrf.mxu0 }
 0x750   : > { %v7319_v62 = vpop.f32.mrf.mxu1  ;;  %v7178_v18 = vadd.f32 %v7133_v26, %v6855_v0 }
 0x752   : > { %v16217_v51 = vadd.f32 %v7317_v39, %v7178_v18 }
 0x753   : > { %v6489_v41 = vpop.f32.mrf.mxu2 }
 0x754   : > { %v6812_v3 = vpop.f32.mrf.mxu3  ;;  %v6533_v59 = vadd.f32 %v6489_v41, %v16029_v53  ;;  %v7414_v53 = vrot.slane %v17322_v10, 2  ;;  %v17324_v41 = vshll.u32 %v16053_v44, 16 }
 0x756   : > { %v6856_v63 = vadd.f32 %v6812_v3, %v6533_v59  ;;  %v7415_v8 = vor.u32 %v7414_v53, %v7413_v22  ;;  %v7418_v3 = vrot.slane %v17324_v41, 2 }
 0x757   : > { %v7138_v46 = vpop.f32.mrf.mxu0 }
 0x758   : > { %v7322_v43 = vpop.f32.mrf.mxu1  ;;  %v7179_v47 = vadd.f32 %v7135_v60, %v6856_v63  ;;  %7522 = vmatmul.bf16.gmra.mxu2 %v7412_v48  ;;  %v7416_v29 = vsel %vm2507_vm5, %v7411_v28, %v7415_v8 }
 0x75a   : > { %v16222_v38 = vadd.f32 %v7319_v62, %v7179_v47  ;;  %v17323_v62 = vshrl.u32 %v16053_v44, 16 }
 0x75b   : > { %v6492_v24 = vpop.f32.mrf.mxu2 }
 0x75c   : > { %v6815_v11 = vpop.f32.mrf.mxu3  ;;  %v6534_v54 = vadd.f32 %v6492_v24, %v16037_v31  ;;  %v7417_v18 = vrot.slane %v17323_v62, 1 }
 0x75e   : > { %v6857_v4 = vadd.f32 %v6815_v11, %v6534_v54  ;;  %v7419_v63 = vor.u32 %v7418_v3, %v7417_v18 }
 0x75f   : > { %v7140_v37 = vpop.f32.mrf.mxu0 }
 0x760   : > { %v7324_v42 = vpop.f32.mrf.mxu1  ;;  %v7180_v45 = vadd.f32 %v7138_v46, %v6857_v4  ;;  %v7420_v11 = vsel %vm2507_vm5, %v7415_v8, %v7419_v63 }
 0x762   : > { %v16229_v26 = vadd.f32 %v7322_v43, %v7180_v45 }
 0x763   : > { %v6494_v39 = vpop.f32.mrf.mxu2 }
 0x764   : > { %v6817_v9 = vpop.f32.mrf.mxu3  ;;  %v6535_v5 = vadd.f32 %v6494_v39, %v16048_v14  ;;  %v17326_v39 = vshll.u32 %v16072_v1, 16 }
 0x766   : > { %v6858_v31 = vadd.f32 %v6817_v9, %v6535_v5  ;;  %v7422_v9 = vrot.slane %v17326_v39, 2 }
 0x767   : > { %v7143_v33 = vpop.f32.mrf.mxu0 }
 0x768   : > { %v7327_v2 = vpop.f32.mrf.mxu1  ;;  %v7181_v61 = vadd.f32 %v7140_v37, %v6858_v31  ;;  %7527 = vmatmul.bf16.gmra.mxu2 %v7416_v29 }
 0x76a   : > { %v16233_v19 = vadd.f32 %v7324_v42, %v7181_v61  ;;  %v17325_v42 = vshrl.u32 %v16072_v1, 16 }
 0x76b   : > { %v6497_v21 = vpop.f32.mrf.mxu2 }
 0x76c   : > { %v6820_v0 = vpop.f32.mrf.mxu3  ;;  %v6536_v60 = vadd.f32 %v6497_v21, %v16057_v12  ;;  %v7421_v45 = vrot.slane %v17325_v42, 1 }
 0x76e   : > { %v6859_v14 = vadd.f32 %v6820_v0, %v6536_v60  ;;  %v7423_v31 = vor.u32 %v7422_v9, %v7421_v45 }
 0x76f   : > { %v7145_v59 = vpop.f32.mrf.mxu0 }
 0x770   : > { %v7329_v28 = vpop.f32.mrf.mxu1  ;;  %v7182_v48 = vadd.f32 %v7143_v33, %v6859_v14  ;;  %v7424_v0 = vsel %vm2507_vm5, %v7419_v63, %v7423_v31 }
 0x772   : > { %v16240_v46 = vadd.f32 %v7327_v2, %v7182_v48  ;;  %v17328_v48 = vshll.u32 %v16092_v57, 16 }
 0x773   : > { %v6499_v43 = vpop.f32.mrf.mxu2 }
 0x774   : > { %v6822_v47 = vpop.f32.mrf.mxu3  ;;  %v6537_v24 = vadd.f32 %v6499_v43, %v16068_v40  ;;  %v7426_v43 = vrot.slane %v17328_v48, 2 }
 0x776   : > { %v6860_v12 = vadd.f32 %v6822_v47, %v6537_v24 }
 0x777   : > { %v7148_v54 = vpop.f32.mrf.mxu0 }
 0x778   : > { %v7332_v22 = vpop.f32.mrf.mxu1  ;;  %v7183_v10 = vadd.f32 %v7145_v59, %v6860_v12  ;;  %7532 = vmatmul.bf16.gmra.mxu2 %v7420_v11  ;;  %v17327_v59 = vshrl.u32 %v16092_v57, 16 }
 0x77a   : > { %v16244_v44 = vadd.f32 %v7329_v28, %v7183_v10  ;;  %v7425_v28 = vrot.slane %v17327_v59, 1 }
 0x77b   : > { %v6502_v53 = vpop.f32.mrf.mxu2 }
 0x77c   : > { %v6825_v4 = vpop.f32.mrf.mxu3  ;;  %v6538_v37 = vadd.f32 %v6502_v53, %v16076_v6  ;;  %v7427_v11 = vor.u32 %v7426_v43, %v7425_v28  ;;  %v17331_v43 = vshrl.u32 %v16131_v55, 16 }
 0x77e   : > { %v6861_v40 = vadd.f32 %v6825_v4, %v6538_v37  ;;  %v7428_v53 = vsel %vm2507_vm5, %v7423_v31, %v7427_v11 }
 0x77f   : > { %v7150_v5 = vpop.f32.mrf.mxu0 }
 0x780   : > { %v7334_v8 = vpop.f32.mrf.mxu1  ;;  %v7184_v29 = vadd.f32 %v7148_v54, %v6861_v40  ;;  %v17329_v40 = vshrl.u32 %v16112_v34, 16 }
 0x782   : > { %v16251_v33 = vadd.f32 %v7332_v22, %v7184_v29 }
 0x783   : > { %v6504_v2 = vpop.f32.mrf.mxu2 }
 0x784   : > { %v6827_v61 = vpop.f32.mrf.mxu3  ;;  %v6539_v21 = vadd.f32 %v6504_v2, %v16088_v25 }
 0x786   : > { %v6862_v6 = vadd.f32 %v6827_v61, %v6539_v21 }
 0x787   : > { %v7153_v60 = vpop.f32.mrf.mxu0 }
 0x788   : > { %v7337_v62 = vpop.f32.mrf.mxu1  ;;  %v7185_v18 = vadd.f32 %v7150_v5, %v6862_v6  ;;  %7537 = vmatmul.bf16.gmra.mxu2 %v7424_v0  ;;  %v7429_v5 = vrot.slane %v17329_v40, 1 }
 0x78a   : > { %v16255_v1 = vadd.f32 %v7334_v8, %v7185_v18  ;;  %v17330_v8 = vshll.u32 %v16112_v34, 16 }
 0x78b   : > { %v6507_v41 = vpop.f32.mrf.mxu2 }
 0x78c   : > { %v6830_v3 = vpop.f32.mrf.mxu3  ;;  %v6540_v14 = vadd.f32 %v6507_v41, %v16096_v13  ;;  %v7430_v29 = vrot.slane %v17330_v8, 2  ;;  %v7437_v8 = vrot.slane %v7039_v35, 1 }
 0x78e   : > { %v6863_v25 = vadd.f32 %v6830_v3, %v6540_v14  ;;  %v7431_v21 = vor.u32 %v7430_v29, %v7429_v5  ;;  %v17333_v29 = vshll.u32 %v16151_v27, 16  ;;  %v13807_v27 = vld [vmem:[%s17247_s3 + $0xa8] sm:$0xff]  }
 0x78f   : > { %v7155_v47 = vpop.f32.mrf.mxu0 }
 0x790   : > { %v7339_v63 = vpop.f32.mrf.mxu1  ;;  %v7186_v24 = vadd.f32 %v7153_v60, %v6863_v25  ;;  %v7432_v18 = vsel %vm2507_vm5, %v7427_v11, %v7431_v21  ;;  %v7433_v25 = vrot.slane %v17331_v43, 1 }
 0x792   : > { %v16262_v12 = vadd.f32 %v7337_v62, %v7186_v24 }
 0x793   : > { %v6509_v54 = vpop.f32.mrf.mxu2 }
 0x794   : > { %v6832_v22 = vpop.f32.mrf.mxu3  ;;  %v6541_v10 = vadd.f32 %v6509_v54, %v16108_v15 }
 0x796   : > { %v6864_v13 = vadd.f32 %v6832_v22, %v6541_v10 }
 0x797   : > { %v7158_v4 = vpop.f32.mrf.mxu0 }
 0x798   : > { %v7342_v37 = vpop.f32.mrf.mxu1  ;;  %v7187_v42 = vadd.f32 %v7155_v47, %v6864_v13  ;;  %7542 = vmatmul.bf16.gmra.mxu2 %v7428_v53  ;;  %v17332_v47 = vshll.u32 %v16131_v55, 16 }
 0x79a   : > { %v16266_v57 = vadd.f32 %v7339_v63, %v7187_v42  ;;  %v7434_v63 = vrot.slane %v17332_v47, 2 }
 0x79b   : > { %v6512_v45 = vpop.f32.mrf.mxu2 }
 0x79c   : > { %v6835_v39 = vpop.f32.mrf.mxu3  ;;  %v6542_v9 = vadd.f32 %v6512_v45, %v16116_v56  ;;  %v7435_v22 = vor.u32 %v7434_v63, %v7433_v25 }
 0x79e   : > { %v6865_v15 = vadd.f32 %v6835_v39, %v6542_v9 }
 0x79f   : > { %v7160_v2 = vpop.f32.mrf.mxu0 }
 0x7a0   : > { %v7344_v31 = vpop.f32.mrf.mxu1  ;;  %v7188_v61 = vadd.f32 %v7158_v4, %v6865_v15  ;;  %v7438_v15 = vrot.slane %v17333_v29, 2 }
 0x7a2   : > { %v16273_v0 = vadd.f32 %v7342_v37, %v7188_v61 }
 0x7a3   : > { %v6514_v6 = vpop.f32.mrf.mxu2 }
 0x7a4   : > { %v6837_v60 = vpop.f32.mrf.mxu3  ;;  %v6543_v62 = vadd.f32 %v6514_v6, %v16127_v23  ;;  %v7439_v6 = vor.u32 %v7438_v15, %v7437_v8 }
 0x7a6   : > { %v6866_v56 = vadd.f32 %v6837_v60, %v6543_v62 }
 0x7a7   : > { %v7163_v41 = vpop.f32.mrf.mxu0 }
 0x7a8   : > { %v7347_v3 = vpop.f32.mrf.mxu1  ;;  %v7189_v14 = vadd.f32 %v7160_v2, %v6866_v56  ;;  %7547 = vmatmul.bf16.gmra.mxu2 %v7432_v18  ;;  %v7377_v2 = vld [vmem:[%s14355_s22 + $0x110] sm:$0x3] }
 0x7a9   : > { %v7395_v60 = vunpack.c.l.b16 %v7377_v2 }
 0x7aa   : > { %v16277_v34 = vadd.f32 %v7344_v31, %v7189_v14 }
 0x7ab   : > { %v6517_v59 = vpop.f32.mrf.mxu2 }
 0x7ac   : > { %v6840_v28 = vpop.f32.mrf.mxu3  ;;  %v6544_v48 = vadd.f32 %v6517_v59, %v16136_v52  ;;  %v7436_v52 = vsel %vm2507_vm5, %v7431_v21, %v7435_v22  ;;  %v16305_v59 = vld [vmem:[%s14184_s23] ss:$0 sm:$0xff] }
 0x7ae   : > { %v6867_v23 = vadd.f32 %v6840_v28, %v6544_v48  ;;  %v13303_v48 = vunpack.c.l.bf16 %v13807_v27 }
 0x7af   : > { %v7165_v24 = vpop.f32.mrf.mxu0 }
 0x7b0   : > { %v7349_v11 = vpop.f32.mrf.mxu1  ;;  %v7190_v54 = vadd.f32 %v7163_v41, %v6867_v23  ;;  %v17334_v41 = vunpack.c.l.b16 %v16165_v36  ;;  %vm7681_vm8 = vcmp.gt.f32.partialorder %v13303_v48, 0.0 }
 0x7b2   : > { %v16284_v10 = vadd.f32 %v7347_v3, %v7190_v54  ;;  %v7396_v35 = vpack.c.b16 %v7395_v60, %v17334_v41 }
 0x7b3   : > { %v6519_v53 = vpop.f32.mrf.mxu2 }
 0x7b4   : > { %v6842_v13 = vpop.f32.mrf.mxu3  ;;  %v6545_v4 = vadd.f32 %v6519_v53, %v16147_v49  ;;  %v7442_v3 = vshrl.u32 %v7396_v35, 16  ;;  %v7445_v14 = vshll.u32 %v7396_v35, 16 }
 0x7b6   : > { %v6868_v37 = vadd.f32 %v6842_v13, %v6545_v4  ;;  %v7444_v25 = vrot.slane %v7442_v3, 1  ;;  %v7447_v47 = vrot.slane %v7445_v14, 2 }
 0x7b7   : > { %v7168_v42 = vpop.f32.mrf.mxu0 }
 0x7b8   : > { %v7352_v45 = vpop.f32.mrf.mxu1  ;;  %v7191_v39 = vadd.f32 %v7165_v24, %v6868_v37  ;;  %7552 = vmatmul.bf16.gmra.mxu2 %v7436_v52  ;;  %v7448_v23 = vor.u32 %v7447_v47, %v7444_v25  ;;  %v13808_v52 = vld [vmem:[%s17247_s3 + $0xb0] sm:$0xff]  }
 0x7b9   : > { %v13308_v8 = vunpack.c.h.bf16 %v13808_v52 }
 0x7ba   : > { %v16288_v55 = vadd.f32 %v7349_v11, %v7191_v39  ;;  %v7449_v13 = vsel %vm2507_vm5, %v7439_v6, %v7448_v23 }
 0x7bb   : > { %v6522_v9 = vpop.f32.mrf.mxu2  ;;  %vm7684_vm11 = vcmp.gt.f32.partialorder %v13308_v8, 0.0 }
 0x7bc   : > { %v6845_v40 = vpop.f32.mrf.mxu3  ;;  %v6546_v5 = vadd.f32 %v6522_v9, %v16155_v17  ;;  %v7440_v17 = vsel %vm2507_vm5, %v7435_v22, %v7439_v6  ;;  %v13304_v22 = vunpack.c.h.bf16 %v13807_v27 }
 0x7be   : > { %v6869_v49 = vadd.f32 %v6845_v40, %v6546_v5  ;;  %vm7682_vm9 = vcmp.gt.f32.partialorder %v13304_v22, 0.0 }
 0x7bf   : > { %v7170_v31 = vpop.f32.mrf.mxu0 }
 0x7c0   : > { %v7354_v61 = vpop.f32.mrf.mxu1  ;;  %v7192_v21 = vadd.f32 %v7168_v42, %v6869_v49 }
 0x7c2   : > { %v16296_v62 = vadd.f32 %v7352_v45, %v7192_v21  ;;  %v13307_v45 = vunpack.c.l.bf16 %v13808_v52 }
 0x7c3   : > { %v6524_v18 = vpop.f32.mrf.mxu2 }
 0x7c4   : > { %v6847_v56 = vpop.f32.mrf.mxu3  ;;  %vm7683_vm10 = vcmp.gt.f32.partialorder %v13307_v45, 0.0 }
 0x7c8   : > { %7557 = vmatmul.bf16.gmra.mxu2 %v7440_v17 }
 0x7cb   : > { %v7518_v28 = vpop.f32.mrf.mxu2 }
 0x7cc   : > { %v7572_v43 = vadd.f32 %v7518_v28, %v16182_v16 }
 0x7ce   : > { %v7597_v63 = vadd.f32 %v16305_v59, %v7572_v43 }
 0x7d0   : > { %v7618_v36 = vmax.f32 %v7597_v63, %v14856_v20 }
 0x7d2   : > { %v16310_v24 = vsel %vm7681_vm8, %v7618_v36, 0.0 }
 0x7d3   : > { %v7723_v11 = vpack.c.bf16 %v16310_v24, %v16310_v24  ;;  %v7520_v54 = vpop.f32.mrf.mxu2 }
 0x7d4   : > { %v7573_v53 = vadd.f32 %v7520_v54, %v16193_v32 }
 0x7d6   : > { %v7598_v16 = vadd.f32 %v16305_v59, %v7573_v53 }
 0x7d8   : > { %v7619_v4 = vmax.f32 %v7598_v16, %v14856_v20  ;;  %7562 = vmatmul.bf16.gmra.mxu2 %v7449_v13 }
 0x7da   : > { %v16321_v37 = vsel %vm7682_vm9, %v7619_v4, 0.0 }
 0x7db   : > { %v7523_v42 = vpop.f32.mrf.mxu2 }
 0x7dc   : > { %v7574_v39 = vadd.f32 %v7523_v42, %v16197_v50  ;;  %v13809_v50 = vld [vmem:[%s17247_s3 + $0xb8] sm:$0xff]  }
 0x7dd   : > { %v13311_v61 = vunpack.c.l.bf16 %v13809_v50  ;;  %v13312_v56 = vunpack.c.h.bf16 %v13809_v50 }
 0x7de   : > { %v7599_v32 = vadd.f32 %v16305_v59, %v7574_v39 }
 0x7df   : > { %vm7685_vm12 = vcmp.gt.f32.partialorder %v13311_v61, 0.0  ;;  %vm7686_vm13 = vcmp.gt.f32.partialorder %v13312_v56, 0.0 }
 0x7e0   : > { %v7620_v9 = vmax.f32 %v7599_v32, %v14856_v20 }
 0x7e2   : > { %v16326_v40 = vsel %vm7683_vm10, %v7620_v9, 0.0 }
 0x7e3   : > { %v7525_v5 = vpop.f32.mrf.mxu2 }
 0x7e4   : > { %v7575_v29 = vadd.f32 %v7525_v5, %v16202_v58 }
 0x7e6   : > { %v7600_v15 = vadd.f32 %v16305_v59, %v7575_v29 }
 0x7e8   : > { %v7621_v49 = vmax.f32 %v7600_v15, %v14856_v20  ;;  %7567 = vmatmul.bf16.gmra.mxu2 %v7448_v23 }
 0x7ea   : > { %v16334_v2 = vsel %vm7684_vm11, %v7621_v49, 0.0 }
 0x7eb   : > { %v7528_v31 = vpop.f32.mrf.mxu2 }
 0x7ec   : > { %v7576_v21 = vadd.f32 %v7528_v31, %v16205_v30  ;;  %v13810_v30 = vld [vmem:[%s17247_s3 + $0xc0] sm:$0xff]  }
 0x7ed   : > { %v13315_v14 = vunpack.c.l.bf16 %v13810_v30  ;;  %v13316_v47 = vunpack.c.h.bf16 %v13810_v30 }
 0x7ee   : > { %v7601_v6 = vadd.f32 %v16305_v59, %v7576_v21 }
 0x7ef   : > { %vm7687_vm14 = vcmp.gt.f32.partialorder %v13315_v14, 0.0  ;;  %vm7688_vm15 = vcmp.gt.f32.partialorder %v13316_v47, 0.0 }
 0x7f0   : > { %v7622_v58 = vmax.f32 %v7601_v6, %v14856_v20 }
 0x7f2   : > { %v16339_v60 = vsel %vm7685_vm12, %v7622_v58, 0.0 }
 0x7f3   : > { %v7530_v18 = vpop.f32.mrf.mxu2 }
 0x7f4   : > { %v7577_v17 = vadd.f32 %v7530_v18, %v16210_v7 }
 0x7f6   : > { %v7602_v41 = vadd.f32 %v16305_v59, %v7577_v17 }
 0x7f8   : > { %v7623_v35 = vmax.f32 %v7602_v41, %v14856_v20 }
 0x7fa   : > { %v16347_v27 = vsel %vm7686_vm13, %v7623_v35, 0.0 }
 0x7fb   : > { %v7533_v3 = vpop.f32.mrf.mxu2 }
 0x7fc   : > { %v7578_v28 = vadd.f32 %v7533_v3, %v16217_v51  ;;  %v13811_v51 = vld [vmem:[%s17247_s3 + $0xc8] sm:$0xff]  }
 0x7fd   : > { %v13319_v53 = vunpack.c.l.bf16 %v13811_v51  ;;  %v13320_v42 = vunpack.c.h.bf16 %v13811_v51 }
 0x7fe   : > { %v7603_v48 = vadd.f32 %v16305_v59, %v7578_v28 }
 0x7ff   : > { %vm7689_vm6 = vcmp.gt.f32.partialorder %v13319_v53, 0.0  ;;  %vm7690_vm7 = vcmp.gt.f32.partialorder %v13320_v42, 0.0 }
 0x800   : > { %v7624_v7 = vmax.f32 %v7603_v48, %v14856_v20 }
 0x802   : > { %v16352_v43 = vsel %vm7687_vm14, %v7624_v7, 0.0 }
 0x803   : > { %v7535_v25 = vpop.f32.mrf.mxu2 }
 0x804   : > { %v7579_v63 = vadd.f32 %v7535_v25, %v16222_v38 }
 0x806   : > { %v7604_v36 = vadd.f32 %v16305_v59, %v7579_v63 }
 0x808   : > { %v7625_v23 = vmax.f32 %v7604_v36, %v14856_v20 }
 0x80a   : > { %v16360_v54 = vsel %vm7688_vm15, %v7625_v23, 0.0 }
 0x80b   : > { %v7538_v22 = vpop.f32.mrf.mxu2 }
 0x80c   : > { %v7580_v13 = vadd.f32 %v7538_v22, %v16229_v26  ;;  %v13812_v26 = vld [vmem:[%s17247_s3 + $0xd0] sm:$0xff]  }
 0x80d   : > { %v13323_v8 = vunpack.c.l.bf16 %v13812_v26  ;;  %v13324_v31 = vunpack.c.h.bf16 %v13812_v26 }
 0x80e   : > { %v7605_v16 = vadd.f32 %v16305_v59, %v7580_v13 }
 0x80f   : > { %vm7691_vm8 = vcmp.gt.f32.partialorder %v13323_v8, 0.0  ;;  %vm7692_vm9 = vcmp.gt.f32.partialorder %v13324_v31, 0.0 }
 0x810   : > { %v7626_v38 = vmax.f32 %v7605_v16, %v14856_v20 }
 0x812   : > { %v16365_v4 = vsel %vm7689_vm6, %v7626_v38, 0.0 }
 0x813   : > { %v7540_v52 = vpop.f32.mrf.mxu2 }
 0x814   : > { %v7581_v45 = vadd.f32 %v7540_v52, %v16233_v19 }
 0x816   : > { %v7606_v39 = vadd.f32 %v16305_v59, %v7581_v45 }
 0x818   : > { %v7627_v32 = vmax.f32 %v7606_v39, %v14856_v20 }
 0x81a   : > { %v16373_v9 = vsel %vm7690_vm7, %v7627_v32, 0.0 }
 0x81b   : > { %v7543_v5 = vpop.f32.mrf.mxu2 }
 0x81c   : > { %v7582_v29 = vadd.f32 %v7543_v5, %v16240_v46  ;;  %v13813_v46 = vld [vmem:[%s17247_s3 + $0xd8] sm:$0xff]  }
 0x81d   : > { %v13327_v56 = vunpack.c.l.bf16 %v13813_v46  ;;  %v13328_v3 = vunpack.c.h.bf16 %v13813_v46 }
 0x81e   : > { %v7607_v15 = vadd.f32 %v16305_v59, %v7582_v29 }
 0x81f   : > { %vm7693_vm10 = vcmp.gt.f32.partialorder %v13327_v56, 0.0  ;;  %vm7694_vm11 = vcmp.gt.f32.partialorder %v13328_v3, 0.0 }
 0x820   : > { %v7628_v19 = vmax.f32 %v7607_v15, %v14856_v20 }
 0x822   : > { %v16378_v49 = vsel %vm7691_vm8, %v7628_v19, 0.0 }
 0x823   : > { %v7545_v50 = vpop.f32.mrf.mxu2 }
 0x824   : > { %v7583_v61 = vadd.f32 %v7545_v50, %v16244_v44 }
 0x826   : > { %v7608_v21 = vadd.f32 %v16305_v59, %v7583_v61 }
 0x828   : > { %v7629_v6 = vmax.f32 %v7608_v21, %v14856_v20 }
 0x82a   : > { %v16386_v58 = vsel %vm7692_vm9, %v7629_v6, 0.0 }
 0x82b   : > { %v7548_v18 = vpop.f32.mrf.mxu2 }
 0x82c   : > { %v7584_v17 = vadd.f32 %v7548_v18, %v16251_v33  ;;  %v13814_v33 = vld [vmem:[%s17247_s3 + $0xe0] sm:$0xff]  }
 0x82d   : > { %v13331_v47 = vunpack.c.l.bf16 %v13814_v33  ;;  %v13332_v22 = vunpack.c.h.bf16 %v13814_v33 }
 0x82e   : > { %v7609_v41 = vadd.f32 %v16305_v59, %v7584_v17 }
 0x82f   : > { %vm7695_vm12 = vcmp.gt.f32.partialorder %v13331_v47, 0.0  ;;  %vm7696_vm13 = vcmp.gt.f32.partialorder %v13332_v22, 0.0 }
 0x830   : > { %v7630_v44 = vmax.f32 %v7609_v41, %v14856_v20 }
 0x832   : > { %v16391_v35 = vsel %vm7693_vm10, %v7630_v44, 0.0 }
 0x833   : > { %v7550_v30 = vpop.f32.mrf.mxu2 }
 0x834   : > { %v7585_v14 = vadd.f32 %v7550_v30, %v16255_v1 }
 0x836   : > { %v7610_v28 = vadd.f32 %v16305_v59, %v7585_v14 }
 0x838   : > { %v7631_v48 = vmax.f32 %v7610_v28, %v14856_v20 }
 0x83a   : > { %v16399_v7 = vsel %vm7694_vm11, %v7631_v48, 0.0 }
 0x83b   : > { %v7553_v25 = vpop.f32.mrf.mxu2 }
 0x83c   : > { %v7586_v63 = vadd.f32 %v7553_v25, %v16262_v12  ;;  %v13815_v12 = vld [vmem:[%s17247_s3 + $0xe8] sm:$0xff]  }
 0x83d   : > { %v13335_v42 = vunpack.c.l.bf16 %v13815_v12  ;;  %v13336_v5 = vunpack.c.h.bf16 %v13815_v12 }
 0x83e   : > { %v7611_v36 = vadd.f32 %v16305_v59, %v7586_v63 }
 0x83f   : > { %vm7697_vm14 = vcmp.gt.f32.partialorder %v13335_v42, 0.0  ;;  %vm7698_vm15 = vcmp.gt.f32.partialorder %v13336_v5, 0.0 }
 0x840   : > { %v7632_v1 = vmax.f32 %v7611_v36, %v14856_v20 }
 0x842   : > { %v16404_v23 = vsel %vm7695_vm12, %v7632_v1, 0.0 }
 0x843   : > { %v7555_v51 = vpop.f32.mrf.mxu2 }
 0x844   : > { %v7587_v53 = vadd.f32 %v7555_v51, %v16266_v57 }
 0x846   : > { %v7612_v13 = vadd.f32 %v16305_v59, %v7587_v53 }
 0x848   : > { %v7633_v16 = vmax.f32 %v7612_v13, %v14856_v20 }
 0x84a   : > { %v16412_v38 = vsel %vm7696_vm13, %v7633_v16, 0.0 }
 0x84b   : > { %v7558_v52 = vpop.f32.mrf.mxu2 }
 0x84c   : > { %v7588_v45 = vadd.f32 %v7558_v52, %v16273_v0  ;;  %v13816_v0 = vld [vmem:[%s17247_s3 + $0xf0] sm:$0xff]  }
 0x84d   : > { %v13339_v31 = vunpack.c.l.bf16 %v13816_v0  ;;  %v13340_v18 = vunpack.c.h.bf16 %v13816_v0 }
 0x84e   : > { %v7613_v39 = vadd.f32 %v16305_v59, %v7588_v45 }
 0x84f   : > { %vm7699_vm6 = vcmp.gt.f32.partialorder %v13339_v31, 0.0  ;;  %vm7700_vm7 = vcmp.gt.f32.partialorder %v13340_v18, 0.0 }
 0x850   : > { %v7634_v57 = vmax.f32 %v7613_v39, %v14856_v20 }
 0x852   : > { %v16417_v32 = vsel %vm7697_vm14, %v7634_v57, 0.0 }
 0x853   : > { %v7560_v26 = vpop.f32.mrf.mxu2 }
 0x854   : > { %v7589_v8 = vadd.f32 %v7560_v26, %v16277_v34 }
 0x856   : > { %v7614_v29 = vadd.f32 %v16305_v59, %v7589_v8 }
 0x858   : > { %v7635_v15 = vmax.f32 %v7614_v29, %v14856_v20 }
 0x85a   : > { %v16425_v19 = vsel %vm7698_vm15, %v7635_v15, 0.0 }
 0x85b   : > { %v7563_v50 = vpop.f32.mrf.mxu2 }
 0x85c   : > { %v7590_v61 = vadd.f32 %v7563_v50, %v16284_v10  ;;  %v7659_v10 = vld [vmem:[%s17247_s3 + $0xf8] sm:$0xf] }
 0x85d   : > { %v7680_v3 = vunpack.c.l.bf16 %v7659_v10 }
 0x85e   : > { %v7615_v21 = vadd.f32 %v16305_v59, %v7590_v61 }
 0x85f   : > { %vm7701_vm8 = vcmp.gt.f32.partialorder %v7680_v3, 0.0 }
 0x860   : > { %v7636_v34 = vmax.f32 %v7615_v21, %v14856_v20 }
 0x862   : > { %v16430_v6 = vsel %vm7699_vm6, %v7636_v34, 0.0 }
 0x863   : > { %v7565_v46 = vpop.f32.mrf.mxu2 }
 0x864   : > { %v7591_v56 = vadd.f32 %v7565_v46, %v16288_v55 }
 0x866   : > { %v7616_v17 = vadd.f32 %v16305_v59, %v7591_v56 }
 0x868   : > { %v7637_v41 = vmax.f32 %v7616_v17, %v14856_v20 }
 0x86a   : > { %v7721_v44 = vsel %vm7700_vm7, %v7637_v41, 0.0 }
 0x86b   : > { %v7568_v30 = vpop.f32.mrf.mxu2 }
 0x86c   : > { %v7592_v14 = vadd.f32 %v7568_v30, %v16296_v62 }
 0x86e   : > { %v7617_v28 = vadd.f32 %v16305_v59, %v7592_v14 }
 0x86f   : > { %7746 = sbr.rel (%p10877_p8) target bundleno = 2176 (0x880), region = 60 }
 0x870   : > { %v7638_v48 = vmax.f32 %v7617_v28, %v14856_v20 }
 0x872   : > { %v7722_v55 = vsel %vm7701_vm8, %v7638_v48, 0.0 }
 0x873   : > { %v7743_v33 = vpack.c.bf16 %v7722_v55, %v7722_v55  ;;  %v7570_v25 = vpop.f32.mrf.mxu2 }
 0x874   : > { %v13344_v47 = vpack.c.bf16 %v16326_v40, %v16321_v37  ;;  %v13349_v63 = vpack.c.bf16 %v16339_v60, %v16334_v2  ;;  %v13354_v62 = vpack.c.bf16 %v16352_v43, %v16347_v27  ;;  %7750 = vst [vmem:[%s7749_s7 + $0xb4] sm:$0xf] %v7723_v11  ;;  %v13359_v59 = vpack.c.bf16 %v16365_v4, %v16360_v54 }
 0x875   : > { %v13364_v36 = vpack.c.bf16 %v16378_v49, %v16373_v9  ;;  %v13369_v1 = vpack.c.bf16 %v16391_v35, %v16386_v58  ;;  %v13374_v51 = vpack.c.bf16 %v16404_v23, %v16399_v7  ;;  %v13379_v22 = vpack.c.bf16 %v16417_v32, %v16412_v38 }
 0x876   : > { %13817 = vst [vmem:[%s7749_s7 + $0xb8] sm:$0xff] %v13344_v47   ;;  %v13384_v11 = vpack.c.bf16 %v16430_v6, %v16425_v19  ;;  %v13389_v53 = vpack.c.bf16 %v7722_v55, %v7721_v44 }
 0x877   : > { %13818 = vst [vmem:[%s7749_s7 + $0xc0] sm:$0xff] %v13349_v63  }
 0x878   : > { %13819 = vst [vmem:[%s7749_s7 + $0xc8] sm:$0xff] %v13354_v62  }
 0x879   : > { %13820 = vst [vmem:[%s7749_s7 + $0xd0] sm:$0xff] %v13359_v59  }
 0x87a   : > { %13821 = vst [vmem:[%s7749_s7 + $0xd8] sm:$0xff] %v13364_v36  }
 0x87b   : > { %13822 = vst [vmem:[%s7749_s7 + $0xe0] sm:$0xff] %v13369_v1  }
 0x87c   : > { %13823 = vst [vmem:[%s7749_s7 + $0xe8] sm:$0xff] %v13374_v51  }
 0x87d   : > { %13824 = vst [vmem:[%s7749_s7 + $0xf0] sm:$0xff] %v13379_v22  }
 0x87e   : > { %13825 = vst [vmem:[%s7749_s7 + $0xf8] sm:$0xff] %v13384_v11  }
 0x87f   : > { %13826 = vst [vmem:[%s7749_s7 + $0x100] sm:$0xff] %v13389_v53  }
 0x880 PF: > { %7773 = sbr.rel (%p10879_p9) target bundleno = 2193 (0x891), region = 64 }
 0x885   : > { %v13394_v13 = vpack.c.bf16 %v16321_v37, %v16310_v24  ;;  %v13399_v16 = vpack.c.bf16 %v16334_v2, %v16326_v40  ;;  %v13404_v12 = vpack.c.bf16 %v16347_v27, %v16339_v60  ;;  %7794 = vst [vmem:[%s17248_s4 + $0xf8] sm:$0xf] %v7743_v33  ;;  %v13409_v52 = vpack.c.bf16 %v16360_v54, %v16352_v43 }
 0x886   : > { %v13414_v24 = vpack.c.bf16 %v16373_v9, %v16365_v4  ;;  %v13419_v37 = vpack.c.bf16 %v16386_v58, %v16378_v49  ;;  %v13424_v40 = vpack.c.bf16 %v16399_v7, %v16391_v35  ;;  %v13429_v2 = vpack.c.bf16 %v16412_v38, %v16404_v23 }
 0x887   : > { %13827 = vst [vmem:[%s17248_s4 + $0xa8] sm:$0xff] %v13394_v13   ;;  %v13434_v60 = vpack.c.bf16 %v16425_v19, %v16417_v32  ;;  %v13439_v27 = vpack.c.bf16 %v7721_v44, %v16430_v6 }
 0x888   : > { %13828 = vst [vmem:[%s17248_s4 + $0xb0] sm:$0xff] %v13399_v16  }
 0x889   : > { %13829 = vst [vmem:[%s17248_s4 + $0xb8] sm:$0xff] %v13404_v12  }
 0x88a   : > { %13830 = vst [vmem:[%s17248_s4 + $0xc0] sm:$0xff] %v13409_v52  }
 0x88b   : > { %13831 = vst [vmem:[%s17248_s4 + $0xc8] sm:$0xff] %v13414_v24  }
 0x88c   : > { %13832 = vst [vmem:[%s17248_s4 + $0xd0] sm:$0xff] %v13419_v37  }
 0x88d   : > { %13833 = vst [vmem:[%s17248_s4 + $0xd8] sm:$0xff] %v13424_v40  }
 0x88e   : > { %13834 = vst [vmem:[%s17248_s4 + $0xe0] sm:$0xff] %v13429_v2  }
 0x88f   : > { %13835 = vst [vmem:[%s17248_s4 + $0xe8] sm:$0xff] %v13434_v60  }
 0x890   : > { %13836 = vst [vmem:[%s17248_s4 + $0xf0] sm:$0xff] %v13439_v27  }
 0x891 PF: > { %v12819_v43 = vld [vmem:[%s14189_s26 + $0x78] sm:$0xff]  ;;  %v12818_v49 = vld [vmem:[%s14189_s26 + $0x70] sm:$0xff]  ;;  %v12817_v23 = vld [vmem:[%s14189_s26 + $0x68] sm:$0xff]  ;;  %s12896_s12 = smul.u32 (!%p10877_p8), 360, %s17356_s19 }
 0x892   : > { %v12835_v54 = vld [vmem:[%s14189_s26 + $0xf8] sm:$0xff]  ;;  %7985 = vmatpush.bf16.msra.mxu3 %v12819_v43  ;;  %v12834_v58 = vld [vmem:[%s14189_s26 + $0xf0] sm:$0xff]  ;;  %v12833_v38 = vld [vmem:[%s14189_s26 + $0xe8] sm:$0xff] }
 0x893   : > { %v12811_v4 = vld [vmem:[%s14189_s26 + $0x38] sm:$0xff]  ;;  %8737 = vmatpush.bf16.msrb.mxu2 %v12835_v54  ;;  %v12810_v35 = vld [vmem:[%s14189_s26 + $0x30] sm:$0xff]  ;;  %v12809_v42 = vld [vmem:[%s14189_s26 + $0x28] sm:$0xff] }
 0x894   : > { %v12827_v9 = vld [vmem:[%s14189_s26 + $0xb8] sm:$0xff]  ;;  %8208 = vmatpush.bf16.msrb.mxu0 %v12811_v4  ;;  %v12826_v7 = vld [vmem:[%s14189_s26 + $0xb0] sm:$0xff]  ;;  %v12825_v45 = vld [vmem:[%s14189_s26 + $0xa8] sm:$0xff] }
 0x895   : > { %8403 = vmatpush.bf16.msrb.mxu1 %v12827_v9  ;;  %v12816_v39 = vld [vmem:[%s14189_s26 + $0x60] sm:$0xff]  ;;  %v7833_v26 = vld [vmem:[%s14355_s22 + $0xfc] sm:$0x8]  ;;  %v14035_v15 = vld [vmem:[%s14355_s22 + $0x104] sm:$0xf0]  }
 0x896   : > { %7986 = vmatpush.bf16.msra.mxu3 %v12818_v49  ;;  %v12832_v57 = vld [vmem:[%s14189_s26 + $0xe0] sm:$0xff]  ;;  %v12815_v0 = vld [vmem:[%s14189_s26 + $0x58] sm:$0xff]  ;;  %v7872_v19 = vunpack.c.l.b16 %v7833_v26  ;;  %v14037_v21 = vld [vmem:[%s14355_s22 + $0x10c] sm:$0xff]  }
 0x897   : > { %8738 = vmatpush.bf16.msrb.mxu2 %v12834_v58  ;;  %v7796_v32 = vld [vmem:[%s14355_s22 + $0x100] sm:$0xf]  ;;  %v13968_v29 = vld [vmem:[%s14355_s22 + $0x104] sm:$0x8]  ;;  %v7795_v31 = vld [vmem:[%s14355_s22 + $0xfc] sm:$0xc] }
 0x898   : > { %8209 = vmatpush.bf16.msrb.mxu0 %v12810_v35  ;;  %v12808_v5 = vld [vmem:[%s14189_s26 + $0x20] sm:$0xff]  ;;  %v7873_v50 = vunpack.c.l.b16 %v7796_v32  ;;  %v12831_v61 = vld [vmem:[%s14189_s26 + $0xd8] sm:$0xff]  ;;  %v13969_v34 = vor.u32 %v14035_v15, %v13968_v29  ;;  %v8049_v6 = vunpack.c.l.b16 %v7795_v31  ;;  %v12814_v10 = vld [vmem:[%s14189_s26 + $0x50] sm:$0xff]  ;;  %v8589_v14 = vshrl.u32 %v14037_v21, 16 }
 0x899   : > { %8404 = vmatpush.bf16.msrb.mxu1 %v12826_v7  ;;  %v12824_v8 = vld [vmem:[%s14189_s26 + $0xa0] sm:$0xff]  ;;  %v12807_v46 = vld [vmem:[%s14189_s26 + $0x18] sm:$0xff]  ;;  %v12830_v44 = vld [vmem:[%s14189_s26 + $0xd0] sm:$0xff]  ;;  %v8592_v28 = vshll.u32 %v14037_v21, 16 }
 0x89a   : > { %7987 = vmatpush.bf16.msra.mxu3 %v12817_v23  ;;  %v12823_v18 = vld [vmem:[%s14189_s26 + $0x98] sm:$0xff]  ;;  %v8050_v56 = vpack.c.b16 %v7873_v50, %v8049_v6  ;;  %v16546_v17 = vld [vmem:[%s14355_s22 + $0x104] sm:$0xff]  ;;  %v7894_v41 = vpack.c.b16 %v7873_v50, %v7872_v19  ;;  %v8581_v30 = vshrl.u32 %v13969_v34, 16  ;;  %v8584_v3 = vshll.u32 %v13969_v34, 16  ;;  %v12806_v48 = vld [vmem:[%s14189_s26 + $0x10] sm:$0xff] }
 0x89b   : > { %8739 = vmatpush.bf16.msrb.mxu2 %v12833_v38  ;;  %v12822_v55 = vld [vmem:[%s14189_s26 + $0x90] sm:$0xff]  ;;  %v8060_v47 = vshrl.u32 %v16546_v17, 16  ;;  %v8063_v63 = vshll.u32 %v16546_v17, 16  ;;  %v12813_v36 = vld [vmem:[%s14189_s26 + $0x48] sm:$0xff]  ;;  %v8591_v11 = vrot.slane %v8589_v14, 3  ;;  %v8594_v53 = vrot.slane %v8592_v28, 4 }
 0x89c   : > { %8210 = vmatpush.bf16.msrb.mxu0 %v12809_v42  ;;  %v8052_v33 = vshrl.u32 %v8050_v56, 16  ;;  %v8055_v25 = vshll.u32 %v8050_v56, 16  ;;  %v8292_v62 = vshrl.u32 %v7894_v41, 16  ;;  %v8295_v59 = vshll.u32 %v7894_v41, 16  ;;  %v12829_v1 = vld [vmem:[%s14189_s26 + $0xc8] sm:$0xff]  ;;  %v12812_v43 = vld [vmem:[%s14189_s26 + $0x40] sm:$0xff] }
 0x89d   : > { %8405 = vmatpush.bf16.msrb.mxu1 %v12825_v45  ;;  %v8583_v51 = vrot.slane %v8581_v30, 3  ;;  %v8586_v22 = vrot.slane %v8584_v3, 4  ;;  %v12805_v13 = vld [vmem:[%s14189_s26 + $0x8] sm:$0xff]  ;;  %v8062_v24 = vrot.slane %v8060_v47, 2  ;;  %v8065_v37 = vrot.slane %v8063_v63, 3  ;;  %v12828_v9 = vld [vmem:[%s14189_s26 + $0xc0] sm:$0xff] }
 0x89e   : > { %7988 = vmatpush.bf16.msra.mxu3 %v12816_v39  ;;  %v12821_v16 = vld [vmem:[%s14189_s26 + $0x88] sm:$0xff]  ;;  %v8054_v12 = vrot.slane %v8052_v33, 2  ;;  %v8057_v52 = vrot.slane %v8055_v25, 3  ;;  %v8294_v40 = vrot.slane %v8292_v62, 3  ;;  %v8297_v2 = vrot.slane %v8295_v59, 4  ;;  %v12843_v35 = vld [vmem:[%s14189_s26 + $0x138] sm:$0xff] }
 0x89f   : > { %8740 = vmatpush.bf16.msrb.mxu2 %v12832_v57  ;;  %v8299_v60 = vrot.slane %v8060_v47, 3  ;;  %v8300_v27 = vrot.slane %v8063_v63, 4  ;;  %v7905_v54 = vrot.slane %v7894_v41, 3  ;;  %v7906_v4 = vrot.slane %v16546_v17, 3  ;;  %v12804_v7 = vld [vmem:[%s14189_s26] sm:$0xff]  ;;  %v14039_v26 = vld [vmem:[%s14355_s22 + $0x114] sm:$0xff]  }
 0x8a0   : > { %8211 = vmatpush.bf16.msrb.mxu0 %v12808_v5  ;;  %v8587_v49 = vor.u32 %v8586_v22, %v8583_v51  ;;  %v8595_v58 = vor.u32 %v8594_v53, %v8591_v11  ;;  %v8058_v23 = vor.u32 %v8057_v52, %v8054_v12  ;;  %v8066_v38 = vor.u32 %v8065_v37, %v8062_v24  ;;  %v12820_v42 = vld [vmem:[%s14189_s26 + $0x80] sm:$0xff]  ;;  %v12796_v15 = vld [vmem:[%s14355_s22 + $0x10c] sm:$0xff] }
 0x8a1   : > { %8406 = vmatpush.bf16.msrb.mxu1 %v12824_v8  ;;  %v8298_v45 = vor.u32 %v8297_v2, %v8294_v40  ;;  %v8301_v39 = vor.u32 %v8300_v27, %v8299_v60  ;;  %v7907_v57 = vsel %vm559_vm0, %v7905_v54, %v7906_v4  ;;  %v12842_v8 = vld [vmem:[%s14189_s26 + $0x130] sm:$0xff]  ;;  %v8601_v19 = vshll.u32 %v14039_v26, 16  ;;  %v14041_v14 = vld [vmem:[%s14355_s22 + $0x11c] sm:$0xff]   ;;  %v14043_v24 = vld [vmem:[%s14355_s22 + $0x124] sm:$0xff]  }
 0x8a2   : > { %7989 = vmatpush.bf16.msra.mxu3 %v12815_v0  ;;  %v8596_v32 = vsel %vm948_vm2, %v8587_v49, %v8595_v58  ;;  %v8067_v5 = vsel %vm706_vm1, %v8058_v23, %v8066_v38  ;;  %v8598_v0 = vshrl.u32 %v14039_v26, 16  ;;  %v8069_v50 = vshrl.u32 %v12796_v15, 16  ;;  %v12798_v2 = vld [vmem:[%s14355_s22 + $0x11c] sm:$0xff]  ;;  %v14045_v26 = vld [vmem:[%s14355_s22 + $0x12c] sm:$0xff]  }
 0x8a3   : > { %8741 = vmatpush.bf16.msrb.mxu2 %v12831_v61  ;;  %v8302_v29 = vsel %vm948_vm2, %v8298_v45, %v8301_v39  ;;  %v8072_v31 = vshll.u32 %v12796_v15, 16  ;;  %v12841_v61 = vld [vmem:[%s14189_s26 + $0x128] sm:$0xff]  ;;  %v8603_v34 = vrot.slane %v8601_v19, 4  ;;  %v7908_v17 = vrot.slane %v12796_v15, 3  ;;  %v12840_v60 = vld [vmem:[%s14189_s26 + $0x120] sm:$0xff] }
 0x8a4   : > { %8212 = vmatpush.bf16.msrb.mxu0 %v12807_v46  ;;  %v8600_v21 = vrot.slane %v8598_v0, 3  ;;  %v8071_v6 = vrot.slane %v8069_v50, 2  ;;  %v8607_v33 = vshrl.u32 %v14041_v14, 16  ;;  %v8610_v25 = vshll.u32 %v14041_v14, 16 }
 0x8a5   : > { %8407 = vmatpush.bf16.msrb.mxu1 %v12823_v18  ;;  %v8074_v46 = vrot.slane %v8072_v31, 3  ;;  %v8303_v18 = vrot.slane %v8069_v50, 3  ;;  %v8304_v56 = vrot.slane %v8072_v31, 4  ;;  %v7909_v30 = vsel %vm559_vm0, %v7906_v4, %v7908_v17  ;;  %v12839_v31 = vld [vmem:[%s14189_s26 + $0x118] sm:$0xff] }
 0x8a6   : > { %7990 = vmatpush.bf16.msra.mxu3 %v12814_v10  ;;  %v8604_v41 = vor.u32 %v8603_v34, %v8600_v21  ;;  %v8609_v62 = vrot.slane %v8607_v33, 3  ;;  %v8612_v59 = vrot.slane %v8610_v25, 4  ;;  %v8616_v27 = vshrl.u32 %v14043_v24, 16 }
 0x8a7   : > { %8742 = vmatpush.bf16.msrb.mxu2 %v12830_v44  ;;  %v8075_v10 = vor.u32 %v8074_v46, %v8071_v6  ;;  %v8305_v44 = vor.u32 %v8304_v56, %v8303_v18  ;;  %v8087_v54 = vshrl.u32 %v12798_v2, 16  ;;  %v8090_v4 = vshll.u32 %v12798_v2, 16 }
 0x8a8   : > { %8213 = vmatpush.bf16.msrb.mxu0 %v12806_v48  ;;  %v8605_v3 = vsel %vm948_vm2, %v8595_v58, %v8604_v41  ;;  %v8613_v53 = vor.u32 %v8612_v59, %v8609_v62  ;;  %v8625_v15 = vshrl.u32 %v14045_v26, 16  ;;  %v8628_v0 = vshll.u32 %v14045_v26, 16 }
 0x8a9   : > { %8408 = vmatpush.bf16.msrb.mxu1 %v12822_v55  ;;  %v8076_v28 = vsel %vm706_vm1, %v8066_v38, %v8075_v10  ;;  %v8306_v48 = vsel %vm948_vm2, %v8301_v39, %v8305_v44  ;;  %v12797_v55 = vld [vmem:[%s14355_s22 + $0x114] sm:$0xff]  ;;  %v8089_v58 = vrot.slane %v8087_v54, 2  ;;  %v8312_v23 = vrot.slane %v8090_v4, 4 }
 0x8aa   : > { %7991 = vmatpush.bf16.msra.mxu3 %v12813_v36  ;;  %v8078_v47 = vshrl.u32 %v12797_v55, 16  ;;  %v8081_v63 = vshll.u32 %v12797_v55, 16  ;;  %v7910_v11 = vrot.slane %v12797_v55, 3  ;;  %v8614_v52 = vsel %vm948_vm2, %v8604_v41, %v8613_v53 }
 0x8ab   : > { %8743 = vmatpush.bf16.msrb.mxu2 %v12829_v1  ;;  %v7912_v38 = vrot.slane %v12798_v2, 3  ;;  %v8630_v21 = vrot.slane %v8628_v0, 4  ;;  %v12801_v2 = vld [vmem:[%s14355_s22 + $0x134] sm:$0xff] }
 0x8ac   : > { %8214 = vmatpush.bf16.msrb.mxu0 %v12805_v13  ;;  %v8080_v36 = vrot.slane %v8078_v47, 2  ;;  %v8083_v1 = vrot.slane %v8081_v63, 3  ;;  %v8307_v51 = vrot.slane %v8078_v47, 3  ;;  %v8308_v22 = vrot.slane %v8081_v63, 4  ;;  %v12838_v63 = vld [vmem:[%s14189_s26 + $0x110] sm:$0xff] }
 0x8ad   : > { %8409 = vmatpush.bf16.msrb.mxu1 %v12821_v16  ;;  %v7911_v12 = vsel %vm559_vm0, %v7908_v17, %v7910_v11 }
 0x8ae   : > { %7992 = vmatpush.bf16.msra.mxu3 %v12812_v43  ;;  %v8084_v13 = vor.u32 %v8083_v1, %v8080_v36  ;;  %v8309_v16 = vor.u32 %v8308_v22, %v8307_v51  ;;  %v8619_v43 = vshll.u32 %v14043_v24, 16  ;;  %v14049_v24 = vld [vmem:[%s14355_s22 + $0x13c] sm:$0xff]  }
 0x8af   : > { %8744 = vmatpush.bf16.msrb.mxu2 %v12828_v9  ;;  %v8618_v9 = vrot.slane %v8616_v27, 3  ;;  %v8646_v27 = vshll.u32 %v14049_v24, 16 }
 0x8b0   : > { %8215 = vmatpush.bf16.msrb.mxu0 %v12804_v7  ;;  %v8085_v37 = vsel %vm706_vm1, %v8075_v10, %v8084_v13  ;;  %v8310_v40 = vsel %vm948_vm2, %v8305_v44, %v8309_v16  ;;  %v8621_v49 = vrot.slane %v8619_v43, 4  ;;  %v8311_v7 = vrot.slane %v8087_v54, 3 }
 0x8b1   : > { %8410 = vmatpush.bf16.msrb.mxu1 %v12820_v42  ;;  %7993 = vmatmul.bf16.vlgmr.msra.gmra.mxu3 %v7907_v57  ;;  %v7913_v57 = vsel %vm559_vm0, %v7910_v11, %v7912_v38  ;;  %v8114_v43 = vshrl.u32 %v12801_v2, 16  ;;  %v8117_v54 = vshll.u32 %v12801_v2, 16 }
 0x8b2   : > { %8907 = vmatpush.bf16.msrb.mxu3 %v12843_v35  ;;  %8745 = vmatmul.bf16.vlgmr.msrb.gmra.mxu2 %v8596_v32  ;;  %v8092_v35 = vrot.slane %v8090_v4, 3  ;;  %v8622_v42 = vor.u32 %v8621_v49, %v8618_v9  ;;  %v8313_v39 = vor.u32 %v8312_v23, %v8311_v7  ;;  %v8648_v9 = vrot.slane %v8646_v27, 4  ;;  %v12886_v27 = vld [vmem:[%s14189_s26 + $0x1f0] sm:$0xff] }
 0x8b3   : > { %8216 = vmatmul.bf16.vlgmr.msrb.gmra.mxu0 %v8067_v5  ;;  %v8116_v49 = vrot.slane %v8114_v43, 2  ;;  %v8324_v7 = vrot.slane %v8117_v54, 4  ;;  %v7918_v23 = vrot.slane %v12801_v2, 3 }
 0x8b4   : > { %8411 = vmatmul.bf16.vlgmr.msrb.gmra.mxu1 %v8302_v29  ;;  %v8093_v45 = vor.u32 %v8092_v35, %v8089_v58  ;;  %v8623_v32 = vsel %vm948_vm2, %v8613_v53, %v8622_v42  ;;  %v12799_v29 = vld [vmem:[%s14355_s22 + $0x124] sm:$0xff]  ;;  %v8119_v58 = vrot.slane %v8117_v54, 3  ;;  %v8323_v35 = vrot.slane %v8114_v43, 3 }
 0x8b5   : > { %v8096_v19 = vshrl.u32 %v12799_v29, 16  ;;  %v8099_v50 = vshll.u32 %v12799_v29, 16  ;;  %v7914_v56 = vrot.slane %v12799_v29, 3 }
 0x8b6   : > { %8908 = vmatpush.bf16.msrb.mxu3 %v12842_v8  ;;  %v8094_v5 = vsel %vm706_vm1, %v8084_v13, %v8093_v45  ;;  %v8314_v8 = vsel %vm948_vm2, %v8309_v16, %v8313_v39 }
 0x8b7   : > { %v8098_v34 = vrot.slane %v8096_v19, 2  ;;  %v8101_v6 = vrot.slane %v8099_v50, 3  ;;  %v8315_v46 = vrot.slane %v8096_v19, 3  ;;  %v8316_v18 = vrot.slane %v8099_v50, 4  ;;  %v12837_v50 = vld [vmem:[%s14189_s26 + $0x108] sm:$0xff] }
 0x8b8   : > { %v7915_v44 = vsel %vm559_vm0, %v7912_v38, %v7914_v56 }
 0x8b9   : > { %v8102_v41 = vor.u32 %v8101_v6, %v8098_v34  ;;  %v8317_v10 = vor.u32 %v8316_v18, %v8315_v46 }
 0x8ba   : > { %8909 = vmatpush.bf16.msrb.mxu3 %v12841_v61  ;;  %v8627_v61 = vrot.slane %v8625_v15, 3 }
 0x8bb   : > { %v8103_v14 = vsel %vm706_vm1, %v8093_v45, %v8102_v41  ;;  %v8325_v45 = vor.u32 %v8324_v7, %v8323_v35  ;;  %v12878_v35 = vld [vmem:[%s14189_s26 + $0x1b0] sm:$0xff]  ;;  %v12885_v7 = vld [vmem:[%s14189_s26 + $0x1e8] sm:$0xff] }
 0x8bc   : > { %v8631_v17 = vor.u32 %v8630_v21, %v8627_v61 }
 0x8be   : > { %8910 = vmatpush.bf16.msrb.mxu3 %v12840_v60  ;;  %v8643_v60 = vshrl.u32 %v14049_v24, 16 }
 0x8c0   : > { %v8645_v4 = vrot.slane %v8643_v60, 3  ;;  %v12879_v60 = vld [vmem:[%s14189_s26 + $0x1b8] sm:$0xff] }
 0x8c1   : > { %7998 = vmatmul.bf16.gmra.mxu3 %v7909_v30  ;;  %v8632_v30 = vsel %vm948_vm2, %v8622_v42, %v8631_v17  ;;  %v8120_v42 = vor.u32 %v8119_v58, %v8116_v49  ;;  %9553 = vmatpush.bf16.msra.mxu1 %v12879_v60 }
 0x8c2   : > { %8750 = vmatmul.bf16.gmra.mxu2 %v8605_v3  ;;  %8911 = vmatpush.bf16.msrb.mxu3 %v12839_v31  ;;  %v14047_v3 = vld [vmem:[%s14355_s22 + $0x134] sm:$0xff]   ;;  %v8649_v38 = vor.u32 %v8648_v9, %v8645_v4 }
 0x8c3   : > { %8221 = vmatmul.bf16.gmra.mxu0 %v8076_v28  ;;  %v8318_v28 = vsel %vm948_vm2, %v8313_v39, %v8317_v10  ;;  %v8634_v55 = vshrl.u32 %v14047_v3, 16  ;;  %v8637_v33 = vshll.u32 %v14047_v3, 16  ;;  %v12861_v4 = vld [vmem:[%s14189_s26 + $0x170] sm:$0xff] }
 0x8c4   : > { %8416 = vmatmul.bf16.gmra.mxu1 %v8306_v48  ;;  %v12800_v48 = vld [vmem:[%s14355_s22 + $0x12c] sm:$0xff] }
 0x8c5   : > { %v8105_v25 = vshrl.u32 %v12800_v48, 16  ;;  %v8108_v47 = vshll.u32 %v12800_v48, 16  ;;  %v8636_v62 = vrot.slane %v8634_v55, 3  ;;  %v8639_v59 = vrot.slane %v8637_v33, 4  ;;  %9554 = vmatpush.bf16.msra.mxu1 %v12878_v35  ;;  %v12872_v35 = vld [vmem:[%s14189_s26 + $0x180] sm:$0xff] }
 0x8c6   : > { %8912 = vmatpush.bf16.msrb.mxu3 %v12838_v63  ;;  %v7916_v11 = vrot.slane %v12800_v48, 3 }
 0x8c7   : > { %v8107_v36 = vrot.slane %v8105_v25, 2  ;;  %v8110_v1 = vrot.slane %v8108_v47, 3  ;;  %v8319_v51 = vrot.slane %v8105_v25, 3  ;;  %v8320_v22 = vrot.slane %v8108_v47, 4 }
 0x8c8   : > { %v8640_v53 = vor.u32 %v8639_v59, %v8636_v62  ;;  %v7919_v39 = vsel %vm559_vm0, %v7916_v11, %v7918_v23  ;;  %v12887_v62 = vld [vmem:[%s14189_s26 + $0x1f8] sm:$0xff] }
 0x8c9   : > { %v8111_v13 = vor.u32 %v8110_v1, %v8107_v36  ;;  %v8321_v16 = vor.u32 %v8320_v22, %v8319_v51  ;;  %v16629_v1 = vld [vmem:[%s14355_s22 + $0x150] sm:$0xff]   ;;  %v8508_v51 = vld [vmem:[%s14355_s22 + $0x158] sm:$0xf]  ;;  %9737 = vmatpush.bf16.msra.mxu2 %v12887_v62 }
 0x8ca   : > { %8913 = vmatpush.bf16.msrb.mxu3 %v12837_v50  ;;  %v16641_v2 = vunpack.c.l.b16 %v8508_v51  ;;  %v12857_v51 = vld [vmem:[%s14189_s26 + $0x150] sm:$0xff] }
 0x8cb   : > { %v8121_v26 = vsel %vm706_vm1, %v8111_v13, %v8120_v42 }
 0x8cd   : > { %9738 = vmatpush.bf16.msra.mxu2 %v12886_v27 }
 0x8d1   : > { %8003 = vmatmul.bf16.gmra.mxu3 %v7911_v12  ;;  %v7917_v12 = vsel %vm559_vm0, %v7914_v56, %v7916_v11  ;;  %9739 = vmatpush.bf16.msra.mxu2 %v12885_v7 }
 0x8d2   : > { %8755 = vmatmul.bf16.gmra.mxu2 %v8614_v52  ;;  %v8641_v52 = vsel %vm948_vm2, %v8631_v17, %v8640_v53 }
 0x8d3   : > { %8226 = vmatmul.bf16.gmra.mxu0 %v8085_v37  ;;  %v8112_v37 = vsel %vm706_vm1, %v8102_v41, %v8111_v13  ;;  %v7815_v13 = vld [vmem:[%s14355_s22 + $0x14c] sm:$0xff]  }
 0x8d4   : > { %8421 = vmatmul.bf16.gmra.mxu1 %v8310_v40  ;;  %v8322_v40 = vsel %vm948_vm2, %v8317_v10, %v8321_v16  ;;  %v8336_v50 = vshrl.u32 %v7815_v13, 16 }
 0x8e1   : > { %8008 = vmatmul.bf16.gmra.mxu3 %v7913_v57  ;;  %v8650_v57 = vsel %vm948_vm2, %v8640_v53, %v8649_v38  ;;  %v12862_v53 = vld [vmem:[%s14189_s26 + $0x178] sm:$0xff] }
 0x8e2   : > { %8760 = vmatmul.bf16.gmra.mxu2 %v8623_v32  ;;  %v14051_v32 = vld [vmem:[%s14355_s22 + $0x144] sm:$0xff]   ;;  %9230 = vmatpush.bf16.msra.mxu0 %v12862_v53 }
 0x8e3   : > { %8231 = vmatmul.bf16.gmra.mxu0 %v8094_v5  ;;  %v8326_v5 = vsel %vm948_vm2, %v8321_v16, %v8325_v45  ;;  %v8652_v29 = vshrl.u32 %v14051_v32, 16  ;;  %v8655_v15 = vshll.u32 %v14051_v32, 16  ;;  %v14090_v16 = vld [vmem:[%s14355_s22 + $0x14c] sm:$0xf]  }
 0x8e4   : > { %8426 = vmatmul.bf16.gmra.mxu1 %v8314_v8  ;;  %v16611_v8 = vld [vmem:[%s14355_s22 + $0x13c] sm:$0xff] }
 0x8e5   : > { %v8123_v0 = vshrl.u32 %v16611_v8, 16  ;;  %v8126_v19 = vshll.u32 %v16611_v8, 16  ;;  %v8654_v31 = vrot.slane %v8652_v29, 3  ;;  %v8657_v61 = vrot.slane %v8655_v15, 4 }
 0x8e6   : > { %v7920_v18 = vrot.slane %v16611_v8, 3  ;;  %9231 = vmatpush.bf16.msra.mxu0 %v12861_v4  ;;  %v12884_v8 = vld [vmem:[%s14189_s26 + $0x1e0] sm:$0xff]  ;;  %v12873_v4 = vld [vmem:[%s14189_s26 + $0x188] sm:$0xff] }
 0x8e7   : > { %v8125_v21 = vrot.slane %v8123_v0, 2  ;;  %v8128_v34 = vrot.slane %v8126_v19, 3  ;;  %v8327_v6 = vrot.slane %v8123_v0, 3  ;;  %v8328_v46 = vrot.slane %v8126_v19, 4  ;;  %9740 = vmatpush.bf16.msra.mxu2 %v12884_v8 }
 0x8e8   : > { %v8658_v56 = vor.u32 %v8657_v61, %v8654_v31  ;;  %v7921_v10 = vsel %vm559_vm0, %v7918_v23, %v7920_v18  ;;  %v8339_v31 = vshll.u32 %v7815_v13, 16  ;;  %v12859_v61 = vld [vmem:[%s14189_s26 + $0x160] sm:$0xff]  ;;  %v12874_v13 = vld [vmem:[%s14189_s26 + $0x190] sm:$0xff] }
 0x8e9   : > { %v8129_v17 = vor.u32 %v8128_v34, %v8125_v21  ;;  %v8329_v41 = vor.u32 %v8328_v46, %v8327_v6  ;;  %v12876_v46 = vld [vmem:[%s14189_s26 + $0x1a0] sm:$0xff] }
 0x8eb   : > { %v8130_v3 = vsel %vm706_vm1, %v8120_v42, %v8129_v17 }
 0x8f1   : > { %8013 = vmatmul.bf16.gmra.mxu3 %v7915_v44  ;;  %v8659_v44 = vsel %vm948_vm2, %v8649_v38, %v8658_v56 }
 0x8f2   : > { %8765 = vmatmul.bf16.gmra.mxu2 %v8632_v30  ;;  %v14052_v30 = vld [vmem:[%s14355_s22 + $0x14c] sm:$0xff]  }
 0x8f3   : > { %8236 = vmatmul.bf16.gmra.mxu0 %v8103_v14  ;;  %v8330_v14 = vsel %vm948_vm2, %v8325_v45, %v8329_v41  ;;  %v8661_v48 = vshrl.u32 %v14052_v30, 16  ;;  %v8664_v55 = vshll.u32 %v14052_v30, 16  ;;  %v8338_v30 = vrot.slane %v8336_v50, 3  ;;  %v12845_v50 = vld [vmem:[%s14355_s22 + $0x110] sm:$0xff] }
 0x8f4   : > { %8431 = vmatmul.bf16.gmra.mxu1 %v8318_v28  ;;  %v16623_v28 = vld [vmem:[%s14355_s22 + $0x144] sm:$0xff] }
 0x8f5   : > { %v8132_v33 = vshrl.u32 %v16623_v28, 16  ;;  %v8135_v25 = vshll.u32 %v16623_v28, 16  ;;  %v8663_v47 = vrot.slane %v8661_v48, 3  ;;  %v8666_v63 = vrot.slane %v8664_v55, 4 }
 0x8f7   : > { %v8134_v59 = vrot.slane %v8132_v33, 2  ;;  %v8137_v36 = vrot.slane %v8135_v25, 3  ;;  %v8331_v22 = vrot.slane %v8132_v33, 3  ;;  %v8332_v11 = vrot.slane %v8135_v25, 4  ;;  %v12875_v25 = vld [vmem:[%s14189_s26 + $0x198] sm:$0xff] }
 0x8f8   : > { %v16637_v24 = vor.u32 %v8666_v63, %v8663_v47  ;;  %v12882_v47 = vld [vmem:[%s14189_s26 + $0x1d0] sm:$0xff] }
 0x8f9   : > { %v16645_v43 = vor.u32 %v8137_v36, %v8134_v59  ;;  %v16647_v54 = vor.u32 %v8332_v11, %v8331_v22 }
 0x8fa   : > { %v8668_v49 = vsel %vm948_vm2, %v8658_v56, %v16637_v24 }
 0x8fb   : > { %v8139_v38 = vsel %vm706_vm1, %v8129_v17, %v16645_v43  ;;  %v8334_v45 = vsel %vm948_vm2, %v8329_v41, %v16647_v54 }
 0x901   : > { %8018 = vmatmul.bf16.gmra.mxu3 %v7917_v12  ;;  %v12836_v12 = vld [vmem:[%s14189_s26 + $0x100] sm:$0xff] }
 0x902   : > { %8770 = vmatmul.bf16.gmra.mxu2 %v8641_v52  ;;  %v7922_v52 = vrot.slane %v16623_v28, 3  ;;  %8914 = vmatpush.bf16.msrb.mxu3 %v12836_v12 }
 0x903   : > { %8241 = vmatmul.bf16.gmra.mxu0 %v8112_v37  ;;  %v14116_v37 = vld [vmem:[%s14355_s22 + $0x14c] sm:$0x70] }
 0x904   : > { %8436 = vmatmul.bf16.gmra.mxu1 %v8322_v40  ;;  %v13480_v40 = vunpack.c.h.b16 %v16629_v1  ;;  %v7923_v9 = vsel %vm559_vm0, %v7920_v18, %v7922_v52  ;;  %v12883_v18 = vld [vmem:[%s14189_s26 + $0x1d8] sm:$0xff] }
 0x905   : > { %9741 = vmatpush.bf16.msra.mxu2 %v12883_v18 }
 0x906   : > { %v8579_v58 = vpack.c.b16 %v16641_v2, %v13480_v40 }
 0x908   : > { %v8670_v32 = vshrl.u32 %v8579_v58, 16 }
 0x909   : > { %9742 = vmatpush.bf16.msra.mxu2 %v12882_v47 }
 0x90a   : > { %v8672_v34 = vrot.slane %v8670_v32, 3 }
 0x911   : > { %8023 = vmatmul.bf16.gmra.mxu3 %v7919_v39  ;;  %v12860_v39 = vld [vmem:[%s14189_s26 + $0x168] sm:$0xff] }
 0x912   : > { %8775 = vmatmul.bf16.gmra.mxu2 %v8650_v57  ;;  %v16663_v57 = vor.u32 %v14116_v37, %v14090_v16  ;;  %9232 = vmatpush.bf16.msra.mxu0 %v12860_v39  ;;  %v12881_v16 = vld [vmem:[%s14189_s26 + $0x1c8] sm:$0xff] }
 0x913   : > { %8246 = vmatmul.bf16.gmra.mxu0 %v8121_v26  ;;  %v8673_v26 = vshll.u32 %v8579_v58, 16  ;;  %9743 = vmatpush.bf16.msra.mxu2 %v12881_v16 }
 0x914   : > { %8441 = vmatmul.bf16.gmra.mxu1 %v8326_v5  ;;  %v12877_v5 = vld [vmem:[%s14189_s26 + $0x1a8] sm:$0xff]  ;;  %v8141_v29 = vshrl.u32 %v16663_v57, 16  ;;  %v8144_v15 = vshll.u32 %v16663_v57, 16  ;;  %v7924_v55 = vrot.slane %v16663_v57, 3 }
 0x915   : > { %9555 = vmatpush.bf16.msra.mxu1 %v12877_v5  ;;  %v8675_v6 = vrot.slane %v8673_v26, 4  ;;  %v12844_v5 = vld [vmem:[%s14355_s22 + $0x108] sm:$0xff] }
 0x916   : > { %v8143_v41 = vrot.slane %v8141_v29, 2  ;;  %9233 = vmatpush.bf16.msra.mxu0 %v12859_v61  ;;  %v7925_v11 = vsel %vm559_vm0, %v7922_v52, %v7924_v55  ;;  %v12856_v52 = vld [vmem:[%s14189_s26 + $0x148] sm:$0xff] }
 0x917   : > { %v8676_v33 = vor.u32 %v8675_v6, %v8672_v34 }
 0x919   : > { %9556 = vmatpush.bf16.msra.mxu1 %v12876_v46  ;;  %v8677_v53 = vsel %vm948_vm2, %v16637_v24, %v8676_v33  ;;  %v12895_v24 = vld [vmem:[%s14189_s26 + $0x238] sm:$0xff] }
 0x91a   : > { %9953 = vmatpush.bf16.msra.mxu3 %v12895_v24  ;;  %v16711_v46 = vld [vmem:[%s14355_s22 + $0x118] sm:$0xff] }
 0x91b   : > { %v12846_v24 = vld [vmem:[%s14355_s22 + $0x118] sm:$0xff] }
 0x91d   : > { %9557 = vmatpush.bf16.msra.mxu1 %v12875_v25 }
 0x921   : > { %8028 = vmatmul.bf16.gmra.mxu3 %v7921_v10  ;;  %v8146_v10 = vrot.slane %v8144_v15, 3  ;;  %9558 = vmatpush.bf16.msra.mxu1 %v12874_v13  ;;  %v16704_v15 = vld [vmem:[%s14355_s22 + $0x110] sm:$0xff]   ;;  %v13837_v13 = vld [vmem:[%s14355_s22 + $0x108] sm:$0xff]  }
 0x922   : > { %8780 = vmatmul.bf16.gmra.mxu2 %v8659_v44  ;;  %v9410_v34 = vshll.u32 %v16704_v15, 16 }
 0x923   : > { %8251 = vmatmul.bf16.gmra.mxu0 %v8130_v3  ;;  %v8341_v3 = vrot.slane %v8339_v31, 4  ;;  %v8147_v63 = vor.u32 %v8146_v10, %v8143_v41  ;;  %v9087_v31 = vshll.u32 %v12844_v5, 16  ;;  %v9085_v41 = vshrl.u32 %v12844_v5, 16 }
 0x924   : > { %8446 = vmatmul.bf16.gmra.mxu1 %v8330_v14  ;;  %v12858_v14 = vld [vmem:[%s14189_s26 + $0x158] sm:$0xff] }
 0x925   : > { %9234 = vmatpush.bf16.msra.mxu0 %v12858_v14  ;;  %v8342_v36 = vor.u32 %v8341_v3, %v8338_v30  ;;  %v8148_v40 = vsel %vm706_vm1, %v16645_v43, %v8147_v63  ;;  %9559 = vmatpush.bf16.msra.mxu1 %v12873_v4  ;;  %v9089_v10 = vrot.slane %v9087_v31, 1  ;;  %v12894_v30 = vld [vmem:[%s14189_s26 + $0x230] sm:$0xff]  ;;  %v9408_v14 = vshrl.u32 %v16704_v15, 16  ;;  %v12893_v31 = vld [vmem:[%s14189_s26 + $0x228] sm:$0xff] }
 0x926   : > { %9954 = vmatpush.bf16.msra.mxu3 %v12894_v30 }
 0x927   : > { %v8343_v28 = vsel %vm948_vm2, %v16647_v54, %v8342_v36  ;;  %v12855_v54 = vld [vmem:[%s14189_s26 + $0x140] sm:$0xff] }
 0x929   : > { %9235 = vmatpush.bf16.msra.mxu0 %v12857_v51  ;;  %9560 = vmatpush.bf16.msra.mxu1 %v12872_v35  ;;  %v9096_v35 = vshrl.u32 %v12845_v50, 16 }
 0x92a   : > { %9955 = vmatpush.bf16.msra.mxu3 %v12893_v31 }
 0x92d   : > { %9236 = vmatpush.bf16.msra.mxu0 %v12856_v52 }
 0x930   : > { %v8217_v23 = vpop.f32.mrf.mxu0 }
 0x931   : > { %v8412_v42 = vpop.f32.mrf.mxu1  ;;  %8033 = vmatmul.bf16.gmra.mxu3 %v7923_v9  ;;  %v12880_v9 = vld [vmem:[%s14189_s26 + $0x1c0] sm:$0xff]  ;;  %9237 = vmatpush.bf16.msra.mxu0 %v12855_v54 }
 0x932   : > { %8785 = vmatmul.bf16.gmra.mxu2 %v8668_v49 }
 0x933   : > { %8256 = vmatmul.bf16.gmra.mxu0 %v8139_v38  ;;  %9744 = vmatpush.bf16.msra.mxu2 %v12880_v9 }
 0x934   : > { %8451 = vmatmul.bf16.gmra.mxu1 %v8334_v45  ;;  %v7994_v0 = vpop.f32.mrf.mxu3 }
 0x935   : > { %v8746_v19 = vpop.f32.mrf.mxu2  ;;  %v8218_v21 = vadd.f32 %v8217_v23, %v7994_v0  ;;  %v13848_v0 = vld [vmem:[%s14355_s22 + $0x110] sm:$0xf0] }
 0x937   : > { %v8466_v56 = vadd.f32 %v8412_v42, %v8218_v21 }
 0x938   : > { %v8219_v17 = vpop.f32.mrf.mxu0 }
 0x939   : > { %v8414_v44 = vpop.f32.mrf.mxu1  ;;  %v16673_v48 = vadd.f32 %v8746_v19, %v8466_v56  ;;  %v13849_v19 = vld [vmem:[%s14355_s22 + $0x110] sm:$0xe] }
 0x93a   : > { %v16713_v18 = vor.u32 %v13849_v19, %v13848_v0 }
 0x93c   : > { %v7996_v62 = vpop.f32.mrf.mxu3  ;;  %v9657_v47 = vrot.slane %v16713_v18, 1 }
 0x93d   : > { %v8748_v59 = vpop.f32.mrf.mxu2  ;;  %v8220_v22 = vadd.f32 %v8219_v17, %v7996_v62  ;;  %v9090_v62 = vor.u32 %v9089_v10, %v9085_v41  ;;  %v12847_v10 = vld [vmem:[%s14355_s22 + $0x120] sm:$0xff] }
 0x93f   : > { %v8467_v12 = vadd.f32 %v8414_v44, %v8220_v22  ;;  %v9092_v44 = vshll.u32 %v12845_v50, 16 }
 0x940   : > { %v8222_v37 = vpop.f32.mrf.mxu0 }
 0x941   : > { %v8417_v60 = vpop.f32.mrf.mxu1  ;;  %v16691_v27 = vadd.f32 %v8748_v59, %v8467_v12  ;;  %8038 = vmatmul.bf16.gmra.mxu3 %v7925_v11  ;;  %v9094_v59 = vrot.slane %v9092_v44, 1 }
 0x942   : > { %8790 = vmatmul.bf16.gmra.mxu2 %v8677_v53 }
 0x943   : > { %8261 = vmatmul.bf16.gmra.mxu0 %v8148_v40  ;;  %v9095_v40 = vsel %vm1745_vm3, %v9090_v62, %v9094_v59  ;;  %v9108_v62 = vshll.u32 %v12847_v10, 16 }
 0x944   : > { %8456 = vmatmul.bf16.gmra.mxu1 %v8343_v28  ;;  %v7999_v43 = vpop.f32.mrf.mxu3 }
 0x945   : > { %v8751_v49 = vpop.f32.mrf.mxu2  ;;  %v8223_v58 = vadd.f32 %v8222_v37, %v7999_v43 }
 0x947   : > { %v8468_v7 = vadd.f32 %v8417_v60, %v8223_v58 }
 0x948   : > { %v8224_v23 = vpop.f32.mrf.mxu0 }
 0x949   : > { %v8419_v38 = vpop.f32.mrf.mxu1  ;;  %v16698_v42 = vadd.f32 %v8751_v49, %v8468_v7  ;;  %v16732_v49 = vld [vmem:[%s14355_s22 + $0x120] sm:$0xff]  ;;  %v9100_v7 = vshll.u32 %v12846_v24, 16 }
 0x94c   : > { %v8001_v45 = vpop.f32.mrf.mxu3 }
 0x94d   : > { %v8753_v39 = vpop.f32.mrf.mxu2  ;;  %v8225_v57 = vadd.f32 %v8224_v23, %v8001_v45  ;;  %v9423_v45 = vshll.u32 %v16732_v49, 16 }
 0x94f   : > { %v8469_v32 = vadd.f32 %v8419_v38, %v8225_v57  ;;  %v9419_v38 = vshrl.u32 %v16711_v46, 16  ;;  %v9660_v57 = vrot.slane %v16732_v49, 1  ;;  %v9425_v19 = vrot.slane %v9423_v45, 1 }
 0x950   : > { %v8227_v26 = vpop.f32.mrf.mxu0 }
 0x951   : > { %v8422_v8 = vpop.f32.mrf.mxu1  ;;  %v16701_v29 = vadd.f32 %v8753_v39, %v8469_v32  ;;  %8043 = vmatmul.bf16.gmra.mxu3 %v7924_v55  ;;  %v9412_v55 = vrot.slane %v9410_v34, 1  ;;  %v9098_v32 = vor.u32 %v9096_v35, %v9094_v59  ;;  %v12892_v35 = vld [vmem:[%s14189_s26 + $0x220] sm:$0xff] }
 0x952   : > { %8795 = vmatmul.bf16.gmra.mxu2 %v8676_v33  ;;  %v9415_v33 = vshll.u32 %v16711_v46, 16  ;;  %9956 = vmatpush.bf16.msra.mxu3 %v12892_v35 }
 0x953   : > { %8266 = vmatmul.bf16.gmra.mxu0 %v8147_v63  ;;  %v9658_v63 = vrot.slane %v16711_v46, 1  ;;  %v9413_v22 = vor.u32 %v9412_v55, %v9408_v14  ;;  %v16752_v14 = vld [vmem:[%s14355_s22 + $0x128] sm:$0xff] }
 0x954   : > { %8461 = vmatmul.bf16.gmra.mxu1 %v8342_v36  ;;  %v8004_v61 = vpop.f32.mrf.mxu3  ;;  %v9417_v11 = vrot.slane %v9415_v33, 1  ;;  %v17297_v31 = vshrl.u32 %v16752_v14, 16 }
 0x955   : > { %v8756_v21 = vpop.f32.mrf.mxu2  ;;  %v8228_v6 = vadd.f32 %v8227_v26, %v8004_v61  ;;  %v9659_v16 = vsel %vm2321_vm4, %v9657_v47, %v9658_v63  ;;  %v9102_v26 = vrot.slane %v9100_v7, 1  ;;  %v9661_v61 = vsel %vm2321_vm4, %v9658_v63, %v9660_v57  ;;  %v12848_v7 = vld [vmem:[%s14355_s22 + $0x128] sm:$0xff] }
 0x956   : > { %v9418_v28 = vsel %vm1745_vm3, %v9413_v22, %v9417_v11  ;;  %v9421_v0 = vor.u32 %v9419_v38, %v9417_v11  ;;  %v9104_v63 = vshrl.u32 %v12846_v24, 16  ;;  %v9662_v22 = vrot.slane %v16752_v14, 1 }
 0x957   : > { %v8470_v56 = vadd.f32 %v8422_v8, %v8228_v6  ;;  %v9103_v6 = vsel %vm1745_vm3, %v9098_v32, %v9102_v26 }
 0x958   : > { %v8229_v17 = vpop.f32.mrf.mxu0  ;;  %v9106_v11 = vor.u32 %v9104_v63, %v9102_v26  ;;  %v16772_v26 = vld [vmem:[%s14355_s22 + $0x130] sm:$0xff] }
 0x959   : > { %v8424_v3 = vpop.f32.mrf.mxu1  ;;  %v16718_v25 = vadd.f32 %v8756_v21, %v8470_v56 }
 0x95c   : > { %v8006_v36 = vpop.f32.mrf.mxu3 }
 0x95d   : > { %v8758_v51 = vpop.f32.mrf.mxu2  ;;  %v8230_v53 = vadd.f32 %v8229_v17, %v8006_v36  ;;  %v9426_v17 = vsel %vm1745_vm3, %v9421_v0, %v9425_v19  ;;  %v9427_v36 = vshrl.u32 %v16732_v49, 16  ;;  %v9112_v0 = vshrl.u32 %v12847_v10, 16 }
 0x95f   : > { %v8471_v12 = vadd.f32 %v8424_v3, %v8230_v53  ;;  %v9110_v53 = vrot.slane %v9108_v62, 1 }
 0x960   : > { %v8232_v37 = vpop.f32.mrf.mxu0 }
 0x961   : > { %v8427_v60 = vpop.f32.mrf.mxu1  ;;  %v16728_v52 = vadd.f32 %v8758_v51, %v8471_v12  ;;  %8915 = vmatmul.bf16.vlgmr.msrb.gmra.mxu3 %v13837_v13  ;;  %v17296_v51 = vshll.u32 %v16752_v14, 16  ;;  %v9429_v12 = vor.u32 %v9427_v36, %v9425_v19  ;;  %v9116_v19 = vshll.u32 %v12848_v7, 16 }
 0x962   : > { %9745 = vmatmul.bf16.vlgmr.msra.gmra.mxu2 %v9659_v16 }
 0x963   : > { %9238 = vmatmul.bf16.vlgmr.msra.gmra.mxu0 %v9095_v40 }
 0x964   : > { %9561 = vmatmul.bf16.vlgmr.msra.gmra.mxu1 %v9418_v28  ;;  %v8009_v4 = vpop.f32.mrf.mxu3  ;;  %v9663_v28 = vsel %vm2321_vm4, %v9660_v57, %v9662_v22 }
 0x965   : > { %v8761_v9 = vpop.f32.mrf.mxu2  ;;  %v8233_v43 = vadd.f32 %v8232_v37, %v8009_v4  ;;  %v9433_v37 = vrot.slane %v17296_v51, 1 }
 0x967   : > { %v8472_v54 = vadd.f32 %v8427_v60, %v8233_v43  ;;  %v13839_v60 = vld [vmem:[%s14355_s22 + $0x118] sm:$0xff]  }
 0x968   : > { %v8234_v58 = vpop.f32.mrf.mxu0 }
 0x969   : > { %v8429_v23 = vpop.f32.mrf.mxu1  ;;  %v16736_v39 = vadd.f32 %v8761_v9, %v8472_v54  ;;  %v9111_v9 = vsel %vm1745_vm3, %v9106_v11, %v9110_v53  ;;  %v9434_v54 = vsel %vm1745_vm3, %v9429_v12, %v9433_v37 }
 0x96c   : > { %v8011_v5 = vpop.f32.mrf.mxu3 }
 0x96d   : > { %v8763_v8 = vpop.f32.mrf.mxu2  ;;  %v8235_v50 = vadd.f32 %v8234_v58, %v8011_v5 }
 0x96f   : > { %v8473_v21 = vadd.f32 %v8429_v23, %v8235_v50 }
 0x970   : > { %v8237_v34 = vpop.f32.mrf.mxu0 }
 0x971   : > { %v8432_v56 = vpop.f32.mrf.mxu1  ;;  %v16747_v41 = vadd.f32 %v8763_v8, %v8473_v21  ;;  %8920 = vmatmul.bf16.gmra.mxu3 %v16704_v15 }
 0x972   : > { %9750 = vmatmul.bf16.gmra.mxu2 %v9661_v61  ;;  %v17294_v61 = vshll.u32 %v16772_v26, 16 }
 0x973   : > { %9243 = vmatmul.bf16.gmra.mxu0 %v9103_v6  ;;  %v9114_v6 = vor.u32 %v9112_v0, %v9110_v53 }
 0x974   : > { %9566 = vmatmul.bf16.gmra.mxu1 %v9426_v17  ;;  %v8014_v44 = vpop.f32.mrf.mxu3  ;;  %v9441_v10 = vrot.slane %v17294_v61, 1 }
 0x975   : > { %v8766_v30 = vpop.f32.mrf.mxu2  ;;  %v8238_v3 = vadd.f32 %v8237_v34, %v8014_v44  ;;  %v9664_v34 = vrot.slane %v16772_v26, 1 }
 0x977   : > { %v8474_v55 = vadd.f32 %v8432_v56, %v8238_v3  ;;  %v9118_v56 = vrot.slane %v9116_v19, 1 }
 0x978   : > { %v8239_v47 = vpop.f32.mrf.mxu0 }
 0x979   : > { %v8434_v59 = vpop.f32.mrf.mxu1  ;;  %v16756_v15 = vadd.f32 %v8766_v30, %v8474_v55  ;;  %v9437_v30 = vor.u32 %v17297_v31, %v9433_v37  ;;  %v13840_v55 = vld [vmem:[%s14355_s22 + $0x120] sm:$0xff]  }
 0x97b   : > { %v9442_v53 = vsel %vm1745_vm3, %v9437_v30, %v9441_v10 }
 0x97c   : > { %v8016_v13 = vpop.f32.mrf.mxu3 }
 0x97d   : > { %v8768_v16 = vpop.f32.mrf.mxu2  ;;  %v8240_v40 = vadd.f32 %v8239_v47, %v8016_v13  ;;  %v9665_v47 = vsel %vm2321_vm4, %v9662_v22, %v9664_v34 }
 0x97f   : > { %v8475_v24 = vadd.f32 %v8434_v59, %v8240_v40  ;;  %v9119_v59 = vsel %vm1745_vm3, %v9114_v6, %v9118_v56  ;;  %v13841_v6 = vld [vmem:[%s14355_s22 + $0x128] sm:$0xff]  }
 0x980   : > { %v8242_v4 = vpop.f32.mrf.mxu0 }
 0x981   : > { %v8437_v43 = vpop.f32.mrf.mxu1  ;;  %v16767_v58 = vadd.f32 %v8768_v16, %v8475_v24  ;;  %8925 = vmatmul.bf16.gmra.mxu3 %v13839_v60  ;;  %v12849_v16 = vld [vmem:[%s14355_s22 + $0x130] sm:$0xff]  ;;  %v16791_v60 = vld [vmem:[%s14355_s22 + $0x138] sm:$0xff]  ;;  %v9120_v24 = vshrl.u32 %v12848_v7, 16 }
 0x982   : > { %9755 = vmatmul.bf16.gmra.mxu2 %v9663_v28 }
 0x983   : > { %9248 = vmatmul.bf16.gmra.mxu0 %v9111_v9 }
 0x984   : > { %9571 = vmatmul.bf16.gmra.mxu1 %v9434_v54  ;;  %v8019_v23 = vpop.f32.mrf.mxu3  ;;  %v17290_v54 = vshll.u32 %v16791_v60, 16 }
 0x985   : > { %v8771_v32 = vpop.f32.mrf.mxu2  ;;  %v8243_v57 = vadd.f32 %v8242_v4, %v8019_v23  ;;  %v9124_v4 = vshll.u32 %v12849_v16, 16  ;;  %v12891_v23 = vld [vmem:[%s14189_s26 + $0x218] sm:$0xff] }
 0x986   : > { %9957 = vmatpush.bf16.msra.mxu3 %v12891_v23  ;;  %v9449_v19 = vrot.slane %v17290_v54, 1 }
 0x987   : > { %v8476_v5 = vadd.f32 %v8437_v43, %v8243_v57  ;;  %v17295_v43 = vshrl.u32 %v16772_v26, 16  ;;  %v9122_v57 = vor.u32 %v9120_v24, %v9118_v56 }
 0x988   : > { %v8244_v8 = vpop.f32.mrf.mxu0 }
 0x989   : > { %v8439_v50 = vpop.f32.mrf.mxu1  ;;  %v16776_v21 = vadd.f32 %v8771_v32, %v8476_v5  ;;  %v9666_v32 = vrot.slane %v16791_v60, 1  ;;  %v9126_v5 = vrot.slane %v9124_v4, 1  ;;  %v9445_v7 = vor.u32 %v17295_v43, %v9441_v10  ;;  %v12850_v10 = vld [vmem:[%s14355_s22 + $0x138] sm:$0xff] }
 0x98b   : > { %v9127_v56 = vsel %vm1745_vm3, %v9122_v57, %v9126_v5 }
 0x98c   : > { %v8021_v17 = vpop.f32.mrf.mxu3 }
 0x98d   : > { %v8773_v44 = vpop.f32.mrf.mxu2  ;;  %v8245_v3 = vadd.f32 %v8244_v8, %v8021_v17  ;;  %v9667_v17 = vsel %vm2321_vm4, %v9664_v34, %v9666_v32 }
 0x98f   : > { %v8477_v63 = vadd.f32 %v8439_v50, %v8245_v3 }
 0x990   : > { %v8247_v62 = vpop.f32.mrf.mxu0 }
 0x991   : > { %v8442_v11 = vpop.f32.mrf.mxu1  ;;  %v16787_v13 = vadd.f32 %v8773_v44, %v8477_v63  ;;  %8930 = vmatmul.bf16.gmra.mxu3 %v13840_v55  ;;  %v9450_v55 = vsel %vm1745_vm3, %v9445_v7, %v9449_v19 }
 0x992   : > { %9760 = vmatmul.bf16.gmra.mxu2 %v9665_v47 }
 0x993   : > { %9253 = vmatmul.bf16.gmra.mxu0 %v9119_v59 }
 0x994   : > { %9576 = vmatmul.bf16.gmra.mxu1 %v9442_v53  ;;  %v8024_v12 = vpop.f32.mrf.mxu3 }
 0x995   : > { %v8776_v37 = vpop.f32.mrf.mxu2  ;;  %v8248_v40 = vadd.f32 %v8247_v62, %v8024_v12  ;;  %v9128_v12 = vshrl.u32 %v12849_v16, 16 }
 0x997   : > { %v8478_v22 = vadd.f32 %v8442_v11, %v8248_v40  ;;  %v16811_v11 = vld [vmem:[%s14355_s22 + $0x140] sm:$0xff] }
 0x998   : > { %v8249_v28 = vpop.f32.mrf.mxu0  ;;  %v9668_v4 = vrot.slane %v16811_v11, 1 }
 0x999   : > { %v8444_v9 = vpop.f32.mrf.mxu1  ;;  %v16795_v35 = vadd.f32 %v8776_v37, %v8478_v22  ;;  %v9132_v37 = vshll.u32 %v12850_v10, 16  ;;  %v17293_v22 = vshrl.u32 %v16791_v60, 16 }
 0x99b   : > { %v9134_v23 = vrot.slane %v9132_v37, 1 }
 0x99c   : > { %v8026_v8 = vpop.f32.mrf.mxu3 }
 0x99d   : > { %v8778_v0 = vpop.f32.mrf.mxu2  ;;  %v8250_v50 = vadd.f32 %v8249_v28, %v8026_v8  ;;  %v17286_v28 = vshll.u32 %v16811_v11, 16 }
 0x99f   : > { %v8479_v44 = vadd.f32 %v8444_v9, %v8250_v50  ;;  %v9130_v9 = vor.u32 %v9128_v12, %v9126_v5  ;;  %v9457_v16 = vrot.slane %v17286_v28, 1  ;;  %v13842_v50 = vld [vmem:[%s14355_s22 + $0x130] sm:$0xff]   ;;  %v9136_v12 = vshrl.u32 %v12850_v10, 16 }
 0x9a0   : > { %v8252_v30 = vpop.f32.mrf.mxu0  ;;  %v12890_v5 = vld [vmem:[%s14189_s26 + $0x210] sm:$0xff] }
 0x9a1   : > { %v8447_v3 = vpop.f32.mrf.mxu1  ;;  %v16807_v47 = vadd.f32 %v8778_v0, %v8479_v44  ;;  %8935 = vmatmul.bf16.gmra.mxu3 %v13841_v6  ;;  %v9453_v0 = vor.u32 %v17293_v22, %v9449_v19  ;;  %v9669_v6 = vsel %vm2321_vm4, %v9666_v32, %v9668_v4  ;;  %v12851_v19 = vld [vmem:[%s14355_s22 + $0x140] sm:$0xff] }
 0x9a2   : > { %9765 = vmatmul.bf16.gmra.mxu2 %v9667_v17  ;;  %9958 = vmatpush.bf16.msra.mxu3 %v12890_v5  ;;  %v9140_v37 = vshll.u32 %v12851_v19, 16  ;;  %v13843_v5 = vld [vmem:[%s14355_s22 + $0x138] sm:$0xff]  }
 0x9a3   : > { %9258 = vmatmul.bf16.gmra.mxu0 %v9127_v56 }
 0x9a4   : > { %9581 = vmatmul.bf16.gmra.mxu1 %v9450_v55  ;;  %v8029_v63 = vpop.f32.mrf.mxu3 }
 0x9a5   : > { %v8781_v62 = vpop.f32.mrf.mxu2  ;;  %v8253_v59 = vadd.f32 %v8252_v30, %v8029_v63  ;;  %v9135_v30 = vsel %vm1745_vm3, %v9130_v9, %v9134_v23  ;;  %v17287_v9 = vshrl.u32 %v16811_v11, 16 }
 0x9a7   : > { %v8480_v34 = vadd.f32 %v8447_v3, %v8253_v59  ;;  %v9458_v3 = vsel %vm1745_vm3, %v9453_v0, %v9457_v16  ;;  %v16831_v59 = vld [vmem:[%s14355_s22 + $0x148] sm:$0xff] }
 0x9a8   : > { %v8254_v53 = vpop.f32.mrf.mxu0  ;;  %v9670_v0 = vrot.slane %v16831_v59, 1 }
 0x9a9   : > { %v8449_v40 = vpop.f32.mrf.mxu1  ;;  %v16815_v24 = vadd.f32 %v8781_v62, %v8480_v34 }
 0x9ac   : > { %v8031_v57 = vpop.f32.mrf.mxu3 }
 0x9ad   : > { %v8783_v8 = vpop.f32.mrf.mxu2  ;;  %v8255_v7 = vadd.f32 %v8254_v53, %v8031_v57  ;;  %v17285_v57 = vshll.u32 %v16831_v59, 16 }
 0x9af   : > { %v8481_v17 = vadd.f32 %v8449_v40, %v8255_v7  ;;  %v9138_v7 = vor.u32 %v9136_v12, %v9134_v23  ;;  %v9465_v10 = vrot.slane %v17285_v57, 1 }
 0x9b0   : > { %v8257_v44 = vpop.f32.mrf.mxu0 }
 0x9b1   : > { %v8452_v56 = vpop.f32.mrf.mxu1  ;;  %v16827_v55 = vadd.f32 %v8783_v8, %v8481_v17  ;;  %8940 = vmatmul.bf16.gmra.mxu3 %v13842_v50  ;;  %v9142_v50 = vrot.slane %v9140_v37, 1 }
 0x9b2   : > { %9770 = vmatmul.bf16.gmra.mxu2 %v9669_v6 }
 0x9b3   : > { %9263 = vmatmul.bf16.gmra.mxu0 %v9135_v30  ;;  %v9143_v23 = vsel %vm1745_vm3, %v9138_v7, %v9142_v50  ;;  %v9144_v7 = vshrl.u32 %v12851_v19, 16 }
 0x9b4   : > { %9586 = vmatmul.bf16.gmra.mxu1 %v9458_v3  ;;  %v8034_v63 = vpop.f32.mrf.mxu3 }
 0x9b5   : > { %v8786_v62 = vpop.f32.mrf.mxu2  ;;  %v8258_v32 = vadd.f32 %v8257_v44, %v8034_v63  ;;  %v9461_v44 = vor.u32 %v17287_v9, %v9457_v16  ;;  %v12852_v16 = vld [vmem:[%s14355_s22 + $0x148] sm:$0xff] }
 0x9b6   : > { %v9148_v57 = vshll.u32 %v12852_v16, 16 }
 0x9b7   : > { %v8482_v34 = vadd.f32 %v8452_v56, %v8258_v32  ;;  %v9671_v56 = vsel %vm2321_vm4, %v9668_v4, %v9670_v0  ;;  %v9466_v32 = vsel %vm1745_vm3, %v9461_v44, %v9465_v10  ;;  %v16851_v4 = vld [vmem:[%s14355_s22 + $0x150] sm:$0xff] }
 0x9b8   : > { %v8259_v53 = vpop.f32.mrf.mxu0 }
 0x9b9   : > { %v8454_v40 = vpop.f32.mrf.mxu1  ;;  %v16835_v8 = vadd.f32 %v8786_v62, %v8482_v34 }
 0x9bc   : > { %v8036_v6 = vpop.f32.mrf.mxu3 }
 0x9bd   : > { %v8788_v17 = vpop.f32.mrf.mxu2  ;;  %v8260_v30 = vadd.f32 %v8259_v53, %v8036_v6  ;;  %v12889_v6 = vld [vmem:[%s14189_s26 + $0x208] sm:$0xff] }
 0x9be   : > { %9959 = vmatpush.bf16.msra.mxu3 %v12889_v6  ;;  %v13844_v6 = vld [vmem:[%s14355_s22 + $0x140] sm:$0xff]  }
 0x9bf   : > { %v8483_v3 = vadd.f32 %v8454_v40, %v8260_v30 }
 0x9c0   : > { %v8262_v63 = vpop.f32.mrf.mxu0 }
 0x9c1   : > { %v8457_v62 = vpop.f32.mrf.mxu1  ;;  %v16846_v34 = vadd.f32 %v8788_v17, %v8483_v3  ;;  %8945 = vmatmul.bf16.gmra.mxu3 %v13843_v5  ;;  %v17289_v17 = vshrl.u32 %v16831_v59, 16  ;;  %v17288_v5 = vshll.u32 %v16851_v4, 16  ;;  %v9672_v3 = vrot.slane %v16851_v4, 1 }
 0x9c2   : > { %9775 = vmatmul.bf16.gmra.mxu2 %v9671_v56 }
 0x9c3   : > { %9268 = vmatmul.bf16.gmra.mxu0 %v9143_v23  ;;  %v9146_v23 = vor.u32 %v9144_v7, %v9142_v50  ;;  %v9473_v19 = vrot.slane %v17288_v5, 1  ;;  %v9673_v28 = vsel %vm2321_vm4, %v9670_v0, %v9672_v3 }
 0x9c4   : > { %9591 = vmatmul.bf16.gmra.mxu1 %v9466_v32  ;;  %v8039_v53 = vpop.f32.mrf.mxu3 }
 0x9c5   : > { %v8791_v12 = vpop.f32.mrf.mxu2  ;;  %v8263_v37 = vadd.f32 %v8262_v63, %v8039_v53  ;;  %v9150_v63 = vrot.slane %v9148_v57, 1 }
 0x9c7   : > { %v8484_v40 = vadd.f32 %v8457_v62, %v8263_v37  ;;  %v9469_v62 = vor.u32 %v17289_v17, %v9465_v10  ;;  %v9151_v9 = vsel %vm1745_vm3, %v9146_v23, %v9150_v63  ;;  %v12853_v10 = vld [vmem:[%s14355_s22 + $0x150] sm:$0xff]  ;;  %v16870_v17 = vld [vmem:[%s14355_s22 + $0x158] sm:$0xff]  ;;  %v9152_v23 = vshrl.u32 %v12852_v16, 16 }
 0x9c8   : > { %v8264_v30 = vpop.f32.mrf.mxu0 }
 0x9c9   : > { %v8459_v44 = vpop.f32.mrf.mxu1  ;;  %v16855_v56 = vadd.f32 %v8791_v12, %v8484_v40  ;;  %v9474_v57 = vsel %vm1745_vm3, %v9469_v62, %v9473_v19  ;;  %v9674_v62 = vrot.slane %v16870_v17, 1 }
 0x9cc   : > { %v8041_v32 = vpop.f32.mrf.mxu3 }
 0x9cd   : > { %v8793_v53 = vpop.f32.mrf.mxu2  ;;  %v8265_v37 = vadd.f32 %v8264_v30, %v8041_v32 }
 0x9cf   : > { %v8485_v12 = vadd.f32 %v8459_v44, %v8265_v37  ;;  %v9156_v37 = vshll.u32 %v12853_v10, 16 }
 0x9d0   : > { %v8267_v40 = vpop.f32.mrf.mxu0 }
 0x9d1   : > { %v8462_v50 = vpop.f32.mrf.mxu1  ;;  %v16866_v7 = vadd.f32 %v8793_v53, %v8485_v12  ;;  %8950 = vmatmul.bf16.gmra.mxu3 %v13844_v6  ;;  %v17292_v53 = vshrl.u32 %v16851_v4, 16  ;;  %v9154_v6 = vor.u32 %v9152_v23, %v9150_v63  ;;  %v9158_v12 = vrot.slane %v9156_v37, 1  ;;  %v16886_v63 = vld [vmem:[%s14355_s22 + $0x160] sm:$0xf] }
 0x9d2   : > { %9780 = vmatmul.bf16.gmra.mxu2 %v9673_v28  ;;  %v17291_v28 = vshll.u32 %v16870_v17, 16 }
 0x9d3   : > { %9273 = vmatmul.bf16.gmra.mxu0 %v9151_v9 }
 0x9d4   : > { %9596 = vmatmul.bf16.gmra.mxu1 %v9474_v57  ;;  %v8044_v30 = vpop.f32.mrf.mxu3  ;;  %v9481_v16 = vrot.slane %v17291_v28, 1  ;;  %v13845_v57 = vld [vmem:[%s14355_s22 + $0x148] sm:$0xff]  }
 0x9d5   : > { %v8796_v32 = vpop.f32.mrf.mxu2  ;;  %v8268_v5 = vadd.f32 %v8267_v40, %v8044_v30  ;;  %v9675_v30 = vsel %vm2321_vm4, %v9672_v3, %v9674_v62 }
 0x9d7   : > { %v8486_v0 = vadd.f32 %v8462_v50, %v8268_v5  ;;  %v12888_v5 = vld [vmem:[%s14189_s26 + $0x200] sm:$0xff] }
 0x9d8   : > { %v8269_v44 = vpop.f32.mrf.mxu0  ;;  %9960 = vmatpush.bf16.msra.mxu3 %v12888_v5 }
 0x9d9   : > { %v8464_v54 = vpop.f32.mrf.mxu1  ;;  %v16874_v9 = vadd.f32 %v8796_v32, %v8486_v0  ;;  %v9159_v0 = vsel %vm1745_vm3, %v9154_v6, %v9158_v12  ;;  %v9335_v44 = vld [vmem:[%s14355_s22 + $0x164] sm:$0x1] }
 0x9da   : > { %v9477_v54 = vor.u32 %v17292_v53, %v9473_v19  ;;  %v17298_v19 = vunpack.c.l.b16 %v16886_v63  ;;  %v9395_v5 = vunpack.c.l.b16 %v9335_v44  ;;  %v9850_v44 = vrot.slane %v9415_v33, 2 }
 0x9dc   : > { %v8046_v40 = vpop.f32.mrf.mxu3  ;;  %v9482_v37 = vsel %vm1745_vm3, %v9477_v54, %v9481_v16  ;;  %v9406_v22 = vpack.c.b16 %v9395_v5, %v17298_v19  ;;  %v9160_v54 = vshrl.u32 %v12853_v10, 16 }
 0x9dd   : > { %v8798_v50 = vpop.f32.mrf.mxu2  ;;  %v12268_v40 = vld [vmem:[%s14355_s22 + $0x158] sm:$0xf] }
 0x9de   : > { %v12854_v50 = vld [vmem:[%s14355_s22 + $0x158] sm:$0x10] }
 0x9df   : > { %v12269_v28 = vor.u32 %v12854_v50, %v12268_v40  ;;  %v9676_v40 = vrot.slane %v9406_v22, 1  ;;  %v9162_v50 = vor.u32 %v9160_v54, %v9158_v12 }
 0x9e0   : > { %v9239_v32 = vpop.f32.mrf.mxu0 }
 0x9e1   : > { %v9562_v23 = vpop.f32.mrf.mxu1  ;;  %8955 = vmatmul.bf16.gmra.mxu3 %v13845_v57  ;;  %v9164_v51 = vshll.u32 %v12269_v28, 16  ;;  %v9483_v57 = vshrl.u32 %v16870_v17, 16 }
 0x9e2   : > { %9785 = vmatmul.bf16.gmra.mxu2 %v9675_v30  ;;  %v9487_v30 = vshll.u32 %v9406_v22, 16 }
 0x9e3   : > { %9278 = vmatmul.bf16.gmra.mxu0 %v9159_v0  ;;  %v9166_v5 = vrot.slane %v9164_v51, 1  ;;  %v9485_v10 = vor.u32 %v9483_v57, %v9481_v16 }
 0x9e4   : > { %9601 = vmatmul.bf16.gmra.mxu1 %v9482_v37  ;;  %v8916_v3 = vpop.f32.mrf.mxu3  ;;  %v9849_v37 = vrot.slane %v9419_v38, 1 }
 0x9e5   : > { %v9746_v53 = vpop.f32.mrf.mxu2  ;;  %v8970_v6 = vadd.f32 %v8916_v3, %v16673_v48  ;;  %v9167_v38 = vsel %vm1745_vm3, %v9162_v50, %v9166_v5  ;;  %v9491_v50 = vshrl.u32 %v9406_v22, 16  ;;  %v9845_v22 = vshll.u32 %v16713_v18, 16 }
 0x9e7   : > { %v9293_v61 = vadd.f32 %v9239_v32, %v8970_v6  ;;  %v9489_v6 = vrot.slane %v9487_v30, 1 }
 0x9e8   : > { %v9241_v43 = vpop.f32.mrf.mxu0 }
 0x9e9   : > { %v9564_v31 = vpop.f32.mrf.mxu1  ;;  %v9616_v0 = vadd.f32 %v9562_v23, %v9293_v61  ;;  %v9677_v61 = vsel %vm2321_vm4, %v9674_v62, %v9676_v40  ;;  %v16907_v23 = vor.u32 %v9850_v44, %v9849_v37  ;;  %v9490_v12 = vsel %vm1745_vm3, %v9485_v10, %v9489_v6 }
 0x9ea   : > { %v9168_v44 = vshrl.u32 %v12269_v28, 16  ;;  %v9842_v28 = vshrl.u32 %v16713_v18, 16 }
 0x9eb   : > { %v16901_v48 = vadd.f32 %v9746_v53, %v9616_v0 }
 0x9ec   : > { %v8918_v32 = vpop.f32.mrf.mxu3  ;;  %v9170_v10 = vor.u32 %v9168_v44, %v9166_v5  ;;  %v9844_v5 = vrot.slane %v9842_v28, 1 }
 0x9ed   : > { %v9748_v3 = vpop.f32.mrf.mxu2  ;;  %v8971_v19 = vadd.f32 %v8918_v32, %v16691_v27 }
 0x9ef   : > { %v9294_v33 = vadd.f32 %v9241_v43, %v8971_v19 }
 0x9f0   : > { %v9244_v46 = vpop.f32.mrf.mxu0 }
 0x9f1   : > { %v9567_v53 = vpop.f32.mrf.mxu1  ;;  %v9617_v51 = vadd.f32 %v9564_v31, %v9294_v33  ;;  %8960 = vmatmul.bf16.gmra.mxu3 %v16629_v1 }
 0x9f2   : > { %9790 = vmatmul.bf16.gmra.mxu2 %v9677_v61 }
 0x9f3   : > { %9283 = vmatmul.bf16.gmra.mxu0 %v9167_v38  ;;  %v16912_v16 = vadd.f32 %v9748_v3, %v9617_v51  ;;  %v8847_v3 = vpack.c.b16 %v16641_v2, %v16641_v2  ;;  %v9493_v38 = vor.u32 %v9491_v50, %v9489_v6  ;;  %v9847_v51 = vrot.slane %v9845_v22, 2 }
 0x9f4   : > { %9606 = vmatmul.bf16.gmra.mxu1 %v9490_v12  ;;  %v8921_v27 = vpop.f32.mrf.mxu3 }
 0x9f5   : > { %v9751_v54 = vpop.f32.mrf.mxu2  ;;  %v8972_v62 = vadd.f32 %v8921_v27, %v16698_v42 }
 0x9f7   : > { %v9295_v30 = vadd.f32 %v9244_v46, %v8972_v62 }
 0x9f8   : > { %v9246_v43 = vpop.f32.mrf.mxu0 }
 0x9f9   : > { %v9569_v19 = vpop.f32.mrf.mxu1  ;;  %v9618_v0 = vadd.f32 %v9567_v53, %v9295_v30  ;;  %v9848_v30 = vor.u32 %v9847_v51, %v9844_v5 }
 0x9fb   : > { %v16915_v37 = vadd.f32 %v9751_v54, %v9618_v0  ;;  %v9852_v0 = vsel %vm2507_vm5, %v9848_v30, %v16907_v23 }
 0x9fc   : > { %v8923_v31 = vpop.f32.mrf.mxu3 }
 0x9fd   : > { %v9753_v32 = vpop.f32.mrf.mxu2  ;;  %v8973_v1 = vadd.f32 %v8923_v31, %v16701_v29 }
 0x9ff   : > { %v9296_v61 = vadd.f32 %v9246_v43, %v8973_v1 }
 0xa00   : > { %v9249_v33 = vpop.f32.mrf.mxu0 }
 0xa01   : > { %v9572_v42 = vpop.f32.mrf.mxu1  ;;  %v9619_v46 = vadd.f32 %v9569_v19, %v9296_v61  ;;  %8965 = vmatmul.bf16.gmra.mxu3 %v8847_v3  ;;  %v9853_v61 = vrot.slane %v9427_v36, 1 }
 0xa02   : > { %9795 = vmatmul.bf16.gmra.mxu2 %v9676_v40 }
 0xa03   : > { %9288 = vmatmul.bf16.gmra.mxu0 %v9170_v10  ;;  %v16922_v53 = vadd.f32 %v9753_v32, %v9619_v46 }
 0xa04   : > { %9611 = vmatmul.bf16.gmra.mxu1 %v9493_v38  ;;  %v8926_v29 = vpop.f32.mrf.mxu3 }
 0xa05   : > { %v9756_v12 = vpop.f32.mrf.mxu2  ;;  %v8974_v2 = vadd.f32 %v8926_v29, %v16718_v25 }
 0xa07   : > { %v9297_v27 = vadd.f32 %v9249_v33, %v8974_v2 }
 0xa08   : > { %v9251_v6 = vpop.f32.mrf.mxu0 }
 0xa09   : > { %v9574_v54 = vpop.f32.mrf.mxu1  ;;  %v9620_v62 = vadd.f32 %v9572_v42, %v9297_v27 }
 0xa0b   : > { %v16925_v40 = vadd.f32 %v9756_v12, %v9620_v62  ;;  %v17335_v62 = vshrl.u32 %v16752_v14, 16 }
 0xa0c   : > { %v8928_v43 = vpop.f32.mrf.mxu3 }
 0xa0d   : > { %v9758_v19 = vpop.f32.mrf.mxu2  ;;  %v8975_v18 = vadd.f32 %v8928_v43, %v16728_v52  ;;  %v9854_v52 = vrot.slane %v9423_v45, 2  ;;  %v9857_v30 = vrot.slane %v17335_v62, 1  ;;  %v17336_v43 = vshll.u32 %v16752_v14, 16 }
 0xa0f   : > { %v9298_v44 = vadd.f32 %v9251_v6, %v8975_v18  ;;  %v9855_v28 = vor.u32 %v9854_v52, %v9853_v61 }
 0xa10   : > { %v9254_v50 = vpop.f32.mrf.mxu0 }
 0xa11   : > { %v9577_v31 = vpop.f32.mrf.mxu1  ;;  %v9621_v25 = vadd.f32 %v9574_v54, %v9298_v44  ;;  %9961 = vmatmul.bf16.vlgmr.msra.gmra.mxu3 %v9852_v0 }
 0xa13   : > { %v16930_v32 = vadd.f32 %v9758_v19, %v9621_v25 }
 0xa14   : > { %v8931_v1 = vpop.f32.mrf.mxu3 }
 0xa15   : > { %v9761_v3 = vpop.f32.mrf.mxu2  ;;  %v8976_v10 = vadd.f32 %v8931_v1, %v16736_v39  ;;  %v9856_v39 = vsel %vm2507_vm5, %v16907_v23, %v9855_v28 }
 0xa17   : > { %v9299_v33 = vadd.f32 %v9254_v50, %v8976_v10 }
 0xa18   : > { %v9256_v38 = vpop.f32.mrf.mxu0 }
 0xa19   : > { %v9579_v42 = vpop.f32.mrf.mxu1  ;;  %v9622_v46 = vadd.f32 %v9577_v31, %v9299_v33 }
 0xa1b   : > { %v16937_v22 = vadd.f32 %v9761_v3, %v9622_v46  ;;  %v17337_v46 = vshrl.u32 %v16772_v26, 16 }
 0xa1c   : > { %v8933_v29 = vpop.f32.mrf.mxu3 }
 0xa1d   : > { %v9763_v12 = vpop.f32.mrf.mxu2  ;;  %v8977_v2 = vadd.f32 %v8933_v29, %v16747_v41  ;;  %v9858_v41 = vrot.slane %v17336_v43, 2  ;;  %v9861_v29 = vrot.slane %v17337_v46, 1 }
 0xa1f   : > { %v9300_v5 = vadd.f32 %v9256_v38, %v8977_v2  ;;  %v9859_v44 = vor.u32 %v9858_v41, %v9857_v30 }
 0xa20   : > { %v9259_v51 = vpop.f32.mrf.mxu0 }
 0xa21   : > { %v9582_v36 = vpop.f32.mrf.mxu1  ;;  %v9623_v27 = vadd.f32 %v9579_v42, %v9300_v5  ;;  %9966 = vmatmul.bf16.gmra.mxu3 %v9856_v39  ;;  %v9860_v3 = vsel %vm2507_vm5, %v9855_v28, %v9859_v44 }
 0xa23   : > { %v16942_v49 = vadd.f32 %v9763_v12, %v9623_v27  ;;  %v17338_v12 = vshll.u32 %v16772_v26, 16 }
 0xa24   : > { %v8936_v45 = vpop.f32.mrf.mxu3 }
 0xa25   : > { %v9766_v6 = vpop.f32.mrf.mxu2  ;;  %v8978_v54 = vadd.f32 %v8936_v45, %v16756_v15  ;;  %v9862_v2 = vrot.slane %v17338_v12, 2 }
 0xa27   : > { %v9301_v19 = vadd.f32 %v9259_v51, %v8978_v54  ;;  %v9863_v51 = vor.u32 %v9862_v2, %v9861_v29 }
 0xa28   : > { %v9261_v18 = vpop.f32.mrf.mxu0 }
 0xa29   : > { %v9584_v23 = vpop.f32.mrf.mxu1  ;;  %v9624_v0 = vadd.f32 %v9582_v36, %v9301_v19  ;;  %v9864_v54 = vsel %vm2507_vm5, %v9859_v44, %v9863_v51 }
 0xa2b   : > { %v16949_v50 = vadd.f32 %v9766_v6, %v9624_v0 }
 0xa2c   : > { %v8938_v31 = vpop.f32.mrf.mxu3 }
 0xa2d   : > { %v9768_v25 = vpop.f32.mrf.mxu2  ;;  %v8979_v1 = vadd.f32 %v8938_v31, %v16767_v58  ;;  %v17340_v31 = vshll.u32 %v16791_v60, 16 }
 0xa2f   : > { %v9302_v15 = vadd.f32 %v9261_v18, %v8979_v1 }
 0xa30   : > { %v9264_v10 = vpop.f32.mrf.mxu0 }
 0xa31   : > { %v9587_v61 = vpop.f32.mrf.mxu1  ;;  %v9625_v52 = vadd.f32 %v9584_v23, %v9302_v15  ;;  %9971 = vmatmul.bf16.gmra.mxu3 %v9860_v3  ;;  %v17339_v23 = vshrl.u32 %v16791_v60, 16 }
 0xa33   : > { %v16953_v14 = vadd.f32 %v9768_v25, %v9625_v52  ;;  %v9865_v0 = vrot.slane %v17339_v23, 1  ;;  %v9866_v25 = vrot.slane %v17340_v31, 2 }
 0xa34   : > { %v8941_v33 = vpop.f32.mrf.mxu3 }
 0xa35   : > { %v9771_v38 = vpop.f32.mrf.mxu2  ;;  %v8980_v42 = vadd.f32 %v8941_v33, %v16776_v21  ;;  %v9867_v15 = vor.u32 %v9866_v25, %v9865_v0 }
 0xa37   : > { %v9303_v58 = vadd.f32 %v9264_v10, %v8980_v42 }
 0xa38   : > { %v9266_v39 = vpop.f32.mrf.mxu0 }
 0xa39   : > { %v9589_v28 = vpop.f32.mrf.mxu1  ;;  %v9626_v5 = vadd.f32 %v9587_v61, %v9303_v58 }
 0xa3b   : > { %v16960_v36 = vadd.f32 %v9771_v38, %v9626_v5  ;;  %v9868_v38 = vsel %vm2507_vm5, %v9863_v51, %v9867_v15  ;;  %v17342_v5 = vshll.u32 %v16811_v11, 16 }
 0xa3c   : > { %v8943_v27 = vpop.f32.mrf.mxu3 }
 0xa3d   : > { %v9773_v45 = vpop.f32.mrf.mxu2  ;;  %v8981_v6 = vadd.f32 %v8943_v27, %v16787_v13  ;;  %v9870_v27 = vrot.slane %v17342_v5, 2 }
 0xa3f   : > { %v9304_v21 = vadd.f32 %v9266_v39, %v8981_v6  ;;  %v17341_v39 = vshrl.u32 %v16811_v11, 16 }
 0xa40   : > { %v9269_v62 = vpop.f32.mrf.mxu0 }
 0xa41   : > { %v9592_v30 = vpop.f32.mrf.mxu1  ;;  %v9627_v43 = vadd.f32 %v9589_v28, %v9304_v21  ;;  %9976 = vmatmul.bf16.gmra.mxu3 %v9864_v54  ;;  %v9869_v28 = vrot.slane %v17341_v39, 1 }
 0xa43   : > { %v16964_v26 = vadd.f32 %v9773_v45, %v9627_v43  ;;  %v9871_v54 = vor.u32 %v9870_v27, %v9869_v28  ;;  %v17345_v27 = vshrl.u32 %v16851_v4, 16 }
 0xa44   : > { %v8946_v41 = vpop.f32.mrf.mxu3 }
 0xa45   : > { %v9776_v19 = vpop.f32.mrf.mxu2  ;;  %v8982_v18 = vadd.f32 %v8946_v41, %v16795_v35  ;;  %v9872_v41 = vsel %vm2507_vm5, %v9867_v15, %v9871_v54 }
 0xa47   : > { %v9305_v13 = vadd.f32 %v9269_v62, %v8982_v18 }
 0xa48   : > { %v9271_v1 = vpop.f32.mrf.mxu0 }
 0xa49   : > { %v9594_v44 = vpop.f32.mrf.mxu1  ;;  %v9628_v3 = vadd.f32 %v9592_v30, %v9305_v13  ;;  %v17343_v13 = vshrl.u32 %v16831_v59, 16 }
 0xa4b   : > { %v16971_v10 = vadd.f32 %v9776_v19, %v9628_v3 }
 0xa4c   : > { %v8948_v61 = vpop.f32.mrf.mxu3 }
 0xa4d   : > { %v9778_v52 = vpop.f32.mrf.mxu2  ;;  %v8983_v33 = vadd.f32 %v8948_v61, %v16807_v47 }
 0xa4f   : > { %v9306_v35 = vadd.f32 %v9271_v1, %v8983_v33  ;;  %v9873_v1 = vrot.slane %v17343_v13, 1 }
 0xa50   : > { %v9274_v42 = vpop.f32.mrf.mxu0 }
 0xa51   : > { %v9597_v46 = vpop.f32.mrf.mxu1  ;;  %v9629_v29 = vadd.f32 %v9594_v44, %v9306_v35  ;;  %9981 = vmatmul.bf16.gmra.mxu3 %v9868_v38  ;;  %v17344_v44 = vshll.u32 %v16831_v59, 16 }
 0xa53   : > { %v16975_v60 = vadd.f32 %v9778_v52, %v9629_v29  ;;  %v9874_v3 = vrot.slane %v17344_v44, 2  ;;  %v9881_v44 = vrot.slane %v9483_v57, 1 }
 0xa54   : > { %v8951_v12 = vpop.f32.mrf.mxu3 }
 0xa55   : > { %v9781_v2 = vpop.f32.mrf.mxu2  ;;  %v8984_v58 = vadd.f32 %v8951_v12, %v16815_v24  ;;  %v9875_v33 = vor.u32 %v9874_v3, %v9873_v1  ;;  %v17347_v3 = vshll.u32 %v16870_v17, 16  ;;  %v10083_v17 = vld [vmem:[%s17247_s3 + $0xfc] sm:$0xf] }
 0xa57   : > { %v9307_v47 = vadd.f32 %v9274_v42, %v8984_v58  ;;  %v9876_v29 = vsel %vm2507_vm5, %v9871_v54, %v9875_v33 }
 0xa58   : > { %v9276_v45 = vpop.f32.mrf.mxu0 }
 0xa59   : > { %v9599_v51 = vpop.f32.mrf.mxu1  ;;  %v9630_v6 = vadd.f32 %v9597_v46, %v9307_v47  ;;  %v9877_v47 = vrot.slane %v17345_v27, 1 }
 0xa5b   : > { %v16982_v21 = vadd.f32 %v9781_v2, %v9630_v6 }
 0xa5c   : > { %v8953_v62 = vpop.f32.mrf.mxu3 }
 0xa5d   : > { %v9783_v30 = vpop.f32.mrf.mxu2  ;;  %v8985_v43 = vadd.f32 %v8953_v62, %v16827_v55 }
 0xa5f   : > { %v9308_v24 = vadd.f32 %v9276_v45, %v8985_v43  ;;  %v17346_v45 = vshll.u32 %v16851_v4, 16 }
 0xa60   : > { %v9279_v19 = vpop.f32.mrf.mxu0 }
 0xa61   : > { %v9602_v18 = vpop.f32.mrf.mxu1  ;;  %v9631_v23 = vadd.f32 %v9599_v51, %v9308_v24  ;;  %9986 = vmatmul.bf16.gmra.mxu3 %v9872_v41  ;;  %v9878_v51 = vrot.slane %v17346_v45, 2 }
 0xa63   : > { %v16986_v11 = vadd.f32 %v9783_v30, %v9631_v23  ;;  %v9879_v30 = vor.u32 %v9878_v51, %v9877_v47 }
 0xa64   : > { %v8956_v0 = vpop.f32.mrf.mxu3 }
 0xa65   : > { %v9786_v31 = vpop.f32.mrf.mxu2  ;;  %v8986_v25 = vadd.f32 %v8956_v0, %v16835_v8 }
 0xa67   : > { %v9309_v55 = vadd.f32 %v9279_v19, %v8986_v25 }
 0xa68   : > { %v9281_v61 = vpop.f32.mrf.mxu0 }
 0xa69   : > { %v9604_v15 = vpop.f32.mrf.mxu1  ;;  %v9632_v52 = vadd.f32 %v9602_v18, %v9309_v55  ;;  %v9882_v55 = vrot.slane %v17347_v3, 2 }
 0xa6b   : > { %v16993_v38 = vadd.f32 %v9786_v31, %v9632_v52 }
 0xa6c   : > { %v8958_v35 = vpop.f32.mrf.mxu3 }
 0xa6d   : > { %v9788_v42 = vpop.f32.mrf.mxu2  ;;  %v8987_v46 = vadd.f32 %v8958_v35, %v16846_v34  ;;  %v9883_v35 = vor.u32 %v9882_v55, %v9881_v44 }
 0xa6f   : > { %v9310_v8 = vadd.f32 %v9281_v61, %v8987_v46  ;;  %v9821_v61 = vld [vmem:[%s14355_s22 + $0x164] sm:$0x3]  ;;  %s10193_s22 = scalar_lea.vmem (!%p10877_p8), [#allocation2], %s12896_s12 }
 0xa70   : > { %v9284_v12 = vpop.f32.mrf.mxu0 }
 0xa71   : > { %v9607_v2 = vpop.f32.mrf.mxu1  ;;  %v9633_v58 = vadd.f32 %v9604_v15, %v9310_v8  ;;  %9991 = vmatmul.bf16.gmra.mxu3 %v9876_v29 }
 0xa73   : > { %v16997_v59 = vadd.f32 %v9788_v42, %v9633_v58  ;;  %v9839_v42 = vunpack.c.l.b16 %v9821_v61 }
 0xa74   : > { %v8961_v39 = vpop.f32.mrf.mxu3 }
 0xa75   : > { %v9791_v28 = vpop.f32.mrf.mxu2  ;;  %v8988_v5 = vadd.f32 %v8961_v39, %v16855_v56  ;;  %v9880_v56 = vsel %vm2507_vm5, %v9875_v33, %v9879_v30  ;;  %v17025_v39 = vld [vmem:[%s14184_s23] ss:$0 sm:$0xff] }
 0xa77   : > { %v9311_v34 = vadd.f32 %v9284_v12, %v8988_v5  ;;  %v17348_v12 = vunpack.c.l.b16 %v16886_v63  ;;  %v10104_v5 = vunpack.c.l.bf16 %v10083_v17 }
 0xa78   : > { %v9286_v6 = vpop.f32.mrf.mxu0 }
 0xa79   : > { %v9609_v54 = vpop.f32.mrf.mxu1  ;;  %v9634_v62 = vadd.f32 %v9607_v2, %v9311_v34  ;;  %v9840_v57 = vpack.c.b16 %v9839_v42, %v17348_v12  ;;  %vm10125_vm0 = vcmp.gt.f32.partialorder %v10104_v5, 0.0  ;;  %v13851_v34 = vld [vmem:[%s17247_s3 + $0x100] sm:$0xff]  }
 0xa7b   : > { %v17004_v43 = vadd.f32 %v9791_v28, %v9634_v62  ;;  %v9886_v2 = vshrl.u32 %v9840_v57, 16  ;;  %v9889_v58 = vshll.u32 %v9840_v57, 16 }
 0xa7c   : > { %v8963_v41 = vpop.f32.mrf.mxu3 }
 0xa7d   : > { %v9793_v24 = vpop.f32.mrf.mxu2  ;;  %v8989_v19 = vadd.f32 %v8963_v41, %v16866_v7  ;;  %v9888_v47 = vrot.slane %v9886_v2, 1  ;;  %v9891_v45 = vrot.slane %v9889_v58, 2  ;;  %v13487_v41 = vunpack.c.l.bf16 %v13851_v34 }
 0xa7f   : > { %v9312_v18 = vadd.f32 %v9286_v6, %v8989_v19  ;;  %v9892_v6 = vor.u32 %v9891_v45, %v9888_v47  ;;  %vm10126_vm1 = vcmp.gt.f32.partialorder %v13487_v41, 0.0 }
 0xa80   : > { %v9289_v23 = vpop.f32.mrf.mxu0 }
 0xa81   : > { %v9612_v0 = vpop.f32.mrf.mxu1  ;;  %v9635_v31 = vadd.f32 %v9609_v54, %v9312_v18  ;;  %9996 = vmatmul.bf16.gmra.mxu3 %v9880_v56 }
 0xa83   : > { %v17008_v4 = vadd.f32 %v9793_v24, %v9635_v31  ;;  %v9893_v24 = vsel %vm2507_vm5, %v9883_v35, %v9892_v6 }
 0xa84   : > { %v8966_v25 = vpop.f32.mrf.mxu3 }
 0xa85   : > { %v9796_v13 = vpop.f32.mrf.mxu2  ;;  %v8990_v1 = vadd.f32 %v8966_v25, %v16874_v9  ;;  %v9884_v9 = vsel %vm2507_vm5, %v9879_v30, %v9883_v35 }
 0xa87   : > { %v9313_v7 = vadd.f32 %v9289_v23, %v8990_v1 }
 0xa88   : > { %v9291_v15 = vpop.f32.mrf.mxu0 }
 0xa89   : > { %v9614_v52 = vpop.f32.mrf.mxu1  ;;  %v9636_v33 = vadd.f32 %v9612_v0, %v9313_v7  ;;  %v13488_v0 = vunpack.c.h.bf16 %v13851_v34 }
 0xa8b   : > { %v17016_v46 = vadd.f32 %v9796_v13, %v9636_v33  ;;  %vm10127_vm2 = vcmp.gt.f32.partialorder %v13488_v0, 0.0 }
 0xa8c   : > { %v8968_v29 = vpop.f32.mrf.mxu3 }
 0xa8d   : > { %v9798_v8 = vpop.f32.mrf.mxu2 }
 0xa91   : > { %10001 = vmatmul.bf16.gmra.mxu3 %v9884_v9 }
 0xa94   : > { %v9962_v28 = vpop.f32.mrf.mxu3 }
 0xa95   : > { %v10016_v27 = vadd.f32 %v9962_v28, %v16901_v48 }
 0xa97   : > { %v10041_v51 = vadd.f32 %v17025_v39, %v10016_v27 }
 0xa99   : > { %v10062_v63 = vmax.f32 %v10041_v51, %v14856_v20 }
 0xa9b   : > { %v17033_v54 = vsel %vm10125_vm0, %v10062_v63, 0.0 }
 0xa9c   : > { %v10167_v62 = vpack.c.bf16 %v17033_v54, %v17033_v54  ;;  %v9964_v30 = vpop.f32.mrf.mxu3 }
 0xa9d   : > { %v10017_v48 = vadd.f32 %v9964_v30, %v16912_v16  ;;  %v13852_v16 = vld [vmem:[%s17247_s3 + $0x108] sm:$0xff]  }
 0xa9e   : > { %v13491_v3 = vunpack.c.l.bf16 %v13852_v16  ;;  %v13492_v52 = vunpack.c.h.bf16 %v13852_v16 }
 0xa9f   : > { %v10042_v19 = vadd.f32 %v17025_v39, %v10017_v48 }
 0xaa0   : > { %vm10128_vm3 = vcmp.gt.f32.partialorder %v13491_v3, 0.0  ;;  %vm10129_vm4 = vcmp.gt.f32.partialorder %v13492_v52, 0.0 }
 0xaa1   : > { %v10063_v56 = vmax.f32 %v10042_v19, %v14856_v20  ;;  %10006 = vmatmul.bf16.gmra.mxu3 %v9893_v24 }
 0xaa3   : > { %v17041_v18 = vsel %vm10126_vm1, %v10063_v56, 0.0 }
 0xaa4   : > { %v9967_v23 = vpop.f32.mrf.mxu3 }
 0xaa5   : > { %v10018_v31 = vadd.f32 %v9967_v23, %v16915_v37 }
 0xaa7   : > { %v10043_v25 = vadd.f32 %v17025_v39, %v10018_v31 }
 0xaa9   : > { %v10064_v13 = vmax.f32 %v10043_v25, %v14856_v20 }
 0xaab   : > { %v17049_v1 = vsel %vm10127_vm2, %v10064_v13, 0.0 }
 0xaac   : > { %v9969_v44 = vpop.f32.mrf.mxu3 }
 0xaad   : > { %v10019_v55 = vadd.f32 %v9969_v44, %v16922_v53  ;;  %v13853_v53 = vld [vmem:[%s17247_s3 + $0x110] sm:$0xff]  }
 0xaae   : > { %v13495_v9 = vunpack.c.l.bf16 %v13853_v53  ;;  %v13496_v58 = vunpack.c.h.bf16 %v13853_v53 }
 0xaaf   : > { %v10044_v7 = vadd.f32 %v17025_v39, %v10019_v55 }
 0xab0   : > { %vm10130_vm5 = vcmp.gt.f32.partialorder %v13495_v9, 0.0  ;;  %vm10131_vm9 = vcmp.gt.f32.partialorder %v13496_v58, 0.0 }
 0xab1   : > { %v10065_v37 = vmax.f32 %v10044_v7, %v14856_v20  ;;  %10011 = vmatmul.bf16.gmra.mxu3 %v9892_v6 }
 0xab3   : > { %v17054_v61 = vsel %vm10128_vm3, %v10065_v37, 0.0 }
 0xab4   : > { %v9972_v15 = vpop.f32.mrf.mxu3 }
 0xab5   : > { %v10020_v33 = vadd.f32 %v9972_v15, %v16925_v40 }
 0xab7   : > { %v10045_v35 = vadd.f32 %v17025_v39, %v10020_v33 }
 0xab9   : > { %v10066_v42 = vmax.f32 %v10045_v35, %v14856_v20 }
 0xabb   : > { %v17062_v29 = vsel %vm10129_vm4, %v10066_v42, 0.0 }
 0xabc   : > { %v9974_v8 = vpop.f32.mrf.mxu3 }
 0xabd   : > { %v10021_v12 = vadd.f32 %v9974_v8, %v16930_v32  ;;  %v13854_v32 = vld [vmem:[%s17247_s3 + $0x118] sm:$0xff]  }
 0xabe   : > { %v13499_v51 = vunpack.c.l.bf16 %v13854_v32  ;;  %v13500_v41 = vunpack.c.h.bf16 %v13854_v32 }
 0xabf   : > { %v10046_v57 = vadd.f32 %v17025_v39, %v10021_v12 }
 0xac0   : > { %vm10132_vm10 = vcmp.gt.f32.partialorder %v13499_v51, 0.0  ;;  %vm10133_vm11 = vcmp.gt.f32.partialorder %v13500_v41, 0.0 }
 0xac1   : > { %v10067_v40 = vmax.f32 %v10046_v57, %v14856_v20 }
 0xac3   : > { %v17067_v17 = vsel %vm10130_vm5, %v10067_v40, 0.0 }
 0xac4   : > { %v9977_v2 = vpop.f32.mrf.mxu3 }
 0xac5   : > { %v10022_v28 = vadd.f32 %v9977_v2, %v16937_v22 }
 0xac7   : > { %v10047_v5 = vadd.f32 %v17025_v39, %v10022_v28 }
 0xac9   : > { %v10068_v27 = vmax.f32 %v10047_v5, %v14856_v20 }
 0xacb   : > { %v17075_v47 = vsel %vm10131_vm9, %v10068_v27, 0.0 }
 0xacc   : > { %v9979_v45 = vpop.f32.mrf.mxu3 }
 0xacd   : > { %v10023_v63 = vadd.f32 %v9979_v45, %v16942_v49  ;;  %v13855_v49 = vld [vmem:[%s17247_s3 + $0x120] sm:$0xff]  }
 0xace   : > { %v13503_v0 = vunpack.c.l.bf16 %v13855_v49  ;;  %v13504_v44 = vunpack.c.h.bf16 %v13855_v49 }
 0xacf   : > { %v10048_v34 = vadd.f32 %v17025_v39, %v10023_v63 }
 0xad0   : > { %vm10134_vm12 = vcmp.gt.f32.partialorder %v13503_v0, 0.0  ;;  %vm10135_vm13 = vcmp.gt.f32.partialorder %v13504_v44, 0.0 }
 0xad1   : > { %v10069_v22 = vmax.f32 %v10048_v34, %v14856_v20 }
 0xad3   : > { %v17080_v6 = vsel %vm10132_vm10, %v10069_v22, 0.0 }
 0xad4   : > { %v9982_v30 = vpop.f32.mrf.mxu3 }
 0xad5   : > { %v10024_v48 = vadd.f32 %v9982_v30, %v16949_v50 }
 0xad7   : > { %v10049_v24 = vadd.f32 %v17025_v39, %v10024_v48 }
 0xad9   : > { %v10070_v19 = vmax.f32 %v10049_v24, %v14856_v20 }
 0xadb   : > { %v17088_v56 = vsel %vm10133_vm11, %v10070_v19, 0.0 }
 0xadc   : > { %v9984_v23 = vpop.f32.mrf.mxu3 }
 0xadd   : > { %v10025_v31 = vadd.f32 %v9984_v23, %v16953_v14  ;;  %v13856_v14 = vld [vmem:[%s17247_s3 + $0x128] sm:$0xff]  }
 0xade   : > { %v13507_v52 = vunpack.c.l.bf16 %v13856_v14  ;;  %v13508_v8 = vunpack.c.h.bf16 %v13856_v14 }
 0xadf   : > { %v10050_v25 = vadd.f32 %v17025_v39, %v10025_v31 }
 0xae0   : > { %vm10136_vm14 = vcmp.gt.f32.partialorder %v13507_v52, 0.0  ;;  %vm10137_vm15 = vcmp.gt.f32.partialorder %v13508_v8, 0.0 }
 0xae1   : > { %v10071_v50 = vmax.f32 %v10050_v25, %v14856_v20 }
 0xae3   : > { %v17093_v13 = vsel %vm10134_vm12, %v10071_v50, 0.0 }
 0xae4   : > { %v9987_v16 = vpop.f32.mrf.mxu3 }
 0xae5   : > { %v10026_v3 = vadd.f32 %v9987_v16, %v16960_v36 }
 0xae7   : > { %v10051_v55 = vadd.f32 %v17025_v39, %v10026_v3 }
 0xae9   : > { %v10072_v7 = vmax.f32 %v10051_v55, %v14856_v20 }
 0xaeb   : > { %v17101_v37 = vsel %vm10135_vm13, %v10072_v7, 0.0 }
 0xaec   : > { %v9989_v15 = vpop.f32.mrf.mxu3 }
 0xaed   : > { %v10027_v33 = vadd.f32 %v9989_v15, %v16964_v26  ;;  %v13857_v26 = vld [vmem:[%s17247_s3 + $0x130] sm:$0xff]  }
 0xaee   : > { %v13511_v58 = vunpack.c.l.bf16 %v13857_v26  ;;  %v13512_v45 = vunpack.c.h.bf16 %v13857_v26 }
 0xaef   : > { %v10052_v35 = vadd.f32 %v17025_v39, %v10027_v33 }
 0xaf0   : > { %vm10138_vm6 = vcmp.gt.f32.partialorder %v13511_v58, 0.0  ;;  %vm10139_vm7 = vcmp.gt.f32.partialorder %v13512_v45, 0.0 }
 0xaf1   : > { %v10073_v36 = vmax.f32 %v10052_v35, %v14856_v20 }
 0xaf3   : > { %v17106_v42 = vsel %vm10136_vm14, %v10073_v36, 0.0 }
 0xaf4   : > { %v9992_v53 = vpop.f32.mrf.mxu3 }
 0xaf5   : > { %v10028_v9 = vadd.f32 %v9992_v53, %v16971_v10 }
 0xaf7   : > { %v10053_v12 = vadd.f32 %v17025_v39, %v10028_v9 }
 0xaf9   : > { %v10074_v57 = vmax.f32 %v10053_v12, %v14856_v20 }
 0xafb   : > { %v17114_v40 = vsel %vm10137_vm15, %v10074_v57, 0.0 }
 0xafc   : > { %v9994_v2 = vpop.f32.mrf.mxu3 }
 0xafd   : > { %v10029_v28 = vadd.f32 %v9994_v2, %v16975_v60  ;;  %v13858_v60 = vld [vmem:[%s17247_s3 + $0x138] sm:$0xff]  }
 0xafe   : > { %v13515_v41 = vunpack.c.l.bf16 %v13858_v60  ;;  %v13516_v23 = vunpack.c.h.bf16 %v13858_v60 }
 0xaff   : > { %v10054_v5 = vadd.f32 %v17025_v39, %v10029_v28 }
 0xb00   : > { %vm10140_vm8 = vcmp.gt.f32.partialorder %v13515_v41, 0.0  ;;  %vm10141_vm0 = vcmp.gt.f32.partialorder %v13516_v23, 0.0 }
 0xb01   : > { %v10075_v10 = vmax.f32 %v10054_v5, %v14856_v20 }
 0xb03   : > { %v17119_v27 = vsel %vm10138_vm6, %v10075_v10, 0.0 }
 0xb04   : > { %v9997_v32 = vpop.f32.mrf.mxu3 }
 0xb05   : > { %v10030_v51 = vadd.f32 %v9997_v32, %v16982_v21 }
 0xb07   : > { %v10055_v63 = vadd.f32 %v17025_v39, %v10030_v51 }
 0xb09   : > { %v10076_v34 = vmax.f32 %v10055_v63, %v14856_v20 }
 0xb0b   : > { %v17127_v22 = vsel %vm10139_vm7, %v10076_v34, 0.0 }
 0xb0c   : > { %v9999_v30 = vpop.f32.mrf.mxu3 }
 0xb0d   : > { %v10031_v48 = vadd.f32 %v9999_v30, %v16986_v11  ;;  %v13859_v11 = vld [vmem:[%s17247_s3 + $0x140] sm:$0xff]  }
 0xb0e   : > { %v13519_v44 = vunpack.c.l.bf16 %v13859_v11  ;;  %v13520_v15 = vunpack.c.h.bf16 %v13859_v11 }
 0xb0f   : > { %v10056_v24 = vadd.f32 %v17025_v39, %v10031_v48 }
 0xb10   : > { %vm10142_vm1 = vcmp.gt.f32.partialorder %v13519_v44, 0.0  ;;  %vm10143_vm2 = vcmp.gt.f32.partialorder %v13520_v15, 0.0 }
 0xb11   : > { %v10077_v21 = vmax.f32 %v10056_v24, %v14856_v20 }
 0xb13   : > { %v17132_v19 = vsel %vm10140_vm8, %v10077_v21, 0.0 }
 0xb14   : > { %v10002_v49 = vpop.f32.mrf.mxu3 }
 0xb15   : > { %v10032_v0 = vadd.f32 %v10002_v49, %v16993_v38 }
 0xb17   : > { %v10057_v31 = vadd.f32 %v17025_v39, %v10032_v0 }
 0xb19   : > { %v10078_v25 = vmax.f32 %v10057_v31, %v14856_v20 }
 0xb1b   : > { %v17140_v50 = vsel %vm10141_vm0, %v10078_v25, 0.0 }
 0xb1c   : > { %v10004_v16 = vpop.f32.mrf.mxu3 }
 0xb1d   : > { %v10033_v3 = vadd.f32 %v10004_v16, %v16997_v59  ;;  %v13860_v59 = vld [vmem:[%s17247_s3 + $0x148] sm:$0xff]  }
 0xb1e   : > { %v13523_v8 = vunpack.c.l.bf16 %v13860_v59  ;;  %v13524_v2 = vunpack.c.h.bf16 %v13860_v59 }
 0xb1f   : > { %v10058_v55 = vadd.f32 %v17025_v39, %v10033_v3 }
 0xb20   : > { %vm10144_vm3 = vcmp.gt.f32.partialorder %v13523_v8, 0.0  ;;  %vm10145_vm4 = vcmp.gt.f32.partialorder %v13524_v2, 0.0 }
 0xb21   : > { %v10079_v38 = vmax.f32 %v10058_v55, %v14856_v20 }
 0xb23   : > { %v17145_v7 = vsel %vm10142_vm1, %v10079_v38, 0.0 }
 0xb24   : > { %v10007_v14 = vpop.f32.mrf.mxu3 }
 0xb25   : > { %v10034_v52 = vadd.f32 %v10007_v14, %v17004_v43 }
 0xb27   : > { %v10059_v33 = vadd.f32 %v17025_v39, %v10034_v52 }
 0xb29   : > { %v10080_v35 = vmax.f32 %v10059_v33, %v14856_v20 }
 0xb2b   : > { %v10164_v36 = vsel %vm10143_vm2, %v10080_v35, 0.0 }
 0xb2c   : > { %v10009_v53 = vpop.f32.mrf.mxu3 }
 0xb2d   : > { %v10035_v9 = vadd.f32 %v10009_v53, %v17008_v4 }
 0xb2f   : > { %v10060_v12 = vadd.f32 %v17025_v39, %v10035_v9 }
 0xb31   : > { %v10081_v57 = vmax.f32 %v10060_v12, %v14856_v20 }
 0xb33   : > { %v10165_v43 = vsel %vm10144_vm3, %v10081_v57, 0.0 }
 0xb34   : > { %v10012_v26 = vpop.f32.mrf.mxu3 }
 0xb35   : > { %v10036_v58 = vadd.f32 %v10012_v26, %v17016_v46 }
 0xb37   : > { %v10061_v28 = vadd.f32 %v17025_v39, %v10036_v58 }
 0xb38   : > { %10190 = sbr.rel (%p10877_p8) target bundleno = 2889 (0xb49), region = 68 }
 0xb39   : > { %v10082_v5 = vmax.f32 %v10061_v28, %v14856_v20 }
 0xb3b   : > { %v10166_v10 = vsel %vm10145_vm4, %v10082_v5, 0.0 }
 0xb3c   : > { %v10187_v32 = vpack.c.bf16 %v10166_v10, %v10166_v10  ;;  %v10014_v45 = vpop.f32.mrf.mxu3 }
 0xb3d   : > { %v13528_v4 = vpack.c.bf16 %v17041_v18, %v17033_v54  ;;  %v13533_v51 = vpack.c.bf16 %v17054_v61, %v17049_v1  ;;  %v13538_v46 = vpack.c.bf16 %v17067_v17, %v17062_v29  ;;  %v13543_v20 = vpack.c.bf16 %v17080_v6, %v17075_v47 }
 0xb3e   : > { %10214 = vst [vmem:[%s10193_s22 + $0x158] sm:$0xf] %v10187_v32  ;;  %v13548_v39 = vpack.c.bf16 %v17093_v13, %v17088_v56  ;;  %v13553_v63 = vpack.c.bf16 %v17106_v42, %v17101_v37  ;;  %v13558_v34 = vpack.c.bf16 %v17119_v27, %v17114_v40  ;;  %v13563_v60 = vpack.c.bf16 %v17132_v19, %v17127_v22 }
 0xb3f   : > { %13861 = vst [vmem:[%s10193_s22 + $0x108] sm:$0xff] %v13528_v4   ;;  %v13568_v30 = vpack.c.bf16 %v17145_v7, %v17140_v50  ;;  %v13573_v41 = vpack.c.bf16 %v10165_v43, %v10164_v36 }
 0xb40   : > { %13862 = vst [vmem:[%s10193_s22 + $0x110] sm:$0xff] %v13533_v51  }
 0xb41   : > { %13863 = vst [vmem:[%s10193_s22 + $0x118] sm:$0xff] %v13538_v46  }
 0xb42   : > { %13864 = vst [vmem:[%s10193_s22 + $0x120] sm:$0xff] %v13543_v20  }
 0xb43   : > { %13865 = vst [vmem:[%s10193_s22 + $0x128] sm:$0xff] %v13548_v39  }
 0xb44   : > { %13866 = vst [vmem:[%s10193_s22 + $0x130] sm:$0xff] %v13553_v63  }
 0xb45   : > { %13867 = vst [vmem:[%s10193_s22 + $0x138] sm:$0xff] %v13558_v34  }
 0xb46   : > { %13868 = vst [vmem:[%s10193_s22 + $0x140] sm:$0xff] %v13563_v60  }
 0xb47   : > { %13869 = vst [vmem:[%s10193_s22 + $0x148] sm:$0xff] %v13568_v30  }
 0xb48   : > { %13870 = vst [vmem:[%s10193_s22 + $0x150] sm:$0xff] %v13573_v41  }
 0xb49 PF: > { %10217 = sbr.rel (%p10879_p9) target bundleno = 2906 (0xb5a), region = 72 }
 0xb4e   : > { %10218 = vst [vmem:[%s17248_s4 + $0xfc] sm:$0xf] %v10167_v62  ;;  %v13578_v48 = vpack.c.bf16 %v17049_v1, %v17041_v18  ;;  %v13583_v24 = vpack.c.bf16 %v17062_v29, %v17054_v61  ;;  %v13588_v21 = vpack.c.bf16 %v17075_v47, %v17067_v17  ;;  %v13593_v49 = vpack.c.bf16 %v17088_v56, %v17080_v6 }
 0xb4f   : > { %v13598_v54 = vpack.c.bf16 %v17101_v37, %v17093_v13  ;;  %v13603_v62 = vpack.c.bf16 %v17114_v40, %v17106_v42  ;;  %v13608_v18 = vpack.c.bf16 %v17127_v22, %v17119_v27  ;;  %v13613_v1 = vpack.c.bf16 %v17140_v50, %v17132_v19 }
 0xb50   : > { %13871 = vst [vmem:[%s17248_s4 + $0x100] sm:$0xff] %v13578_v48   ;;  %v13618_v61 = vpack.c.bf16 %v10164_v36, %v17145_v7  ;;  %v13623_v29 = vpack.c.bf16 %v10166_v10, %v10165_v43 }
 0xb51   : > { %13872 = vst [vmem:[%s17248_s4 + $0x108] sm:$0xff] %v13583_v24  }
 0xb52   : > { %13873 = vst [vmem:[%s17248_s4 + $0x110] sm:$0xff] %v13588_v21  }
 0xb53   : > { %13874 = vst [vmem:[%s17248_s4 + $0x118] sm:$0xff] %v13593_v49  }
 0xb54   : > { %13875 = vst [vmem:[%s17248_s4 + $0x120] sm:$0xff] %v13598_v54  }
 0xb55   : > { %13876 = vst [vmem:[%s17248_s4 + $0x128] sm:$0xff] %v13603_v62  }
 0xb56   : > { %13877 = vst [vmem:[%s17248_s4 + $0x130] sm:$0xff] %v13608_v18  }
 0xb57   : > { %13878 = vst [vmem:[%s17248_s4 + $0x138] sm:$0xff] %v13613_v1  }
 0xb58   : > { %13879 = vst [vmem:[%s17248_s4 + $0x140] sm:$0xff] %v13618_v61  }
 0xb59   : > { %13880 = vst [vmem:[%s17248_s4 + $0x148] sm:$0xff] %v13623_v29  }
 0xb5a PF: > { %s14_s17 = sadd.s32 1, %s14130_s17   ;;  %s17349_s15 = smov %s14126_s16 }
 0xb5b   : > { %p11_p10 = scmp.ge.s32.totalorder %s14_s17, 7   ;;  %s17350_s16 = smov %s17352_s18 }
 0xb5d   :  { %13 = sbr.rel (!%p11_p10) target bundleno = 2 (0x2), region = 122 }

</bundles_post_ra>
